<compile_context>
chip_gen: v7x
topology: tpu7x:2x2x1
jax: 0.10.0
libtpu: 0.0.40
codegen_flags: <defaults>
</compile_context>

<pallas_src>
import math
from collections import OrderedDict

import jax
import jax.numpy as jnp
from jax.experimental import pallas as pl
from jax.experimental.pallas import tpu as pltpu

BN_EPS = 1e-5
CPAD = 128  # all channel dims padded to a full 128-lane vreg width


# ----------------------------------------------------------------------------
# In-kernel helpers (static shapes, Python-unrolled)
# ----------------------------------------------------------------------------
def _downsample2(y):
    """y[::2, ::2, :] via static slices + concat (robust Mosaic lowering)."""
    h, w, _ = y.shape
    y = jnp.concatenate([y[i:i + 1] for i in range(0, h, 2)], axis=0)
    y = jnp.concatenate([y[:, j:j + 1, :] for j in range(0, w, 2)], axis=1)
    return y


def _make_fused_kernel(plan, H0, W0):
    """Build the fused kernel for a static layer plan and input spatial size.

    Kernel refs (in order):
      x_ref                       (1, H0, W0, Cin)   f32
      w_refs  (one per layer)     2D bf16, BN folded, zero-padded to 128 lanes
      o_refs  (one per emit)      (1, h, w, 128)     f32
      buf_a, buf_b                (H0+2, W0+2, 128)  f32 VMEM scratch
    """
    n_layers = len(plan)
    n_out = sum(1 for c in plan if c["emit"])

    def kernel(*refs):
        x_ref = refs[0]
        w_refs = refs[1:1 + n_layers]
        o_refs = refs[1 + n_layers:1 + n_layers + n_out]
        buf_a, buf_b = refs[1 + n_layers + n_out:]

        def stage(buf, val, h, w):
            # zero whole buffer (provides the 1-px zero halo for the next 3x3),
            # then write the activation interior at offset (1, 1).
            buf[...] = jnp.zeros_like(buf)
            buf[1:1 + h, 1:1 + w, 0:val.shape[-1]] = val.astype(buf.dtype)

        def conv1x1(src, h, w, w_ref):
            xv = src[1:1 + h, 1:1 + w, :].astype(jnp.bfloat16)
            xv = xv.reshape(h * w, CPAD)
            y = jnp.dot(xv, w_ref[...], preferred_element_type=jnp.float32)
            return jnp.maximum(y, 0.0).reshape(h, w, CPAD)

        def conv3x3(src, h, w, w_ref, stride):
            # im2col: one (h*w, 9*128) x (9*128, 128) MXU matmul
            pieces = []
            for dy in range(3):
                for dx in range(3):
                    p = src[dy:dy + h, dx:dx + w, :].astype(jnp.bfloat16)
                    pieces.append(p.reshape(h * w, CPAD))
            patches = jnp.concatenate(pieces, axis=-1)
            y = jnp.dot(patches, w_ref[...], preferred_element_type=jnp.float32)
            y = jnp.maximum(y, 0.0).reshape(h, w, CPAD)
            if stride == 2:
                y = _downsample2(y)
            return y

        # stage the input image (real channels only; rest of lanes stay zero)
        stage(buf_a, x_ref[0], H0, W0)
        src, dst = buf_a, buf_b

        h, w = H0, W0
        oi = 0
        for li, cfg in enumerate(plan):
            if cfg["kind"] == "c1":
                y = conv1x1(src, h, w, w_refs[li])
            else:
                y = conv3x3(src, h, w, w_refs[li], cfg["stride"])
                if cfg["stride"] == 2:
                    h, w = h // 2, w // 2
            if cfg["emit"]:
                o_refs[oi][0] = y.astype(o_refs[oi].dtype)
                oi += 1
            if li + 1 < n_layers:          # keep result resident for next layer
                stage(dst, y, h, w)
                src, dst = dst, src

    return kernel


# ----------------------------------------------------------------------------
# Deterministic parameter construction (xavier-uniform conv weights, zero bias,
# fresh BatchNorm folded into the weights, zero-padded to 128 lanes, bf16).
# ----------------------------------------------------------------------------
def _xavier(key, kh, kw, cin, cout):
    fan_in, fan_out = cin * kh * kw, cout * kh * kw
    a = math.sqrt(6.0 / (fan_in + fan_out))
    return jax.random.uniform(key, (kh, kw, cin, cout), jnp.float32, -a, a)


def _conv3x3_weight(key, cin, cout, scale):
    w = _xavier(key, 3, 3, cin, cout) * scale               # fold BN scale
    w = jnp.pad(w, ((0, 0), (0, 0), (0, CPAD - cin), (0, CPAD - cout)))
    return w.reshape(9 * CPAD, CPAD).astype(jnp.bfloat16)   # im2col layout


def _conv1x1_weight(key, cin, cout, scale):
    w = _xavier(key, 1, 1, cin, cout)[0, 0] * scale
    w = jnp.pad(w, ((0, CPAD - cin), (0, CPAD - cout)))
    return w.astype(jnp.bfloat16)


def build_reduced_avtn4_params(in_img_ch=3, feat_ch=64, hidden=32):
    # out_channels must equal hidden_size for the module's BN(out_channels)
    # after hidden-sized convs to be well-formed (as in the PyTorch code).
    out_ch = hidden
    bn_scale = 1.0 / math.sqrt(1.0 + BN_EPS)   # gamma=1, var=1, mean=0, beta=0

    plan = [
        # synthetic stand-in for external ResNet-50 `features` prefix
        # TODO(synk): replace by the real backbone when its weights are given.
        dict(kind="c3", stride=2, cin=in_img_ch, cout=feat_ch, emit=False, bn=True),
        # adjust_layer (the module's own compute): 1x1 + three 3x3, BN+ReLU each
        dict(kind="c1", stride=1, cin=feat_ch, cout=hidden, emit=False, bn=True),
        dict(kind="c3", stride=1, cin=hidden, cout=hidden, emit=False, bn=True),
        dict(kind="c3", stride=1, cin=hidden, cout=hidden, emit=False, bn=True),
        dict(kind="c3", stride=1, cin=hidden, cout=out_ch, emit=True, bn=True),
        # synthetic stand-in for external `extra` blocks (SSD-style, conv+ReLU)
        dict(kind="c1", stride=1, cin=out_ch, cout=out_ch // 2, emit=False, bn=False),
        dict(kind="c3", stride=2, cin=out_ch // 2, cout=out_ch, emit=True, bn=False),
        dict(kind="c1", stride=1, cin=out_ch, cout=out_ch // 2, emit=False, bn=False),
        dict(kind="c3", stride=2, cin=out_ch // 2, cout=out_ch, emit=True, bn=False),
    ]

    keys = jax.random.split(jax.random.PRNGKey(0), len(plan))
    weights = []
    for k, cfg in zip(keys, plan):
        s = bn_scale if cfg["bn"] else 1.0
        if cfg["kind"] == "c1":
            weights.append(_conv1x1_weight(k, cfg["cin"], cfg["cout"], s))
        else:
            weights.append(_conv3x3_weight(k, cfg["cin"], cfg["cout"], s))
    return dict(plan=plan, weights=weights)


# ----------------------------------------------------------------------------
# Forward pass (mirrors ReducedAVTN4.forward)
# ----------------------------------------------------------------------------
def reduced_avtn4_forward(params, x_nchw):
    plan, weights = params["plan"], params["weights"]

    # NCHW (PyTorch) -> NHWC (channels last -> lanes)
    x = jnp.transpose(x_nchw, (0, 2, 3, 1)).astype(jnp.float32)
    N, H0, W0, Cin = x.shape
    assert H0 % 8 == 0 and W0 % 8 == 0, "need 3 spatial halvings"

    # emitted feature-map shapes (lane-padded) and their real channel counts
    out_shapes, out_couts = [], []
    h, w = H0, W0
    for cfg in plan:
        if cfg["kind"] == "c3" and cfg["stride"] == 2:
            h, w = h // 2, w // 2
        if cfg["emit"]:
            out_shapes.append((N, h, w, CPAD))
            out_couts.append(cfg["cout"])

    kernel = _make_fused_kernel(plan, H0, W0)

    outs = pl.pallas_call(
        kernel,
        out_shape=tuple(jax.ShapeDtypeStruct(s, jnp.float32) for s in out_shapes),
        grid=(N,),
        in_specs=[pl.BlockSpec((1, H0, W0, Cin), lambda n: (n, 0, 0, 0))]
        + [pl.BlockSpec(wt.shape, lambda n: (0, 0)) for wt in weights],
        out_specs=tuple(
            pl.BlockSpec((1,) + s[1:], lambda n: (n, 0, 0, 0)) for s in out_shapes
        ),
        scratch_shapes=[
            pltpu.VMEM((H0 + 2, W0 + 2, CPAD), jnp.float32),   # ping
            pltpu.VMEM((H0 + 2, W0 + 2, CPAD), jnp.float32),   # pong
        ],
        compiler_params=pltpu.CompilerParams(dimension_semantics=("parallel",)),
    )(x, *weights)

    if not isinstance(outs, (list, tuple)):
        outs = (outs,)

    # slice real channels + NHWC -> NCHW (single glue op per output)
    return OrderedDict(
        (str(i), jnp.transpose(y[..., :c], (0, 3, 1, 2)))
        for i, (y, c) in enumerate(zip(outs, out_couts))
    )


# ----------------------------------------------------------------------------
if __name__ == "__main__":
    N, C, H, W = 2, 3, 16, 16  # small NCHW input, like the PyTorch module
    key = jax.random.PRNGKey(0)
    x = jax.random.normal(key, (N, C, H, W), dtype=jnp.float32)

    params = build_reduced_avtn4_params(in_img_ch=C, feat_ch=64, hidden=32)
    fwd = jax.jit(lambda xx: reduced_avtn4_forward(params, xx))
    out = fwd(x)
    jax.block_until_ready(list(out.values()))

    # sanity: multi-scale pyramid with halving spatial sizes
    assert out["0"].shape == (N, 32, 8, 8), out["0"].shape
    assert out["1"].shape == (N, 32, 4, 4), out["1"].shape
    assert out["2"].shape == (N, 32, 2, 2), out["2"].shape
    assert all(bool(jnp.all(jnp.isfinite(v))) for v in out.values())

    print("KERNEL_OK")
</pallas_src>

<mosaic_0001>
module attributes {stable_mosaic.version = 11 : i64} {
  func.func @kernel(%arg0: i32, %arg1: memref<1x16x16x3xf32, #tpu.memory_space<vmem>>, %arg2: memref<1152x128xbf16, #tpu.memory_space<vmem>>, %arg3: memref<128x128xbf16, #tpu.memory_space<vmem>>, %arg4: memref<1152x128xbf16, #tpu.memory_space<vmem>>, %arg5: memref<1152x128xbf16, #tpu.memory_space<vmem>>, %arg6: memref<1152x128xbf16, #tpu.memory_space<vmem>>, %arg7: memref<128x128xbf16, #tpu.memory_space<vmem>>, %arg8: memref<1152x128xbf16, #tpu.memory_space<vmem>>, %arg9: memref<128x128xbf16, #tpu.memory_space<vmem>>, %arg10: memref<1152x128xbf16, #tpu.memory_space<vmem>>, %arg11: memref<1x8x8x128xf32, #tpu.memory_space<vmem>>, %arg12: memref<1x4x4x128xf32, #tpu.memory_space<vmem>>, %arg13: memref<1x2x2x128xf32, #tpu.memory_space<vmem>>, %arg14: memref<18x18x128xf32, #tpu.memory_space<vmem>>, %arg15: memref<18x18x128xf32, #tpu.memory_space<vmem>>) attributes {dimension_semantics = [#tpu.dimension_semantics<parallel>], iteration_bounds = array<i64: 2>, scalar_prefetch = 0 : i64, scratch_operands = 2 : i64, tpu.core_type = #tpu.core_type<tc>, window_params = [{transform_indices = @transform_0, window_bounds = array<i64: 1, 16, 16, 3>}, {pipeline_mode = #tpu.pipeline_mode<synchronous>, transform_indices = @transform_1, window_bounds = array<i64: 1152, 128>}, {pipeline_mode = #tpu.pipeline_mode<synchronous>, transform_indices = @transform_2, window_bounds = array<i64: 128, 128>}, {pipeline_mode = #tpu.pipeline_mode<synchronous>, transform_indices = @transform_3, window_bounds = array<i64: 1152, 128>}, {pipeline_mode = #tpu.pipeline_mode<synchronous>, transform_indices = @transform_4, window_bounds = array<i64: 1152, 128>}, {pipeline_mode = #tpu.pipeline_mode<synchronous>, transform_indices = @transform_5, window_bounds = array<i64: 1152, 128>}, {pipeline_mode = #tpu.pipeline_mode<synchronous>, transform_indices = @transform_6, window_bounds = array<i64: 128, 128>}, {pipeline_mode = #tpu.pipeline_mode<synchronous>, transform_indices = @transform_7, window_bounds = array<i64: 1152, 128>}, {pipeline_mode = #tpu.pipeline_mode<synchronous>, transform_indices = @transform_8, window_bounds = array<i64: 128, 128>}, {pipeline_mode = #tpu.pipeline_mode<synchronous>, transform_indices = @transform_9, window_bounds = array<i64: 1152, 128>}, {transform_indices = @transform_10, window_bounds = array<i64: 1, 8, 8, 128>}, {transform_indices = @transform_11, window_bounds = array<i64: 1, 4, 4, 128>}, {transform_indices = @transform_12, window_bounds = array<i64: 1, 2, 2, 128>}]} {
    %c0 = arith.constant 0 : index
    %c0_0 = arith.constant 0 : index
    %c0_1 = arith.constant 0 : index
    %c0_2 = arith.constant 0 : index
    %0 = vector.load %arg1[%c0, %c0_0, %c0_1, %c0_2] : memref<1x16x16x3xf32, #tpu.memory_space<vmem>>, vector<1x16x16x3xf32>
    %1 = vector.shape_cast %0 : vector<1x16x16x3xf32> to vector<16x16x3xf32>
    %cst = arith.constant 0.000000e+00 : f32
    %2 = vector.broadcast %cst : f32 to vector<18x18x128xf32>
    %c0_3 = arith.constant 0 : index
    %c0_4 = arith.constant 0 : index
    %c0_5 = arith.constant 0 : index
    %3 = vector.load %arg14[%c0_3, %c0_4, %c0_5] : memref<18x18x128xf32, #tpu.memory_space<vmem>>, vector<18x18x128xf32>
    tpu.vector_store %arg14[%c0_3, %c0_4, %c0_5], %2 {strides = array<i32>} : memref<18x18x128xf32, #tpu.memory_space<vmem>>, vector<18x18x128xf32>,
    %c1 = arith.constant 1 : index
    %c1_6 = arith.constant 1 : index
    %c0_7 = arith.constant 0 : index
    %4 = vector.load %arg14[%c1, %c1_6, %c0_7] : memref<18x18x128xf32, #tpu.memory_space<vmem>>, vector<16x16x3xf32>
    tpu.vector_store %arg14[%c1, %c1_6, %c0_7], %1 {strides = array<i32>} : memref<18x18x128xf32, #tpu.memory_space<vmem>>, vector<16x16x3xf32>,
    %c0_8 = arith.constant 0 : index
    %c0_9 = arith.constant 0 : index
    %c0_10 = arith.constant 0 : index
    %5 = vector.load %arg14[%c0_8, %c0_9, %c0_10] : memref<18x18x128xf32, #tpu.memory_space<vmem>>, vector<16x16x128xf32>
    %6 = arith.truncf %5 : vector<16x16x128xf32> to vector<16x16x128xbf16>
    %7 = vector.shape_cast %6 : vector<16x16x128xbf16> to vector<256x128xbf16>
    %c0_11 = arith.constant 0 : index
    %c1_12 = arith.constant 1 : index
    %c0_13 = arith.constant 0 : index
    %8 = vector.load %arg14[%c0_11, %c1_12, %c0_13] : memref<18x18x128xf32, #tpu.memory_space<vmem>>, vector<16x16x128xf32>
    %9 = arith.truncf %8 : vector<16x16x128xf32> to vector<16x16x128xbf16>
    %10 = vector.shape_cast %9 : vector<16x16x128xbf16> to vector<256x128xbf16>
    %c0_14 = arith.constant 0 : index
    %c2 = arith.constant 2 : index
    %c0_15 = arith.constant 0 : index
    %11 = vector.load %arg14[%c0_14, %c2, %c0_15] : memref<18x18x128xf32, #tpu.memory_space<vmem>>, vector<16x16x128xf32>
    %12 = arith.truncf %11 : vector<16x16x128xf32> to vector<16x16x128xbf16>
    %13 = vector.shape_cast %12 : vector<16x16x128xbf16> to vector<256x128xbf16>
    %c1_16 = arith.constant 1 : index
    %c0_17 = arith.constant 0 : index
    %c0_18 = arith.constant 0 : index
    %14 = vector.load %arg14[%c1_16, %c0_17, %c0_18] : memref<18x18x128xf32, #tpu.memory_space<vmem>>, vector<16x16x128xf32>
    %15 = arith.truncf %14 : vector<16x16x128xf32> to vector<16x16x128xbf16>
    %16 = vector.shape_cast %15 : vector<16x16x128xbf16> to vector<256x128xbf16>
    %c1_19 = arith.constant 1 : index
    %c1_20 = arith.constant 1 : index
    %c0_21 = arith.constant 0 : index
    %17 = vector.load %arg14[%c1_19, %c1_20, %c0_21] : memref<18x18x128xf32, #tpu.memory_space<vmem>>, vector<16x16x128xf32>
    %18 = arith.truncf %17 : vector<16x16x128xf32> to vector<16x16x128xbf16>
    %19 = vector.shape_cast %18 : vector<16x16x128xbf16> to vector<256x128xbf16>
    %c1_22 = arith.constant 1 : index
    %c2_23 = arith.constant 2 : index
    %c0_24 = arith.constant 0 : index
    %20 = vector.load %arg14[%c1_22, %c2_23, %c0_24] : memref<18x18x128xf32, #tpu.memory_space<vmem>>, vector<16x16x128xf32>
    %21 = arith.truncf %20 : vector<16x16x128xf32> to vector<16x16x128xbf16>
    %22 = vector.shape_cast %21 : vector<16x16x128xbf16> to vector<256x128xbf16>
    %c2_25 = arith.constant 2 : index
    %c0_26 = arith.constant 0 : index
    %c0_27 = arith.constant 0 : index
    %23 = vector.load %arg14[%c2_25, %c0_26, %c0_27] : memref<18x18x128xf32, #tpu.memory_space<vmem>>, vector<16x16x128xf32>
    %24 = arith.truncf %23 : vector<16x16x128xf32> to vector<16x16x128xbf16>
    %25 = vector.shape_cast %24 : vector<16x16x128xbf16> to vector<256x128xbf16>
    %c2_28 = arith.constant 2 : index
    %c1_29 = arith.constant 1 : index
    %c0_30 = arith.constant 0 : index
    %26 = vector.load %arg14[%c2_28, %c1_29, %c0_30] : memref<18x18x128xf32, #tpu.memory_space<vmem>>, vector<16x16x128xf32>
    %27 = arith.truncf %26 : vector<16x16x128xf32> to vector<16x16x128xbf16>
    %28 = vector.shape_cast %27 : vector<16x16x128xbf16> to vector<256x128xbf16>
    %c2_31 = arith.constant 2 : index
    %c2_32 = arith.constant 2 : index
    %c0_33 = arith.constant 0 : index
    %29 = vector.load %arg14[%c2_31, %c2_32, %c0_33] : memref<18x18x128xf32, #tpu.memory_space<vmem>>, vector<16x16x128xf32>
    %30 = arith.truncf %29 : vector<16x16x128xf32> to vector<16x16x128xbf16>
    %31 = vector.shape_cast %30 : vector<16x16x128xbf16> to vector<256x128xbf16>
    %32 = tpu.concatenate %7, %10, %13, %16, %19, %22, %25, %28, %31 in 1 : vector<256x128xbf16>, vector<256x128xbf16>, vector<256x128xbf16>, vector<256x128xbf16>, vector<256x128xbf16>, vector<256x128xbf16>, vector<256x128xbf16>, vector<256x128xbf16>, vector<256x128xbf16> -> vector<256x1152xbf16>
    %c0_34 = arith.constant 0 : index
    %c0_35 = arith.constant 0 : index
    %33 = vector.load %arg2[%c0_34, %c0_35] : memref<1152x128xbf16, #tpu.memory_space<vmem>>, vector<1152x128xbf16>
    %cst_36 = arith.constant dense<0.000000e+00> : vector<256x128xf32>
    %34 = tpu.matmul %32, %33, %cst_36 {dimension_numbers = #tpu.dot_dimension_numbers<[1], [0], [0], [1], [0, 0, 1, 1], [], []>} : vector<256x1152xbf16>, vector<1152x128xbf16>, vector<256x128xf32> -> vector<256x128xf32>
    %cst_37 = arith.constant 0.000000e+00 : f32
    %35 = vector.broadcast %cst_37 : f32 to vector<256x128xf32>
    %36 = arith.maximumf %34, %35 : vector<256x128xf32>
    %37 = vector.shape_cast %36 : vector<256x128xf32> to vector<16x16x128xf32>
    %38 = vector.extract_strided_slice %37 {offsets = [0, 0, 0], sizes = [1, 16, 128], strides = [1, 1, 1]} : vector<16x16x128xf32> to vector<1x16x128xf32>
    %39 = vector.extract_strided_slice %37 {offsets = [2, 0, 0], sizes = [1, 16, 128], strides = [1, 1, 1]} : vector<16x16x128xf32> to vector<1x16x128xf32>
    %40 = vector.extract_strided_slice %37 {offsets = [4, 0, 0], sizes = [1, 16, 128], strides = [1, 1, 1]} : vector<16x16x128xf32> to vector<1x16x128xf32>
    %41 = vector.extract_strided_slice %37 {offsets = [6, 0, 0], sizes = [1, 16, 128], strides = [1, 1, 1]} : vector<16x16x128xf32> to vector<1x16x128xf32>
    %42 = vector.extract_strided_slice %37 {offsets = [8, 0, 0], sizes = [1, 16, 128], strides = [1, 1, 1]} : vector<16x16x128xf32> to vector<1x16x128xf32>
    %43 = vector.extract_strided_slice %37 {offsets = [10, 0, 0], sizes = [1, 16, 128], strides = [1, 1, 1]} : vector<16x16x128xf32> to vector<1x16x128xf32>
    %44 = vector.extract_strided_slice %37 {offsets = [12, 0, 0], sizes = [1, 16, 128], strides = [1, 1, 1]} : vector<16x16x128xf32> to vector<1x16x128xf32>
    %45 = vector.extract_strided_slice %37 {offsets = [14, 0, 0], sizes = [1, 16, 128], strides = [1, 1, 1]} : vector<16x16x128xf32> to vector<1x16x128xf32>
    %46 = tpu.concatenate %38, %39, %40, %41, %42, %43, %44, %45 in 0 : vector<1x16x128xf32>, vector<1x16x128xf32>, vector<1x16x128xf32>, vector<1x16x128xf32>, vector<1x16x128xf32>, vector<1x16x128xf32>, vector<1x16x128xf32>, vector<1x16x128xf32> -> vector<8x16x128xf32>
    %47 = vector.extract_strided_slice %46 {offsets = [0, 0, 0], sizes = [8, 1, 128], strides = [1, 1, 1]} : vector<8x16x128xf32> to vector<8x1x128xf32>
    %48 = vector.extract_strided_slice %46 {offsets = [0, 2, 0], sizes = [8, 1, 128], strides = [1, 1, 1]} : vector<8x16x128xf32> to vector<8x1x128xf32>
    %49 = vector.extract_strided_slice %46 {offsets = [0, 4, 0], sizes = [8, 1, 128], strides = [1, 1, 1]} : vector<8x16x128xf32> to vector<8x1x128xf32>
    %50 = vector.extract_strided_slice %46 {offsets = [0, 6, 0], sizes = [8, 1, 128], strides = [1, 1, 1]} : vector<8x16x128xf32> to vector<8x1x128xf32>
    %51 = vector.extract_strided_slice %46 {offsets = [0, 8, 0], sizes = [8, 1, 128], strides = [1, 1, 1]} : vector<8x16x128xf32> to vector<8x1x128xf32>
    %52 = vector.extract_strided_slice %46 {offsets = [0, 10, 0], sizes = [8, 1, 128], strides = [1, 1, 1]} : vector<8x16x128xf32> to vector<8x1x128xf32>
    %53 = vector.extract_strided_slice %46 {offsets = [0, 12, 0], sizes = [8, 1, 128], strides = [1, 1, 1]} : vector<8x16x128xf32> to vector<8x1x128xf32>
    %54 = vector.extract_strided_slice %46 {offsets = [0, 14, 0], sizes = [8, 1, 128], strides = [1, 1, 1]} : vector<8x16x128xf32> to vector<8x1x128xf32>
    %55 = tpu.concatenate %47, %48, %49, %50, %51, %52, %53, %54 in 1 : vector<8x1x128xf32>, vector<8x1x128xf32>, vector<8x1x128xf32>, vector<8x1x128xf32>, vector<8x1x128xf32>, vector<8x1x128xf32>, vector<8x1x128xf32>, vector<8x1x128xf32> -> vector<8x8x128xf32>
    %cst_38 = arith.constant 0.000000e+00 : f32
    %56 = vector.broadcast %cst_38 : f32 to vector<18x18x128xf32>
    %c0_39 = arith.constant 0 : index
    %c0_40 = arith.constant 0 : index
    %c0_41 = arith.constant 0 : index
    %57 = vector.load %arg15[%c0_39, %c0_40, %c0_41] : memref<18x18x128xf32, #tpu.memory_space<vmem>>, vector<18x18x128xf32>
    tpu.vector_store %arg15[%c0_39, %c0_40, %c0_41], %56 {strides = array<i32>} : memref<18x18x128xf32, #tpu.memory_space<vmem>>, vector<18x18x128xf32>,
    %c1_42 = arith.constant 1 : index
    %c1_43 = arith.constant 1 : index
    %c0_44 = arith.constant 0 : index
    %58 = vector.load %arg15[%c1_42, %c1_43, %c0_44] : memref<18x18x128xf32, #tpu.memory_space<vmem>>, vector<8x8x128xf32>
    tpu.vector_store %arg15[%c1_42, %c1_43, %c0_44], %55 {strides = array<i32>} : memref<18x18x128xf32, #tpu.memory_space<vmem>>, vector<8x8x128xf32>,
    %c1_45 = arith.constant 1 : index
    %c1_46 = arith.constant 1 : index
    %c0_47 = arith.constant 0 : index
    %59 = vector.load %arg15[%c1_45, %c1_46, %c0_47] : memref<18x18x128xf32, #tpu.memory_space<vmem>>, vector<8x8x128xf32>
    %60 = arith.truncf %59 : vector<8x8x128xf32> to vector<8x8x128xbf16>
    %61 = vector.shape_cast %60 : vector<8x8x128xbf16> to vector<64x128xbf16>
    %c0_48 = arith.constant 0 : index
    %c0_49 = arith.constant 0 : index
    %62 = vector.load %arg3[%c0_48, %c0_49] : memref<128x128xbf16, #tpu.memory_space<vmem>>, vector<128x128xbf16>
    %cst_50 = arith.constant dense<0.000000e+00> : vector<64x128xf32>
    %63 = tpu.matmul %61, %62, %cst_50 {dimension_numbers = #tpu.dot_dimension_numbers<[1], [0], [0], [1], [0, 0, 1, 1], [], []>} : vector<64x128xbf16>, vector<128x128xbf16>, vector<64x128xf32> -> vector<64x128xf32>
    %cst_51 = arith.constant 0.000000e+00 : f32
    %64 = vector.broadcast %cst_51 : f32 to vector<64x128xf32>
    %65 = arith.maximumf %63, %64 : vector<64x128xf32>
    %66 = vector.shape_cast %65 : vector<64x128xf32> to vector<8x8x128xf32>
    %cst_52 = arith.constant 0.000000e+00 : f32
    %67 = vector.broadcast %cst_52 : f32 to vector<18x18x128xf32>
    %c0_53 = arith.constant 0 : index
    %c0_54 = arith.constant 0 : index
    %c0_55 = arith.constant 0 : index
    %68 = vector.load %arg14[%c0_53, %c0_54, %c0_55] : memref<18x18x128xf32, #tpu.memory_space<vmem>>, vector<18x18x128xf32>
    tpu.vector_store %arg14[%c0_53, %c0_54, %c0_55], %67 {strides = array<i32>} : memref<18x18x128xf32, #tpu.memory_space<vmem>>, vector<18x18x128xf32>,
    %c1_56 = arith.constant 1 : index
    %c1_57 = arith.constant 1 : index
    %c0_58 = arith.constant 0 : index
    %69 = vector.load %arg14[%c1_56, %c1_57, %c0_58] : memref<18x18x128xf32, #tpu.memory_space<vmem>>, vector<8x8x128xf32>
    tpu.vector_store %arg14[%c1_56, %c1_57, %c0_58], %66 {strides = array<i32>} : memref<18x18x128xf32, #tpu.memory_space<vmem>>, vector<8x8x128xf32>,
    %c0_59 = arith.constant 0 : index
    %c0_60 = arith.constant 0 : index
    %c0_61 = arith.constant 0 : index
    %70 = vector.load %arg14[%c0_59, %c0_60, %c0_61] : memref<18x18x128xf32, #tpu.memory_space<vmem>>, vector<8x8x128xf32>
    %71 = arith.truncf %70 : vector<8x8x128xf32> to vector<8x8x128xbf16>
    %72 = vector.shape_cast %71 : vector<8x8x128xbf16> to vector<64x128xbf16>
    %c0_62 = arith.constant 0 : index
    %c1_63 = arith.constant 1 : index
    %c0_64 = arith.constant 0 : index
    %73 = vector.load %arg14[%c0_62, %c1_63, %c0_64] : memref<18x18x128xf32, #tpu.memory_space<vmem>>, vector<8x8x128xf32>
    %74 = arith.truncf %73 : vector<8x8x128xf32> to vector<8x8x128xbf16>
    %75 = vector.shape_cast %74 : vector<8x8x128xbf16> to vector<64x128xbf16>
    %c0_65 = arith.constant 0 : index
    %c2_66 = arith.constant 2 : index
    %c0_67 = arith.constant 0 : index
    %76 = vector.load %arg14[%c0_65, %c2_66, %c0_67] : memref<18x18x128xf32, #tpu.memory_space<vmem>>, vector<8x8x128xf32>
    %77 = arith.truncf %76 : vector<8x8x128xf32> to vector<8x8x128xbf16>
    %78 = vector.shape_cast %77 : vector<8x8x128xbf16> to vector<64x128xbf16>
    %c1_68 = arith.constant 1 : index
    %c0_69 = arith.constant 0 : index
    %c0_70 = arith.constant 0 : index
    %79 = vector.load %arg14[%c1_68, %c0_69, %c0_70] : memref<18x18x128xf32, #tpu.memory_space<vmem>>, vector<8x8x128xf32>
    %80 = arith.truncf %79 : vector<8x8x128xf32> to vector<8x8x128xbf16>
    %81 = vector.shape_cast %80 : vector<8x8x128xbf16> to vector<64x128xbf16>
    %c1_71 = arith.constant 1 : index
    %c1_72 = arith.constant 1 : index
    %c0_73 = arith.constant 0 : index
    %82 = vector.load %arg14[%c1_71, %c1_72, %c0_73] : memref<18x18x128xf32, #tpu.memory_space<vmem>>, vector<8x8x128xf32>
    %83 = arith.truncf %82 : vector<8x8x128xf32> to vector<8x8x128xbf16>
    %84 = vector.shape_cast %83 : vector<8x8x128xbf16> to vector<64x128xbf16>
    %c1_74 = arith.constant 1 : index
    %c2_75 = arith.constant 2 : index
    %c0_76 = arith.constant 0 : index
    %85 = vector.load %arg14[%c1_74, %c2_75, %c0_76] : memref<18x18x128xf32, #tpu.memory_space<vmem>>, vector<8x8x128xf32>
    %86 = arith.truncf %85 : vector<8x8x128xf32> to vector<8x8x128xbf16>
    %87 = vector.shape_cast %86 : vector<8x8x128xbf16> to vector<64x128xbf16>
    %c2_77 = arith.constant 2 : index
    %c0_78 = arith.constant 0 : index
    %c0_79 = arith.constant 0 : index
    %88 = vector.load %arg14[%c2_77, %c0_78, %c0_79] : memref<18x18x128xf32, #tpu.memory_space<vmem>>, vector<8x8x128xf32>
    %89 = arith.truncf %88 : vector<8x8x128xf32> to vector<8x8x128xbf16>
    %90 = vector.shape_cast %89 : vector<8x8x128xbf16> to vector<64x128xbf16>
    %c2_80 = arith.constant 2 : index
    %c1_81 = arith.constant 1 : index
    %c0_82 = arith.constant 0 : index
    %91 = vector.load %arg14[%c2_80, %c1_81, %c0_82] : memref<18x18x128xf32, #tpu.memory_space<vmem>>, vector<8x8x128xf32>
    %92 = arith.truncf %91 : vector<8x8x128xf32> to vector<8x8x128xbf16>
    %93 = vector.shape_cast %92 : vector<8x8x128xbf16> to vector<64x128xbf16>
    %c2_83 = arith.constant 2 : index
    %c2_84 = arith.constant 2 : index
    %c0_85 = arith.constant 0 : index
    %94 = vector.load %arg14[%c2_83, %c2_84, %c0_85] : memref<18x18x128xf32, #tpu.memory_space<vmem>>, vector<8x8x128xf32>
    %95 = arith.truncf %94 : vector<8x8x128xf32> to vector<8x8x128xbf16>
    %96 = vector.shape_cast %95 : vector<8x8x128xbf16> to vector<64x128xbf16>
    %97 = tpu.concatenate %72, %75, %78, %81, %84, %87, %90, %93, %96 in 1 : vector<64x128xbf16>, vector<64x128xbf16>, vector<64x128xbf16>, vector<64x128xbf16>, vector<64x128xbf16>, vector<64x128xbf16>, vector<64x128xbf16>, vector<64x128xbf16>, vector<64x128xbf16> -> vector<64x1152xbf16>
    %c0_86 = arith.constant 0 : index
    %c0_87 = arith.constant 0 : index
    %98 = vector.load %arg4[%c0_86, %c0_87] : memref<1152x128xbf16, #tpu.memory_space<vmem>>, vector<1152x128xbf16>
    %cst_88 = arith.constant dense<0.000000e+00> : vector<64x128xf32>
    %99 = tpu.matmul %97, %98, %cst_88 {dimension_numbers = #tpu.dot_dimension_numbers<[1], [0], [0], [1], [0, 0, 1, 1], [], []>} : vector<64x1152xbf16>, vector<1152x128xbf16>, vector<64x128xf32> -> vector<64x128xf32>
    %cst_89 = arith.constant 0.000000e+00 : f32
    %100 = vector.broadcast %cst_89 : f32 to vector<64x128xf32>
    %101 = arith.maximumf %99, %100 : vector<64x128xf32>
    %102 = vector.shape_cast %101 : vector<64x128xf32> to vector<8x8x128xf32>
    %cst_90 = arith.constant 0.000000e+00 : f32
    %103 = vector.broadcast %cst_90 : f32 to vector<18x18x128xf32>
    %c0_91 = arith.constant 0 : index
    %c0_92 = arith.constant 0 : index
    %c0_93 = arith.constant 0 : index
    %104 = vector.load %arg15[%c0_91, %c0_92, %c0_93] : memref<18x18x128xf32, #tpu.memory_space<vmem>>, vector<18x18x128xf32>
    tpu.vector_store %arg15[%c0_91, %c0_92, %c0_93], %103 {strides = array<i32>} : memref<18x18x128xf32, #tpu.memory_space<vmem>>, vector<18x18x128xf32>,
    %c1_94 = arith.constant 1 : index
    %c1_95 = arith.constant 1 : index
    %c0_96 = arith.constant 0 : index
    %105 = vector.load %arg15[%c1_94, %c1_95, %c0_96] : memref<18x18x128xf32, #tpu.memory_space<vmem>>, vector<8x8x128xf32>
    tpu.vector_store %arg15[%c1_94, %c1_95, %c0_96], %102 {strides = array<i32>} : memref<18x18x128xf32, #tpu.memory_space<vmem>>, vector<8x8x128xf32>,
    %c0_97 = arith.constant 0 : index
    %c0_98 = arith.constant 0 : index
    %c0_99 = arith.constant 0 : index
    %106 = vector.load %arg15[%c0_97, %c0_98, %c0_99] : memref<18x18x128xf32, #tpu.memory_space<vmem>>, vector<8x8x128xf32>
    %107 = arith.truncf %106 : vector<8x8x128xf32> to vector<8x8x128xbf16>
    %108 = vector.shape_cast %107 : vector<8x8x128xbf16> to vector<64x128xbf16>
    %c0_100 = arith.constant 0 : index
    %c1_101 = arith.constant 1 : index
    %c0_102 = arith.constant 0 : index
    %109 = vector.load %arg15[%c0_100, %c1_101, %c0_102] : memref<18x18x128xf32, #tpu.memory_space<vmem>>, vector<8x8x128xf32>
    %110 = arith.truncf %109 : vector<8x8x128xf32> to vector<8x8x128xbf16>
    %111 = vector.shape_cast %110 : vector<8x8x128xbf16> to vector<64x128xbf16>
    %c0_103 = arith.constant 0 : index
    %c2_104 = arith.constant 2 : index
    %c0_105 = arith.constant 0 : index
    %112 = vector.load %arg15[%c0_103, %c2_104, %c0_105] : memref<18x18x128xf32, #tpu.memory_space<vmem>>, vector<8x8x128xf32>
    %113 = arith.truncf %112 : vector<8x8x128xf32> to vector<8x8x128xbf16>
    %114 = vector.shape_cast %113 : vector<8x8x128xbf16> to vector<64x128xbf16>
    %c1_106 = arith.constant 1 : index
    %c0_107 = arith.constant 0 : index
    %c0_108 = arith.constant 0 : index
    %115 = vector.load %arg15[%c1_106, %c0_107, %c0_108] : memref<18x18x128xf32, #tpu.memory_space<vmem>>, vector<8x8x128xf32>
    %116 = arith.truncf %115 : vector<8x8x128xf32> to vector<8x8x128xbf16>
    %117 = vector.shape_cast %116 : vector<8x8x128xbf16> to vector<64x128xbf16>
    %c1_109 = arith.constant 1 : index
    %c1_110 = arith.constant 1 : index
    %c0_111 = arith.constant 0 : index
    %118 = vector.load %arg15[%c1_109, %c1_110, %c0_111] : memref<18x18x128xf32, #tpu.memory_space<vmem>>, vector<8x8x128xf32>
    %119 = arith.truncf %118 : vector<8x8x128xf32> to vector<8x8x128xbf16>
    %120 = vector.shape_cast %119 : vector<8x8x128xbf16> to vector<64x128xbf16>
    %c1_112 = arith.constant 1 : index
    %c2_113 = arith.constant 2 : index
    %c0_114 = arith.constant 0 : index
    %121 = vector.load %arg15[%c1_112, %c2_113, %c0_114] : memref<18x18x128xf32, #tpu.memory_space<vmem>>, vector<8x8x128xf32>
    %122 = arith.truncf %121 : vector<8x8x128xf32> to vector<8x8x128xbf16>
    %123 = vector.shape_cast %122 : vector<8x8x128xbf16> to vector<64x128xbf16>
    %c2_115 = arith.constant 2 : index
    %c0_116 = arith.constant 0 : index
    %c0_117 = arith.constant 0 : index
    %124 = vector.load %arg15[%c2_115, %c0_116, %c0_117] : memref<18x18x128xf32, #tpu.memory_space<vmem>>, vector<8x8x128xf32>
    %125 = arith.truncf %124 : vector<8x8x128xf32> to vector<8x8x128xbf16>
    %126 = vector.shape_cast %125 : vector<8x8x128xbf16> to vector<64x128xbf16>
    %c2_118 = arith.constant 2 : index
    %c1_119 = arith.constant 1 : index
    %c0_120 = arith.constant 0 : index
    %127 = vector.load %arg15[%c2_118, %c1_119, %c0_120] : memref<18x18x128xf32, #tpu.memory_space<vmem>>, vector<8x8x128xf32>
    %128 = arith.truncf %127 : vector<8x8x128xf32> to vector<8x8x128xbf16>
    %129 = vector.shape_cast %128 : vector<8x8x128xbf16> to vector<64x128xbf16>
    %c2_121 = arith.constant 2 : index
    %c2_122 = arith.constant 2 : index
    %c0_123 = arith.constant 0 : index
    %130 = vector.load %arg15[%c2_121, %c2_122, %c0_123] : memref<18x18x128xf32, #tpu.memory_space<vmem>>, vector<8x8x128xf32>
    %131 = arith.truncf %130 : vector<8x8x128xf32> to vector<8x8x128xbf16>
    %132 = vector.shape_cast %131 : vector<8x8x128xbf16> to vector<64x128xbf16>
    %133 = tpu.concatenate %108, %111, %114, %117, %120, %123, %126, %129, %132 in 1 : vector<64x128xbf16>, vector<64x128xbf16>, vector<64x128xbf16>, vector<64x128xbf16>, vector<64x128xbf16>, vector<64x128xbf16>, vector<64x128xbf16>, vector<64x128xbf16>, vector<64x128xbf16> -> vector<64x1152xbf16>
    %c0_124 = arith.constant 0 : index
    %c0_125 = arith.constant 0 : index
    %134 = vector.load %arg5[%c0_124, %c0_125] : memref<1152x128xbf16, #tpu.memory_space<vmem>>, vector<1152x128xbf16>
    %cst_126 = arith.constant dense<0.000000e+00> : vector<64x128xf32>
    %135 = tpu.matmul %133, %134, %cst_126 {dimension_numbers = #tpu.dot_dimension_numbers<[1], [0], [0], [1], [0, 0, 1, 1], [], []>} : vector<64x1152xbf16>, vector<1152x128xbf16>, vector<64x128xf32> -> vector<64x128xf32>
    %cst_127 = arith.constant 0.000000e+00 : f32
    %136 = vector.broadcast %cst_127 : f32 to vector<64x128xf32>
    %137 = arith.maximumf %135, %136 : vector<64x128xf32>
    %138 = vector.shape_cast %137 : vector<64x128xf32> to vector<8x8x128xf32>
    %cst_128 = arith.constant 0.000000e+00 : f32
    %139 = vector.broadcast %cst_128 : f32 to vector<18x18x128xf32>
    %c0_129 = arith.constant 0 : index
    %c0_130 = arith.constant 0 : index
    %c0_131 = arith.constant 0 : index
    %140 = vector.load %arg14[%c0_129, %c0_130, %c0_131] : memref<18x18x128xf32, #tpu.memory_space<vmem>>, vector<18x18x128xf32>
    tpu.vector_store %arg14[%c0_129, %c0_130, %c0_131], %139 {strides = array<i32>} : memref<18x18x128xf32, #tpu.memory_space<vmem>>, vector<18x18x128xf32>,
    %c1_132 = arith.constant 1 : index
    %c1_133 = arith.constant 1 : index
    %c0_134 = arith.constant 0 : index
    %141 = vector.load %arg14[%c1_132, %c1_133, %c0_134] : memref<18x18x128xf32, #tpu.memory_space<vmem>>, vector<8x8x128xf32>
    tpu.vector_store %arg14[%c1_132, %c1_133, %c0_134], %138 {strides = array<i32>} : memref<18x18x128xf32, #tpu.memory_space<vmem>>, vector<8x8x128xf32>,
    %c0_135 = arith.constant 0 : index
    %c0_136 = arith.constant 0 : index
    %c0_137 = arith.constant 0 : index
    %142 = vector.load %arg14[%c0_135, %c0_136, %c0_137] : memref<18x18x128xf32, #tpu.memory_space<vmem>>, vector<8x8x128xf32>
    %143 = arith.truncf %142 : vector<8x8x128xf32> to vector<8x8x128xbf16>
    %144 = vector.shape_cast %143 : vector<8x8x128xbf16> to vector<64x128xbf16>
    %c0_138 = arith.constant 0 : index
    %c1_139 = arith.constant 1 : index
    %c0_140 = arith.constant 0 : index
    %145 = vector.load %arg14[%c0_138, %c1_139, %c0_140] : memref<18x18x128xf32, #tpu.memory_space<vmem>>, vector<8x8x128xf32>
    %146 = arith.truncf %145 : vector<8x8x128xf32> to vector<8x8x128xbf16>
    %147 = vector.shape_cast %146 : vector<8x8x128xbf16> to vector<64x128xbf16>
    %c0_141 = arith.constant 0 : index
    %c2_142 = arith.constant 2 : index
    %c0_143 = arith.constant 0 : index
    %148 = vector.load %arg14[%c0_141, %c2_142, %c0_143] : memref<18x18x128xf32, #tpu.memory_space<vmem>>, vector<8x8x128xf32>
    %149 = arith.truncf %148 : vector<8x8x128xf32> to vector<8x8x128xbf16>
    %150 = vector.shape_cast %149 : vector<8x8x128xbf16> to vector<64x128xbf16>
    %c1_144 = arith.constant 1 : index
    %c0_145 = arith.constant 0 : index
    %c0_146 = arith.constant 0 : index
    %151 = vector.load %arg14[%c1_144, %c0_145, %c0_146] : memref<18x18x128xf32, #tpu.memory_space<vmem>>, vector<8x8x128xf32>
    %152 = arith.truncf %151 : vector<8x8x128xf32> to vector<8x8x128xbf16>
    %153 = vector.shape_cast %152 : vector<8x8x128xbf16> to vector<64x128xbf16>
    %c1_147 = arith.constant 1 : index
    %c1_148 = arith.constant 1 : index
    %c0_149 = arith.constant 0 : index
    %154 = vector.load %arg14[%c1_147, %c1_148, %c0_149] : memref<18x18x128xf32, #tpu.memory_space<vmem>>, vector<8x8x128xf32>
    %155 = arith.truncf %154 : vector<8x8x128xf32> to vector<8x8x128xbf16>
    %156 = vector.shape_cast %155 : vector<8x8x128xbf16> to vector<64x128xbf16>
    %c1_150 = arith.constant 1 : index
    %c2_151 = arith.constant 2 : index
    %c0_152 = arith.constant 0 : index
    %157 = vector.load %arg14[%c1_150, %c2_151, %c0_152] : memref<18x18x128xf32, #tpu.memory_space<vmem>>, vector<8x8x128xf32>
    %158 = arith.truncf %157 : vector<8x8x128xf32> to vector<8x8x128xbf16>
    %159 = vector.shape_cast %158 : vector<8x8x128xbf16> to vector<64x128xbf16>
    %c2_153 = arith.constant 2 : index
    %c0_154 = arith.constant 0 : index
    %c0_155 = arith.constant 0 : index
    %160 = vector.load %arg14[%c2_153, %c0_154, %c0_155] : memref<18x18x128xf32, #tpu.memory_space<vmem>>, vector<8x8x128xf32>
    %161 = arith.truncf %160 : vector<8x8x128xf32> to vector<8x8x128xbf16>
    %162 = vector.shape_cast %161 : vector<8x8x128xbf16> to vector<64x128xbf16>
    %c2_156 = arith.constant 2 : index
    %c1_157 = arith.constant 1 : index
    %c0_158 = arith.constant 0 : index
    %163 = vector.load %arg14[%c2_156, %c1_157, %c0_158] : memref<18x18x128xf32, #tpu.memory_space<vmem>>, vector<8x8x128xf32>
    %164 = arith.truncf %163 : vector<8x8x128xf32> to vector<8x8x128xbf16>
    %165 = vector.shape_cast %164 : vector<8x8x128xbf16> to vector<64x128xbf16>
    %c2_159 = arith.constant 2 : index
    %c2_160 = arith.constant 2 : index
    %c0_161 = arith.constant 0 : index
    %166 = vector.load %arg14[%c2_159, %c2_160, %c0_161] : memref<18x18x128xf32, #tpu.memory_space<vmem>>, vector<8x8x128xf32>
    %167 = arith.truncf %166 : vector<8x8x128xf32> to vector<8x8x128xbf16>
    %168 = vector.shape_cast %167 : vector<8x8x128xbf16> to vector<64x128xbf16>
    %169 = tpu.concatenate %144, %147, %150, %153, %156, %159, %162, %165, %168 in 1 : vector<64x128xbf16>, vector<64x128xbf16>, vector<64x128xbf16>, vector<64x128xbf16>, vector<64x128xbf16>, vector<64x128xbf16>, vector<64x128xbf16>, vector<64x128xbf16>, vector<64x128xbf16> -> vector<64x1152xbf16>
    %c0_162 = arith.constant 0 : index
    %c0_163 = arith.constant 0 : index
    %170 = vector.load %arg6[%c0_162, %c0_163] : memref<1152x128xbf16, #tpu.memory_space<vmem>>, vector<1152x128xbf16>
    %cst_164 = arith.constant dense<0.000000e+00> : vector<64x128xf32>
    %171 = tpu.matmul %169, %170, %cst_164 {dimension_numbers = #tpu.dot_dimension_numbers<[1], [0], [0], [1], [0, 0, 1, 1], [], []>} : vector<64x1152xbf16>, vector<1152x128xbf16>, vector<64x128xf32> -> vector<64x128xf32>
    %cst_165 = arith.constant 0.000000e+00 : f32
    %172 = vector.broadcast %cst_165 : f32 to vector<64x128xf32>
    %173 = arith.maximumf %171, %172 : vector<64x128xf32>
    %174 = vector.shape_cast %173 : vector<64x128xf32> to vector<8x8x128xf32>
    %c0_166 = arith.constant 0 : index
    %c0_167 = arith.constant 0 : index
    %c0_168 = arith.constant 0 : index
    %c0_169 = arith.constant 0 : index
    %175 = vector.load %arg11[%c0_166, %c0_167, %c0_168, %c0_169] : memref<1x8x8x128xf32, #tpu.memory_space<vmem>>, vector<1x8x8x128xf32>
    %176 = vector.shape_cast %175 : vector<1x8x8x128xf32> to vector<8x8x128xf32>
    %177 = vector.shape_cast %174 : vector<8x8x128xf32> to vector<1x8x8x128xf32>
    tpu.vector_store %arg11[%c0_166, %c0_167, %c0_168, %c0_169], %177 {strides = array<i32>} : memref<1x8x8x128xf32, #tpu.memory_space<vmem>>, vector<1x8x8x128xf32>,
    %cst_170 = arith.constant 0.000000e+00 : f32
    %178 = vector.broadcast %cst_170 : f32 to vector<18x18x128xf32>
    %c0_171 = arith.constant 0 : index
    %c0_172 = arith.constant 0 : index
    %c0_173 = arith.constant 0 : index
    %179 = vector.load %arg15[%c0_171, %c0_172, %c0_173] : memref<18x18x128xf32, #tpu.memory_space<vmem>>, vector<18x18x128xf32>
    tpu.vector_store %arg15[%c0_171, %c0_172, %c0_173], %178 {strides = array<i32>} : memref<18x18x128xf32, #tpu.memory_space<vmem>>, vector<18x18x128xf32>,
    %c1_174 = arith.constant 1 : index
    %c1_175 = arith.constant 1 : index
    %c0_176 = arith.constant 0 : index
    %180 = vector.load %arg15[%c1_174, %c1_175, %c0_176] : memref<18x18x128xf32, #tpu.memory_space<vmem>>, vector<8x8x128xf32>
    tpu.vector_store %arg15[%c1_174, %c1_175, %c0_176], %174 {strides = array<i32>} : memref<18x18x128xf32, #tpu.memory_space<vmem>>, vector<8x8x128xf32>,
    %c1_177 = arith.constant 1 : index
    %c1_178 = arith.constant 1 : index
    %c0_179 = arith.constant 0 : index
    %181 = vector.load %arg15[%c1_177, %c1_178, %c0_179] : memref<18x18x128xf32, #tpu.memory_space<vmem>>, vector<8x8x128xf32>
    %182 = arith.truncf %181 : vector<8x8x128xf32> to vector<8x8x128xbf16>
    %183 = vector.shape_cast %182 : vector<8x8x128xbf16> to vector<64x128xbf16>
    %c0_180 = arith.constant 0 : index
    %c0_181 = arith.constant 0 : index
    %184 = vector.load %arg7[%c0_180, %c0_181] : memref<128x128xbf16, #tpu.memory_space<vmem>>, vector<128x128xbf16>
    %cst_182 = arith.constant dense<0.000000e+00> : vector<64x128xf32>
    %185 = tpu.matmul %183, %184, %cst_182 {dimension_numbers = #tpu.dot_dimension_numbers<[1], [0], [0], [1], [0, 0, 1, 1], [], []>} : vector<64x128xbf16>, vector<128x128xbf16>, vector<64x128xf32> -> vector<64x128xf32>
    %cst_183 = arith.constant 0.000000e+00 : f32
    %186 = vector.broadcast %cst_183 : f32 to vector<64x128xf32>
    %187 = arith.maximumf %185, %186 : vector<64x128xf32>
    %188 = vector.shape_cast %187 : vector<64x128xf32> to vector<8x8x128xf32>
    %cst_184 = arith.constant 0.000000e+00 : f32
    %189 = vector.broadcast %cst_184 : f32 to vector<18x18x128xf32>
    %c0_185 = arith.constant 0 : index
    %c0_186 = arith.constant 0 : index
    %c0_187 = arith.constant 0 : index
    %190 = vector.load %arg14[%c0_185, %c0_186, %c0_187] : memref<18x18x128xf32, #tpu.memory_space<vmem>>, vector<18x18x128xf32>
    tpu.vector_store %arg14[%c0_185, %c0_186, %c0_187], %189 {strides = array<i32>} : memref<18x18x128xf32, #tpu.memory_space<vmem>>, vector<18x18x128xf32>,
    %c1_188 = arith.constant 1 : index
    %c1_189 = arith.constant 1 : index
    %c0_190 = arith.constant 0 : index
    %191 = vector.load %arg14[%c1_188, %c1_189, %c0_190] : memref<18x18x128xf32, #tpu.memory_space<vmem>>, vector<8x8x128xf32>
    tpu.vector_store %arg14[%c1_188, %c1_189, %c0_190], %188 {strides = array<i32>} : memref<18x18x128xf32, #tpu.memory_space<vmem>>, vector<8x8x128xf32>,
    %c0_191 = arith.constant 0 : index
    %c0_192 = arith.constant 0 : index
    %c0_193 = arith.constant 0 : index
    %192 = vector.load %arg14[%c0_191, %c0_192, %c0_193] : memref<18x18x128xf32, #tpu.memory_space<vmem>>, vector<8x8x128xf32>
    %193 = arith.truncf %192 : vector<8x8x128xf32> to vector<8x8x128xbf16>
    %194 = vector.shape_cast %193 : vector<8x8x128xbf16> to vector<64x128xbf16>
    %c0_194 = arith.constant 0 : index
    %c1_195 = arith.constant 1 : index
    %c0_196 = arith.constant 0 : index
    %195 = vector.load %arg14[%c0_194, %c1_195, %c0_196] : memref<18x18x128xf32, #tpu.memory_space<vmem>>, vector<8x8x128xf32>
    %196 = arith.truncf %195 : vector<8x8x128xf32> to vector<8x8x128xbf16>
    %197 = vector.shape_cast %196 : vector<8x8x128xbf16> to vector<64x128xbf16>
    %c0_197 = arith.constant 0 : index
    %c2_198 = arith.constant 2 : index
    %c0_199 = arith.constant 0 : index
    %198 = vector.load %arg14[%c0_197, %c2_198, %c0_199] : memref<18x18x128xf32, #tpu.memory_space<vmem>>, vector<8x8x128xf32>
    %199 = arith.truncf %198 : vector<8x8x128xf32> to vector<8x8x128xbf16>
    %200 = vector.shape_cast %199 : vector<8x8x128xbf16> to vector<64x128xbf16>
    %c1_200 = arith.constant 1 : index
    %c0_201 = arith.constant 0 : index
    %c0_202 = arith.constant 0 : index
    %201 = vector.load %arg14[%c1_200, %c0_201, %c0_202] : memref<18x18x128xf32, #tpu.memory_space<vmem>>, vector<8x8x128xf32>
    %202 = arith.truncf %201 : vector<8x8x128xf32> to vector<8x8x128xbf16>
    %203 = vector.shape_cast %202 : vector<8x8x128xbf16> to vector<64x128xbf16>
    %c1_203 = arith.constant 1 : index
    %c1_204 = arith.constant 1 : index
    %c0_205 = arith.constant 0 : index
    %204 = vector.load %arg14[%c1_203, %c1_204, %c0_205] : memref<18x18x128xf32, #tpu.memory_space<vmem>>, vector<8x8x128xf32>
    %205 = arith.truncf %204 : vector<8x8x128xf32> to vector<8x8x128xbf16>
    %206 = vector.shape_cast %205 : vector<8x8x128xbf16> to vector<64x128xbf16>
    %c1_206 = arith.constant 1 : index
    %c2_207 = arith.constant 2 : index
    %c0_208 = arith.constant 0 : index
    %207 = vector.load %arg14[%c1_206, %c2_207, %c0_208] : memref<18x18x128xf32, #tpu.memory_space<vmem>>, vector<8x8x128xf32>
    %208 = arith.truncf %207 : vector<8x8x128xf32> to vector<8x8x128xbf16>
    %209 = vector.shape_cast %208 : vector<8x8x128xbf16> to vector<64x128xbf16>
    %c2_209 = arith.constant 2 : index
    %c0_210 = arith.constant 0 : index
    %c0_211 = arith.constant 0 : index
    %210 = vector.load %arg14[%c2_209, %c0_210, %c0_211] : memref<18x18x128xf32, #tpu.memory_space<vmem>>, vector<8x8x128xf32>
    %211 = arith.truncf %210 : vector<8x8x128xf32> to vector<8x8x128xbf16>
    %212 = vector.shape_cast %211 : vector<8x8x128xbf16> to vector<64x128xbf16>
    %c2_212 = arith.constant 2 : index
    %c1_213 = arith.constant 1 : index
    %c0_214 = arith.constant 0 : index
    %213 = vector.load %arg14[%c2_212, %c1_213, %c0_214] : memref<18x18x128xf32, #tpu.memory_space<vmem>>, vector<8x8x128xf32>
    %214 = arith.truncf %213 : vector<8x8x128xf32> to vector<8x8x128xbf16>
    %215 = vector.shape_cast %214 : vector<8x8x128xbf16> to vector<64x128xbf16>
    %c2_215 = arith.constant 2 : index
    %c2_216 = arith.constant 2 : index
    %c0_217 = arith.constant 0 : index
    %216 = vector.load %arg14[%c2_215, %c2_216, %c0_217] : memref<18x18x128xf32, #tpu.memory_space<vmem>>, vector<8x8x128xf32>
    %217 = arith.truncf %216 : vector<8x8x128xf32> to vector<8x8x128xbf16>
    %218 = vector.shape_cast %217 : vector<8x8x128xbf16> to vector<64x128xbf16>
    %219 = tpu.concatenate %194, %197, %200, %203, %206, %209, %212, %215, %218 in 1 : vector<64x128xbf16>, vector<64x128xbf16>, vector<64x128xbf16>, vector<64x128xbf16>, vector<64x128xbf16>, vector<64x128xbf16>, vector<64x128xbf16>, vector<64x128xbf16>, vector<64x128xbf16> -> vector<64x1152xbf16>
    %c0_218 = arith.constant 0 : index
    %c0_219 = arith.constant 0 : index
    %220 = vector.load %arg8[%c0_218, %c0_219] : memref<1152x128xbf16, #tpu.memory_space<vmem>>, vector<1152x128xbf16>
    %cst_220 = arith.constant dense<0.000000e+00> : vector<64x128xf32>
    %221 = tpu.matmul %219, %220, %cst_220 {dimension_numbers = #tpu.dot_dimension_numbers<[1], [0], [0], [1], [0, 0, 1, 1], [], []>} : vector<64x1152xbf16>, vector<1152x128xbf16>, vector<64x128xf32> -> vector<64x128xf32>
    %cst_221 = arith.constant 0.000000e+00 : f32
    %222 = vector.broadcast %cst_221 : f32 to vector<64x128xf32>
    %223 = arith.maximumf %221, %222 : vector<64x128xf32>
    %224 = vector.shape_cast %223 : vector<64x128xf32> to vector<8x8x128xf32>
    %225 = vector.extract_strided_slice %224 {offsets = [0, 0, 0], sizes = [1, 8, 128], strides = [1, 1, 1]} : vector<8x8x128xf32> to vector<1x8x128xf32>
    %226 = vector.extract_strided_slice %224 {offsets = [2, 0, 0], sizes = [1, 8, 128], strides = [1, 1, 1]} : vector<8x8x128xf32> to vector<1x8x128xf32>
    %227 = vector.extract_strided_slice %224 {offsets = [4, 0, 0], sizes = [1, 8, 128], strides = [1, 1, 1]} : vector<8x8x128xf32> to vector<1x8x128xf32>
    %228 = vector.extract_strided_slice %224 {offsets = [6, 0, 0], sizes = [1, 8, 128], strides = [1, 1, 1]} : vector<8x8x128xf32> to vector<1x8x128xf32>
    %229 = tpu.concatenate %225, %226, %227, %228 in 0 : vector<1x8x128xf32>, vector<1x8x128xf32>, vector<1x8x128xf32>, vector<1x8x128xf32> -> vector<4x8x128xf32>
    %230 = vector.extract_strided_slice %229 {offsets = [0, 0, 0], sizes = [4, 1, 128], strides = [1, 1, 1]} : vector<4x8x128xf32> to vector<4x1x128xf32>
    %231 = vector.extract_strided_slice %229 {offsets = [0, 2, 0], sizes = [4, 1, 128], strides = [1, 1, 1]} : vector<4x8x128xf32> to vector<4x1x128xf32>
    %232 = vector.extract_strided_slice %229 {offsets = [0, 4, 0], sizes = [4, 1, 128], strides = [1, 1, 1]} : vector<4x8x128xf32> to vector<4x1x128xf32>
    %233 = vector.extract_strided_slice %229 {offsets = [0, 6, 0], sizes = [4, 1, 128], strides = [1, 1, 1]} : vector<4x8x128xf32> to vector<4x1x128xf32>
    %234 = tpu.concatenate %230, %231, %232, %233 in 1 : vector<4x1x128xf32>, vector<4x1x128xf32>, vector<4x1x128xf32>, vector<4x1x128xf32> -> vector<4x4x128xf32>
    %c0_222 = arith.constant 0 : index
    %c0_223 = arith.constant 0 : index
    %c0_224 = arith.constant 0 : index
    %c0_225 = arith.constant 0 : index
    %235 = vector.load %arg12[%c0_222, %c0_223, %c0_224, %c0_225] : memref<1x4x4x128xf32, #tpu.memory_space<vmem>>, vector<1x4x4x128xf32>
    %236 = vector.shape_cast %235 : vector<1x4x4x128xf32> to vector<4x4x128xf32>
    %237 = vector.shape_cast %234 : vector<4x4x128xf32> to vector<1x4x4x128xf32>
    tpu.vector_store %arg12[%c0_222, %c0_223, %c0_224, %c0_225], %237 {strides = array<i32>} : memref<1x4x4x128xf32, #tpu.memory_space<vmem>>, vector<1x4x4x128xf32>,
    %cst_226 = arith.constant 0.000000e+00 : f32
    %238 = vector.broadcast %cst_226 : f32 to vector<18x18x128xf32>
    %c0_227 = arith.constant 0 : index
    %c0_228 = arith.constant 0 : index
    %c0_229 = arith.constant 0 : index
    %239 = vector.load %arg15[%c0_227, %c0_228, %c0_229] : memref<18x18x128xf32, #tpu.memory_space<vmem>>, vector<18x18x128xf32>
    tpu.vector_store %arg15[%c0_227, %c0_228, %c0_229], %238 {strides = array<i32>} : memref<18x18x128xf32, #tpu.memory_space<vmem>>, vector<18x18x128xf32>,
    %c1_230 = arith.constant 1 : index
    %c1_231 = arith.constant 1 : index
    %c0_232 = arith.constant 0 : index
    %240 = vector.load %arg15[%c1_230, %c1_231, %c0_232] : memref<18x18x128xf32, #tpu.memory_space<vmem>>, vector<4x4x128xf32>
    tpu.vector_store %arg15[%c1_230, %c1_231, %c0_232], %234 {strides = array<i32>} : memref<18x18x128xf32, #tpu.memory_space<vmem>>, vector<4x4x128xf32>,
    %c1_233 = arith.constant 1 : index
    %c1_234 = arith.constant 1 : index
    %c0_235 = arith.constant 0 : index
    %241 = vector.load %arg15[%c1_233, %c1_234, %c0_235] : memref<18x18x128xf32, #tpu.memory_space<vmem>>, vector<4x4x128xf32>
    %242 = arith.truncf %241 : vector<4x4x128xf32> to vector<4x4x128xbf16>
    %243 = vector.shape_cast %242 : vector<4x4x128xbf16> to vector<16x128xbf16>
    %c0_236 = arith.constant 0 : index
    %c0_237 = arith.constant 0 : index
    %244 = vector.load %arg9[%c0_236, %c0_237] : memref<128x128xbf16, #tpu.memory_space<vmem>>, vector<128x128xbf16>
    %cst_238 = arith.constant dense<0.000000e+00> : vector<16x128xf32>
    %245 = tpu.matmul %243, %244, %cst_238 {dimension_numbers = #tpu.dot_dimension_numbers<[1], [0], [0], [1], [0, 0, 1, 1], [], []>} : vector<16x128xbf16>, vector<128x128xbf16>, vector<16x128xf32> -> vector<16x128xf32>
    %cst_239 = arith.constant 0.000000e+00 : f32
    %246 = vector.broadcast %cst_239 : f32 to vector<16x128xf32>
    %247 = arith.maximumf %245, %246 : vector<16x128xf32>
    %248 = vector.shape_cast %247 : vector<16x128xf32> to vector<4x4x128xf32>
    %cst_240 = arith.constant 0.000000e+00 : f32
    %249 = vector.broadcast %cst_240 : f32 to vector<18x18x128xf32>
    %c0_241 = arith.constant 0 : index
    %c0_242 = arith.constant 0 : index
    %c0_243 = arith.constant 0 : index
    %250 = vector.load %arg14[%c0_241, %c0_242, %c0_243] : memref<18x18x128xf32, #tpu.memory_space<vmem>>, vector<18x18x128xf32>
    tpu.vector_store %arg14[%c0_241, %c0_242, %c0_243], %249 {strides = array<i32>} : memref<18x18x128xf32, #tpu.memory_space<vmem>>, vector<18x18x128xf32>,
    %c1_244 = arith.constant 1 : index
    %c1_245 = arith.constant 1 : index
    %c0_246 = arith.constant 0 : index
    %251 = vector.load %arg14[%c1_244, %c1_245, %c0_246] : memref<18x18x128xf32, #tpu.memory_space<vmem>>, vector<4x4x128xf32>
    tpu.vector_store %arg14[%c1_244, %c1_245, %c0_246], %248 {strides = array<i32>} : memref<18x18x128xf32, #tpu.memory_space<vmem>>, vector<4x4x128xf32>,
    %c0_247 = arith.constant 0 : index
    %c0_248 = arith.constant 0 : index
    %c0_249 = arith.constant 0 : index
    %252 = vector.load %arg14[%c0_247, %c0_248, %c0_249] : memref<18x18x128xf32, #tpu.memory_space<vmem>>, vector<4x4x128xf32>
    %253 = arith.truncf %252 : vector<4x4x128xf32> to vector<4x4x128xbf16>
    %254 = vector.shape_cast %253 : vector<4x4x128xbf16> to vector<16x128xbf16>
    %c0_250 = arith.constant 0 : index
    %c1_251 = arith.constant 1 : index
    %c0_252 = arith.constant 0 : index
    %255 = vector.load %arg14[%c0_250, %c1_251, %c0_252] : memref<18x18x128xf32, #tpu.memory_space<vmem>>, vector<4x4x128xf32>
    %256 = arith.truncf %255 : vector<4x4x128xf32> to vector<4x4x128xbf16>
    %257 = vector.shape_cast %256 : vector<4x4x128xbf16> to vector<16x128xbf16>
    %c0_253 = arith.constant 0 : index
    %c2_254 = arith.constant 2 : index
    %c0_255 = arith.constant 0 : index
    %258 = vector.load %arg14[%c0_253, %c2_254, %c0_255] : memref<18x18x128xf32, #tpu.memory_space<vmem>>, vector<4x4x128xf32>
    %259 = arith.truncf %258 : vector<4x4x128xf32> to vector<4x4x128xbf16>
    %260 = vector.shape_cast %259 : vector<4x4x128xbf16> to vector<16x128xbf16>
    %c1_256 = arith.constant 1 : index
    %c0_257 = arith.constant 0 : index
    %c0_258 = arith.constant 0 : index
    %261 = vector.load %arg14[%c1_256, %c0_257, %c0_258] : memref<18x18x128xf32, #tpu.memory_space<vmem>>, vector<4x4x128xf32>
    %262 = arith.truncf %261 : vector<4x4x128xf32> to vector<4x4x128xbf16>
    %263 = vector.shape_cast %262 : vector<4x4x128xbf16> to vector<16x128xbf16>
    %c1_259 = arith.constant 1 : index
    %c1_260 = arith.constant 1 : index
    %c0_261 = arith.constant 0 : index
    %264 = vector.load %arg14[%c1_259, %c1_260, %c0_261] : memref<18x18x128xf32, #tpu.memory_space<vmem>>, vector<4x4x128xf32>
    %265 = arith.truncf %264 : vector<4x4x128xf32> to vector<4x4x128xbf16>
    %266 = vector.shape_cast %265 : vector<4x4x128xbf16> to vector<16x128xbf16>
    %c1_262 = arith.constant 1 : index
    %c2_263 = arith.constant 2 : index
    %c0_264 = arith.constant 0 : index
    %267 = vector.load %arg14[%c1_262, %c2_263, %c0_264] : memref<18x18x128xf32, #tpu.memory_space<vmem>>, vector<4x4x128xf32>
    %268 = arith.truncf %267 : vector<4x4x128xf32> to vector<4x4x128xbf16>
    %269 = vector.shape_cast %268 : vector<4x4x128xbf16> to vector<16x128xbf16>
    %c2_265 = arith.constant 2 : index
    %c0_266 = arith.constant 0 : index
    %c0_267 = arith.constant 0 : index
    %270 = vector.load %arg14[%c2_265, %c0_266, %c0_267] : memref<18x18x128xf32, #tpu.memory_space<vmem>>, vector<4x4x128xf32>
    %271 = arith.truncf %270 : vector<4x4x128xf32> to vector<4x4x128xbf16>
    %272 = vector.shape_cast %271 : vector<4x4x128xbf16> to vector<16x128xbf16>
    %c2_268 = arith.constant 2 : index
    %c1_269 = arith.constant 1 : index
    %c0_270 = arith.constant 0 : index
    %273 = vector.load %arg14[%c2_268, %c1_269, %c0_270] : memref<18x18x128xf32, #tpu.memory_space<vmem>>, vector<4x4x128xf32>
    %274 = arith.truncf %273 : vector<4x4x128xf32> to vector<4x4x128xbf16>
    %275 = vector.shape_cast %274 : vector<4x4x128xbf16> to vector<16x128xbf16>
    %c2_271 = arith.constant 2 : index
    %c2_272 = arith.constant 2 : index
    %c0_273 = arith.constant 0 : index
    %276 = vector.load %arg14[%c2_271, %c2_272, %c0_273] : memref<18x18x128xf32, #tpu.memory_space<vmem>>, vector<4x4x128xf32>
    %277 = arith.truncf %276 : vector<4x4x128xf32> to vector<4x4x128xbf16>
    %278 = vector.shape_cast %277 : vector<4x4x128xbf16> to vector<16x128xbf16>
    %279 = tpu.concatenate %254, %257, %260, %263, %266, %269, %272, %275, %278 in 1 : vector<16x128xbf16>, vector<16x128xbf16>, vector<16x128xbf16>, vector<16x128xbf16>, vector<16x128xbf16>, vector<16x128xbf16>, vector<16x128xbf16>, vector<16x128xbf16>, vector<16x128xbf16> -> vector<16x1152xbf16>
    %c0_274 = arith.constant 0 : index
    %c0_275 = arith.constant 0 : index
    %280 = vector.load %arg10[%c0_274, %c0_275] : memref<1152x128xbf16, #tpu.memory_space<vmem>>, vector<1152x128xbf16>
    %cst_276 = arith.constant dense<0.000000e+00> : vector<16x128xf32>
    %281 = tpu.matmul %279, %280, %cst_276 {dimension_numbers = #tpu.dot_dimension_numbers<[1], [0], [0], [1], [0, 0, 1, 1], [], []>} : vector<16x1152xbf16>, vector<1152x128xbf16>, vector<16x128xf32> -> vector<16x128xf32>
    %cst_277 = arith.constant 0.000000e+00 : f32
    %282 = vector.broadcast %cst_277 : f32 to vector<16x128xf32>
    %283 = arith.maximumf %281, %282 : vector<16x128xf32>
    %284 = vector.shape_cast %283 : vector<16x128xf32> to vector<4x4x128xf32>
    %285 = vector.extract_strided_slice %284 {offsets = [0, 0, 0], sizes = [1, 4, 128], strides = [1, 1, 1]} : vector<4x4x128xf32> to vector<1x4x128xf32>
    %286 = vector.extract_strided_slice %284 {offsets = [2, 0, 0], sizes = [1, 4, 128], strides = [1, 1, 1]} : vector<4x4x128xf32> to vector<1x4x128xf32>
    %287 = tpu.concatenate %285, %286 in 0 : vector<1x4x128xf32>, vector<1x4x128xf32> -> vector<2x4x128xf32>
    %288 = vector.extract_strided_slice %287 {offsets = [0, 0, 0], sizes = [2, 1, 128], strides = [1, 1, 1]} : vector<2x4x128xf32> to vector<2x1x128xf32>
    %289 = vector.extract_strided_slice %287 {offsets = [0, 2, 0], sizes = [2, 1, 128], strides = [1, 1, 1]} : vector<2x4x128xf32> to vector<2x1x128xf32>
    %290 = tpu.concatenate %288, %289 in 1 : vector<2x1x128xf32>, vector<2x1x128xf32> -> vector<2x2x128xf32>
    %c0_278 = arith.constant 0 : index
    %c0_279 = arith.constant 0 : index
    %c0_280 = arith.constant 0 : index
    %c0_281 = arith.constant 0 : index
    %291 = vector.load %arg13[%c0_278, %c0_279, %c0_280, %c0_281] : memref<1x2x2x128xf32, #tpu.memory_space<vmem>>, vector<1x2x2x128xf32>
    %292 = vector.shape_cast %291 : vector<1x2x2x128xf32> to vector<2x2x128xf32>
    %293 = vector.shape_cast %290 : vector<2x2x128xf32> to vector<1x2x2x128xf32>
    tpu.vector_store %arg13[%c0_278, %c0_279, %c0_280, %c0_281], %293 {strides = array<i32>} : memref<1x2x2x128xf32, #tpu.memory_space<vmem>>, vector<1x2x2x128xf32>,
    return
  }
  func.func @transform_0(%arg0: i32) -> (i32, i32, i32, i32) {
    %c0_i32 = arith.constant 0 : i32
    %c0_i32_0 = arith.constant 0 : i32
    %c0_i32_1 = arith.constant 0 : i32
    %c0_i32_2 = arith.constant 0 : i32
    return %arg0, %c0_i32, %c0_i32_0, %c0_i32_1 : i32, i32, i32, i32
  }
  func.func @transform_1(%arg0: i32) -> (i32, i32) {
    %c0_i32 = arith.constant 0 : i32
    %c0_i32_0 = arith.constant 0 : i32
    %c0_i32_1 = arith.constant 0 : i32
    return %c0_i32, %c0_i32_0 : i32, i32
  }
  func.func @transform_2(%arg0: i32) -> (i32, i32) {
    %c0_i32 = arith.constant 0 : i32
    %c0_i32_0 = arith.constant 0 : i32
    %c0_i32_1 = arith.constant 0 : i32
    return %c0_i32, %c0_i32_0 : i32, i32
  }
  func.func @transform_3(%arg0: i32) -> (i32, i32) {
    %c0_i32 = arith.constant 0 : i32
    %c0_i32_0 = arith.constant 0 : i32
    %c0_i32_1 = arith.constant 0 : i32
    return %c0_i32, %c0_i32_0 : i32, i32
  }
  func.func @transform_4(%arg0: i32) -> (i32, i32) {
    %c0_i32 = arith.constant 0 : i32
    %c0_i32_0 = arith.constant 0 : i32
    %c0_i32_1 = arith.constant 0 : i32
    return %c0_i32, %c0_i32_0 : i32, i32
  }
  func.func @transform_5(%arg0: i32) -> (i32, i32) {
    %c0_i32 = arith.constant 0 : i32
    %c0_i32_0 = arith.constant 0 : i32
    %c0_i32_1 = arith.constant 0 : i32
    return %c0_i32, %c0_i32_0 : i32, i32
  }
  func.func @transform_6(%arg0: i32) -> (i32, i32) {
    %c0_i32 = arith.constant 0 : i32
    %c0_i32_0 = arith.constant 0 : i32
    %c0_i32_1 = arith.constant 0 : i32
    return %c0_i32, %c0_i32_0 : i32, i32
  }
  func.func @transform_7(%arg0: i32) -> (i32, i32) {
    %c0_i32 = arith.constant 0 : i32
    %c0_i32_0 = arith.constant 0 : i32
    %c0_i32_1 = arith.constant 0 : i32
    return %c0_i32, %c0_i32_0 : i32, i32
  }
  func.func @transform_8(%arg0: i32) -> (i32, i32) {
    %c0_i32 = arith.constant 0 : i32
    %c0_i32_0 = arith.constant 0 : i32
    %c0_i32_1 = arith.constant 0 : i32
    return %c0_i32, %c0_i32_0 : i32, i32
  }
  func.func @transform_9(%arg0: i32) -> (i32, i32) {
    %c0_i32 = arith.constant 0 : i32
    %c0_i32_0 = arith.constant 0 : i32
    %c0_i32_1 = arith.constant 0 : i32
    return %c0_i32, %c0_i32_0 : i32, i32
  }
  func.func @transform_10(%arg0: i32) -> (i32, i32, i32, i32) {
    %c0_i32 = arith.constant 0 : i32
    %c0_i32_0 = arith.constant 0 : i32
    %c0_i32_1 = arith.constant 0 : i32
    %c0_i32_2 = arith.constant 0 : i32
    return %arg0, %c0_i32, %c0_i32_0, %c0_i32_1 : i32, i32, i32, i32
  }
  func.func @transform_11(%arg0: i32) -> (i32, i32, i32, i32) {
    %c0_i32 = arith.constant 0 : i32
    %c0_i32_0 = arith.constant 0 : i32
    %c0_i32_1 = arith.constant 0 : i32
    %c0_i32_2 = arith.constant 0 : i32
    return %arg0, %c0_i32, %c0_i32_0, %c0_i32_1 : i32, i32, i32, i32
  }
  func.func @transform_12(%arg0: i32) -> (i32, i32, i32, i32) {
    %c0_i32 = arith.constant 0 : i32
    %c0_i32_0 = arith.constant 0 : i32
    %c0_i32_1 = arith.constant 0 : i32
    %c0_i32_2 = arith.constant 0 : i32
    return %arg0, %c0_i32, %c0_i32_0, %c0_i32_1 : i32, i32, i32, i32
  }
}

</mosaic_0001>

<bundles_post_ra>
// kernel: _lambda_.1
= control target key start
LH: loop header
LB: loop body
LE: loop exit
PB: predicated region body
PF: predicated region fallthrough
CT: control target
= control target key end

     0   :  { %s15043_s0 = inlined_call_operand.vmem [shape: f32[2,16,16,3], index: 0, kind: input, shape index: {}]   ;;  %s15044_s1 = inlined_call_operand.hbm [shape: bf16[1152,128], index: 1, kind: input, shape index: {}]   ;;  %s15045_s2 = inlined_call_operand.hbm [shape: bf16[128,128], index: 2, kind: input, shape index: {}]   ;;  %s15046_s3 = inlined_call_operand.hbm [shape: bf16[1152,128], index: 3, kind: input, shape index: {}]   ;;  %s15047_s4 = inlined_call_operand.hbm [shape: bf16[1152,128], index: 4, kind: input, shape index: {}]   ;;  %s15048_s5 = inlined_call_operand.hbm [shape: bf16[1152,128], index: 5, kind: input, shape index: {}]   ;;  %s15049_s6 = inlined_call_operand.hbm [shape: bf16[128,128], index: 6, kind: input, shape index: {}]   ;;  %s15050_s7 = inlined_call_operand.hbm [shape: bf16[1152,128], index: 7, kind: input, shape index: {}]   ;;  %s15051_s8 = inlined_call_operand.vmem [shape: bf16[128,128], index: 8, kind: input, shape index: {}]   ;;  %s15052_s9 = inlined_call_operand.vmem [shape: bf16[1152,128], index: 9, kind: input, shape index: {}]   ;;  %s15053_s10 = inlined_call_operand.vmem [shape: f32[2,8,8,128], index: 10, kind: output, shape index: {0}]   ;;  %s15054_s11 = inlined_call_operand.vmem [shape: f32[2,4,4,128], index: 11, kind: output, shape index: {1}]   ;;  %s15055_s12 = inlined_call_operand.vmem [shape: f32[2,2,2,128], index: 12, kind: output, shape index: {2}]  }
   0x1   :  { %15059 = sst [smem:[#allocation20_spill]] %s15055_s12 }
   0x2   :  { %18 = vsyncpa [#allocation5], 0 }
   0x3   :  { %19 = vsyncpa [#allocation7], 0 }
   0x4   :  { %20 = vsyncpa [#allocation10], 0 }
   0x5   :  { %21 = vsyncpa [#allocation13], 0  ;;  %s13132_s21 = smov 0  }
   0x6 LB: > { %15060 = sst [smem:[#allocation19_spill]] %s13052_s21  ;;  %s13138_s22 = sadd.s32 4294967295, %s13052_s21   ;;  %s13052_s21 = sphi %s13132_s21, %s27_s21  }
   0x7   : > { %p9955_p0 = scmp.ge.s32.totalorder %s13052_s21, 1  ;;  %p325_p1 = scmp.lt.s32.totalorder %s13052_s21, 3 }
   0x8   : > { %p15057_p2 = scmp.eq.s32.totalorder %s13138_s22, 0  ;;  %s13054_s24 = smov [#allocation6]  }
   0x9   : > { %p13143_p3 = pnand %p9955_p0, %p325_p1  ;;  %s350_s25 = sshll.u32 %s13054_s24, 4  ;;  %s13147_s25 = int_to_ptr.vmem [resolvable:$true] %s350_s25 }
   0xa   : > { %s13055_s26 = smov [#allocation9]   ;;  %s13056_s29 = smov [#allocation12]  }
   0xb   : > { %s15061_s23 = scalar_select %p13143_p3, 1, 0 }
   0xc   : > { %p12316_p4 = pneg %p13143_p3  ;;  %s376_s27 = sshll.u32 %s13055_s26, 4  ;;  %s13151_s27 = int_to_ptr.vmem [resolvable:$true] %s376_s27 }
   0xd   : > { %s402_s30 = sshll.u32 %s13056_s29, 4  ;;  %s13057_s13 = smov [#allocation4]   ;;  %s13159_s30 = int_to_ptr.vmem [resolvable:$true] %s402_s30 }
   0xe   : > { %p13155_p5 = pnand %p15057_p2, %p12316_p4  ;;  %s13161_s14 = sshll.u32 %s13057_s13, 4  ;;  %s338_s14 = int_to_ptr.vmem [resolvable:$true] %s13161_s14 }
   0xf   : > { %s12834_s17 = scalar_lea.hbm %s15045_s2, 1024 }
  0x10   : > { %p12835_p6 = scmp.ne.s32.totalorder %s15045_s2, %s12834_s17  ;;  %p13171_p7 = pneg %p13155_p5 }
  0x11   : > { %p12841_p10 = scmp.lt.u32.totalorder %s12834_s17, %s15045_s2 }
  0x12   : > { %p12837_p8 = pnand %p13171_p7, %p12835_p6 }
  0x14   : > { %p12838_p9 = pneg %p12837_p8 }
  0x16   : > { %p12843_p11 = pnand %p12841_p10, %p12838_p9 }
  0x18   : > { %12846 = shalt.err (!%p12843_p11)
}
  0x19   : > { %s12847_s29 = scalar_lea.vmem %s13147_s25, 1024  ;;  %p12855_p1 = scmp.lt.s32.totalorder %s13147_s25, %s13147_s25 }
  0x1a   : > { %p12848_p12 = scmp.ne.s32.totalorder %s13147_s25, %s12847_s29  ;;  %p12856_p4 = scmp.lt.s32.totalorder %s12847_s29, %s12847_s29 }
  0x1c   : > { %p12850_p13 = pnand %p12848_p12, %p13171_p7  ;;  %p12857_p6 = por %p12856_p4, %p12855_p1 }
  0x1e   : > { %p12851_p0 = pneg %p12850_p13 }
  0x20   : > { %p12858_p8 = pnand %p12857_p6, %p12851_p0 }
  0x22   : > { %12861 = shalt.err (!%p12858_p8)
}
  0x23   : > { %s13058_s13 = smov 64   ;;  %s13059_s15 = smov 4  }
  0x24   : > { %12322 = dma.hbm_to_vmem [thread:$0]  (!%p13155_p5), %s15045_s2, 1024, %s13147_s25, [#allocation7], %s13058_s13, %s13058_s13, %s13059_s15  }
  0x25   : > { %s12862_s24 = scalar_lea.hbm %s15047_s4, 9216 }
  0x26   : > { %p12863_p9 = scmp.ne.s32.totalorder %s15047_s4, %s12862_s24  ;;  %p12869_p12 = scmp.lt.u32.totalorder %s12862_s24, %s15047_s4 }
  0x28   : > { %p12865_p10 = pnand %p12863_p9, %p13171_p7 }
  0x2a   : > { %p12866_p11 = pneg %p12865_p10 }
  0x2c   : > { %p12871_p13 = pnand %p12869_p12, %p12866_p11 }
  0x2e   : > { %12874 = shalt.err (!%p12871_p13)
}
  0x2f   : > { %s12875_s25 = scalar_lea.vmem %s13151_s27, 9216  ;;  %p12883_p6 = scmp.lt.s32.totalorder %s13151_s27, %s13151_s27 }
  0x30   : > { %p12876_p0 = scmp.ne.s32.totalorder %s13151_s27, %s12875_s25  ;;  %p12884_p8 = scmp.lt.s32.totalorder %s12875_s25, %s12875_s25 }
  0x32   : > { %p12878_p1 = pnand %p12876_p0, %p13171_p7  ;;  %p12885_p9 = por %p12884_p8, %p12883_p6 }
  0x34   : > { %p12879_p4 = pneg %p12878_p1 }
  0x36   : > { %p12886_p10 = pnand %p12885_p9, %p12879_p4 }
  0x38   : > { %12889 = shalt.err (!%p12886_p10)
}
  0x39   : > { %12328 = dma.hbm_to_vmem [thread:$0]  (!%p13155_p5), %s15047_s4, 9216, %s13151_s27, [#allocation10], %s13058_s13, %s13058_s13, %s13059_s15  }
  0x3a   : > { %s12890_s18 = scalar_lea.hbm %s15049_s6, 1024 }
  0x3b   : > { %p12891_p11 = scmp.ne.s32.totalorder %s15049_s6, %s12890_s18  ;;  %p12897_p0 = scmp.lt.u32.totalorder %s12890_s18, %s15049_s6 }
  0x3d   : > { %p12893_p12 = pnand %p12891_p11, %p13171_p7 }
  0x3f   : > { %p12894_p13 = pneg %p12893_p12 }
  0x41   : > { %p12899_p1 = pnand %p12897_p0, %p12894_p13 }
  0x43   : > { %12902 = shalt.err (!%p12899_p1)
}
  0x44   : > { %s12903_s27 = scalar_lea.vmem %s13159_s30, 1024  ;;  %p12911_p9 = scmp.lt.s32.totalorder %s13159_s30, %s13159_s30 }
  0x45   : > { %p12904_p4 = scmp.ne.s32.totalorder %s13159_s30, %s12903_s27  ;;  %p12912_p10 = scmp.lt.s32.totalorder %s12903_s27, %s12903_s27 }
  0x47   : > { %p12906_p6 = pnand %p12904_p4, %p13171_p7  ;;  %p12913_p11 = por %p12912_p10, %p12911_p9 }
  0x49   : > { %p12907_p8 = pneg %p12906_p6 }
  0x4b   : > { %p12914_p12 = pnand %p12913_p11, %p12907_p8 }
  0x4d   : > { %12917 = shalt.err (!%p12914_p12)
}
  0x4e   : > { %12334 = dma.hbm_to_vmem [thread:$0]  (!%p13155_p5), %s15049_s6, 1024, %s13159_s30, [#allocation13], %s13058_s13, %s13058_s13, %s13059_s15  }
  0x4f   : > { %s12918_s17 = scalar_lea.hbm %s15044_s1, 9216 }
  0x50   : > { %p12919_p13 = scmp.ne.s32.totalorder %s15044_s1, %s12918_s17  ;;  %p12925_p4 = scmp.lt.u32.totalorder %s12918_s17, %s15044_s1 }
  0x52   : > { %p12921_p0 = pnand %p12919_p13, %p13171_p7 }
  0x54   : > { %p12922_p1 = pneg %p12921_p0 }
  0x56   : > { %p12927_p6 = pnand %p12925_p4, %p12922_p1 }
  0x58   : > { %12930 = shalt.err (!%p12927_p6)
}
  0x59   : > { %s12931_s29 = scalar_lea.vmem %s338_s14, 9216  ;;  %p12939_p11 = scmp.lt.s32.totalorder %s338_s14, %s338_s14 }
  0x5a   : > { %p12932_p8 = scmp.ne.s32.totalorder %s338_s14, %s12931_s29  ;;  %p12940_p12 = scmp.lt.s32.totalorder %s12931_s29, %s12931_s29 }
  0x5c   : > { %p12934_p9 = pnand %p12932_p8, %p13171_p7  ;;  %p12941_p2 = por %p12940_p12, %p12939_p11 }
  0x5e   : > { %p12935_p10 = pneg %p12934_p9 }
  0x60   : > { %p12942_p3 = pnand %p12941_p2, %p12935_p10 }
  0x62   : > { %12945 = shalt.err (!%p12942_p3)
}
  0x63   : > { %12319 = dma.hbm_to_vmem [thread:$0]  (!%p13155_p5), %s15044_s1, 9216, %s338_s14, [#allocation5], %s13058_s13, %s13058_s13, %s13059_s15  }
  0x64   : > { %s13060_s25 = smov [#allocation8]   ;;  %s13061_s21 = smov [#allocation11]  }
  0x65   : > { %s363_s12 = sshll.u32 %s13060_s25, 4  ;;  %s389_s16 = sshll.u32 %s13061_s21, 4  ;;  %s364_s12 = int_to_ptr.vmem [resolvable:$true] %s363_s12  ;;  %s390_s16 = int_to_ptr.vmem [resolvable:$true] %s389_s16 }
  0x66   : > { %s12946_s19 = scalar_lea.hbm %s15046_s3, 9216 }
  0x67   : > { %p12947_p2 = scmp.ne.s32.totalorder %s15046_s3, %s12946_s19  ;;  %p12953_p0 = scmp.lt.u32.totalorder %s12946_s19, %s15046_s3 }
  0x69   : > { %p12949_p3 = pnand %p12947_p2, %p13171_p7 }
  0x6b   : > { %p12950_p13 = pneg %p12949_p3 }
  0x6d   : > { %p12955_p1 = pnand %p12953_p0, %p12950_p13 }
  0x6f   : > { %12958 = shalt.err (!%p12955_p1)
}
  0x70   : > { %s12959_s14 = scalar_lea.vmem %s364_s12, 9216  ;;  %p12967_p9 = scmp.lt.s32.totalorder %s364_s12, %s364_s12 }
  0x71   : > { %p12960_p4 = scmp.ne.s32.totalorder %s364_s12, %s12959_s14  ;;  %p12968_p10 = scmp.lt.s32.totalorder %s12959_s14, %s12959_s14 }
  0x73   : > { %p12962_p6 = pnand %p12960_p4, %p13171_p7  ;;  %p12969_p11 = por %p12968_p10, %p12967_p9 }
  0x75   : > { %p12963_p8 = pneg %p12962_p6 }
  0x77   : > { %p12970_p12 = pnand %p12969_p11, %p12963_p8 }
  0x79   : > { %12973 = shalt.err (!%p12970_p12)
}
  0x7a   : > { %12325 = dma.hbm_to_vmem [thread:$0]  (!%p13155_p5), %s15046_s3, 9216, %s364_s12, [#allocation7], %s13058_s13, %s13058_s13, %s13059_s15  }
  0x7b   : > { %s12974_s18 = scalar_lea.hbm %s15048_s5, 9216 }
  0x7c   : > { %p12975_p2 = scmp.ne.s32.totalorder %s15048_s5, %s12974_s18  ;;  %p12981_p0 = scmp.lt.u32.totalorder %s12974_s18, %s15048_s5 }
  0x7e   : > { %p12977_p3 = pnand %p12975_p2, %p13171_p7 }
  0x80   : > { %p12978_p13 = pneg %p12977_p3 }
  0x82   : > { %p12983_p1 = pnand %p12981_p0, %p12978_p13 }
  0x84   : > { %12986 = shalt.err (!%p12983_p1)
}
  0x85   : > { %s12987_s30 = scalar_lea.vmem %s390_s16, 9216  ;;  %p12995_p9 = scmp.lt.s32.totalorder %s390_s16, %s390_s16 }
  0x86   : > { %p12988_p4 = scmp.ne.s32.totalorder %s390_s16, %s12987_s30  ;;  %p12996_p10 = scmp.lt.s32.totalorder %s12987_s30, %s12987_s30 }
  0x88   : > { %p12990_p6 = pnand %p12988_p4, %p13171_p7  ;;  %p12997_p11 = por %p12996_p10, %p12995_p9 }
  0x8a   : > { %p12991_p8 = pneg %p12990_p6 }
  0x8c   : > { %p12998_p12 = pnand %p12997_p11, %p12991_p8 }
  0x8e   : > { %13001 = shalt.err (!%p12998_p12)
}
  0x8f   : > { %12331 = dma.hbm_to_vmem [thread:$0]  (!%p13155_p5), %s15048_s5, 9216, %s390_s16, [#allocation10], %s13058_s13, %s13058_s13, %s13059_s15  }
  0x90   : > { %s13062_s27 = smov [#allocation14]   ;;  %s13002_s18 = scalar_lea.hbm %s15050_s7, 9216 }
  0x91   : > { %s415_s25 = sshll.u32 %s13062_s27, 4  ;;  %p13003_p2 = scmp.ne.s32.totalorder %s15050_s7, %s13002_s18  ;;  %s416_s25 = int_to_ptr.vmem [resolvable:$true] %s415_s25 }
  0x92   : > { %p13009_p0 = scmp.lt.u32.totalorder %s13002_s18, %s15050_s7 }
  0x93   : > { %p13005_p3 = pnand %p13003_p2, %p13171_p7 }
  0x95   : > { %p13006_p13 = pneg %p13005_p3 }
  0x97   : > { %p13011_p1 = pnand %p13009_p0, %p13006_p13 }
  0x99   : > { %13014 = shalt.err (!%p13011_p1)
}
  0x9a   : > { %s13015_s16 = scalar_lea.vmem %s416_s25, 9216  ;;  %p13023_p9 = scmp.lt.s32.totalorder %s416_s25, %s416_s25 }
  0x9b   : > { %p13016_p4 = scmp.ne.s32.totalorder %s416_s25, %s13015_s16  ;;  %p13024_p10 = scmp.lt.s32.totalorder %s13015_s16, %s13015_s16 }
  0x9d   : > { %p13018_p6 = pnand %p13016_p4, %p13171_p7  ;;  %p13025_p11 = por %p13024_p10, %p13023_p9 }
  0x9f   : > { %p13019_p8 = pneg %p13018_p6 }
  0xa1   : > { %p13026_p12 = pnand %p13025_p11, %p13019_p8 }
  0xa3   : > { %13029 = shalt.err (!%p13026_p12)
}
  0xa4   : > { %12337 = dma.hbm_to_vmem [thread:$0]  (!%p13155_p5), %s15050_s7, 9216, %s416_s25, [#allocation13], %s13058_s13, %s13058_s13, %s13059_s15  }
  0xa5   : > { %p15064_p2 = scmp.ne.s32.totalorder %s15061_s23, 0 }
  0xa6   : > { %p15065_p7 = scmp.eq.s32.totalorder (!%p15064_p2), %s13138_s22, 0 }
  0xa7   : > { %445 = sbr.rel (%p15064_p2) target bundleno = 2895 (0xb4f), region = 60 }
  0xae   : > { %13035 = dma.done.wait (%p15065_p7), [#allocation5], 9216   ;;  %p15066_p3 = pmov %p15065_p7 }
  0xb0   : > { %13037 = vsyncadd (%p15066_p3), [#allocation5], 4294958080  ;;  %p15067_p13 = pmov %p15066_p3 }
  0xb1   : > { %p15068_p0 = pmov %p15066_p3 }
  0xb2   : > { %13039 = dma.done.wait (%p15067_p13), [#allocation7], 10240  }
  0xb3   : > { %13041 = vsyncadd (%p15068_p0), [#allocation7], 4294957056  ;;  %p15069_p1 = pmov %p15068_p0 }
  0xb4   : > { %p15070_p5 = pmov %p15068_p0 }
  0xb5   : > { %13043 = dma.done.wait (%p15069_p1), [#allocation10], 18432  }
  0xb6   : > { %13045 = vsyncadd (%p15070_p5), [#allocation10], 4294948864  ;;  %p15071_p4 = pmov %p15068_p0 }
  0xb7   : > { %p15072_p6 = pmov %p15068_p0 }
  0xb8   : > { %13047 = dma.done.wait (%p15071_p4), [#allocation13], 10240  }
  0xb9   : > { %13049 = vsyncadd (%p15072_p6), [#allocation13], 4294957056  ;;  %v13063_v0 = vmov 0.0   ;;  %v12372_v1 = vld [vmem:[#allocation4 + $0x40] sm:$0xff]   ;;  %v12376_v5 = vld [vmem:[#allocation4 + $0x48] sm:$0xff]   ;;  %p521_p8 = scmp.lt.s32.totalorder %s13138_s22, 1 }
  0xba   : > { %8465 = vst [vmem:[#allocation3 + $0xf0] sm:$0xff] %v13063_v0  ;;  %574 = vst [vmem:[#allocation2] sm:$0xff] %v13063_v0  ;;  %v12373_v2 = vld [vmem:[#allocation4 + $0xc0] sm:$0xff]   ;;  %10766 = vmatprep.subr.bf16.mxu0 %v12372_v1  ;;  %v12377_v6 = vld [vmem:[#allocation4 + $0xc8] sm:$0xff]   ;;  %vm629_vm0 = vcmask 23552   ;;  %v13064_v42 = vmov 0.0|0.0  }
  0xbb   : > { %575 = vst [vmem:[#allocation2 + $0x8] sm:$0xff] %v13063_v0  ;;  %576 = vst [vmem:[#allocation2 + $0x10] sm:$0x3] %v13063_v0  ;;  %v12374_v3 = vld [vmem:[#allocation4] sm:$0xff]   ;;  %10878 = vmatprep.subr.bf16.mxu1 %v12373_v2  ;;  %v12378_v7 = vld [vmem:[#allocation4 + $0x8] sm:$0xff]   ;;  %s15076_s22 = smov (!%p521_p8, %s13138_s22), 1 }
  0xbc   : > { %577 = vst [vmem:[#allocation2 + $0x18] sm:$0xff] %v13063_v0  ;;  %578 = vst [vmem:[#allocation2 + $0x20] sm:$0xff] %v13063_v0  ;;  %v12375_v4 = vld [vmem:[#allocation4 + $0x80] sm:$0xff]   ;;  %10767 = vmatpush3.bf16.msra.mxu0 %v12374_v3  ;;  %v12379_v8 = vld [vmem:[#allocation4 + $0x88] sm:$0xff]   ;;  %s10610_s23 = sshll.u32 %s15076_s22, 8  ;;  %vm2540_vm1 = vcmask 1040384  }
  0xbd   : > { %579 = vst [vmem:[#allocation2 + $0x28] sm:$0x3] %v13063_v0  ;;  %580 = vst [vmem:[#allocation2 + $0x30] sm:$0xff] %v13063_v0  ;;  %10879 = vmatpush3.bf16.msra.mxu1 %v12375_v4  ;;  %10768 = vmatprep.subr.bf16.mxu0 %v12376_v5  ;;  %v12380_v9 = vld [vmem:[#allocation4 + $0x50] sm:$0xff]   ;;  %v12384_v13 = vld [vmem:[#allocation4 + $0x58] sm:$0xff]   ;;  %s13433_s13 = scalar_lea.vmem %s15043_s0, %s10610_s23  ;;  %vm2549_vm2 = vcmask 1041408  }
  0xbe   : > { %581 = vst [vmem:[#allocation2 + $0x38] sm:$0xff] %v13063_v0  ;;  %582 = vst [vmem:[#allocation2 + $0x40] sm:$0x3] %v13063_v0  ;;  %10880 = vmatprep.subr.bf16.mxu1 %v12377_v6  ;;  %v12381_v10 = vld [vmem:[#allocation4 + $0xd0] sm:$0xff]   ;;  %v12385_v14 = vld [vmem:[#allocation4 + $0xd8] sm:$0xff]   ;;  %vm2558_vm3 = vcmask 1042432  }
  0xbf   : > { %583 = vst [vmem:[#allocation2 + $0x48] sm:$0xff] %v13063_v0  ;;  %584 = vst [vmem:[#allocation2 + $0x50] sm:$0xff] %v13063_v0  ;;  %v12382_v11 = vld [vmem:[#allocation4 + $0x10] sm:$0xff]   ;;  %v12386_v15 = vld [vmem:[#allocation4 + $0x18] sm:$0xff]   ;;  %vm2567_vm4 = vcmask 1043456   ;;  %vm2576_vm5 = vcmask 1044480  }
  0xc0   : > { %585 = vst [vmem:[#allocation2 + $0x58] sm:$0x3] %v13063_v0  ;;  %586 = vst [vmem:[#allocation2 + $0x60] sm:$0xff] %v13063_v0  ;;  %10769 = vmatpush3.bf16.msra.mxu0 %v12378_v7  ;;  %v12383_v12 = vld [vmem:[#allocation4 + $0x90] sm:$0xff]   ;;  %v12387_v16 = vld [vmem:[#allocation4 + $0x98] sm:$0xff]   ;;  %vm2585_vm6 = vcmask 1045504  }
  0xc1   : > { %587 = vst [vmem:[#allocation2 + $0x68] sm:$0xff] %v13063_v0  ;;  %588 = vst [vmem:[#allocation2 + $0x70] sm:$0x3] %v13063_v0  ;;  %10881 = vmatpush3.bf16.msra.mxu1 %v12379_v8  ;;  %10770 = vmatprep.subr.bf16.mxu0 %v12380_v9  ;;  %v12388_v17 = vld [vmem:[#allocation4 + $0x60] sm:$0xff]   ;;  %v12392_v21 = vld [vmem:[#allocation4 + $0x68] sm:$0xff]   ;;  %vm2594_vm7 = vcmask 1046528  }
  0xc2   : > { %589 = vst [vmem:[#allocation2 + $0x78] sm:$0xff] %v13063_v0  ;;  %590 = vst [vmem:[#allocation2 + $0x80] sm:$0xff] %v13063_v0  ;;  %10882 = vmatprep.subr.bf16.mxu1 %v12381_v10  ;;  %v12389_v18 = vld [vmem:[#allocation4 + $0xe0] sm:$0xff]   ;;  %v12393_v22 = vld [vmem:[#allocation4 + $0xe8] sm:$0xff]   ;;  %s10611_s15 = sshll.u32 %s15076_s22, 6  ;;  %vm13065_vm8 = vmmov 0  }
  0xc3   : > { %591 = vst [vmem:[#allocation2 + $0x88] sm:$0x3] %v13063_v0  ;;  %592 = vst [vmem:[#allocation2 + $0x90] sm:$0xff] %v13063_v0  ;;  %v12390_v19 = vld [vmem:[#allocation4 + $0x20] sm:$0xff]   ;;  %v12394_v23 = vld [vmem:[#allocation4 + $0x28] sm:$0xff]   ;;  %s14552_s25 = scalar_lea.vmem %s15053_s10, %s10611_s15  ;;  %s10612_s15 = sshll.u32 %s15076_s22, 4 }
  0xc4   : > { %593 = vst [vmem:[#allocation2 + $0x98] sm:$0xff] %v13063_v0  ;;  %594 = vst [vmem:[#allocation2 + $0xa0] sm:$0x3] %v13063_v0  ;;  %10771 = vmatpush3.bf16.msra.mxu0 %v12382_v11  ;;  %v12391_v20 = vld [vmem:[#allocation4 + $0xa0] sm:$0xff]   ;;  %v12395_v24 = vld [vmem:[#allocation4 + $0xa8] sm:$0xff]   ;;  %s10613_s18 = sshll.u32 %s15076_s22, 2 }
  0xc5   : > { %595 = vst [vmem:[#allocation2 + $0xa8] sm:$0xff] %v13063_v0  ;;  %596 = vst [vmem:[#allocation2 + $0xb0] sm:$0xff] %v13063_v0  ;;  %10883 = vmatpush3.bf16.msra.mxu1 %v12383_v12  ;;  %10772 = vmatprep.subr.bf16.mxu0 %v12384_v13  ;;  %v12396_v25 = vld [vmem:[#allocation4 + $0x70] sm:$0xff]   ;;  %v12400_v29 = vld [vmem:[#allocation4 + $0x78] sm:$0xff]   ;;  %s15073_s26 = sld [smem:[#allocation20_spill]] }
  0xc6   : > { %597 = vst [vmem:[#allocation2 + $0xb8] sm:$0x3] %v13063_v0  ;;  %598 = vst [vmem:[#allocation2 + $0xc0] sm:$0xff] %v13063_v0  ;;  %10884 = vmatprep.subr.bf16.mxu1 %v12385_v14  ;;  %v12397_v26 = vld [vmem:[#allocation4 + $0xf0] sm:$0xff]   ;;  %v12401_v30 = vld [vmem:[#allocation4 + $0xf8] sm:$0xff]  }
  0xc7   : > { %599 = vst [vmem:[#allocation2 + $0xc8] sm:$0xff] %v13063_v0  ;;  %600 = vst [vmem:[#allocation2 + $0xd0] sm:$0x3] %v13063_v0  ;;  %v12398_v27 = vld [vmem:[#allocation4 + $0x30] sm:$0xff]   ;;  %v12402_v31 = vld [vmem:[#allocation4 + $0x38] sm:$0xff]  }
  0xc8   : > { %601 = vst [vmem:[#allocation2 + $0xd8] sm:$0xff] %v13063_v0  ;;  %602 = vst [vmem:[#allocation2 + $0xe0] sm:$0xff] %v13063_v0  ;;  %10773 = vmatpush3.bf16.msra.mxu0 %v12386_v15  ;;  %v12399_v28 = vld [vmem:[#allocation4 + $0xb0] sm:$0xff]   ;;  %v12403_v32 = vld [vmem:[#allocation4 + $0xb8] sm:$0xff]  }
  0xc9   : > { %603 = vst [vmem:[#allocation2 + $0xe8] sm:$0x3] %v13063_v0  ;;  %604 = vst [vmem:[#allocation2 + $0xf0] sm:$0xff] %v13063_v0  ;;  %10885 = vmatpush3.bf16.msra.mxu1 %v12387_v16  ;;  %10774 = vmatprep.subr.bf16.mxu0 %v12388_v17  ;;  %v710_v33 = vld [vmem:[#allocation2 + $0x1] sm:$0xff]  ;;  %v711_v34 = vld [vmem:[#allocation2 + $0x9] sm:$0xff] }
  0xca   : > { %605 = vst [vmem:[#allocation2 + $0xf8] sm:$0xff] %v13063_v0  ;;  %606 = vst [vmem:[#allocation2 + $0x100] sm:$0x3] %v13063_v0  ;;  %10886 = vmatprep.subr.bf16.mxu1 %v12389_v18  ;;  %v542_v35 = vld [vmem:[%s13433_s13] sm:$0xff]  ;;  %v742_v36 = vpack.c.bf16 %v711_v34, %v710_v33  ;;  %v543_v37 = vld [vmem:[%s13433_s13 + $0x8] sm:$0xff] }
  0xcb   : > { %607 = vst [vmem:[#allocation2 + $0x108] sm:$0xff] %v13063_v0  ;;  %608 = vst [vmem:[#allocation2 + $0x110] sm:$0xff] %v13063_v0  ;;  %v758_v38 = vld [vmem:[#allocation2 + $0x2] sm:$0xff]  ;;  %v759_v39 = vld [vmem:[#allocation2 + $0xa] sm:$0xff]  ;;  %s540_s29 = scalar_lea.vmem %s15073_s26, %s10613_s18 }
  0xcc   : > { %609 = vst [vmem:[#allocation2 + $0x118] sm:$0x3] %v13063_v0  ;;  %610 = vst [vmem:[#allocation2 + $0x120] sm:$0xff] %v13063_v0  ;;  %10775 = vmatpush3.bf16.msra.mxu0 %v12390_v19  ;;  %v12404_v40 = vld [vmem:[#allocation4 + $0x140] sm:$0xff]   ;;  %1703 = vmatprep.mubr.bf16.mxu0 %v742_v36  ;;  %v544_v43 = vld [vmem:[%s13433_s13 + $0x10] sm:$0xff]  ;;  %v790_v55 = vpack.c.bf16 %v759_v39, %v758_v38 }
  0xcd   : > { %611 = vst [vmem:[#allocation2 + $0x128] sm:$0xff] %v13063_v0  ;;  %612 = vst [vmem:[#allocation2 + $0x130] sm:$0x3] %v13063_v0  ;;  %10887 = vmatpush3.bf16.msra.mxu1 %v12391_v20  ;;  %10776 = vmatprep.subr.bf16.mxu0 %v12392_v21  ;;  %v12405_v41 = vld [vmem:[#allocation4 + $0x100] sm:$0xff]   ;;  %v545_v44 = vld [vmem:[%s13433_s13 + $0x18] sm:$0xff] }
  0xce   : > { %613 = vst [vmem:[#allocation2 + $0x138] sm:$0xff] %v13063_v0  ;;  %614 = vst [vmem:[#allocation2 + $0x140] sm:$0xff] %v13063_v0  ;;  %10888 = vmatprep.subr.bf16.mxu1 %v12393_v22  ;;  %v546_v45 = vld [vmem:[%s13433_s13 + $0x20] sm:$0xff]  ;;  %v547_v46 = vld [vmem:[%s13433_s13 + $0x28] sm:$0xff] }
  0xcf   : > { %615 = vst [vmem:[#allocation2 + $0x148] sm:$0x3] %v13063_v0  ;;  %616 = vst [vmem:[#allocation2 + $0x150] sm:$0xff] %v13063_v0  ;;  %v12406_v47 = vld [vmem:[#allocation4 + $0x148] sm:$0xff]   ;;  %v548_v49 = vld [vmem:[%s13433_s13 + $0x30] sm:$0xff] }
  0xd0   : > { %617 = vst [vmem:[#allocation2 + $0x158] sm:$0xff] %v13063_v0  ;;  %618 = vst [vmem:[#allocation2 + $0x160] sm:$0x3] %v13063_v0  ;;  %10777 = vmatpush3.bf16.msra.mxu0 %v12394_v23  ;;  %v12407_v48 = vld [vmem:[#allocation4 + $0x108] sm:$0xff]   ;;  %v549_v50 = vld [vmem:[%s13433_s13 + $0x38] sm:$0xff] }
  0xd1   : > { %619 = vst [vmem:[#allocation2 + $0x168] sm:$0xff] %v13063_v0  ;;  %620 = vst [vmem:[#allocation2 + $0x170] sm:$0xff] %v13063_v0  ;;  %10889 = vmatpush3.bf16.msra.mxu1 %v12395_v24  ;;  %10778 = vmatprep.subr.bf16.mxu0 %v12396_v25  ;;  %v550_v53 = vld [vmem:[%s13433_s13 + $0x40] sm:$0xff]  ;;  %v551_v61 = vld [vmem:[%s13433_s13 + $0x48] sm:$0xff] }
  0xd2   : > { %621 = vst [vmem:[#allocation2 + $0x178] sm:$0x3] %v13063_v0  ;;  %622 = vst [vmem:[#allocation2 + $0x180] sm:$0xff] %v13063_v0  ;;  %10890 = vmatprep.subr.bf16.mxu1 %v12397_v26  ;;  %v12408_v62 = vld [vmem:[#allocation4 + $0x150] sm:$0xff]   ;;  %v553_v18 = vld [vmem:[%s13433_s13 + $0x58] sm:$0xff] }
  0xd3   : > { %623 = vst [vmem:[#allocation2 + $0x188] sm:$0xff] %v13063_v0  ;;  %624 = vst [vmem:[#allocation2 + $0x190] sm:$0x3] %v13063_v0  ;;  %v12409_v14 = vld [vmem:[#allocation4 + $0x110] sm:$0xff]   ;;  %v554_v22 = vld [vmem:[%s13433_s13 + $0x60] sm:$0xff] }
  0xd4   : > { %625 = vst [vmem:[#allocation2 + $0x198] sm:$0xff] %v13063_v0  ;;  %626 = vst [vmem:[#allocation2 + $0x1a0] sm:$0xff] %v13063_v0  ;;  %10779 = vmatpush3.bf16.msra.mxu0 %v12398_v27  ;;  %v552_v17 = vld [vmem:[%s13433_s13 + $0x50] sm:$0xff]  ;;  %v555_v23 = vld [vmem:[%s13433_s13 + $0x68] sm:$0xff] }
  0xd5   : > { %627 = vst [vmem:[#allocation2 + $0x1a8] sm:$0x3] %v13063_v0  ;;  %2606 = vst [vmem:[#allocation3 + $0x18] sm:$0xff] %v13063_v0  ;;  %10891 = vmatpush3.bf16.msra.mxu1 %v12399_v28  ;;  %10780 = vmatprep.subr.bf16.mxu0 %v12400_v29  ;;  %v12410_v24 = vld [vmem:[#allocation4 + $0x158] sm:$0xff]   ;;  %v556_v26 = vld [vmem:[%s13433_s13 + $0x70] sm:$0xff] }
  0xd6   : > { %2607 = vst [vmem:[#allocation3 + $0x20] sm:$0xff] %v13063_v0  ;;  %2609 = vst [vmem:[#allocation3 + $0x30] sm:$0xff] %v13063_v0  ;;  %10892 = vmatprep.subr.bf16.mxu1 %v12401_v30  ;;  %v12411_v25 = vld [vmem:[#allocation4 + $0x118] sm:$0xff]   ;;  %v558_v28 = vld [vmem:[%s13433_s13 + $0x80] sm:$0xff] }
  0xd7   : > { %2610 = vst [vmem:[#allocation3 + $0x38] sm:$0xff] %v13063_v0  ;;  %2612 = vst [vmem:[#allocation3 + $0x48] sm:$0xff] %v13063_v0  ;;  %v557_v27 = vld [vmem:[%s13433_s13 + $0x78] sm:$0xff]  ;;  %v559_v30 = vld [vmem:[%s13433_s13 + $0x88] sm:$0xff] }
  0xd8   : > { %2613 = vst [vmem:[#allocation3 + $0x50] sm:$0xff] %v13063_v0  ;;  %2615 = vst [vmem:[#allocation3 + $0x60] sm:$0xff] %v13063_v0  ;;  %10781 = vmatpush3.bf16.msra.mxu0 %v12402_v31  ;;  %v12412_v33 = vld [vmem:[#allocation4 + $0x160] sm:$0xff]  }
  0xd9   : > { %2616 = vst [vmem:[#allocation3 + $0x68] sm:$0xff] %v13063_v0  ;;  %2618 = vst [vmem:[#allocation3 + $0x78] sm:$0xff] %v13063_v0  ;;  %10893 = vmatpush3.bf16.msra.mxu1 %v12403_v32  ;;  %10990 = vmatprep.subr.bf16.mxu0 %v12404_v40  ;;  %v12413_v34 = vld [vmem:[#allocation4 + $0x120] sm:$0xff]  }
  0xda   : > { %2619 = vst [vmem:[#allocation3 + $0x80] sm:$0xff] %v13063_v0  ;;  %2621 = vst [vmem:[#allocation3 + $0x90] sm:$0xff] %v13063_v0 }
  0xdb   : > { %2622 = vst [vmem:[#allocation3 + $0x98] sm:$0xff] %v13063_v0  ;;  %2624 = vst [vmem:[#allocation3 + $0xa8] sm:$0xff] %v13063_v0  ;;  %1704 = vmatmul.mubr.bf16.vlgmr.msra.gmra.mrb[0].mxu0 %v13064_v42 }
  0xdc   : > { %2625 = vst [vmem:[#allocation3 + $0xb0] sm:$0xff] %v13063_v0  ;;  %2627 = vst [vmem:[#allocation3 + $0xc0] sm:$0xff] %v13063_v0  ;;  %10991 = vmatpush3.bf16.msra.mxu0 %v12405_v41 }
  0xdd   : > { %2628 = vst [vmem:[#allocation3 + $0xc8] sm:$0xff] %v13063_v0  ;;  %4174 = vst [vmem:[#allocation3] sm:$0xff] %v13063_v0  ;;  %10992 = vmatprep.subr.bf16.mxu0 %v12406_v47  ;;  %v560_v47 = vld [vmem:[%s13433_s13 + $0x90] sm:$0xff] }
  0xde   : > { %4175 = vst [vmem:[#allocation3 + $0x8] sm:$0xff] %v13063_v0  ;;  %4201 = vst [vmem:[#allocation3 + $0xd8] sm:$0xff] %v13063_v0 }
  0xdf   : > { %4202 = vst [vmem:[#allocation3 + $0xe0] sm:$0xff] %v13063_v0  ;;  %630 = vst.msk [vmem:[#allocation2 + $0x19] sm:$0xff] %vm629_vm0, %v542_v35 }
  0xe0   : > { %631 = vst.msk [vmem:[#allocation2 + $0x21] sm:$0xff] %vm629_vm0, %v543_v37  ;;  %2843 = vst [vmem:[#allocation2] sm:$0xff] %v13063_v0  ;;  %10993 = vmatpush3.bf16.msra.mxu0 %v12407_v48 }
  0xe1   : > { %2844 = vst [vmem:[#allocation2 + $0x8] sm:$0xff] %v13063_v0  ;;  %2845 = vst [vmem:[#allocation2 + $0x10] sm:$0x3] %v13063_v0  ;;  %10994 = vmatprep.subr.bf16.mxu0 %v12408_v62  ;;  %v12419_v62 = vld [vmem:[#allocation4 + $0x188] sm:$0xff]  }
  0xe2   : > { %5508 = vst [vmem:[#allocation2 + $0x10] sm:$0x3] %v13063_v0  ;;  %632 = vst.msk [vmem:[#allocation2 + $0x31] sm:$0xff] %vm629_vm0, %v544_v43  ;;  %v12414_v43 = vld [vmem:[#allocation4 + $0x1c0] sm:$0xff]  }
  0xe3   : > { %7086 = vst [vmem:[#allocation2 + $0x10] sm:$0x3] %v13063_v0  ;;  %633 = vst.msk [vmem:[#allocation2 + $0x39] sm:$0xff] %vm629_vm0, %v545_v44  ;;  %v12415_v44 = vld [vmem:[#allocation4 + $0x180] sm:$0xff]   ;;  %11102 = vmatprep.subr.bf16.mxu1 %v12414_v43 }
  0xe4   : > { %8638 = vst [vmem:[#allocation2 + $0x10] sm:$0x3] %v13063_v0  ;;  %634 = vst.msk [vmem:[#allocation2 + $0x49] sm:$0xff] %vm629_vm0, %v546_v45  ;;  %10995 = vmatpush3.bf16.msra.mxu0 %v12409_v14 }
  0xe5   : > { %635 = vst.msk [vmem:[#allocation2 + $0x51] sm:$0xff] %vm629_vm0, %v547_v46  ;;  %636 = vst.msk [vmem:[#allocation2 + $0x61] sm:$0xff] %vm629_vm0, %v548_v49  ;;  %10996 = vmatprep.subr.bf16.mxu0 %v12410_v24  ;;  %v12422_v24 = vld [vmem:[#allocation4 + $0x1d0] sm:$0xff]  }
  0xe6   : > { %v806_v51 = vld [vmem:[#allocation2 + $0x18] sm:$0xff]  ;;  %637 = vst.msk [vmem:[#allocation2 + $0x69] sm:$0xff] %vm629_vm0, %v549_v50  ;;  %638 = vst.msk [vmem:[#allocation2 + $0x79] sm:$0xff] %vm629_vm0, %v550_v53  ;;  %v562_v53 = vld [vmem:[%s13433_s13 + $0xa0] sm:$0xff] }
  0xe7   : > { %v712_v52 = vld [vmem:[#allocation2 + $0x19] sm:$0xff]  ;;  %v713_v56 = vld [vmem:[#allocation2 + $0x21] sm:$0xff]  ;;  %639 = vst.msk [vmem:[#allocation2 + $0x81] sm:$0xff] %vm629_vm0, %v551_v61  ;;  %640 = vst.msk [vmem:[#allocation2 + $0x91] sm:$0xff] %vm629_vm0, %v552_v17 }
  0xe8   : > { %v807_v54 = vld [vmem:[#allocation2 + $0x20] sm:$0xff]  ;;  %v13459_v59 = vpack.c.bf16 %v713_v56, %v712_v52  ;;  %641 = vst.msk [vmem:[#allocation2 + $0x99] sm:$0xff] %vm629_vm0, %v553_v18  ;;  %642 = vst.msk [vmem:[#allocation2 + $0xa9] sm:$0xff] %vm629_vm0, %v554_v22  ;;  %10997 = vmatpush3.bf16.msra.mxu0 %v12411_v25  ;;  %v561_v52 = vld [vmem:[%s13433_s13 + $0x98] sm:$0xff] }
  0xe9   : > { %v760_v57 = vld [vmem:[#allocation2 + $0x1a] sm:$0xff]  ;;  %v838_v58 = vpack.c.bf16 %v807_v54, %v806_v51  ;;  %v761_v60 = vld [vmem:[#allocation2 + $0x22] sm:$0xff]  ;;  %v808_v63 = vld [vmem:[#allocation2 + $0x30] sm:$0xff]  ;;  %643 = vst.msk [vmem:[#allocation2 + $0xb1] sm:$0xff] %vm629_vm0, %v555_v23  ;;  %10998 = vmatprep.subr.bf16.mxu0 %v12412_v33 }
  0xea   : > { %2846 = vst [vmem:[#allocation2 + $0x18] sm:$0xff] %v13063_v0  ;;  %2848 = vst [vmem:[#allocation2 + $0x28] sm:$0x3] %v13063_v0  ;;  %1711 = vmatprep.mubr.bf16.mxu0 %v13459_v59  ;;  %v809_v1 = vld [vmem:[#allocation2 + $0x38] sm:$0xff]  ;;  %v13479_v11 = vpack.c.bf16 %v761_v60, %v760_v57  ;;  %v563_v54 = vld [vmem:[%s13433_s13 + $0xa8] sm:$0xff] }
  0xeb   : > { %2847 = vst [vmem:[#allocation2 + $0x20] sm:$0xff] %v13063_v0  ;;  %1848 = vmatprep.mubr.bf16.mxu1 %v838_v58  ;;  %v714_v2 = vld [vmem:[#allocation2 + $0x31] sm:$0xff]  ;;  %5511 = vst [vmem:[#allocation2 + $0x28] sm:$0x3] %v13063_v0  ;;  %v13468_v3 = vpack.c.bf16 %v809_v1, %v808_v63  ;;  %1712 = vmatmul.mubr.bf16.gmra.mrb[4].mxu0 %v838_v58  ;;  %v715_v4 = vld [vmem:[#allocation2 + $0x39] sm:$0xff] }
  0xec   : > { %1849 = vmatmul.mubr.bf16.vlgmr.msra.gmra.mrb[0].mxu1 %v790_v55  ;;  %7089 = vst [vmem:[#allocation2 + $0x28] sm:$0x3] %v13063_v0  ;;  %v13471_v5 = vpack.c.bf16 %v715_v4, %v714_v2  ;;  %v810_v6 = vld [vmem:[#allocation2 + $0x48] sm:$0xff]  ;;  %v811_v7 = vld [vmem:[#allocation2 + $0x50] sm:$0xff]  ;;  %v763_v16 = vld [vmem:[#allocation2 + $0x3a] sm:$0xff]  ;;  %10999 = vmatpush3.bf16.msra.mxu0 %v12413_v34 }
  0xed   : > { %8641 = vst [vmem:[#allocation2 + $0x28] sm:$0x3] %v13063_v0  ;;  %1856 = vmatprep.mubr.bf16.mxu1 %v13468_v3  ;;  %v13475_v8 = vld [vmem:[#allocation2 + $0x4a] sm:$0xff]  ;;  %v13481_v12 = vpack.c.bf16 %v811_v7, %v810_v6  ;;  %v762_v15 = vld [vmem:[#allocation2 + $0x32] sm:$0xff]  ;;  %v812_v19 = vld [vmem:[#allocation2 + $0x60] sm:$0xff]  ;;  %11103 = vmatpush3.bf16.msra.mxu1 %v12415_v44 }
  0xee   : > { %v716_v9 = vld [vmem:[#allocation2 + $0x49] sm:$0xff]  ;;  %v717_v10 = vld [vmem:[#allocation2 + $0x51] sm:$0xff]  ;;  %1717 = vmatprep.mubr.bf16.mxu0 %v13471_v5  ;;  %v718_v20 = vld [vmem:[#allocation2 + $0x61] sm:$0xff]  ;;  %v13500_v29 = vpack.c.bf16 %v763_v16, %v762_v15  ;;  %644 = vst.msk [vmem:[#allocation2 + $0xc1] sm:$0xff] %vm629_vm0, %v556_v26 }
  0xef   : > { %2852 = vst [vmem:[#allocation2 + $0x48] sm:$0xff] %v13063_v0  ;;  %v13483_v13 = vpack.c.bf16 %v717_v10, %v716_v9  ;;  %v813_v0 = vld [vmem:[#allocation2 + $0x68] sm:$0xff]  ;;  %645 = vst.msk [vmem:[#allocation2 + $0xc9] sm:$0xff] %vm629_vm0, %v557_v27  ;;  %v765_v35 = vld [vmem:[#allocation2 + $0x52] sm:$0xff] }
  0xf0   : > { %v719_v21 = vld [vmem:[#allocation2 + $0x69] sm:$0xff]  ;;  %646 = vst.msk [vmem:[#allocation2 + $0xd9] sm:$0xff] %vm629_vm0, %v558_v28  ;;  %v13506_v31 = vpack.c.bf16 %v813_v0, %v812_v19  ;;  %647 = vst.msk [vmem:[#allocation2 + $0xe1] sm:$0xff] %vm629_vm0, %v559_v30  ;;  %v814_v36 = vld [vmem:[#allocation2 + $0x78] sm:$0xff]  ;;  %v13516_v40 = vpack.c.bf16 %v765_v35, %v13475_v8 }
  0xf1   : > { %v13508_v32 = vpack.c.bf16 %v719_v21, %v718_v20  ;;  %v815_v37 = vld [vmem:[#allocation2 + $0x80] sm:$0xff]  ;;  %v767_v46 = vld [vmem:[#allocation2 + $0x6a] sm:$0xff]  ;;  %v817_v49 = vld [vmem:[#allocation2 + $0x98] sm:$0xff]  ;;  %648 = vst.msk [vmem:[#allocation2 + $0xf1] sm:$0xff] %vm629_vm0, %v560_v47 }
  0xf2   : > { %v720_v38 = vld [vmem:[#allocation2 + $0x79] sm:$0xff]  ;;  %v721_v39 = vld [vmem:[#allocation2 + $0x81] sm:$0xff]  ;;  %v13518_v41 = vpack.c.bf16 %v815_v37, %v814_v36  ;;  %v816_v48 = vld [vmem:[#allocation2 + $0x90] sm:$0xff]  ;;  %649 = vst.msk [vmem:[#allocation2 + $0xf9] sm:$0xff] %vm629_vm0, %v561_v52 }
  0xf3   : > { %1718 = vmatmul.mubr.bf16.gmra.mrb[8].mxu0 %v13468_v3  ;;  %v13520_v42 = vpack.c.bf16 %v721_v39, %v720_v38  ;;  %v766_v45 = vld [vmem:[#allocation2 + $0x62] sm:$0xff]  ;;  %v722_v50 = vld [vmem:[#allocation2 + $0x91] sm:$0xff]  ;;  %v723_v51 = vld [vmem:[#allocation2 + $0x99] sm:$0xff]  ;;  %650 = vst.msk [vmem:[#allocation2 + $0x109] sm:$0xff] %vm629_vm0, %v562_v53  ;;  %v13536_v60 = vpack.c.bf16 %v817_v49, %v816_v48 }
  0xf4   : > { %1857 = vmatmul.mubr.bf16.gmra.mrb[4].mxu1 %v13479_v11  ;;  %1725 = vmatprep.mubr.bf16.mxu0 %v13483_v13  ;;  %651 = vst.msk [vmem:[#allocation2 + $0x111] sm:$0xff] %vm629_vm0, %v563_v54  ;;  %v12416_v55 = vld [vmem:[#allocation4 + $0x168] sm:$0xff]   ;;  %v13534_v57 = vpack.c.bf16 %v767_v46, %v766_v45  ;;  %v13538_v61 = vpack.c.bf16 %v723_v51, %v722_v50  ;;  %v564_v63 = vld [vmem:[%s13433_s13 + $0xb0] sm:$0xff]  ;;  %v565_v1 = vld [vmem:[%s13433_s13 + $0xb8] sm:$0xff] }
  0xf5   : > { %1862 = vmatprep.mubr.bf16.mxu1 %v13481_v12  ;;  %v12417_v56 = vld [vmem:[#allocation4 + $0x128] sm:$0xff]   ;;  %11000 = vmatprep.subr.bf16.mxu0 %v12416_v55  ;;  %652 = vst.msk [vmem:[#allocation2 + $0x121] sm:$0xff] %vm629_vm0, %v564_v63  ;;  %v566_v2 = vld [vmem:[%s13433_s13 + $0xc0] sm:$0xff]  ;;  %653 = vst.msk [vmem:[#allocation2 + $0x129] sm:$0xff] %vm629_vm0, %v565_v1 }
  0xf6   : > { %v12418_v58 = vld [vmem:[#allocation4 + $0x1c8] sm:$0xff]   ;;  %11001 = vmatpush3.bf16.msra.mxu0 %v12417_v56  ;;  %654 = vst.msk [vmem:[#allocation2 + $0x139] sm:$0xff] %vm629_vm0, %v566_v2  ;;  %v768_v6 = vld [vmem:[#allocation2 + $0x7a] sm:$0xff]  ;;  %v819_v10 = vld [vmem:[#allocation2 + $0xb0] sm:$0xff] }
  0xf7   : > { %11104 = vmatprep.subr.bf16.mxu1 %v12418_v58  ;;  %v567_v4 = vld [vmem:[%s13433_s13 + $0xc8] sm:$0xff]  ;;  %v725_v15 = vld [vmem:[#allocation2 + $0xb1] sm:$0xff]  ;;  %v771_v21 = vld [vmem:[#allocation2 + $0x9a] sm:$0xff] }
  0xf8   : > { %11105 = vmatpush3.bf16.msra.mxu1 %v12419_v62  ;;  %655 = vst.msk [vmem:[#allocation2 + $0x141] sm:$0xff] %vm629_vm0, %v567_v4  ;;  %v769_v7 = vld [vmem:[#allocation2 + $0x82] sm:$0xff]  ;;  %v12420_v16 = vld [vmem:[#allocation4 + $0x170] sm:$0xff]   ;;  %v569_v30 = vld [vmem:[%s13433_s13 + $0xd8] sm:$0xff] }
  0xf9   : > { %v818_v9 = vld [vmem:[#allocation2 + $0xa8] sm:$0xff]  ;;  %v13552_v17 = vpack.c.bf16 %v769_v7, %v768_v6  ;;  %v12421_v18 = vld [vmem:[#allocation4 + $0x130] sm:$0xff]   ;;  %11002 = vmatprep.subr.bf16.mxu0 %v12420_v16  ;;  %v820_v22 = vld [vmem:[#allocation2 + $0xc0] sm:$0xff]  ;;  %11106 = vmatprep.subr.bf16.mxu1 %v12422_v24  ;;  %657 = vst.msk [vmem:[#allocation2 + $0x159] sm:$0xff] %vm629_vm0, %v569_v30 }
  0xfa   : > { %v724_v14 = vld [vmem:[#allocation2 + $0xa9] sm:$0xff]  ;;  %v13554_v19 = vpack.c.bf16 %v819_v10, %v818_v9  ;;  %11003 = vmatpush3.bf16.msra.mxu0 %v12421_v18  ;;  %v770_v20 = vld [vmem:[#allocation2 + $0x92] sm:$0xff]  ;;  %v726_v25 = vld [vmem:[#allocation2 + $0xc1] sm:$0xff] }
  0xfb   : > { %1726 = vmatmul.mubr.bf16.gmra.mrb[12].mxu0 %v13481_v12  ;;  %v13556_v0 = vpack.c.bf16 %v725_v15, %v724_v14  ;;  %v821_v23 = vld [vmem:[#allocation2 + $0xc8] sm:$0xff]  ;;  %v12423_v26 = vld [vmem:[#allocation4 + $0x190] sm:$0xff]   ;;  %v13566_v33 = vpack.c.bf16 %v771_v21, %v770_v20  ;;  %v12424_v34 = vld [vmem:[#allocation4 + $0x1d8] sm:$0xff]  }
  0xfc   : > { %1863 = vmatmul.mubr.bf16.gmra.mrb[8].mxu1 %v13500_v29  ;;  %1731 = vmatprep.mubr.bf16.mxu0 %v13508_v32  ;;  %v727_v27 = vld [vmem:[#allocation2 + $0xc9] sm:$0xff]  ;;  %v570_v35 = vld [vmem:[%s13433_s13 + $0xe0] sm:$0xff]  ;;  %v13569_v36 = vpack.c.bf16 %v821_v23, %v820_v22  ;;  %v12425_v39 = vld [vmem:[#allocation4 + $0x198] sm:$0xff]  }
  0xfd   : > { %1870 = vmatprep.mubr.bf16.mxu1 %v13506_v31  ;;  %v568_v28 = vld [vmem:[%s13433_s13 + $0xd0] sm:$0xff]  ;;  %11107 = vmatpush3.bf16.msra.mxu1 %v12423_v26  ;;  %v13571_v37 = vpack.c.bf16 %v727_v27, %v726_v25  ;;  %v571_v38 = vld [vmem:[%s13433_s13 + $0xe8] sm:$0xff]  ;;  %658 = vst.msk [vmem:[#allocation2 + $0x169] sm:$0xff] %vm629_vm0, %v570_v35  ;;  %v12426_v45 = vld [vmem:[#allocation4 + $0x178] sm:$0xff]  }
  0xfe   : > { %656 = vst.msk [vmem:[#allocation2 + $0x151] sm:$0xff] %vm629_vm0, %v568_v28  ;;  %11108 = vmatprep.subr.bf16.mxu1 %v12424_v34  ;;  %659 = vst.msk [vmem:[#allocation2 + $0x171] sm:$0xff] %vm629_vm0, %v571_v38  ;;  %v772_v43 = vld [vmem:[#allocation2 + $0xaa] sm:$0xff]  ;;  %v773_v44 = vld [vmem:[#allocation2 + $0xb2] sm:$0xff]  ;;  %11004 = vmatprep.subr.bf16.mxu0 %v12426_v45 }
  0xff   : > { %v822_v46 = vld [vmem:[#allocation2 + $0xd8] sm:$0xff]  ;;  %v12428_v48 = vld [vmem:[#allocation4 + $0x1e0] sm:$0xff]   ;;  %v13580_v52 = vpack.c.bf16 %v773_v44, %v772_v43  ;;  %v12430_v56 = vld [vmem:[#allocation4 + $0x1e8] sm:$0xff]  }
 0x100   : > { %v12427_v47 = vld [vmem:[#allocation4 + $0x138] sm:$0xff]   ;;  %v823_v49 = vld [vmem:[#allocation2 + $0xe0] sm:$0xff]  ;;  %v775_v62 = vld [vmem:[#allocation2 + $0xca] sm:$0xff] }
 0x101   : > { %v728_v50 = vld [vmem:[#allocation2 + $0xd9] sm:$0xff]  ;;  %v729_v51 = vld [vmem:[#allocation2 + $0xe1] sm:$0xff]  ;;  %11109 = vmatpush3.bf16.msra.mxu1 %v12425_v39  ;;  %11005 = vmatpush3.bf16.msra.mxu0 %v12427_v47  ;;  %v13582_v54 = vpack.c.bf16 %v823_v49, %v822_v46  ;;  %v572_v1 = vld [vmem:[%s13433_s13 + $0xf0] sm:$0xff] }
 0x102   : > { %11110 = vmatprep.subr.bf16.mxu1 %v12428_v48  ;;  %v12429_v53 = vld [vmem:[#allocation4 + $0x1a0] sm:$0xff]   ;;  %v13584_v55 = vpack.c.bf16 %v729_v51, %v728_v50  ;;  %v12431_v63 = vld [vmem:[#allocation4 + $0x1a8] sm:$0xff]   ;;  %v824_v2 = vld [vmem:[#allocation2 + $0xf0] sm:$0xff]  ;;  %660 = vst.msk [vmem:[#allocation2 + $0x181] sm:$0xff] %vm629_vm0, %v572_v1 }
 0x103   : > { %1732 = vmatmul.mubr.bf16.gmra.mrb[16].mxu0 %v13506_v31  ;;  %v774_v58 = vld [vmem:[#allocation2 + $0xc2] sm:$0xff]  ;;  %v825_v4 = vld [vmem:[#allocation2 + $0xf8] sm:$0xff]  ;;  %v12432_v10 = vld [vmem:[#allocation4 + $0x1f0] sm:$0xff]  }
 0x104   : > { %1871 = vmatmul.mubr.bf16.gmra.mrb[12].mxu1 %v13516_v40  ;;  %1739 = vmatprep.mubr.bf16.mxu0 %v13520_v42  ;;  %v730_v6 = vld [vmem:[#allocation2 + $0xf1] sm:$0xff]  ;;  %v731_v7 = vld [vmem:[#allocation2 + $0xf9] sm:$0xff]  ;;  %v13594_v16 = vpack.c.bf16 %v775_v62, %v774_v58  ;;  %v13596_v18 = vpack.c.bf16 %v825_v4, %v824_v2  ;;  %v777_v24 = vld [vmem:[#allocation2 + $0xe2] sm:$0xff] }
 0x105   : > { %1876 = vmatprep.mubr.bf16.mxu1 %v13518_v41  ;;  %11111 = vmatpush3.bf16.msra.mxu1 %v12429_v53  ;;  %v573_v9 = vld [vmem:[%s13433_s13 + $0xf8] sm:$0xff]  ;;  %v12433_v14 = vld [vmem:[#allocation4 + $0x1b0] sm:$0xff]   ;;  %v13598_v20 = vpack.c.bf16 %v731_v7, %v730_v6  ;;  %v13600_v21 = vld [vmem:[#allocation4 + $0x200] sm:$0xff]  }
 0x106   : > { %11112 = vmatprep.subr.bf16.mxu1 %v12430_v56  ;;  %661 = vst.msk [vmem:[#allocation2 + $0x189] sm:$0xff] %vm629_vm0, %v573_v9  ;;  %v12434_v15 = vld [vmem:[#allocation4 + $0x1f8] sm:$0xff]   ;;  %12056 = vmatprep.subr.bf16.mxu0 %v13600_v21  ;;  %v826_v25 = vld [vmem:[#allocation2 + $0x108] sm:$0xff]  ;;  %v827_v26 = vld [vmem:[#allocation2 + $0x110] sm:$0xff] }
 0x107   : > { %v12435_v22 = vld [vmem:[#allocation4 + $0x1b8] sm:$0xff]   ;;  %v732_v27 = vld [vmem:[#allocation2 + $0x109] sm:$0xff]  ;;  %v13609_v34 = vpack.c.bf16 %v827_v26, %v826_v25  ;;  %v828_v43 = vld [vmem:[#allocation2 + $0x120] sm:$0xff] }
 0x108   : > { %v776_v23 = vld [vmem:[#allocation2 + $0xda] sm:$0xff]  ;;  %v733_v28 = vld [vmem:[#allocation2 + $0x111] sm:$0xff]  ;;  %v829_v44 = vld [vmem:[#allocation2 + $0x128] sm:$0xff] }
 0x109   : > { %11113 = vmatpush3.bf16.msra.mxu1 %v12431_v63  ;;  %v13607_v30 = vpack.c.bf16 %v777_v24, %v776_v23  ;;  %v13611_v35 = vpack.c.bf16 %v733_v28, %v732_v27  ;;  %v778_v38 = vld [vmem:[#allocation2 + $0xf2] sm:$0xff]  ;;  %v779_v39 = vld [vmem:[#allocation2 + $0xfa] sm:$0xff]  ;;  %v735_v46 = vld [vmem:[#allocation2 + $0x129] sm:$0xff]  ;;  %v13619_v48 = vpack.c.bf16 %v829_v44, %v828_v43 }
 0x10a   : > { %11114 = vmatprep.subr.bf16.mxu1 %v12432_v10  ;;  %v734_v45 = vld [vmem:[#allocation2 + $0x121] sm:$0xff]  ;;  %v13617_v47 = vpack.c.bf16 %v779_v39, %v778_v38  ;;  %v780_v50 = vld [vmem:[#allocation2 + $0x10a] sm:$0xff]  ;;  %v781_v51 = vld [vmem:[#allocation2 + $0x112] sm:$0xff] }
 0x10b   : > { %1740 = vmatmul.mubr.bf16.gmra.mrb[20].mxu0 %v13518_v41  ;;  %v13621_v49 = vpack.c.bf16 %v735_v46, %v734_v45  ;;  %v830_v53 = vld [vmem:[#allocation2 + $0x138] sm:$0xff]  ;;  %v831_v56 = vld [vmem:[#allocation2 + $0x140] sm:$0xff]  ;;  %v13627_v63 = vpack.c.bf16 %v781_v51, %v780_v50  ;;  %v783_v6 = vld [vmem:[#allocation2 + $0x12a] sm:$0xff] }
 0x10c   : > { %1877 = vmatmul.mubr.bf16.gmra.mrb[16].mxu1 %v13534_v57  ;;  %1745 = vmatprep.mubr.bf16.mxu0 %v13538_v61  ;;  %v736_v58 = vld [vmem:[#allocation2 + $0x139] sm:$0xff]  ;;  %v737_v62 = vld [vmem:[#allocation2 + $0x141] sm:$0xff]  ;;  %v13629_v1 = vpack.c.bf16 %v831_v56, %v830_v53  ;;  %v832_v7 = vld [vmem:[#allocation2 + $0x150] sm:$0xff] }
 0x10d   : > { %1884 = vmatprep.mubr.bf16.mxu1 %v13536_v60  ;;  %11115 = vmatpush3.bf16.msra.mxu1 %v12433_v14  ;;  %v13631_v2 = vpack.c.bf16 %v737_v62, %v736_v58  ;;  %v782_v4 = vld [vmem:[#allocation2 + $0x122] sm:$0xff]  ;;  %v833_v9 = vld [vmem:[#allocation2 + $0x158] sm:$0xff]  ;;  %v835_v27 = vld [vmem:[#allocation2 + $0x170] sm:$0xff] }
 0x10e   : > { %11116 = vmatprep.subr.bf16.mxu1 %v12434_v15  ;;  %v738_v10 = vld [vmem:[#allocation2 + $0x151] sm:$0xff]  ;;  %v739_v14 = vld [vmem:[#allocation2 + $0x159] sm:$0xff]  ;;  %v13637_v15 = vpack.c.bf16 %v783_v6, %v782_v4  ;;  %v785_v25 = vld [vmem:[#allocation2 + $0x142] sm:$0xff] }
 0x10f   : > { %v13641_v23 = vpack.c.bf16 %v739_v14, %v738_v10  ;;  %v784_v24 = vld [vmem:[#allocation2 + $0x13a] sm:$0xff]  ;;  %v834_v26 = vld [vmem:[#allocation2 + $0x168] sm:$0xff]  ;;  %v741_v38 = vld [vmem:[#allocation2 + $0x171] sm:$0xff] }
 0x110   : > { %v740_v28 = vld [vmem:[#allocation2 + $0x169] sm:$0xff]  ;;  %v13647_v39 = vpack.c.bf16 %v785_v25, %v784_v24  ;;  %v13649_v43 = vpack.c.bf16 %v835_v27, %v834_v26  ;;  %v786_v45 = vld [vmem:[#allocation2 + $0x152] sm:$0xff]  ;;  %v787_v46 = vld [vmem:[#allocation2 + $0x15a] sm:$0xff] }
 0x111   : > { %11117 = vmatpush3.bf16.msra.mxu1 %v12435_v22  ;;  %v13639_v22 = vpack.c.bf16 %v833_v9, %v832_v7  ;;  %v13651_v44 = vpack.c.bf16 %v741_v38, %v740_v28  ;;  %v836_v50 = vld [vmem:[#allocation2 + $0x180] sm:$0xff]  ;;  %v837_v51 = vld [vmem:[#allocation2 + $0x188] sm:$0xff]  ;;  %v13657_v53 = vpack.c.bf16 %v787_v46, %v786_v45  ;;  %v789_v7 = vld [vmem:[#allocation2 + $0x172] sm:$0xff] }
 0x112   : > { %v13659_v56 = vpack.c.bf16 %v837_v51, %v836_v50  ;;  %v1027_v58 = vld [vmem:[#allocation2 + $0x181] sm:$0xff]  ;;  %v1028_v62 = vld [vmem:[#allocation2 + $0x189] sm:$0xff]  ;;  %v13684_v27 = vld [vmem:[#allocation2 + $0x32] sm:$0xff] }
 0x113   : > { %1746 = vmatmul.mubr.bf16.gmra.mrb[24].mxu0 %v13536_v60  ;;  %v13661_v4 = vpack.c.bf16 %v1028_v62, %v1027_v58  ;;  %v788_v6 = vld [vmem:[#allocation2 + $0x16a] sm:$0xff]  ;;  %v932_v14 = vld [vmem:[#allocation2 + $0x182] sm:$0xff]  ;;  %v13686_v28 = vld [vmem:[#allocation2 + $0x3a] sm:$0xff] }
 0x114   : > { %1885 = vmatmul.mubr.bf16.gmra.mrb[20].mxu1 %v13552_v17  ;;  %1753 = vmatprep.mubr.bf16.mxu0 %v13556_v0  ;;  %v13667_v9 = vpack.c.bf16 %v789_v7, %v788_v6  ;;  %v12437_v10 = vld [vmem:[#allocation4 + $0x208] sm:$0xff]   ;;  %v13671_v26 = vld [vmem:[#allocation3 + $0xf0] sm:$0xff]  ;;  %v12439_v38 = vld [vmem:[#allocation4 + $0x218] sm:$0xff]  }
 0x115   : > { %1890 = vmatprep.mubr.bf16.mxu1 %v13554_v19  ;;  %v933_v24 = vld [vmem:[#allocation2 + $0x18a] sm:$0xff]  ;;  %8684 = vst [vmem:[#allocation2 + $0x180] sm:$0xff] %v13671_v26  ;;  %2851 = vst [vmem:[#allocation2 + $0x40] sm:$0x3] %v13671_v26  ;;  %v13729_v50 = vld [vmem:[#allocation2 + $0x92] sm:$0xff] }
 0x116   : > { %v13669_v25 = vpack.c.bf16 %v933_v24, %v932_v14  ;;  %2893 = vst [vmem:[#allocation2 + $0x190] sm:$0x3] %v13671_v26  ;;  %8685 = vst [vmem:[#allocation2 + $0x188] sm:$0xff] %v13671_v26  ;;  %v13707_v45 = vld [vmem:[#allocation2 + $0x6a] sm:$0xff]  ;;  %v13731_v51 = vld [vmem:[#allocation2 + $0x9a] sm:$0xff] }
 0x117   : > { %5556 = vst [vmem:[#allocation2 + $0x190] sm:$0x3] %v13671_v26  ;;  %2849 = vst [vmem:[#allocation2 + $0x30] sm:$0xff] %v13671_v26  ;;  %v12441_v46 = vld [vmem:[#allocation4 + $0x228] sm:$0xff]   ;;  %v13779_v6 = vld [vmem:[#allocation2 + $0xfa] sm:$0xff] }
 0x118   : > { %7134 = vst [vmem:[#allocation2 + $0x190] sm:$0x3] %v13671_v26  ;;  %2850 = vst [vmem:[#allocation2 + $0x38] sm:$0xff] %v13671_v26  ;;  %v13753_v58 = vld [vmem:[#allocation2 + $0xc2] sm:$0xff]  ;;  %v13755_v62 = vld [vmem:[#allocation2 + $0xca] sm:$0xff] }
 0x119   : > { %8686 = vst [vmem:[#allocation2 + $0x190] sm:$0x3] %v13671_v26  ;;  %5514 = vst [vmem:[#allocation2 + $0x40] sm:$0x3] %v13671_v26  ;;  %v13807_v14 = vld [vmem:[#allocation2 + $0x12a] sm:$0xff] }
 0x11a   : > { %7092 = vst [vmem:[#allocation2 + $0x40] sm:$0x3] %v13671_v26  ;;  %2857 = vst [vmem:[#allocation2 + $0x70] sm:$0x3] %v13671_v26 }
 0x11b   : > { %1754 = vmatmul.mubr.bf16.gmra.mrb[28].mxu0 %v13554_v19  ;;  %8644 = vst [vmem:[#allocation2 + $0x40] sm:$0x3] %v13671_v26  ;;  %5520 = vst [vmem:[#allocation2 + $0x70] sm:$0x3] %v13671_v26 }
 0x11c   : > { %1891 = vmatmul.mubr.bf16.gmra.mrb[24].mxu1 %v13566_v33  ;;  %1759 = vmatprep.mubr.bf16.mxu0 %v13571_v37  ;;  %7098 = vst [vmem:[#allocation2 + $0x70] sm:$0x3] %v13671_v26  ;;  %2863 = vst [vmem:[#allocation2 + $0xa0] sm:$0x3] %v13671_v26 }
 0x11d   : > { %1898 = vmatprep.mubr.bf16.mxu1 %v13569_v36  ;;  %8650 = vst [vmem:[#allocation2 + $0x70] sm:$0x3] %v13671_v26  ;;  %2861 = vst [vmem:[#allocation2 + $0x90] sm:$0xff] %v13671_v26 }
 0x11e   : > { %2862 = vst [vmem:[#allocation2 + $0x98] sm:$0xff] %v13671_v26  ;;  %5526 = vst [vmem:[#allocation2 + $0xa0] sm:$0x3] %v13671_v26 }
 0x11f   : > { %7104 = vst [vmem:[#allocation2 + $0xa0] sm:$0x3] %v13671_v26  ;;  %2869 = vst [vmem:[#allocation2 + $0xd0] sm:$0x3] %v13671_v26 }
 0x120   : > { %8656 = vst [vmem:[#allocation2 + $0xa0] sm:$0x3] %v13671_v26  ;;  %2867 = vst [vmem:[#allocation2 + $0xc0] sm:$0xff] %v13671_v26 }
 0x121   : > { %2868 = vst [vmem:[#allocation2 + $0xc8] sm:$0xff] %v13671_v26  ;;  %5532 = vst [vmem:[#allocation2 + $0xd0] sm:$0x3] %v13671_v26 }
 0x122   : > { %7110 = vst [vmem:[#allocation2 + $0xd0] sm:$0x3] %v13671_v26  ;;  %2875 = vst [vmem:[#allocation2 + $0x100] sm:$0x3] %v13671_v26 }
 0x123   : > { %1760 = vmatmul.mubr.bf16.gmra.mrb[32].mxu0 %v13569_v36  ;;  %8662 = vst [vmem:[#allocation2 + $0xd0] sm:$0x3] %v13671_v26  ;;  %5538 = vst [vmem:[#allocation2 + $0x100] sm:$0x3] %v13671_v26 }
 0x124   : > { %1899 = vmatmul.mubr.bf16.gmra.mrb[28].mxu1 %v13580_v52  ;;  %1767 = vmatprep.mubr.bf16.mxu0 %v13584_v55  ;;  %7116 = vst [vmem:[#allocation2 + $0x100] sm:$0x3] %v13671_v26  ;;  %2881 = vst [vmem:[#allocation2 + $0x130] sm:$0x3] %v13671_v26 }
 0x125   : > { %1904 = vmatprep.mubr.bf16.mxu1 %v13582_v54  ;;  %8668 = vst [vmem:[#allocation2 + $0x100] sm:$0x3] %v13671_v26  ;;  %5544 = vst [vmem:[#allocation2 + $0x130] sm:$0x3] %v13671_v26 }
 0x126   : > { %7122 = vst [vmem:[#allocation2 + $0x130] sm:$0x3] %v13671_v26 }
 0x127   : > { %8674 = vst [vmem:[#allocation2 + $0x130] sm:$0x3] %v13671_v26 }
 0x12b   : > { %1768 = vmatmul.mubr.bf16.gmra.mrb[36].mxu0 %v13582_v54 }
 0x12c   : > { %1905 = vmatmul.mubr.bf16.gmra.mrb[32].mxu1 %v13594_v16  ;;  %1773 = vmatprep.mubr.bf16.mxu0 %v13598_v20 }
 0x12d   : > { %1912 = vmatprep.mubr.bf16.mxu1 %v13596_v18 }
 0x133   : > { %1774 = vmatmul.mubr.bf16.gmra.mrb[40].mxu0 %v13596_v18 }
 0x134   : > { %1913 = vmatmul.mubr.bf16.gmra.mrb[36].mxu1 %v13607_v30  ;;  %1781 = vmatprep.mubr.bf16.mxu0 %v13611_v35 }
 0x135   : > { %1918 = vmatprep.mubr.bf16.mxu1 %v13609_v34 }
 0x13b   : > { %1782 = vmatmul.mubr.bf16.gmra.mrb[44].mxu0 %v13609_v34 }
 0x13c   : > { %1919 = vmatmul.mubr.bf16.gmra.mrb[40].mxu1 %v13617_v47  ;;  %1787 = vmatprep.mubr.bf16.mxu0 %v13621_v49 }
 0x13d   : > { %1926 = vmatprep.mubr.bf16.mxu1 %v13619_v48 }
 0x143   : > { %1788 = vmatmul.mubr.bf16.gmra.mrb[48].mxu0 %v13619_v48 }
 0x144   : > { %1927 = vmatmul.mubr.bf16.gmra.mrb[44].mxu1 %v13627_v63  ;;  %1795 = vmatprep.mubr.bf16.mxu0 %v13631_v2 }
 0x145   : > { %1932 = vmatprep.mubr.bf16.mxu1 %v13629_v1 }
 0x14b   : > { %1796 = vmatmul.mubr.bf16.gmra.mrb[52].mxu0 %v13629_v1 }
 0x14c   : > { %1933 = vmatmul.mubr.bf16.gmra.mrb[48].mxu1 %v13637_v15  ;;  %1801 = vmatprep.mubr.bf16.mxu0 %v13641_v23 }
 0x14d   : > { %1940 = vmatprep.mubr.bf16.mxu1 %v13639_v22 }
 0x153   : > { %1802 = vmatmul.mubr.bf16.gmra.mrb[56].mxu0 %v13639_v22 }
 0x154   : > { %1941 = vmatmul.mubr.bf16.gmra.mrb[52].mxu1 %v13647_v39  ;;  %1809 = vmatprep.mubr.bf16.mxu0 %v13651_v44 }
 0x155   : > { %1946 = vmatprep.mubr.bf16.mxu1 %v13649_v43 }
 0x15b   : > { %1810 = vmatmul.mubr.bf16.gmra.mrb[60].mxu0 %v13649_v43 }
 0x15c   : > { %1947 = vmatmul.mubr.bf16.gmra.mrb[56].mxu1 %v13657_v53  ;;  %1993 = vmatprep.mubr.bf16.mxu0 %v13479_v11  ;;  %v12438_v11 = vld [vmem:[#allocation4 + $0x210] sm:$0xff]  }
 0x15d   : > { %1954 = vmatprep.mubr.bf16.mxu1 %v13659_v56 }
 0x163   : > { %1994 = vmatmul.mubr.bf16.vlgmr.msra.gmra.mrb[64].mxu0 %v13459_v59  ;;  %v13691_v59 = vld [vmem:[#allocation2 + $0x52] sm:$0xff] }
 0x164   : > { %1955 = vmatmul.mubr.bf16.gmra.mrb[60].mxu1 %v13667_v9  ;;  %12057 = vmatpush3.bf16.msra.mxu0 %v13600_v21  ;;  %2854 = vst [vmem:[#allocation2 + $0x58] sm:$0x3] %v13671_v26  ;;  %2853 = vst [vmem:[#allocation2 + $0x50] sm:$0xff] %v13671_v26  ;;  %v13705_v21 = vld [vmem:[#allocation2 + $0x62] sm:$0xff] }
 0x165   : > { %2138 = vmatprep.mubr.bf16.mxu1 %v13471_v5  ;;  %2001 = vmatprep.mubr.bf16.mxu0 %v13500_v29  ;;  %5517 = vst [vmem:[#allocation2 + $0x58] sm:$0x3] %v13671_v26  ;;  %v12440_v29 = vld [vmem:[#allocation4 + $0x220] sm:$0xff]   ;;  %2855 = vst [vmem:[#allocation2 + $0x60] sm:$0xff] %v13671_v26 }
 0x166   : > { %12058 = vmatprep.subr.bf16.mxu0 %v12437_v10  ;;  %7095 = vst [vmem:[#allocation2 + $0x58] sm:$0x3] %v13671_v26  ;;  %2856 = vst [vmem:[#allocation2 + $0x68] sm:$0xff] %v13671_v26 }
 0x167   : > { %8647 = vst [vmem:[#allocation2 + $0x58] sm:$0x3] %v13671_v26 }
 0x168   : > { %12059 = vmatpush3.bf16.msra.mxu0 %v12437_v10  ;;  %v13805_v10 = vld [vmem:[#allocation2 + $0x122] sm:$0xff] }
 0x169   : > { %12060 = vmatprep.subr.bf16.mxu0 %v12438_v11  ;;  %v1089_v24 = vpack.c.bf16 %v13807_v14, %v13805_v10  ;;  %8672 = vst [vmem:[#allocation2 + $0x120] sm:$0xff] %v13671_v26  ;;  %8673 = vst [vmem:[#allocation2 + $0x128] sm:$0xff] %v13671_v26 }
 0x16b   : > { %2002 = vmatmul.mubr.bf16.gmra.mrb[68].mxu0 %v13471_v5  ;;  %v13714_v5 = vld [vmem:[#allocation2 + $0x82] sm:$0xff] }
 0x16c   : > { %2139 = vmatmul.mubr.bf16.vlgmr.msra.gmra.mrb[64].mxu1 %v13468_v3  ;;  %2007 = vmatprep.mubr.bf16.mxu0 %v13516_v40  ;;  %v13712_v3 = vld [vmem:[#allocation2 + $0x7a] sm:$0xff]  ;;  %2860 = vst [vmem:[#allocation2 + $0x88] sm:$0x3] %v13671_v26  ;;  %v12442_v40 = vld [vmem:[#allocation4 + $0x230] sm:$0xff]  }
 0x16d   : > { %2146 = vmatprep.mubr.bf16.mxu1 %v13483_v13  ;;  %12061 = vmatpush3.bf16.msra.mxu0 %v12438_v11  ;;  %2858 = vst [vmem:[#allocation2 + $0x78] sm:$0xff] %v13671_v26  ;;  %2859 = vst [vmem:[#allocation2 + $0x80] sm:$0xff] %v13671_v26  ;;  %v13833_v11 = vld [vmem:[#allocation2 + $0x152] sm:$0xff] }
 0x16e   : > { %12062 = vmatprep.subr.bf16.mxu0 %v12439_v38  ;;  %5523 = vst [vmem:[#allocation2 + $0x88] sm:$0x3] %v13671_v26  ;;  %8678 = vst [vmem:[#allocation2 + $0x150] sm:$0xff] %v13671_v26 }
 0x16f   : > { %7101 = vst [vmem:[#allocation2 + $0x88] sm:$0x3] %v13671_v26 }
 0x170   : > { %8653 = vst [vmem:[#allocation2 + $0x88] sm:$0x3] %v13671_v26 }
 0x171   : > { %12063 = vmatpush3.bf16.msra.mxu0 %v12439_v38  ;;  %v13835_v38 = vld [vmem:[#allocation2 + $0x15a] sm:$0xff] }
 0x172   : > { %12064 = vmatprep.subr.bf16.mxu0 %v12440_v29  ;;  %2887 = vst [vmem:[#allocation2 + $0x160] sm:$0x3] %v13671_v26  ;;  %8679 = vst [vmem:[#allocation2 + $0x158] sm:$0xff] %v13671_v26 }
 0x173   : > { %2008 = vmatmul.mubr.bf16.gmra.mrb[72].mxu0 %v13483_v13  ;;  %v13738_v13 = vld [vmem:[#allocation2 + $0xb2] sm:$0xff]  ;;  %5550 = vst [vmem:[#allocation2 + $0x160] sm:$0x3] %v13671_v26 }
 0x174   : > { %2147 = vmatmul.mubr.bf16.gmra.mrb[68].mxu1 %v13481_v12  ;;  %2015 = vmatprep.mubr.bf16.mxu0 %v13534_v57  ;;  %v13736_v12 = vld [vmem:[#allocation2 + $0xaa] sm:$0xff]  ;;  %v12443_v57 = vld [vmem:[#allocation4 + $0x238] sm:$0xff]   ;;  %2866 = vst [vmem:[#allocation2 + $0xb8] sm:$0x3] %v13671_v26  ;;  %7128 = vst [vmem:[#allocation2 + $0x160] sm:$0x3] %v13671_v26 }
 0x175   : > { %2152 = vmatprep.mubr.bf16.mxu1 %v13508_v32  ;;  %12065 = vmatpush3.bf16.msra.mxu0 %v12440_v29  ;;  %2864 = vst [vmem:[#allocation2 + $0xa8] sm:$0xff] %v13671_v26  ;;  %2865 = vst [vmem:[#allocation2 + $0xb0] sm:$0xff] %v13671_v26  ;;  %v1091_v29 = vpack.c.bf16 %v13835_v38, %v13833_v11 }
 0x176   : > { %12066 = vmatprep.subr.bf16.mxu0 %v12441_v46  ;;  %5529 = vst [vmem:[#allocation2 + $0xb8] sm:$0x3] %v13671_v26  ;;  %8680 = vst [vmem:[#allocation2 + $0x160] sm:$0x3] %v13671_v26 }
 0x177   : > { %7107 = vst [vmem:[#allocation2 + $0xb8] sm:$0x3] %v13671_v26 }
 0x178   : > { %8659 = vst [vmem:[#allocation2 + $0xb8] sm:$0x3] %v13671_v26 }
 0x179   : > { %12067 = vmatpush3.bf16.msra.mxu0 %v12441_v46 }
 0x17a   : > { %12068 = vmatprep.subr.bf16.mxu0 %v12442_v40 }
 0x17b   : > { %2016 = vmatmul.mubr.bf16.gmra.mrb[76].mxu0 %v13508_v32  ;;  %v13762_v32 = vld [vmem:[#allocation2 + $0xe2] sm:$0xff] }
 0x17c   : > { %2153 = vmatmul.mubr.bf16.gmra.mrb[72].mxu1 %v13506_v31  ;;  %2021 = vmatprep.mubr.bf16.mxu0 %v13552_v17  ;;  %v13760_v31 = vld [vmem:[#allocation2 + $0xda] sm:$0xff]  ;;  %2872 = vst [vmem:[#allocation2 + $0xe8] sm:$0x3] %v13671_v26  ;;  %v13777_v17 = vld [vmem:[#allocation2 + $0xf2] sm:$0xff] }
 0x17d   : > { %2160 = vmatprep.mubr.bf16.mxu1 %v13520_v42  ;;  %12069 = vmatpush3.bf16.msra.mxu0 %v12442_v40  ;;  %2870 = vst [vmem:[#allocation2 + $0xd8] sm:$0xff] %v13671_v26  ;;  %2871 = vst [vmem:[#allocation2 + $0xe0] sm:$0xff] %v13671_v26  ;;  %v1087_v7 = vpack.c.bf16 %v13779_v6, %v13777_v17 }
 0x17e   : > { %12070 = vmatprep.subr.bf16.mxu0 %v12443_v57  ;;  %5535 = vst [vmem:[#allocation2 + $0xe8] sm:$0x3] %v13671_v26  ;;  %8666 = vst [vmem:[#allocation2 + $0xf0] sm:$0xff] %v13671_v26 }
 0x17f   : > { %7113 = vst [vmem:[#allocation2 + $0xe8] sm:$0x3] %v13671_v26  ;;  %8667 = vst [vmem:[#allocation2 + $0xf8] sm:$0xff] %v13671_v26 }
 0x180   : > { %8665 = vst [vmem:[#allocation2 + $0xe8] sm:$0x3] %v13671_v26 }
 0x181   : > { %12071 = vmatpush3.bf16.msra.mxu0 %v12443_v57 }
 0x183   : > { %2022 = vmatmul.mubr.bf16.gmra.mrb[80].mxu0 %v13520_v42  ;;  %v13788_v42 = vld [vmem:[#allocation2 + $0x112] sm:$0xff] }
 0x184   : > { %2161 = vmatmul.mubr.bf16.gmra.mrb[76].mxu1 %v13518_v41  ;;  %2029 = vmatprep.mubr.bf16.mxu0 %v13566_v33  ;;  %v13786_v41 = vld [vmem:[#allocation2 + $0x10a] sm:$0xff]  ;;  %2878 = vst [vmem:[#allocation2 + $0x118] sm:$0x3] %v13671_v26 }
 0x185   : > { %2166 = vmatprep.mubr.bf16.mxu1 %v13538_v61  ;;  %v1088_v33 = vpack.c.bf16 %v13788_v42, %v13786_v41  ;;  %8669 = vst [vmem:[#allocation2 + $0x108] sm:$0xff] %v13671_v26  ;;  %8670 = vst [vmem:[#allocation2 + $0x110] sm:$0xff] %v13671_v26 }
 0x186   : > { %5541 = vst [vmem:[#allocation2 + $0x118] sm:$0x3] %v13671_v26 }
 0x187   : > { %7119 = vst [vmem:[#allocation2 + $0x118] sm:$0x3] %v13671_v26 }
 0x188   : > { %8671 = vst [vmem:[#allocation2 + $0x118] sm:$0x3] %v13671_v26 }
 0x18b   : > { %2030 = vmatmul.mubr.bf16.gmra.mrb[84].mxu0 %v13538_v61  ;;  %v13816_v61 = vld [vmem:[#allocation2 + $0x142] sm:$0xff] }
 0x18c   : > { %2167 = vmatmul.mubr.bf16.gmra.mrb[80].mxu1 %v13536_v60  ;;  %2035 = vmatprep.mubr.bf16.mxu0 %v13580_v52  ;;  %v13814_v60 = vld [vmem:[#allocation2 + $0x13a] sm:$0xff]  ;;  %2884 = vst [vmem:[#allocation2 + $0x148] sm:$0x3] %v13671_v26 }
 0x18d   : > { %2174 = vmatprep.mubr.bf16.mxu1 %v13556_v0  ;;  %v1090_v52 = vpack.c.bf16 %v13816_v61, %v13814_v60  ;;  %8675 = vst [vmem:[#allocation2 + $0x138] sm:$0xff] %v13671_v26  ;;  %8676 = vst [vmem:[#allocation2 + $0x140] sm:$0xff] %v13671_v26 }
 0x18e   : > { %5547 = vst [vmem:[#allocation2 + $0x148] sm:$0x3] %v13671_v26 }
 0x18f   : > { %7125 = vst [vmem:[#allocation2 + $0x148] sm:$0x3] %v13671_v26 }
 0x190   : > { %8677 = vst [vmem:[#allocation2 + $0x148] sm:$0x3] %v13671_v26 }
 0x193   : > { %2036 = vmatmul.mubr.bf16.gmra.mrb[88].mxu0 %v13556_v0  ;;  %v13844_v0 = vld [vmem:[#allocation2 + $0x172] sm:$0xff] }
 0x194   : > { %2175 = vmatmul.mubr.bf16.gmra.mrb[84].mxu1 %v13554_v19  ;;  %2043 = vmatprep.mubr.bf16.mxu0 %v13594_v16  ;;  %v13842_v19 = vld [vmem:[#allocation2 + $0x16a] sm:$0xff]  ;;  %2890 = vst [vmem:[#allocation2 + $0x178] sm:$0x3] %v13671_v26 }
 0x195   : > { %2180 = vmatprep.mubr.bf16.mxu1 %v13571_v37  ;;  %v1092_v16 = vpack.c.bf16 %v13844_v0, %v13842_v19  ;;  %8681 = vst [vmem:[#allocation2 + $0x168] sm:$0xff] %v13671_v26  ;;  %8682 = vst [vmem:[#allocation2 + $0x170] sm:$0xff] %v13671_v26 }
 0x196   : > { %5553 = vst [vmem:[#allocation2 + $0x178] sm:$0x3] %v13671_v26 }
 0x197   : > { %7131 = vst [vmem:[#allocation2 + $0x178] sm:$0x3] %v13671_v26 }
 0x198   : > { %8683 = vst [vmem:[#allocation2 + $0x178] sm:$0x3] %v13671_v26 }
 0x19b   : > { %2044 = vmatmul.mubr.bf16.gmra.mrb[92].mxu0 %v13571_v37 }
 0x19c   : > { %2181 = vmatmul.mubr.bf16.gmra.mrb[88].mxu1 %v13569_v36  ;;  %2049 = vmatprep.mubr.bf16.mxu0 %v13607_v30 }
 0x19d   : > { %2188 = vmatprep.mubr.bf16.mxu1 %v13584_v55 }
 0x1a3   : > { %2050 = vmatmul.mubr.bf16.gmra.mrb[96].mxu0 %v13584_v55 }
 0x1a4   : > { %2189 = vmatmul.mubr.bf16.gmra.mrb[92].mxu1 %v13582_v54  ;;  %2057 = vmatprep.mubr.bf16.mxu0 %v13617_v47 }
 0x1a5   : > { %2194 = vmatprep.mubr.bf16.mxu1 %v13598_v20 }
 0x1ab   : > { %2058 = vmatmul.mubr.bf16.gmra.mrb[100].mxu0 %v13598_v20 }
 0x1ac   : > { %2195 = vmatmul.mubr.bf16.gmra.mrb[96].mxu1 %v13596_v18  ;;  %2063 = vmatprep.mubr.bf16.mxu0 %v13627_v63 }
 0x1ad   : > { %2202 = vmatprep.mubr.bf16.mxu1 %v13611_v35 }
 0x1ae   : > { %v10782_v36 = vpop.f32.mrb[0].mxu0 }
 0x1af   : > { %v10783_v37 = vpop.f32.mrb[1].mxu0 }
 0x1b0   : > { %v10784_v54 = vadd.f32 %v10783_v37, %v10782_v36  ;;  %v10785_v55 = vpop.f32.mrb[2].mxu0 }
 0x1b1   : > { %v10786_v30 = vpop.f32.mrb[3].mxu0 }
 0x1b2   : > { %v10787_v18 = vadd.f32 %v10786_v30, %v10785_v55 }
 0x1b3   : > { %2064 = vmatmul.mubr.bf16.gmra.mrb[104].mxu0 %v13611_v35 }
 0x1b4   : > { %2203 = vmatmul.mubr.bf16.gmra.mrb[100].mxu1 %v13609_v34  ;;  %2071 = vmatprep.mubr.bf16.mxu0 %v13637_v15 }
 0x1b5   : > { %2208 = vmatprep.mubr.bf16.mxu1 %v13621_v49 }
 0x1bb   : > { %2072 = vmatmul.mubr.bf16.gmra.mrb[108].mxu0 %v13621_v49 }
 0x1bc   : > { %2209 = vmatmul.mubr.bf16.gmra.mrb[104].mxu1 %v13619_v48  ;;  %2077 = vmatprep.mubr.bf16.mxu0 %v13647_v39 }
 0x1bd   : > { %2216 = vmatprep.mubr.bf16.mxu1 %v13631_v2 }
 0x1be   : > { %v10788_v34 = vpop.f32.mrb[4].mxu0 }
 0x1bf   : > { %v10894_v20 = vpop.f32.mrb[0].mxu1  ;;  %v10789_v47 = vpop.f32.mrb[5].mxu0 }
 0x1c0   : > { %v10895_v35 = vpop.f32.mrb[1].mxu1  ;;  %v10791_v26 = vpop.f32.mrb[6].mxu0 }
 0x1c1   : > { %v10896_v63 = vadd.f32 %v10895_v35, %v10894_v20  ;;  %v10897_v15 = vpop.f32.mrb[2].mxu1  ;;  %v10792_v40 = vpop.f32.mrb[7].mxu0 }
 0x1c2   : > { %v10898_v46 = vpop.f32.mrb[3].mxu1 }
 0x1c3   : > { %v10899_v57 = vadd.f32 %v10898_v46, %v10897_v15  ;;  %v13877_v36 = vadd.f32 %v10896_v63, %v10784_v54  ;;  %2078 = vmatmul.mubr.bf16.gmra.mrb[112].mxu0 %v13631_v2 }
 0x1c4   : > { %2217 = vmatmul.mubr.bf16.gmra.mrb[108].mxu1 %v13629_v1  ;;  %2085 = vmatprep.mubr.bf16.mxu0 %v13657_v53 }
 0x1c5   : > { %2222 = vmatprep.mubr.bf16.mxu1 %v13641_v23  ;;  %v13883_v48 = vadd.f32 %v10899_v57, %v10787_v18 }
 0x1c6   : > { %v10794_v39 = vpop.f32.mrb[8].mxu0 }
 0x1c7   : > { %v10900_v49 = vpop.f32.mrb[4].mxu1  ;;  %v10795_v55 = vpop.f32.mrb[9].mxu0 }
 0x1c8   : > { %v10901_v37 = vpop.f32.mrb[5].mxu1  ;;  %v10796_v20 = vadd.f32 %v10795_v55, %v10794_v39  ;;  %v10797_v34 = vpop.f32.mrb[10].mxu0 }
 0x1c9   : > { %v10903_v30 = vpop.f32.mrb[6].mxu1  ;;  %v10798_v54 = vpop.f32.mrb[11].mxu0 }
 0x1ca   : > { %v10904_v35 = vpop.f32.mrb[7].mxu1  ;;  %v10799_v47 = vadd.f32 %v10798_v54, %v10797_v34 }
 0x1cb   : > { %2086 = vmatmul.mubr.bf16.gmra.mrb[116].mxu0 %v13641_v23 }
 0x1cc   : > { %2223 = vmatmul.mubr.bf16.gmra.mrb[112].mxu1 %v13639_v22  ;;  %2091 = vmatprep.mubr.bf16.mxu0 %v13667_v9 }
 0x1cd   : > { %2230 = vmatprep.mubr.bf16.mxu1 %v13651_v44 }
 0x1ce   : > { %v10800_v2 = vpop.f32.mrb[12].mxu0 }
 0x1cf   : > { %v10906_v1 = vpop.f32.mrb[8].mxu1  ;;  %v10801_v18 = vpop.f32.mrb[13].mxu0 }
 0x1d0   : > { %v10907_v53 = vpop.f32.mrb[9].mxu1  ;;  %v10803_v26 = vpop.f32.mrb[14].mxu0 }
 0x1d1   : > { %v10908_v63 = vadd.f32 %v10907_v53, %v10906_v1  ;;  %v10909_v15 = vpop.f32.mrb[10].mxu1  ;;  %v10804_v40 = vpop.f32.mrb[15].mxu0  ;;  %v1080_v53 = vpack.c.bf16 %v13691_v59, %v13475_v8  ;;  %v1082_v8 = vpack.c.bf16 %v13714_v5, %v13712_v3 }
 0x1d2   : > { %v10910_v46 = vpop.f32.mrb[11].mxu1 }
 0x1d3   : > { %v10911_v57 = vadd.f32 %v10910_v46, %v10909_v15  ;;  %v13889_v49 = vadd.f32 %v10908_v63, %v10796_v20  ;;  %2092 = vmatmul.mubr.bf16.gmra.mrb[120].mxu0 %v13651_v44  ;;  %v1079_v20 = vpack.c.bf16 %v13686_v28, %v13684_v27  ;;  %v1081_v27 = vpack.c.bf16 %v13707_v45, %v13705_v21 }
 0x1d4   : > { %2231 = vmatmul.mubr.bf16.gmra.mrb[116].mxu1 %v13649_v43  ;;  %2099 = vmatprep.mubr.bf16.mxu0 %v13669_v25  ;;  %v1083_v21 = vpack.c.bf16 %v13731_v51, %v13729_v50 }
 0x1d5   : > { %2236 = vmatprep.mubr.bf16.mxu1 %v13661_v4  ;;  %v13895_v22 = vadd.f32 %v10911_v57, %v10799_v47 }
 0x1d6   : > { %v10806_v9 = vpop.f32.mrb[16].mxu0 }
 0x1d7   : > { %v10912_v23 = vpop.f32.mrb[12].mxu1  ;;  %v10807_v37 = vpop.f32.mrb[17].mxu0 }
 0x1d8   : > { %v10913_v39 = vpop.f32.mrb[13].mxu1  ;;  %v10808_v30 = vadd.f32 %v10807_v37, %v10806_v9  ;;  %v10809_v34 = vpop.f32.mrb[18].mxu0 }
 0x1d9   : > { %v10915_v55 = vpop.f32.mrb[14].mxu1  ;;  %v10810_v43 = vpop.f32.mrb[19].mxu0 }
 0x1da   : > { %v10916_v35 = vpop.f32.mrb[15].mxu1  ;;  %v10811_v54 = vadd.f32 %v10810_v43, %v10809_v34 }
 0x1db   : > { %2100 = vmatmul.mubr.bf16.gmra.mrb[124].mxu0 %v13661_v4 }
 0x1dc   : > { %2237 = vmatmul.mubr.bf16.gmra.mrb[120].mxu1 %v13659_v56  ;;  %12072 = vmatprep.mubr.bf16.mxu0 %v1079_v20 }
 0x1de   : > { %v10812_v47 = vpop.f32.mrb[20].mxu0 }
 0x1df   : > { %v10918_v44 = vpop.f32.mrb[16].mxu1  ;;  %v10813_v2 = vpop.f32.mrb[21].mxu0  ;;  %v1085_v47 = vpack.c.bf16 %v13755_v62, %v13753_v58 }
 0x1e0   : > { %v10919_v1 = vpop.f32.mrb[17].mxu1  ;;  %v10815_v15 = vpop.f32.mrb[22].mxu0 }
 0x1e1   : > { %v10920_v18 = vadd.f32 %v10919_v1, %v10918_v44  ;;  %v10921_v63 = vpop.f32.mrb[18].mxu1  ;;  %v10816_v26 = vpop.f32.mrb[23].mxu0 }
 0x1e2   : > { %v10922_v28 = vpop.f32.mrb[19].mxu1 }
 0x1e3   : > { %v10923_v46 = vadd.f32 %v10922_v28, %v10921_v63  ;;  %v13905_v56 = vadd.f32 %v10920_v18, %v10808_v30  ;;  %12073 = vmatmul.mubr.bf16.vlgmr.msra.gmra.mrb[128].mxu0 %v1080_v53 }
 0x1e4   : > { %12076 = vmatprep.mubr.bf16.mxu0 %v1081_v27 }
 0x1e5   : > { %v13907_v4 = vadd.f32 %v10923_v46, %v10811_v54  ;;  %v1084_v54 = vpack.c.bf16 %v13738_v13, %v13736_v12  ;;  %v1086_v12 = vpack.c.bf16 %v13762_v32, %v13760_v31 }
 0x1e6   : > { %v10818_v57 = vpop.f32.mrb[24].mxu0 }
 0x1e7   : > { %v10924_v40 = vpop.f32.mrb[20].mxu1  ;;  %v10819_v9 = vpop.f32.mrb[25].mxu0 }
 0x1e8   : > { %v10925_v23 = vpop.f32.mrb[21].mxu1  ;;  %v10820_v39 = vadd.f32 %v10819_v9, %v10818_v57  ;;  %v10821_v37 = vpop.f32.mrb[26].mxu0  ;;  %v12444_v40 = vld [vmem:[#allocation6] sm:$0xff]  }
 0x1e9   : > { %v10927_v59 = vpop.f32.mrb[22].mxu1  ;;  %v10822_v55 = vpop.f32.mrb[27].mxu0  ;;  %12104 = vmatprep.subr.bf16.mxu1 %v12444_v40 }
 0x1ea   : > { %v10928_v45 = vpop.f32.mrb[23].mxu1  ;;  %v10823_v30 = vadd.f32 %v10822_v55, %v10821_v37  ;;  %12105 = vmatpush3.bf16.msra.mxu1 %v12444_v40 }
 0x1eb   : > { %12077 = vmatmul.mubr.bf16.gmra.mrb[132].mxu0 %v1082_v8 }
 0x1ec   : > { %12080 = vmatprep.mubr.bf16.mxu0 %v1083_v21 }
 0x1ee   : > { %v10824_v20 = vpop.f32.mrb[28].mxu0 }
 0x1ef   : > { %v10930_v34 = vpop.f32.mrb[24].mxu1  ;;  %v10825_v43 = vpop.f32.mrb[29].mxu0 }
 0x1f0   : > { %v10931_v35 = vpop.f32.mrb[25].mxu1  ;;  %v10827_v5 = vpop.f32.mrb[30].mxu0 }
 0x1f1   : > { %v10932_v44 = vadd.f32 %v10931_v35, %v10930_v34  ;;  %v10933_v3 = vpop.f32.mrb[26].mxu1  ;;  %v10828_v50 = vpop.f32.mrb[31].mxu0 }
 0x1f2   : > { %v10934_v1 = vpop.f32.mrb[27].mxu1 }
 0x1f3   : > { %v10935_v51 = vadd.f32 %v10934_v1, %v10933_v3  ;;  %v13917_v2 = vadd.f32 %v10932_v44, %v10820_v39  ;;  %12081 = vmatmul.mubr.bf16.gmra.mrb[136].mxu0 %v1084_v54  ;;  %v12445_v3 = vld [vmem:[#allocation6 + $0x8] sm:$0xff]  }
 0x1f4   : > { %12084 = vmatprep.mubr.bf16.mxu0 %v1085_v47  ;;  %12106 = vmatprep.subr.bf16.mxu1 %v12445_v3 }
 0x1f5   : > { %v13919_v53 = vadd.f32 %v10935_v51, %v10823_v30  ;;  %12107 = vmatpush3.bf16.msra.mxu1 %v12445_v3  ;;  %v1077_v51 = vld [vmem:[#allocation2 + $0x19a] sm:$0xff] }
 0x1f6   : > { %v10830_v63 = vpop.f32.mrb[32].mxu0 }
 0x1f7   : > { %v10936_v18 = vpop.f32.mrb[28].mxu1  ;;  %v10831_v27 = vpop.f32.mrb[33].mxu0 }
 0x1f8   : > { %v10937_v15 = vpop.f32.mrb[29].mxu1  ;;  %v10832_v28 = vadd.f32 %v10831_v27, %v10830_v63  ;;  %v10833_v26 = vpop.f32.mrb[34].mxu0  ;;  %v1078_v18 = vld [vmem:[#allocation2 + $0x1a2] sm:$0xff] }
 0x1f9   : > { %v10939_v13 = vpop.f32.mrb[30].mxu1  ;;  %v10834_v62 = vpop.f32.mrb[35].mxu0  ;;  %v1094_v63 = vpack.c.bf16 %v1078_v18, %v1077_v51 }
 0x1fa   : > { %v10940_v58 = vpop.f32.mrb[31].mxu1  ;;  %v10835_v46 = vadd.f32 %v10834_v62, %v10833_v26 }
 0x1fb   : > { %12085 = vmatmul.mubr.bf16.gmra.mrb[140].mxu0 %v1086_v12  ;;  %v12446_v58 = vld [vmem:[#allocation6 + $0x10] sm:$0xff]  }
 0x1fc   : > { %12088 = vmatprep.mubr.bf16.mxu0 %v1087_v7  ;;  %12108 = vmatprep.subr.bf16.mxu1 %v12446_v58 }
 0x1fd   : > { %12109 = vmatpush3.bf16.msra.mxu1 %v12446_v58 }
 0x1fe   : > { %v10836_v23 = vpop.f32.mrb[36].mxu0 }
 0x1ff   : > { %v10942_v57 = vpop.f32.mrb[32].mxu1  ;;  %v10837_v8 = vpop.f32.mrb[37].mxu0 }
 0x200   : > { %v10943_v9 = vpop.f32.mrb[33].mxu1  ;;  %v10839_v32 = vpop.f32.mrb[38].mxu0 }
 0x201   : > { %v10944_v59 = vadd.f32 %v10943_v9, %v10942_v57  ;;  %v10945_v31 = vpop.f32.mrb[34].mxu1  ;;  %v10840_v37 = vpop.f32.mrb[39].mxu0 }
 0x202   : > { %v10946_v39 = vpop.f32.mrb[35].mxu1 }
 0x203   : > { %v10947_v21 = vadd.f32 %v10946_v39, %v10945_v31  ;;  %v13926_v45 = vadd.f32 %v10944_v59, %v10832_v28  ;;  %12089 = vmatmul.mubr.bf16.gmra.mrb[144].mxu0 %v1088_v33 }
 0x204   : > { %12092 = vmatprep.mubr.bf16.mxu0 %v1089_v24 }
 0x205   : > { %v13934_v17 = vadd.f32 %v10947_v21, %v10835_v46 }
 0x206   : > { %v10842_v7 = vpop.f32.mrb[40].mxu0 }
 0x207   : > { %v10948_v6 = vpop.f32.mrb[36].mxu1  ;;  %v10843_v30 = vpop.f32.mrb[41].mxu0 }
 0x208   : > { %v10949_v55 = vpop.f32.mrb[37].mxu1  ;;  %v10844_v20 = vadd.f32 %v10843_v30, %v10842_v7  ;;  %v10845_v35 = vpop.f32.mrb[42].mxu0 }
 0x209   : > { %v10951_v34 = vpop.f32.mrb[38].mxu1  ;;  %v10846_v54 = vpop.f32.mrb[43].mxu0 }
 0x20a   : > { %v10952_v43 = vpop.f32.mrb[39].mxu1  ;;  %v10847_v44 = vadd.f32 %v10846_v54, %v10845_v35 }
 0x20b   : > { %12093 = vmatmul.mubr.bf16.gmra.mrb[148].mxu0 %v1090_v52 }
 0x20c   : > { %12096 = vmatprep.mubr.bf16.mxu0 %v1091_v29 }
 0x20e   : > { %v10848_v42 = vpop.f32.mrb[44].mxu0 }
 0x20f   : > { %v10954_v41 = vpop.f32.mrb[40].mxu1  ;;  %v10849_v10 = vpop.f32.mrb[45].mxu0 }
 0x210   : > { %v10955_v33 = vpop.f32.mrb[41].mxu1  ;;  %v10851_v5 = vpop.f32.mrb[46].mxu0 }
 0x211   : > { %v10956_v14 = vadd.f32 %v10955_v33, %v10954_v41  ;;  %v10957_v24 = vpop.f32.mrb[42].mxu1  ;;  %v10852_v1 = vpop.f32.mrb[47].mxu0 }
 0x212   : > { %v10958_v47 = vpop.f32.mrb[43].mxu1 }
 0x213   : > { %v10959_v50 = vadd.f32 %v10958_v47, %v10957_v24  ;;  %v13942_v60 = vadd.f32 %v10956_v14, %v10844_v20  ;;  %12097 = vmatmul.mubr.bf16.gmra.mrb[152].mxu0 %v1092_v16  ;;  %v12447_v20 = vld [vmem:[#allocation6 + $0x18] sm:$0xff]  }
 0x214   : > { %12100 = vmatprep.mubr.bf16.mxu0 %v13669_v25  ;;  %12110 = vmatprep.subr.bf16.mxu1 %v12447_v20 }
 0x215   : > { %v13948_v61 = vadd.f32 %v10959_v50, %v10847_v44  ;;  %12111 = vmatpush3.bf16.msra.mxu1 %v12447_v20 }
 0x216   : > { %v10854_v11 = vpop.f32.mrb[48].mxu0 }
 0x217   : > { %v10960_v52 = vpop.f32.mrb[44].mxu1  ;;  %v10855_v29 = vpop.f32.mrb[49].mxu0 }
 0x218   : > { %v10961_v38 = vpop.f32.mrb[45].mxu1  ;;  %v10856_v27 = vadd.f32 %v10855_v29, %v10854_v11  ;;  %v10857_v12 = vpop.f32.mrb[50].mxu0 }
 0x219   : > { %v10963_v15 = vpop.f32.mrb[46].mxu1  ;;  %v10858_v28 = vpop.f32.mrb[51].mxu0 }
 0x21a   : > { %v10964_v13 = vpop.f32.mrb[47].mxu1  ;;  %v10859_v26 = vadd.f32 %v10858_v28, %v10857_v12 }
 0x21b   : > { %12101 = vmatmul.mubr.bf16.gmra.mrb[156].mxu0 %v1094_v63 }
 0x21e   : > { %v10860_v0 = vpop.f32.mrb[52].mxu0 }
 0x21f   : > { %v10966_v19 = vpop.f32.mrb[48].mxu1  ;;  %v10861_v16 = vpop.f32.mrb[53].mxu0 }
 0x220   : > { %v10967_v25 = vpop.f32.mrb[49].mxu1  ;;  %v10863_v40 = vpop.f32.mrb[54].mxu0 }
 0x221   : > { %v10968_v62 = vadd.f32 %v10967_v25, %v10966_v19  ;;  %v10969_v46 = vpop.f32.mrb[50].mxu1  ;;  %v10864_v23 = vpop.f32.mrb[55].mxu0  ;;  %v12448_v25 = vld [vmem:[#allocation6 + $0x20] sm:$0xff]  }
 0x222   : > { %v10970_v57 = vpop.f32.mrb[51].mxu1  ;;  %12112 = vmatprep.subr.bf16.mxu1 %v12448_v25 }
 0x223   : > { %v13950_v9 = vadd.f32 %v10968_v62, %v10856_v27  ;;  %v10971_v8 = vadd.f32 %v10970_v57, %v10969_v46  ;;  %12113 = vmatpush3.bf16.msra.mxu1 %v12448_v25 }
 0x225   : > { %v13952_v59 = vadd.f32 %v10971_v8, %v10859_v26 }
 0x226   : > { %v10866_v32 = vpop.f32.mrb[56].mxu0 }
 0x227   : > { %v10972_v31 = vpop.f32.mrb[52].mxu1  ;;  %v10867_v37 = vpop.f32.mrb[57].mxu0 }
 0x228   : > { %v10973_v39 = vpop.f32.mrb[53].mxu1  ;;  %v10868_v6 = vadd.f32 %v10867_v37, %v10866_v32  ;;  %v10869_v7 = vpop.f32.mrb[58].mxu0 }
 0x229   : > { %v10975_v21 = vpop.f32.mrb[54].mxu1  ;;  %v10870_v30 = vpop.f32.mrb[59].mxu0 }
 0x22a   : > { %v10976_v55 = vpop.f32.mrb[55].mxu1  ;;  %v10871_v34 = vadd.f32 %v10870_v30, %v10869_v7 }
 0x22e   : > { %v10872_v43 = vpop.f32.mrb[60].mxu0 }
 0x22f   : > { %v10978_v35 = vpop.f32.mrb[56].mxu1  ;;  %v10873_v44 = vpop.f32.mrb[61].mxu0 }
 0x230   : > { %v10979_v54 = vpop.f32.mrb[57].mxu1  ;;  %v10875_v42 = vpop.f32.mrb[62].mxu0 }
 0x231   : > { %v10980_v3 = vadd.f32 %v10979_v54, %v10978_v35  ;;  %v10981_v41 = vpop.f32.mrb[58].mxu1  ;;  %v10876_v10 = vpop.f32.mrb[63].mxu0 }
 0x232   : > { %v10982_v33 = vpop.f32.mrb[59].mxu1 }
 0x233   : > { %v13954_v14 = vadd.f32 %v10980_v3, %v10868_v6  ;;  %v10983_v24 = vadd.f32 %v10982_v33, %v10981_v41  ;;  %v12449_v3 = vld [vmem:[#allocation6 + $0x28] sm:$0xff]  }
 0x234   : > { %12114 = vmatprep.subr.bf16.mxu1 %v12449_v3 }
 0x235   : > { %v13956_v5 = vadd.f32 %v10983_v24, %v10871_v34  ;;  %v1029_v24 = vld [vmem:[#allocation2 + $0x199] sm:$0xff]  ;;  %12115 = vmatpush3.bf16.msra.mxu1 %v12449_v3 }
 0x236   : > { %v11006_v1 = vpop.f32.mrb[64].mxu0 }
 0x237   : > { %v10984_v47 = vpop.f32.mrb[60].mxu1  ;;  %v11007_v51 = vpop.f32.mrb[65].mxu0 }
 0x238   : > { %v10985_v50 = vpop.f32.mrb[61].mxu1  ;;  %v11008_v52 = vadd.f32 %v11007_v51, %v11006_v1  ;;  %v11009_v11 = vpop.f32.mrb[66].mxu0  ;;  %v1030_v47 = vld [vmem:[#allocation2 + $0x1a1] sm:$0xff] }
 0x239   : > { %v10987_v18 = vpop.f32.mrb[62].mxu1  ;;  %v11010_v29 = vpop.f32.mrb[67].mxu0  ;;  %v13968_v1 = vld [vmem:[#allocation3 + $0xf0] sm:$0xff] }
 0x23a   : > { %v10988_v38 = vpop.f32.mrb[63].mxu1  ;;  %v1996_v63 = vadd.f32 %v11008_v52, %v13877_v36  ;;  %v11011_v15 = vadd.f32 %v11010_v29, %v11009_v11  ;;  %2896 = vst [vmem:[#allocation2 + $0x1a8] sm:$0x3] %v13968_v1  ;;  %8687 = vst [vmem:[#allocation2 + $0x198] sm:$0xff] %v13968_v1  ;;  %v998_v50 = vpack.c.bf16 %v13968_v1, %v13968_v1 }
 0x23b   : > { %8688 = vst [vmem:[#allocation2 + $0x1a0] sm:$0xff] %v13968_v1  ;;  %5559 = vst [vmem:[#allocation2 + $0x1a8] sm:$0x3] %v13968_v1 }
 0x23c   : > { %v1999_v27 = vadd.f32 %v11011_v15, %v13883_v48  ;;  %7137 = vst [vmem:[#allocation2 + $0x1a8] sm:$0x3] %v13968_v1 }
 0x23d   : > { %8689 = vst [vmem:[#allocation2 + $0x1a8] sm:$0x3] %v13968_v1 }
 0x23e   : > { %v11012_v13 = vpop.f32.mrb[68].mxu0 }
 0x23f   : > { %v11118_v12 = vpop.f32.mrb[64].mxu1  ;;  %v11013_v26 = vpop.f32.mrb[69].mxu0 }
 0x240   : > { %v11119_v28 = vpop.f32.mrb[65].mxu1  ;;  %v11015_v0 = vpop.f32.mrb[70].mxu0  ;;  %v12450_v26 = vld [vmem:[#allocation6 + $0x30] sm:$0xff]  }
 0x241   : > { %v11120_v58 = vadd.f32 %v11119_v28, %v11118_v12  ;;  %v11121_v19 = vpop.f32.mrb[66].mxu1  ;;  %v11016_v62 = vpop.f32.mrb[71].mxu0  ;;  %12116 = vmatprep.subr.bf16.mxu1 %v12450_v26 }
 0x242   : > { %v11122_v16 = vpop.f32.mrb[67].mxu1  ;;  %12117 = vmatpush3.bf16.msra.mxu1 %v12450_v26 }
 0x243   : > { %v11123_v46 = vadd.f32 %v11122_v16, %v11121_v19  ;;  %v13960_v40 = vadd.f32 %v11120_v58, %v1996_v63 }
 0x245   : > { %v13962_v57 = vadd.f32 %v11123_v46, %v1999_v27 }
 0x246   : > { %v11018_v23 = vpop.f32.mrb[72].mxu0 }
 0x247   : > { %v11124_v36 = vpop.f32.mrb[68].mxu1  ;;  %v11019_v8 = vpop.f32.mrb[73].mxu0 }
 0x248   : > { %v11125_v48 = vpop.f32.mrb[69].mxu1  ;;  %v11020_v32 = vadd.f32 %v11019_v8, %v11018_v23  ;;  %v11021_v39 = vpop.f32.mrb[74].mxu0 }
 0x249   : > { %v11127_v31 = vpop.f32.mrb[70].mxu1  ;;  %v11022_v21 = vpop.f32.mrb[75].mxu0  ;;  %v12451_v48 = vld [vmem:[#allocation6 + $0x38] sm:$0xff]  }
 0x24a   : > { %v11128_v37 = vpop.f32.mrb[71].mxu1  ;;  %v2010_v6 = vadd.f32 %v11020_v32, %v13889_v49  ;;  %v11023_v7 = vadd.f32 %v11022_v21, %v11021_v39  ;;  %v1046_v49 = vpack.c.bf16 %v1030_v47, %v1029_v24  ;;  %12118 = vmatprep.subr.bf16.mxu1 %v12451_v48 }
 0x24b   : > { %12119 = vmatpush3.bf16.msra.mxu1 %v12451_v48 }
 0x24c   : > { %v2013_v55 = vadd.f32 %v11023_v7, %v13895_v22  ;;  %2244 = vmatprep.mubr.bf16.mxu1 %v1046_v49 }
 0x24d   : > { %2245 = vmatmul.mubr.bf16.gmra.mrb[124].mxu1 %v998_v50 }
 0x24e   : > { %v11024_v34 = vpop.f32.mrb[76].mxu0 }
 0x24f   : > { %v11130_v30 = vpop.f32.mrb[72].mxu1  ;;  %v11025_v35 = vpop.f32.mrb[77].mxu0 }
 0x250   : > { %v11131_v20 = vpop.f32.mrb[73].mxu1  ;;  %v11027_v44 = vpop.f32.mrb[78].mxu0 }
 0x251   : > { %v11132_v43 = vadd.f32 %v11131_v20, %v11130_v30  ;;  %v11133_v54 = vpop.f32.mrb[74].mxu1  ;;  %v11028_v42 = vpop.f32.mrb[79].mxu0 }
 0x252   : > { %v11134_v41 = vpop.f32.mrb[75].mxu1 }
 0x253   : > { %v11135_v33 = vadd.f32 %v11134_v41, %v11133_v54  ;;  %v13966_v10 = vadd.f32 %v11132_v43, %v2010_v6 }
 0x255   : > { %v13973_v22 = vadd.f32 %v11135_v33, %v2013_v55 }
 0x256   : > { %v11030_v18 = vpop.f32.mrb[80].mxu0 }
 0x257   : > { %v11136_v51 = vpop.f32.mrb[76].mxu1  ;;  %v11031_v11 = vpop.f32.mrb[81].mxu0 }
 0x258   : > { %v11137_v52 = vpop.f32.mrb[77].mxu1  ;;  %v11032_v29 = vadd.f32 %v11031_v11, %v11030_v18  ;;  %v11033_v63 = vpop.f32.mrb[82].mxu0 }
 0x259   : > { %v11139_v38 = vpop.f32.mrb[78].mxu1  ;;  %v11034_v27 = vpop.f32.mrb[83].mxu0 }
 0x25a   : > { %v11140_v15 = vpop.f32.mrb[79].mxu1  ;;  %v2024_v12 = vadd.f32 %v11032_v29, %v13905_v56  ;;  %v11035_v13 = vadd.f32 %v11034_v27, %v11033_v63 }
 0x25c   : > { %v2027_v28 = vadd.f32 %v11035_v13, %v13907_v4 }
 0x25e   : > { %v11036_v19 = vpop.f32.mrb[84].mxu0 }
 0x25f   : > { %v11142_v58 = vpop.f32.mrb[80].mxu1  ;;  %v11037_v25 = vpop.f32.mrb[85].mxu0 }
 0x260   : > { %v11143_v0 = vpop.f32.mrb[81].mxu1  ;;  %v11039_v46 = vpop.f32.mrb[86].mxu0  ;;  %v12454_v25 = vld [vmem:[#allocation8 + $0xc0] sm:$0xff]  }
 0x261   : > { %v11144_v16 = vadd.f32 %v11143_v0, %v11142_v58  ;;  %v11145_v62 = vpop.f32.mrb[82].mxu1  ;;  %v11040_v23 = vpop.f32.mrb[87].mxu0  ;;  %v12452_v0 = vld [vmem:[#allocation8 + $0x40] sm:$0xff]   ;;  %11290 = vmatprep.subr.bf16.mxu0 %v12454_v25 }
 0x262   : > { %v11146_v36 = vpop.f32.mrb[83].mxu1  ;;  %11250 = vmatprep.subr.bf16.mxu1 %v12452_v0 }
 0x263   : > { %v11147_v8 = vadd.f32 %v11146_v36, %v11145_v62  ;;  %v13982_v31 = vadd.f32 %v11144_v16, %v2024_v12  ;;  %v12455_v36 = vld [vmem:[#allocation8 + $0x80] sm:$0xff]  }
 0x264   : > { %11291 = vmatpush3.bf16.msra.mxu0 %v12455_v36 }
 0x265   : > { %v13984_v56 = vadd.f32 %v11147_v8, %v2027_v28  ;;  %v12458_v8 = vld [vmem:[#allocation8 + $0xc8] sm:$0xff]  }
 0x266   : > { %v11042_v32 = vpop.f32.mrb[88].mxu0  ;;  %11292 = vmatprep.subr.bf16.mxu0 %v12458_v8 }
 0x267   : > { %v11148_v4 = vpop.f32.mrb[84].mxu1  ;;  %v11043_v37 = vpop.f32.mrb[89].mxu0 }
 0x268   : > { %v11149_v39 = vpop.f32.mrb[85].mxu1  ;;  %v11044_v6 = vadd.f32 %v11043_v37, %v11042_v32  ;;  %v11045_v7 = vpop.f32.mrb[90].mxu0  ;;  %v12462_v32 = vld [vmem:[#allocation8 + $0xd0] sm:$0xff]  }
 0x269   : > { %v11151_v21 = vpop.f32.mrb[86].mxu1  ;;  %v11046_v30 = vpop.f32.mrb[91].mxu0 }
 0x26a   : > { %v11152_v55 = vpop.f32.mrb[87].mxu1  ;;  %v2038_v34 = vadd.f32 %v11044_v6, %v13917_v2  ;;  %v11047_v20 = vadd.f32 %v11046_v30, %v11045_v7  ;;  %v12463_v6 = vld [vmem:[#allocation8 + $0x90] sm:$0xff]  }
 0x26c   : > { %v2041_v35 = vadd.f32 %v11047_v20, %v13919_v53 }
 0x26e   : > { %v11048_v54 = vpop.f32.mrb[92].mxu0 }
 0x26f   : > { %v11154_v43 = vpop.f32.mrb[88].mxu1  ;;  %v11049_v3 = vpop.f32.mrb[93].mxu0 }
 0x270   : > { %v11155_v44 = vpop.f32.mrb[89].mxu1  ;;  %v11051_v33 = vpop.f32.mrb[94].mxu0 }
 0x271   : > { %v11156_v41 = vadd.f32 %v11155_v44, %v11154_v43  ;;  %v11157_v42 = vpop.f32.mrb[90].mxu1  ;;  %v11052_v47 = vpop.f32.mrb[95].mxu0 }
 0x272   : > { %v11158_v24 = vpop.f32.mrb[91].mxu1 }
 0x273   : > { %v11159_v49 = vadd.f32 %v11158_v24, %v11157_v42  ;;  %v13988_v50 = vadd.f32 %v11156_v41, %v2038_v34 }
 0x275   : > { %v13990_v51 = vadd.f32 %v11159_v49, %v2041_v35 }
 0x276   : > { %v11054_v52 = vpop.f32.mrb[96].mxu0 }
 0x277   : > { %v11160_v18 = vpop.f32.mrb[92].mxu1  ;;  %v11055_v11 = vpop.f32.mrb[97].mxu0 }
 0x278   : > { %v11161_v2 = vpop.f32.mrb[93].mxu1  ;;  %v11056_v53 = vadd.f32 %v11055_v11, %v11054_v52  ;;  %v11057_v29 = vpop.f32.mrb[98].mxu0 }
 0x279   : > { %v11163_v38 = vpop.f32.mrb[94].mxu1  ;;  %v11058_v15 = vpop.f32.mrb[99].mxu0 }
 0x27a   : > { %v11164_v63 = vpop.f32.mrb[95].mxu1  ;;  %v2052_v27 = vadd.f32 %v11056_v53, %v13926_v45  ;;  %v11059_v12 = vadd.f32 %v11058_v15, %v11057_v29 }
 0x27c   : > { %v2055_v13 = vadd.f32 %v11059_v12, %v13934_v17  ;;  %v12459_v17 = vld [vmem:[#allocation8 + $0x88] sm:$0xff]  }
 0x27d   : > { %11293 = vmatpush3.bf16.msra.mxu0 %v12459_v17 }
 0x27e   : > { %v11060_v26 = vpop.f32.mrb[100].mxu0  ;;  %11294 = vmatprep.subr.bf16.mxu0 %v12462_v32 }
 0x27f   : > { %v11166_v28 = vpop.f32.mrb[96].mxu1  ;;  %v11061_v19 = vpop.f32.mrb[101].mxu0 }
 0x280   : > { %v11167_v58 = vpop.f32.mrb[97].mxu1  ;;  %v11063_v46 = vpop.f32.mrb[102].mxu0 }
 0x281   : > { %v11168_v16 = vadd.f32 %v11167_v58, %v11166_v28  ;;  %v11169_v62 = vpop.f32.mrb[98].mxu1  ;;  %v11064_v48 = vpop.f32.mrb[103].mxu0  ;;  %11295 = vmatpush3.bf16.msra.mxu0 %v12463_v6 }
 0x282   : > { %v11170_v23 = vpop.f32.mrb[99].mxu1 }
 0x283   : > { %v11171_v4 = vadd.f32 %v11170_v23, %v11169_v62  ;;  %v13994_v45 = vadd.f32 %v11168_v16, %v2052_v27 }
 0x285   : > { %v13996_v39 = vadd.f32 %v11171_v4, %v2055_v13 }
 0x286   : > { %v11066_v21 = vpop.f32.mrb[104].mxu0 }
 0x287   : > { %v11172_v37 = vpop.f32.mrb[100].mxu1  ;;  %v11067_v55 = vpop.f32.mrb[105].mxu0 }
 0x288   : > { %v11173_v7 = vpop.f32.mrb[101].mxu1  ;;  %v11068_v34 = vadd.f32 %v11067_v55, %v11066_v21  ;;  %v11069_v20 = vpop.f32.mrb[106].mxu0 }
 0x289   : > { %v11175_v30 = vpop.f32.mrb[102].mxu1  ;;  %v11070_v43 = vpop.f32.mrb[107].mxu0 }
 0x28a   : > { %v11176_v35 = vpop.f32.mrb[103].mxu1  ;;  %v2066_v54 = vadd.f32 %v11068_v34, %v13942_v60  ;;  %v11071_v44 = vadd.f32 %v11070_v43, %v11069_v20  ;;  %v12466_v43 = vld [vmem:[#allocation8 + $0xd8] sm:$0xff]  }
 0x28b   : > { %11296 = vmatprep.subr.bf16.mxu0 %v12466_v43 }
 0x28c   : > { %v2069_v3 = vadd.f32 %v11071_v44, %v13948_v61 }
 0x28e   : > { %v11072_v42 = vpop.f32.mrb[108].mxu0 }
 0x28f   : > { %v11178_v41 = vpop.f32.mrb[104].mxu1  ;;  %v11073_v24 = vpop.f32.mrb[109].mxu0 }
 0x290   : > { %v11179_v33 = vpop.f32.mrb[105].mxu1  ;;  %v11075_v18 = vpop.f32.mrb[110].mxu0 }
 0x291   : > { %v11180_v47 = vadd.f32 %v11179_v33, %v11178_v41  ;;  %v11181_v49 = vpop.f32.mrb[106].mxu1  ;;  %v11076_v2 = vpop.f32.mrb[111].mxu0 }
 0x292   : > { %v11182_v52 = vpop.f32.mrb[107].mxu1 }
 0x293   : > { %v11183_v11 = vadd.f32 %v11182_v52, %v11181_v49  ;;  %v14000_v38 = vadd.f32 %v11180_v47, %v2066_v54  ;;  %v12467_v54 = vld [vmem:[#allocation8 + $0x98] sm:$0xff]  }
 0x294   : > { %11297 = vmatpush3.bf16.msra.mxu0 %v12467_v54 }
 0x295   : > { %v14002_v53 = vadd.f32 %v11183_v11, %v2069_v3 }
 0x296   : > { %v11078_v60 = vpop.f32.mrb[112].mxu0 }
 0x297   : > { %v11184_v29 = vpop.f32.mrb[108].mxu1  ;;  %v11079_v15 = vpop.f32.mrb[113].mxu0 }
 0x298   : > { %v11185_v63 = vpop.f32.mrb[109].mxu1  ;;  %v11080_v61 = vadd.f32 %v11079_v15, %v11078_v60  ;;  %v11081_v12 = vpop.f32.mrb[114].mxu0 }
 0x299   : > { %v11187_v27 = vpop.f32.mrb[110].mxu1  ;;  %v11082_v28 = vpop.f32.mrb[115].mxu0 }
 0x29a   : > { %v11188_v13 = vpop.f32.mrb[111].mxu1  ;;  %v2080_v26 = vadd.f32 %v11080_v61, %v13950_v9  ;;  %v11083_v58 = vadd.f32 %v11082_v28, %v11081_v12 }
 0x29c   : > { %v2083_v19 = vadd.f32 %v11083_v58, %v13952_v59 }
 0x29e   : > { %v11084_v25 = vpop.f32.mrb[116].mxu0 }
 0x29f   : > { %v11190_v0 = vpop.f32.mrb[112].mxu1  ;;  %v11085_v62 = vpop.f32.mrb[117].mxu0 }
 0x2a0   : > { %v11191_v16 = vpop.f32.mrb[113].mxu1  ;;  %v11087_v23 = vpop.f32.mrb[118].mxu0 }
 0x2a1   : > { %v11192_v46 = vadd.f32 %v11191_v16, %v11190_v0  ;;  %v11193_v36 = vpop.f32.mrb[114].mxu1  ;;  %v11088_v8 = vpop.f32.mrb[119].mxu0 }
 0x2a2   : > { %v11194_v48 = vpop.f32.mrb[115].mxu1 }
 0x2a3   : > { %v11195_v4 = vadd.f32 %v11194_v48, %v11193_v36  ;;  %v14006_v17 = vadd.f32 %v11192_v46, %v2080_v26 }
 0x2a5   : > { %v14008_v32 = vadd.f32 %v11195_v4, %v2083_v19 }
 0x2a6   : > { %v11090_v21 = vpop.f32.mrb[120].mxu0 }
 0x2a7   : > { %v11196_v37 = vpop.f32.mrb[116].mxu1  ;;  %v11091_v6 = vpop.f32.mrb[121].mxu0 }
 0x2a8   : > { %v11197_v9 = vpop.f32.mrb[117].mxu1  ;;  %v11092_v59 = vadd.f32 %v11091_v6, %v11090_v21  ;;  %v11093_v55 = vpop.f32.mrb[122].mxu0 }
 0x2a9   : > { %v11199_v7 = vpop.f32.mrb[118].mxu1  ;;  %v11094_v34 = vpop.f32.mrb[123].mxu0 }
 0x2aa   : > { %v11200_v30 = vpop.f32.mrb[119].mxu1  ;;  %v2094_v20 = vadd.f32 %v11092_v59, %v13954_v14  ;;  %v11095_v35 = vadd.f32 %v11094_v34, %v11093_v55 }
 0x2ac   : > { %v2097_v44 = vadd.f32 %v11095_v35, %v13956_v5 }
 0x2ae   : > { %v11096_v41 = vpop.f32.mrb[124].mxu0 }
 0x2af   : > { %v11202_v3 = vpop.f32.mrb[120].mxu1  ;;  %v11097_v33 = vpop.f32.mrb[125].mxu0 }
 0x2b0   : > { %v11203_v42 = vpop.f32.mrb[121].mxu1  ;;  %v11099_v49 = vpop.f32.mrb[126].mxu0 }
 0x2b1   : > { %v11204_v24 = vadd.f32 %v11203_v42, %v11202_v3  ;;  %v11205_v47 = vpop.f32.mrb[122].mxu1  ;;  %v11100_v52 = vpop.f32.mrb[127].mxu0 }
 0x2b2   : > { %v11206_v18 = vpop.f32.mrb[123].mxu1 }
 0x2b3   : > { %v11207_v2 = vadd.f32 %v11206_v18, %v11205_v47  ;;  %v14012_v11 = vadd.f32 %v11204_v24, %v2094_v20 }
 0x2b5   : > { %v14014_v14 = vadd.f32 %v11207_v2, %v2097_v44 }
 0x2b6   : > { %v12074_v29 = vpop.f32.mrb[128].mxu0 }
 0x2b7   : > { %v2285_v60 = vpop.f32.mrb[129].mxu0 }
 0x2b8   : > { %v2286_v5 = vadd.f32 %v2285_v60, %v13960_v40  ;;  %v12075_v63 = vpop.f32.mrb[130].mxu0 }
 0x2b9   : > { %v2288_v15 = vpop.f32.mrb[131].mxu0 }
 0x2ba   : > { %v2396_v27 = vmax.f32 %v2286_v5, 0.0  ;;  %v2289_v61 = vadd.f32 %v2288_v15, %v13962_v57 }
 0x2bc   : > { %v2420_v12 = vrot.slane %v2396_v27, 1  ;;  %v2436_v13 = vrot.slane %v2396_v27, 2  ;;  %v2397_v28 = vmax.f32 %v2289_v61, 0.0  ;;  %v2452_v26 = vrot.slane %v2396_v27, 3 }
 0x2be   : > { %v2541_v58 = vsel %vm2540_vm1, %v2396_v27, %v2420_v12  ;;  %v2476_v19 = vrot.slane %v2397_v28, 4  ;;  %v12078_v0 = vpop.f32.mrb[132].mxu0  ;;  %v2492_v62 = vrot.slane %v2397_v28, 5  ;;  %v2508_v36 = vrot.slane %v2397_v28, 6 }
 0x2bf   : > { %v2550_v25 = vsel %vm2549_vm2, %v2541_v58, %v2436_v13  ;;  %v2299_v40 = vpop.f32.mrb[133].mxu0  ;;  %v2524_v8 = vrot.slane %v2397_v28, 7 }
 0x2c0   : > { %v2559_v16 = vsel %vm2558_vm3, %v2550_v25, %v2452_v26  ;;  %v2300_v57 = vadd.f32 %v2299_v40, %v13966_v10  ;;  %v12079_v46 = vpop.f32.mrb[134].mxu0 }
 0x2c1   : > { %v2568_v23 = vsel %vm2567_vm4, %v2559_v16, %v2476_v19  ;;  %v2302_v48 = vpop.f32.mrb[135].mxu0 }
 0x2c2   : > { %v2577_v4 = vsel %vm2576_vm5, %v2568_v23, %v2492_v62  ;;  %v2398_v37 = vmax.f32 %v2300_v57, 0.0  ;;  %v2303_v21 = vadd.f32 %v2302_v48, %v13973_v22 }
 0x2c3   : > { %v2586_v9 = vsel %vm2585_vm6, %v2577_v4, %v2508_v36 }
 0x2c4   : > { %v2595_v6 = vsel %vm2594_vm7, %v2586_v9, %v2524_v8  ;;  %v2421_v7 = vrot.slane %v2398_v37, 1  ;;  %v2437_v59 = vrot.slane %v2398_v37, 2  ;;  %v2399_v10 = vmax.f32 %v2303_v21, 0.0 }
 0x2c5   : > { %2658 = vst [vmem:[#allocation3 + $0x19] sm:$0xff] %v2595_v6  ;;  %v2453_v55 = vrot.slane %v2398_v37, 3 }
 0x2c6   : > { %v2542_v30 = vsel %vm2540_vm1, %v2398_v37, %v2421_v7  ;;  %v12082_v34 = vpop.f32.mrb[136].mxu0  ;;  %4177 = vst [vmem:[#allocation3 + $0x18] sm:$0xff] %v13968_v1  ;;  %4178 = vst [vmem:[#allocation3 + $0x20] sm:$0xff] %v13968_v1  ;;  %v2477_v35 = vrot.slane %v2399_v10, 4  ;;  %v2493_v54 = vrot.slane %v2399_v10, 5  ;;  %v2509_v41 = vrot.slane %v2399_v10, 6 }
 0x2c7   : > { %v2551_v20 = vsel %vm2549_vm2, %v2542_v30, %v2437_v59  ;;  %v2313_v22 = vpop.f32.mrb[137].mxu0  ;;  %v2525_v24 = vrot.slane %v2399_v10, 7 }
 0x2c8   : > { %v2560_v43 = vsel %vm2558_vm3, %v2551_v20, %v2453_v55  ;;  %v2314_v44 = vadd.f32 %v2313_v22, %v13982_v31  ;;  %v12083_v3 = vpop.f32.mrb[138].mxu0 }
 0x2c9   : > { %v2569_v42 = vsel %vm2567_vm4, %v2560_v43, %v2477_v35  ;;  %v2316_v33 = vpop.f32.mrb[139].mxu0 }
 0x2ca   : > { %v2578_v47 = vsel %vm2576_vm5, %v2569_v42, %v2493_v54  ;;  %v2400_v49 = vmax.f32 %v2314_v44, 0.0  ;;  %v2317_v18 = vadd.f32 %v2316_v33, %v13984_v56  ;;  %v12453_v42 = vld [vmem:[#allocation8] sm:$0xff]  }
 0x2cb   : > { %v2587_v52 = vsel %vm2585_vm6, %v2578_v47, %v2509_v41 }
 0x2cc   : > { %v2596_v2 = vsel %vm2594_vm7, %v2587_v52, %v2525_v24  ;;  %v2422_v29 = vrot.slane %v2400_v49, 1  ;;  %v2438_v60 = vrot.slane %v2400_v49, 2  ;;  %v2401_v5 = vmax.f32 %v2317_v18, 0.0  ;;  %v12456_v24 = vld [vmem:[#allocation8 + $0x48] sm:$0xff]  }
 0x2cd   : > { %2659 = vst [vmem:[#allocation3 + $0x31] sm:$0xff] %v2596_v2  ;;  %v10614_v31 = vpack.c.bf16 %v2596_v2, %v2595_v6  ;;  %v2454_v63 = vrot.slane %v2400_v49, 3 }
 0x2ce   : > { %v2543_v15 = vsel %vm2540_vm1, %v2400_v49, %v2422_v29  ;;  %v12086_v27 = vpop.f32.mrb[140].mxu0  ;;  %4180 = vst [vmem:[#allocation3 + $0x30] sm:$0xff] %v13968_v1  ;;  %4181 = vst [vmem:[#allocation3 + $0x38] sm:$0xff] %v13968_v1  ;;  %v2478_v56 = vrot.slane %v2401_v5, 4  ;;  %v2494_v28 = vrot.slane %v2401_v5, 5  ;;  %v2510_v19 = vrot.slane %v2401_v5, 6 }
 0x2cf   : > { %v2552_v61 = vsel %vm2549_vm2, %v2543_v15, %v2438_v60  ;;  %v2327_v12 = vpop.f32.mrb[141].mxu0  ;;  %12120 = vmatprep.mubr.bf16.mxu1 %v10614_v31  ;;  %v2526_v40 = vrot.slane %v2401_v5, 7 }
 0x2d0   : > { %v2561_v13 = vsel %vm2558_vm3, %v2552_v61, %v2454_v63  ;;  %v2328_v26 = vadd.f32 %v2327_v12, %v13988_v50  ;;  %v12087_v58 = vpop.f32.mrb[142].mxu0  ;;  %v12457_v63 = vld [vmem:[#allocation8 + $0x8] sm:$0xff]  }
 0x2d1   : > { %v2570_v0 = vsel %vm2567_vm4, %v2561_v13, %v2478_v56  ;;  %v2330_v25 = vpop.f32.mrb[143].mxu0  ;;  %v12460_v56 = vld [vmem:[#allocation8 + $0x50] sm:$0xff]  }
 0x2d2   : > { %v2579_v16 = vsel %vm2576_vm5, %v2570_v0, %v2494_v28  ;;  %v2402_v62 = vmax.f32 %v2328_v26, 0.0  ;;  %v2331_v57 = vadd.f32 %v2330_v25, %v13990_v51  ;;  %v12461_v25 = vld [vmem:[#allocation8 + $0x10] sm:$0xff]  }
 0x2d3   : > { %v2588_v46 = vsel %vm2585_vm6, %v2579_v16, %v2510_v19  ;;  %v12464_v16 = vld [vmem:[#allocation8 + $0x58] sm:$0xff]  }
 0x2d4   : > { %v2597_v36 = vsel %vm2594_vm7, %v2588_v46, %v2526_v40  ;;  %v2423_v23 = vrot.slane %v2402_v62, 1  ;;  %v2439_v48 = vrot.slane %v2402_v62, 2  ;;  %v2403_v8 = vmax.f32 %v2331_v57, 0.0 }
 0x2d5   : > { %2660 = vst [vmem:[#allocation3 + $0x49] sm:$0xff] %v2597_v36  ;;  %v2455_v50 = vrot.slane %v2402_v62, 3 }
 0x2d6   : > { %v2544_v4 = vsel %vm2540_vm1, %v2402_v62, %v2423_v23  ;;  %v12090_v37 = vpop.f32.mrb[144].mxu0  ;;  %4183 = vst [vmem:[#allocation3 + $0x48] sm:$0xff] %v13968_v1  ;;  %4184 = vst [vmem:[#allocation3 + $0x50] sm:$0xff] %v13968_v1  ;;  %v2479_v9 = vrot.slane %v2403_v8, 4  ;;  %v2495_v7 = vrot.slane %v2403_v8, 5  ;;  %v2511_v55 = vrot.slane %v2403_v8, 6 }
 0x2d7   : > { %v2553_v21 = vsel %vm2549_vm2, %v2544_v4, %v2439_v48  ;;  %v2341_v51 = vpop.f32.mrb[145].mxu0  ;;  %v2527_v20 = vrot.slane %v2403_v8, 7  ;;  %v12465_v37 = vld [vmem:[#allocation8 + $0x18] sm:$0xff]  }
 0x2d8   : > { %v2562_v6 = vsel %vm2558_vm3, %v2553_v21, %v2455_v50  ;;  %v2342_v59 = vadd.f32 %v2341_v51, %v13994_v45  ;;  %v12091_v10 = vpop.f32.mrb[146].mxu0 }
 0x2d9   : > { %v2571_v30 = vsel %vm2567_vm4, %v2562_v6, %v2479_v9  ;;  %v2344_v34 = vpop.f32.mrb[147].mxu0  ;;  %v12468_v6 = vld [vmem:[#allocation8 + $0x60] sm:$0xff]  }
 0x2da   : > { %v2580_v35 = vsel %vm2576_vm5, %v2571_v30, %v2495_v7  ;;  %v2404_v22 = vmax.f32 %v2342_v59, 0.0  ;;  %v2345_v43 = vadd.f32 %v2344_v34, %v13996_v39 }
 0x2db   : > { %v2589_v54 = vsel %vm2585_vm6, %v2580_v35, %v2511_v55 }
 0x2dc   : > { %v2598_v44 = vsel %vm2594_vm7, %v2589_v54, %v2527_v20  ;;  %v2424_v3 = vrot.slane %v2404_v22, 1  ;;  %v2440_v41 = vrot.slane %v2404_v22, 2  ;;  %v2405_v45 = vmax.f32 %v2345_v43, 0.0 }
 0x2dd   : > { %2661 = vst [vmem:[#allocation3 + $0x61] sm:$0xff] %v2598_v44  ;;  %v10615_v33 = vpack.c.bf16 %v2598_v44, %v2597_v36  ;;  %v2456_v47 = vrot.slane %v2404_v22, 3 }
 0x2de   : > { %v2545_v49 = vsel %vm2540_vm1, %v2404_v22, %v2424_v3  ;;  %v12094_v18 = vpop.f32.mrb[148].mxu0  ;;  %4186 = vst [vmem:[#allocation3 + $0x60] sm:$0xff] %v13968_v1  ;;  %4187 = vst [vmem:[#allocation3 + $0x68] sm:$0xff] %v13968_v1  ;;  %v2480_v52 = vrot.slane %v2405_v45, 4  ;;  %v2496_v60 = vrot.slane %v2405_v45, 5  ;;  %v2512_v15 = vrot.slane %v2405_v45, 6 }
 0x2df   : > { %v2554_v39 = vsel %vm2549_vm2, %v2545_v49, %v2440_v41  ;;  %v2355_v2 = vpop.f32.mrb[149].mxu0  ;;  %12121 = vmatmul.mubr.bf16.vlgmr.msra.gmra.mrb[128].mxu1 %v10615_v33  ;;  %v2528_v12 = vrot.slane %v2405_v45, 7 }
 0x2e0   : > { %v2563_v29 = vsel %vm2558_vm3, %v2554_v39, %v2456_v47  ;;  %v2356_v5 = vadd.f32 %v2355_v2, %v14000_v38  ;;  %v12095_v31 = vpop.f32.mrb[150].mxu0  ;;  %11251 = vmatpush3.bf16.msra.mxu1 %v12453_v42 }
 0x2e1   : > { %v2572_v27 = vsel %vm2567_vm4, %v2563_v29, %v2480_v52  ;;  %v2358_v61 = vpop.f32.mrb[151].mxu0  ;;  %11252 = vmatprep.subr.bf16.mxu1 %v12456_v24 }
 0x2e2   : > { %v2581_v13 = vsel %vm2576_vm5, %v2572_v27, %v2496_v60  ;;  %v2406_v28 = vmax.f32 %v2356_v5, 0.0  ;;  %v2359_v26 = vadd.f32 %v2358_v61, %v14002_v53 }
 0x2e3   : > { %v2590_v58 = vsel %vm2585_vm6, %v2581_v13, %v2512_v15 }
 0x2e4   : > { %v2599_v19 = vsel %vm2594_vm7, %v2590_v58, %v2528_v12  ;;  %v2425_v38 = vrot.slane %v2406_v28, 1  ;;  %v2441_v0 = vrot.slane %v2406_v28, 2  ;;  %11253 = vmatpush3.bf16.msra.mxu1 %v12457_v63  ;;  %v2407_v40 = vmax.f32 %v2359_v26, 0.0 }
 0x2e5   : > { %2662 = vst [vmem:[#allocation3 + $0x79] sm:$0xff] %v2599_v19  ;;  %11254 = vmatprep.subr.bf16.mxu1 %v12460_v56  ;;  %v2457_v62 = vrot.slane %v2406_v28, 3 }
 0x2e6   : > { %v2546_v57 = vsel %vm2540_vm1, %v2406_v28, %v2425_v38  ;;  %v12098_v46 = vpop.f32.mrb[152].mxu0  ;;  %4189 = vst [vmem:[#allocation3 + $0x78] sm:$0xff] %v13968_v1  ;;  %4190 = vst [vmem:[#allocation3 + $0x80] sm:$0xff] %v13968_v1  ;;  %v2481_v36 = vrot.slane %v2407_v40, 4  ;;  %v2497_v8 = vrot.slane %v2407_v40, 5  ;;  %v2513_v21 = vrot.slane %v2407_v40, 6 }
 0x2e7   : > { %v2555_v53 = vsel %vm2549_vm2, %v2546_v57, %v2441_v0  ;;  %v2369_v23 = vpop.f32.mrb[153].mxu0  ;;  %v2529_v7 = vrot.slane %v2407_v40, 7  ;;  %v12469_v57 = vld [vmem:[#allocation8 + $0x20] sm:$0xff]  }
 0x2e8   : > { %v2564_v48 = vsel %vm2558_vm3, %v2555_v53, %v2457_v62  ;;  %v2370_v50 = vadd.f32 %v2369_v23, %v14006_v17  ;;  %v12099_v4 = vpop.f32.mrb[154].mxu0  ;;  %11255 = vmatpush3.bf16.msra.mxu1 %v12461_v25  ;;  %v12470_v46 = vld [vmem:[#allocation8 + $0xe0] sm:$0xff]   ;;  %v12473_v23 = vld [vmem:[#allocation8 + $0x28] sm:$0xff]  }
 0x2e9   : > { %v2573_v9 = vsel %vm2567_vm4, %v2564_v48, %v2481_v36  ;;  %v2372_v51 = vpop.f32.mrb[155].mxu0  ;;  %11256 = vmatprep.subr.bf16.mxu1 %v12464_v16  ;;  %v12471_v53 = vld [vmem:[#allocation8 + $0xa0] sm:$0xff]   ;;  %11298 = vmatprep.subr.bf16.mxu0 %v12470_v46  ;;  %v12472_v36 = vld [vmem:[#allocation8 + $0x68] sm:$0xff]   ;;  %v12478_v4 = vld [vmem:[#allocation8 + $0xf0] sm:$0xff]  }
 0x2ea   : > { %v2582_v59 = vsel %vm2576_vm5, %v2573_v9, %v2497_v8  ;;  %v2408_v10 = vmax.f32 %v2370_v50, 0.0  ;;  %v2373_v55 = vadd.f32 %v2372_v51, %v14008_v32  ;;  %v12474_v48 = vld [vmem:[#allocation8 + $0xe8] sm:$0xff]   ;;  %11299 = vmatpush3.bf16.msra.mxu0 %v12471_v53  ;;  %v12476_v50 = vld [vmem:[#allocation8 + $0x70] sm:$0xff]   ;;  %v12482_v51 = vld [vmem:[#allocation8 + $0xf8] sm:$0xff]  }
 0x2eb   : > { %v2591_v30 = vsel %vm2585_vm6, %v2582_v59, %v2513_v21  ;;  %v12475_v8 = vld [vmem:[#allocation8 + $0xa8] sm:$0xff]   ;;  %11300 = vmatprep.subr.bf16.mxu0 %v12474_v48  ;;  %v12480_v21 = vld [vmem:[#allocation8 + $0x78] sm:$0xff]   ;;  %v12479_v9 = vld [vmem:[#allocation8 + $0xb0] sm:$0xff]  }
 0x2ec   : > { %v2600_v34 = vsel %vm2594_vm7, %v2591_v30, %v2529_v7  ;;  %v2426_v17 = vrot.slane %v2408_v10, 1  ;;  %v2442_v20 = vrot.slane %v2408_v10, 2  ;;  %11257 = vmatpush3.bf16.msra.mxu1 %v12465_v37  ;;  %v2409_v35 = vmax.f32 %v2373_v55, 0.0  ;;  %v12477_v37 = vld [vmem:[#allocation8 + $0x30] sm:$0xff]   ;;  %v12483_v7 = vld [vmem:[#allocation8 + $0xb8] sm:$0xff]   ;;  %v2921_v59 = vld [vmem:[#allocation2 + $0x1] sm:$0xff] }
 0x2ed   : > { %2663 = vst [vmem:[#allocation3 + $0x91] sm:$0xff] %v2600_v34  ;;  %v10616_v22 = vpack.c.bf16 %v2600_v34, %v2599_v19  ;;  %11258 = vmatprep.subr.bf16.mxu1 %v12468_v6  ;;  %v2458_v43 = vrot.slane %v2408_v10, 3  ;;  %v12481_v6 = vld [vmem:[#allocation8 + $0x38] sm:$0xff]   ;;  %v12484_v55 = vld [vmem:[#allocation8 + $0x140] sm:$0xff]   ;;  %v12504_v46 = vld [vmem:[#allocation8 + $0x168] sm:$0xff]  }
 0x2ee   : > { %v2547_v54 = vsel %vm2540_vm1, %v2408_v10, %v2426_v17  ;;  %v12102_v44 = vpop.f32.mrb[156].mxu0  ;;  %4192 = vst [vmem:[#allocation3 + $0x90] sm:$0xff] %v13968_v1  ;;  %4193 = vst [vmem:[#allocation3 + $0x98] sm:$0xff] %v13968_v1  ;;  %v2482_v3 = vrot.slane %v2409_v35, 4  ;;  %v2498_v45 = vrot.slane %v2409_v35, 5  ;;  %v2514_v47 = vrot.slane %v2409_v35, 6  ;;  %11301 = vmatpush3.bf16.msra.mxu0 %v12475_v8 }
 0x2ef   : > { %v2556_v32 = vsel %vm2549_vm2, %v2547_v54, %v2442_v20  ;;  %v2383_v41 = vpop.f32.mrb[157].mxu0  ;;  %12124 = vmatprep.mubr.bf16.mxu1 %v10616_v22  ;;  %v2530_v39 = vrot.slane %v2409_v35, 7  ;;  %11302 = vmatprep.subr.bf16.mxu0 %v12478_v4  ;;  %v2937_v10 = vld [vmem:[#allocation2 + $0x2] sm:$0xff]  ;;  %v14106_v34 = vld [vmem:[#allocation2 + $0xd9] sm:$0xff]  ;;  %v12508_v8 = vld [vmem:[#allocation8 + $0x170] sm:$0xff]  }
 0x2f0   : > { %v2565_v42 = vsel %vm2558_vm3, %v2556_v32, %v2458_v43  ;;  %v2384_v33 = vadd.f32 %v2383_v41, %v14012_v11  ;;  %v12103_v24 = vpop.f32.mrb[158].mxu0  ;;  %11259 = vmatpush3.bf16.msra.mxu1 %v12469_v57  ;;  %5506 = vst [vmem:[#allocation2] sm:$0xff] %v13968_v1  ;;  %5507 = vst [vmem:[#allocation2 + $0x8] sm:$0xff] %v13968_v1  ;;  %v12486_v30 = vld [vmem:[#allocation8 + $0x1c0] sm:$0xff]  }
 0x2f1   : > { %v2574_v49 = vsel %vm2567_vm4, %v2565_v42, %v2482_v3  ;;  %v2386_v18 = vpop.f32.mrb[159].mxu0  ;;  %11260 = vmatprep.subr.bf16.mxu1 %v12472_v36  ;;  %v14108_v17 = vld [vmem:[#allocation2 + $0xda] sm:$0xff]  ;;  %v12505_v36 = vld [vmem:[#allocation8 + $0x128] sm:$0xff]  }
 0x2f2   : > { %v2583_v52 = vsel %vm2576_vm5, %v2574_v49, %v2498_v45  ;;  %v2410_v2 = vmax.f32 %v2384_v33, 0.0  ;;  %v2387_v29 = vadd.f32 %v2386_v18, %v14014_v14  ;;  %11303 = vmatpush3.bf16.msra.mxu0 %v12479_v9  ;;  %5533 = vst [vmem:[#allocation2 + $0xd8] sm:$0xff] %v13968_v1  ;;  %5534 = vst [vmem:[#allocation2 + $0xe0] sm:$0xff] %v13968_v1  ;;  %v12502_v57 = vld [vmem:[#allocation8 + $0x1e0] sm:$0xff]   ;;  %v12507_v9 = vld [vmem:[#allocation8 + $0x1a8] sm:$0xff]  }
 0x2f3   : > { %v2592_v60 = vsel %vm2585_vm6, %v2583_v52, %v2514_v47  ;;  %11304 = vmatprep.subr.bf16.mxu0 %v12482_v51  ;;  %v12503_v53 = vld [vmem:[#allocation8 + $0x1a0] sm:$0xff]  }
 0x2f4   : > { %v2601_v5 = vsel %vm2594_vm7, %v2592_v60, %v2530_v39  ;;  %v2427_v31 = vrot.slane %v2410_v2, 1  ;;  %v2443_v63 = vrot.slane %v2410_v2, 2  ;;  %v2411_v15 = vmax.f32 %v2387_v29, 0.0  ;;  %11261 = vmatpush3.bf16.msra.mxu1 %v12473_v23  ;;  %v12485_v39 = vld [vmem:[#allocation8 + $0x100] sm:$0xff]   ;;  %v12488_v29 = vld [vmem:[#allocation8 + $0x148] sm:$0xff]  }
 0x2f5   : > { %2664 = vst [vmem:[#allocation3 + $0xa9] sm:$0xff] %v2601_v5  ;;  %v2459_v11 = vrot.slane %v2410_v2, 3  ;;  %11262 = vmatprep.subr.bf16.mxu1 %v12476_v50  ;;  %v12506_v23 = vld [vmem:[#allocation8 + $0x1e8] sm:$0xff]  }
 0x2f6   : > { %v2548_v27 = vsel %vm2540_vm1, %v2410_v2, %v2427_v31  ;;  %4195 = vst [vmem:[#allocation3 + $0xa8] sm:$0xff] %v13968_v1  ;;  %4196 = vst [vmem:[#allocation3 + $0xb0] sm:$0xff] %v13968_v1  ;;  %v2483_v56 = vrot.slane %v2411_v15, 4  ;;  %v2499_v12 = vrot.slane %v2411_v15, 5  ;;  %v2515_v13 = vrot.slane %v2411_v15, 6  ;;  %11305 = vmatpush3.bf16.msra.mxu0 %v12483_v7  ;;  %v12509_v7 = vld [vmem:[#allocation8 + $0x130] sm:$0xff]  }
 0x2f7   : > { %v2557_v61 = vsel %vm2549_vm2, %v2548_v27, %v2443_v63  ;;  %v2531_v26 = vrot.slane %v2411_v15, 7  ;;  %11370 = vmatprep.subr.bf16.mxu0 %v12486_v30  ;;  %v14149_v63 = vld [vmem:[#allocation3 + $0xf0] sm:$0xff]  ;;  %v12512_v30 = vld [vmem:[#allocation8 + $0x178] sm:$0xff]  }
 0x2f8   : > { %v2566_v14 = vsel %vm2558_vm3, %v2557_v61, %v2459_v11  ;;  %11263 = vmatpush3.bf16.msra.mxu1 %v12477_v37  ;;  %v12487_v11 = vld [vmem:[#allocation8 + $0x180] sm:$0xff]   ;;  %v12489_v61 = vld [vmem:[#allocation8 + $0x108] sm:$0xff]  }
 0x2f9   : > { %v2575_v28 = vsel %vm2567_vm4, %v2566_v14, %v2483_v56  ;;  %11264 = vmatprep.subr.bf16.mxu1 %v12480_v21  ;;  %v12490_v56 = vld [vmem:[#allocation8 + $0x1c8] sm:$0xff]   ;;  %v12492_v14 = vld [vmem:[#allocation8 + $0x150] sm:$0xff]  }
 0x2fa   : > { %v2584_v58 = vsel %vm2576_vm5, %v2575_v28, %v2499_v12  ;;  %v12491_v12 = vld [vmem:[#allocation8 + $0x188] sm:$0xff]   ;;  %v12494_v28 = vld [vmem:[#allocation8 + $0x1d0] sm:$0xff]  }
 0x2fb   : > { %v2593_v19 = vsel %vm2585_vm6, %v2584_v58, %v2515_v13  ;;  %v12493_v13 = vld [vmem:[#allocation8 + $0x110] sm:$0xff]   ;;  %v12496_v58 = vld [vmem:[#allocation8 + $0x158] sm:$0xff]  }
 0x2fc   : > { %v2602_v38 = vsel %vm2594_vm7, %v2593_v19, %v2531_v26  ;;  %11265 = vmatpush3.bf16.msra.mxu1 %v12481_v6  ;;  %v12495_v19 = vld [vmem:[#allocation8 + $0x190] sm:$0xff]  }
 0x2fd   : > { %2665 = vst [vmem:[#allocation3 + $0xc1] sm:$0xff] %v2602_v38  ;;  %v10617_v0 = vpack.c.bf16 %v2602_v38, %v2601_v5  ;;  %11330 = vmatprep.subr.bf16.mxu1 %v12484_v55 }
 0x2fe   : > { %4198 = vst [vmem:[#allocation3 + $0xc0] sm:$0xff] %v13968_v1  ;;  %4199 = vst [vmem:[#allocation3 + $0xc8] sm:$0xff] %v13968_v1 }
 0x2ff   : > { %12125 = vmatmul.mubr.bf16.gmra.mrb[132].mxu1 %v10617_v0  ;;  %v12497_v0 = vld [vmem:[#allocation8 + $0x118] sm:$0xff]  }
 0x320   : > { %v11208_v25 = vpop.f32.mrb[124].mxu1 }
 0x321   : > { %v11209_v40 = vpop.f32.mrb[125].mxu1  ;;  %v12498_v25 = vld [vmem:[#allocation8 + $0x1d8] sm:$0xff]  }
 0x322   : > { %v11211_v16 = vpop.f32.mrb[126].mxu1  ;;  %v12500_v40 = vld [vmem:[#allocation8 + $0x160] sm:$0xff]  }
 0x323   : > { %v11212_v62 = vpop.f32.mrb[127].mxu1  ;;  %v12499_v16 = vld [vmem:[#allocation8 + $0x198] sm:$0xff]  }
 0x324   : > { %v12501_v62 = vld [vmem:[#allocation8 + $0x120] sm:$0xff]  }
 0x3b2   : > { %v12122_v20 = vpop.f32.mrb[128].mxu1 }
 0x3b3   : > { %v14112_v35 = vmax.f32 %v12122_v20, 0.0  ;;  %v2804_v22 = vpop.f32.mrb[129].mxu1 }
 0x3b4   : > { %v14114_v43 = vmax.f32 %v2804_v22, 0.0  ;;  %v12123_v54 = vpop.f32.mrb[130].mxu1 }
 0x3b5   : > { %2899 = vst [vmem:[#allocation2 + $0x49] sm:$0xff] %v14112_v35  ;;  %v14117_v44 = vmax.f32 %v12123_v54, 0.0  ;;  %v2807_v32 = vpop.f32.mrb[131].mxu1  ;;  %v12511_v54 = vld [vmem:[#allocation8 + $0x1b0] sm:$0xff]  }
 0x3b6   : > { %2897 = vst [vmem:[#allocation2 + $0x19] sm:$0xff] %v14114_v43  ;;  %v14120_v3 = vmax.f32 %v2807_v32, 0.0  ;;  %v10622_v41 = vpack.c.bf16 %v14114_v43, %v2921_v59  ;;  %v12510_v59 = vld [vmem:[#allocation8 + $0x1f0] sm:$0xff]  }
 0x3b7   : > { %2900 = vst [vmem:[#allocation2 + $0x61] sm:$0xff] %v14117_v44  ;;  %v10635_v42 = vpack.c.bf16 %v14117_v44, %v14112_v35 }
 0x3b8   : > { %2898 = vst [vmem:[#allocation2 + $0x31] sm:$0xff] %v14120_v3  ;;  %3873 = vmatprep.mubr.bf16.mxu1 %v10622_v41  ;;  %v14129_v45 = vpack.c.bf16 %v14112_v35, %v14120_v3  ;;  %v10634_v33 = vpack.c.bf16 %v14120_v3, %v14114_v43  ;;  %v12513_v41 = vld [vmem:[#allocation8 + $0x138] sm:$0xff]   ;;  %v12520_v43 = vld [vmem:[#allocation8 + $0x220] sm:$0xff]   ;;  %v12521_v3 = vld [vmem:[#allocation8 + $0x228] sm:$0xff]  }
 0x3bc   : > { %v2955_v24 = vld [vmem:[#allocation2 + $0x48] sm:$0xff] }
 0x3bd   : > { %v14133_v47 = vld [vmem:[#allocation2 + $0x4a] sm:$0xff]  ;;  %v2906_v49 = vld [vmem:[#allocation2 + $0x18] sm:$0xff] }
 0x3be   : > { %v14135_v18 = vld [vmem:[#allocation2 + $0x1a] sm:$0xff]  ;;  %5515 = vst [vmem:[#allocation2 + $0x48] sm:$0xff] %v13968_v1  ;;  %5516 = vst [vmem:[#allocation2 + $0x50] sm:$0xff] %v13968_v1  ;;  %v10618_v52 = vpack.c.bf16 %v2906_v49, %v13968_v1  ;;  %v14142_v60 = vld [vmem:[#allocation2 + $0x62] sm:$0xff] }
 0x3bf   : > { %v14140_v2 = vld [vmem:[#allocation2 + $0x60] sm:$0xff]  ;;  %5509 = vst [vmem:[#allocation2 + $0x18] sm:$0xff] %v13968_v1  ;;  %5510 = vst [vmem:[#allocation2 + $0x20] sm:$0xff] %v13968_v1  ;;  %v2954_v5 = vld [vmem:[#allocation2 + $0x30] sm:$0xff]  ;;  %v10626_v27 = vpack.c.bf16 %v14135_v18, %v2937_v10 }
 0x3c0   : > { %v14146_v31 = vld [vmem:[#allocation2 + $0x32] sm:$0xff]  ;;  %5518 = vst [vmem:[#allocation2 + $0x60] sm:$0xff] %v13968_v1  ;;  %5519 = vst [vmem:[#allocation2 + $0x68] sm:$0xff] %v14149_v63  ;;  %3874 = vmatmul.mubr.bf16.vlgmr.msra.gmra.mrb[136].mxu1 %v10618_v52  ;;  %v10630_v15 = vpack.c.bf16 %v2954_v5, %v2906_v49  ;;  %v10631_v1 = vpack.c.bf16 %v14140_v2, %v2955_v24  ;;  %v14157_v26 = vpack.c.bf16 %v2955_v24, %v2954_v5  ;;  %v12516_v49 = vld [vmem:[#allocation8 + $0x200] sm:$0xff]  }
 0x3c1   : > { %5512 = vst [vmem:[#allocation2 + $0x30] sm:$0xff] %v14149_v63  ;;  %5513 = vst [vmem:[#allocation2 + $0x38] sm:$0xff] %v14149_v63  ;;  %3881 = vmatprep.mubr.bf16.mxu1 %v14129_v45  ;;  %11331 = vmatpush3.bf16.msra.mxu1 %v12485_v39  ;;  %v14162_v38 = vpack.c.bf16 %v14133_v47, %v14146_v31  ;;  %v12514_v24 = vld [vmem:[#allocation8 + $0x1f8] sm:$0xff]  }
 0x3c2   : > { %3938 = vmatprep.mubr.bf16.mxu0 %v10630_v15  ;;  %11332 = vmatprep.subr.bf16.mxu1 %v12488_v29  ;;  %v12515_v29 = vld [vmem:[#allocation8 + $0x1b8] sm:$0xff]  }
 0x3c3   : > { %3939 = vmatmul.mubr.bf16.vlgmr.msra.gmra.mrb[160].mxu0 %v10626_v27 }
 0x3c4   : > { %3946 = vmatprep.mubr.bf16.mxu0 %v10631_v1  ;;  %11371 = vmatpush3.bf16.msra.mxu0 %v12487_v11 }
 0x3c5   : > { %11333 = vmatpush3.bf16.msra.mxu1 %v12489_v61  ;;  %11372 = vmatprep.subr.bf16.mxu0 %v12490_v56 }
 0x3c6   : > { %11334 = vmatprep.subr.bf16.mxu1 %v12492_v14 }
 0x3c8   : > { %3882 = vmatmul.mubr.bf16.gmra.mrb[140].mxu1 %v14157_v26  ;;  %11373 = vmatpush3.bf16.msra.mxu0 %v12491_v12 }
 0x3c9   : > { %11335 = vmatpush3.bf16.msra.mxu1 %v12493_v13  ;;  %11374 = vmatprep.subr.bf16.mxu0 %v12494_v28  ;;  %v10638_v28 = vpack.c.bf16 %v14146_v31, %v14135_v18  ;;  %v12519_v18 = vld [vmem:[#allocation8 + $0x218] sm:$0xff]  }
 0x3ca   : > { %11336 = vmatprep.subr.bf16.mxu1 %v12496_v58 }
 0x3cb   : > { %3947 = vmatmul.mubr.bf16.gmra.mrb[164].mxu0 %v14162_v38 }
 0x3cc   : > { %11375 = vmatpush3.bf16.msra.mxu0 %v12495_v19  ;;  %v12517_v19 = vld [vmem:[#allocation8 + $0x208] sm:$0xff]  }
 0x3cd   : > { %11337 = vmatpush3.bf16.msra.mxu1 %v12497_v0  ;;  %11376 = vmatprep.subr.bf16.mxu0 %v12498_v25  ;;  %v10639_v0 = vpack.c.bf16 %v14142_v60, %v14133_v47  ;;  %v12518_v25 = vld [vmem:[#allocation8 + $0x210] sm:$0xff]   ;;  %v12524_v47 = vld [vmem:[#allocation9 + $0x40] sm:$0xff]  }
 0x3ce   : > { %11338 = vmatprep.subr.bf16.mxu1 %v12500_v40  ;;  %v12527_v40 = vld [vmem:[#allocation9 + $0x80] sm:$0xff]  }
 0x3d0   : > { %11377 = vmatpush3.bf16.msra.mxu0 %v12499_v16  ;;  %v12528_v16 = vld [vmem:[#allocation9 + $0x48] sm:$0xff]  }
 0x3d1   : > { %11339 = vmatpush3.bf16.msra.mxu1 %v12501_v62  ;;  %11378 = vmatprep.subr.bf16.mxu0 %v12502_v57  ;;  %v12530_v62 = vld [vmem:[#allocation9 + $0xc8] sm:$0xff]  }
 0x3d2   : > { %v12126_v48 = vpop.f32.mrb[132].mxu1  ;;  %11340 = vmatprep.subr.bf16.mxu1 %v12504_v46  ;;  %v12531_v57 = vld [vmem:[#allocation9 + $0x88] sm:$0xff]   ;;  %v12532_v46 = vld [vmem:[#allocation9 + $0x50] sm:$0xff]  }
 0x3d3   : > { %v14165_v50 = vmax.f32 %v12126_v48, 0.0  ;;  %v2820_v4 = vpop.f32.mrb[133].mxu1  ;;  %v12537_v48 = vld [vmem:[#allocation9 + $0x18] sm:$0xff]  }
 0x3d4   : > { %v14167_v37 = vmax.f32 %v2820_v4, 0.0  ;;  %v12127_v21 = vpop.f32.mrb[134].mxu1  ;;  %11379 = vmatpush3.bf16.msra.mxu0 %v12503_v53  ;;  %v12533_v53 = vld [vmem:[#allocation9 + $0x10] sm:$0xff]   ;;  %v12540_v4 = vld [vmem:[#allocation9 + $0x60] sm:$0xff]  }
 0x3d5   : > { %2903 = vst [vmem:[#allocation2 + $0xa9] sm:$0xff] %v14165_v50  ;;  %v14170_v51 = vmax.f32 %v12127_v21, 0.0  ;;  %v2823_v6 = vpop.f32.mrb[135].mxu1  ;;  %11341 = vmatpush3.bf16.msra.mxu1 %v12505_v36  ;;  %11380 = vmatprep.subr.bf16.mxu0 %v12506_v23  ;;  %v12535_v36 = vld [vmem:[#allocation9 + $0x90] sm:$0xff]   ;;  %v12536_v23 = vld [vmem:[#allocation9 + $0x58] sm:$0xff]   ;;  %v12542_v21 = vld [vmem:[#allocation9 + $0xe0] sm:$0xff]  }
 0x3d6   : > { %2901 = vst [vmem:[#allocation2 + $0x79] sm:$0xff] %v14167_v37  ;;  %v14173_v10 = vmax.f32 %v2823_v6, 0.0  ;;  %v10624_v55 = vpack.c.bf16 %v14167_v37, %v14117_v44  ;;  %11342 = vmatprep.subr.bf16.mxu1 %v12508_v8  ;;  %v12522_v44 = vld [vmem:[#allocation8 + $0x230] sm:$0xff]   ;;  %v12538_v8 = vld [vmem:[#allocation9 + $0xd8] sm:$0xff]   ;;  %v12545_v6 = vld [vmem:[#allocation9 + $0x28] sm:$0xff]  }
 0x3d7   : > { %2904 = vst [vmem:[#allocation2 + $0xc1] sm:$0xff] %v14170_v51  ;;  %v10637_v20 = vpack.c.bf16 %v14170_v51, %v14165_v50  ;;  %v10649_v35 = vpack.c.bf16 %v14106_v34, %v14170_v51  ;;  %v12544_v51 = vld [vmem:[#allocation9 + $0x68] sm:$0xff]  }
 0x3d8   : > { %2902 = vst [vmem:[#allocation2 + $0x91] sm:$0xff] %v14173_v10  ;;  %3889 = vmatprep.mubr.bf16.mxu1 %v10624_v55  ;;  %v14183_v22 = vpack.c.bf16 %v14165_v50, %v14173_v10  ;;  %11381 = vmatpush3.bf16.msra.mxu0 %v12507_v9  ;;  %v10636_v32 = vpack.c.bf16 %v14173_v10, %v14167_v37  ;;  %v12539_v50 = vld [vmem:[#allocation9 + $0x98] sm:$0xff]   ;;  %v12541_v37 = vld [vmem:[#allocation9 + $0x20] sm:$0xff]   ;;  %v12548_v10 = vld [vmem:[#allocation9 + $0x70] sm:$0xff]  }
 0x3d9   : > { %11343 = vmatpush3.bf16.msra.mxu1 %v12509_v7  ;;  %11382 = vmatprep.subr.bf16.mxu0 %v12510_v59  ;;  %v12543_v9 = vld [vmem:[#allocation9 + $0xa0] sm:$0xff]   ;;  %v12546_v7 = vld [vmem:[#allocation9 + $0xe8] sm:$0xff]  }
 0x3da   : > { %11344 = vmatprep.subr.bf16.mxu1 %v12512_v30  ;;  %v12547_v59 = vld [vmem:[#allocation9 + $0xa8] sm:$0xff]   ;;  %v14230_v30 = vld [vmem:[#allocation3 + $0x1] sm:$0xff] }
 0x3dc   : > { %v2959_v39 = vld [vmem:[#allocation2 + $0xa8] sm:$0xff]  ;;  %11383 = vmatpush3.bf16.msra.mxu0 %v12511_v54  ;;  %v12552_v54 = vld [vmem:[#allocation9 + $0x78] sm:$0xff]  }
 0x3dd   : > { %v2944_v52 = vld [vmem:[#allocation2 + $0xaa] sm:$0xff]  ;;  %v2910_v5 = vld [vmem:[#allocation2 + $0x78] sm:$0xff]  ;;  %11345 = vmatpush3.bf16.msra.mxu1 %v12513_v41  ;;  %11384 = vmatprep.subr.bf16.mxu0 %v12514_v24 }
 0x3de   : > { %v2942_v15 = vld [vmem:[#allocation2 + $0x7a] sm:$0xff]  ;;  %5527 = vst [vmem:[#allocation2 + $0xa8] sm:$0xff] %v14149_v63  ;;  %5528 = vst [vmem:[#allocation2 + $0xb0] sm:$0xff] %v14149_v63  ;;  %v10620_v11 = vpack.c.bf16 %v2910_v5, %v14140_v2  ;;  %12128 = vmatprep.subr.bf16.mxu1 %v12516_v49  ;;  %v14192_v61 = vld [vmem:[#allocation2 + $0xc2] sm:$0xff] }
 0x3df   : > { %v14190_v27 = vld [vmem:[#allocation2 + $0xc0] sm:$0xff]  ;;  %5521 = vst [vmem:[#allocation2 + $0x78] sm:$0xff] %v14149_v63  ;;  %5522 = vst [vmem:[#allocation2 + $0x80] sm:$0xff] %v14149_v63  ;;  %v2958_v56 = vld [vmem:[#allocation2 + $0x90] sm:$0xff]  ;;  %v10628_v2 = vpack.c.bf16 %v2942_v15, %v14142_v60  ;;  %v10653_v34 = vpack.c.bf16 %v14108_v17, %v14192_v61 }
 0x3e0   : > { %v2943_v1 = vld [vmem:[#allocation2 + $0x92] sm:$0xff]  ;;  %5530 = vst [vmem:[#allocation2 + $0xc0] sm:$0xff] %v14149_v63  ;;  %5531 = vst [vmem:[#allocation2 + $0xc8] sm:$0xff] %v14149_v63  ;;  %3890 = vmatmul.mubr.bf16.gmra.mrb[144].mxu1 %v10620_v11  ;;  %v10632_v14 = vpack.c.bf16 %v2958_v56, %v2910_v5  ;;  %11385 = vmatpush3.bf16.msra.mxu0 %v12515_v29  ;;  %v10633_v12 = vpack.c.bf16 %v14190_v27, %v2959_v39  ;;  %v12525_v60 = vld [vmem:[#allocation9] sm:$0xff]  }
 0x3e1   : > { %5524 = vst [vmem:[#allocation2 + $0x90] sm:$0xff] %v14149_v63  ;;  %5525 = vst [vmem:[#allocation2 + $0x98] sm:$0xff] %v14149_v63  ;;  %3897 = vmatprep.mubr.bf16.mxu1 %v14183_v22  ;;  %v10621_v13 = vpack.c.bf16 %v2959_v39, %v2958_v56  ;;  %v10629_v58 = vpack.c.bf16 %v2944_v52, %v2943_v1  ;;  %v10640_v31 = vpack.c.bf16 %v2943_v1, %v2942_v15  ;;  %v12534_v17 = vld [vmem:[#allocation9 + $0xd0] sm:$0xff]   ;;  %v12554_v41 = vld [vmem:[#allocation9 + $0xf8] sm:$0xff]  }
 0x3e2   : > { %3954 = vmatprep.mubr.bf16.mxu0 %v10632_v14  ;;  %11422 = vmatprep.subr.bf16.mxu0 %v12524_v47  ;;  %v14232_v24 = vld [vmem:[#allocation3 + $0x2] sm:$0xff]  ;;  %v14236_v29 = vld [vmem:[#allocation3 + $0xd9] sm:$0xff] }
 0x3e3   : > { %3955 = vmatmul.mubr.bf16.gmra.mrb[168].mxu0 %v10628_v2  ;;  %8436 = vst [vmem:[#allocation3 + $0x8] sm:$0xff] %v14149_v63  ;;  %8435 = vst [vmem:[#allocation3] sm:$0xff] %v14149_v63  ;;  %v12555_v39 = vld [vmem:[#allocation9 + $0xb8] sm:$0xff]   ;;  %v14238_v5 = vld [vmem:[#allocation3 + $0xda] sm:$0xff] }
 0x3e4   : > { %3962 = vmatprep.mubr.bf16.mxu0 %v10633_v12  ;;  %8462 = vst [vmem:[#allocation3 + $0xd8] sm:$0xff] %v14149_v63  ;;  %8463 = vst [vmem:[#allocation3 + $0xe0] sm:$0xff] %v14149_v63 }
 0x3e8   : > { %3898 = vmatmul.mubr.bf16.gmra.mrb[148].mxu1 %v10621_v13 }
 0x3e9   : > { %4003 = vmatprep.mubr.bf16.mxu1 %v10638_v28 }
 0x3eb   : > { %3963 = vmatmul.mubr.bf16.gmra.mrb[172].mxu0 %v10629_v58 }
 0x3ec   : > { %4068 = vmatprep.mubr.bf16.mxu0 %v14129_v45  ;;  %v10641_v45 = vpack.c.bf16 %v14192_v61, %v2944_v52  ;;  %v12558_v52 = vld [vmem:[#allocation9 + $0x1c0] sm:$0xff]  }
 0x3f0   : > { %4004 = vmatmul.mubr.bf16.vlgmr.msra.gmra.mrb[152].mxu1 %v10634_v33  ;;  %v10645_v33 = vpack.c.bf16 %v14149_v63, %v14190_v27 }
 0x3f1   : > { %4011 = vmatprep.mubr.bf16.mxu1 %v10639_v0  ;;  %12129 = vmatpush3.bf16.msra.mxu1 %v12516_v49  ;;  %v12556_v49 = vld [vmem:[#allocation9 + $0x140] sm:$0xff]  }
 0x3f2   : > { %12130 = vmatprep.subr.bf16.mxu1 %v12517_v19 }
 0x3f3   : > { %4069 = vmatmul.mubr.bf16.vlgmr.msra.gmra.mrb[176].mxu0 %v14157_v26  ;;  %v12526_v26 = vld [vmem:[#allocation9 + $0xc0] sm:$0xff]  }
 0x3f4   : > { %4076 = vmatprep.mubr.bf16.mxu0 %v10624_v55  ;;  %11423 = vmatpush3.bf16.msra.mxu0 %v12525_v60  ;;  %v12549_v55 = vld [vmem:[#allocation9 + $0x30] sm:$0xff]  }
 0x3f5   : > { %12131 = vmatpush3.bf16.msra.mxu1 %v12517_v19  ;;  %11424 = vmatprep.subr.bf16.mxu0 %v12528_v16 }
 0x3f6   : > { %12132 = vmatprep.subr.bf16.mxu1 %v12518_v25 }
 0x3f8   : > { %4012 = vmatmul.mubr.bf16.gmra.mrb[156].mxu1 %v10635_v42  ;;  %v12523_v42 = vld [vmem:[#allocation8 + $0x238] sm:$0xff]  }
 0x3f9   : > { %4019 = vmatprep.mubr.bf16.mxu1 %v10640_v31  ;;  %12133 = vmatpush3.bf16.msra.mxu1 %v12518_v25 }
 0x3fa   : > { %12134 = vmatprep.subr.bf16.mxu1 %v12519_v18 }
 0x3fb   : > { %4077 = vmatmul.mubr.bf16.gmra.mrb[180].mxu0 %v10620_v11 }
 0x3fc   : > { %4084 = vmatprep.mubr.bf16.mxu0 %v14183_v22  ;;  %v12551_v22 = vld [vmem:[#allocation9 + $0xb0] sm:$0xff]  }
 0x3fd   : > { %12135 = vmatpush3.bf16.msra.mxu1 %v12519_v18 }
 0x3fe   : > { %12136 = vmatprep.subr.bf16.mxu1 %v12520_v43 }
 0x400   : > { %4020 = vmatmul.mubr.bf16.gmra.mrb[160].mxu1 %v10636_v32  ;;  %v12553_v32 = vld [vmem:[#allocation9 + $0x38] sm:$0xff]  }
 0x401   : > { %4027 = vmatprep.mubr.bf16.mxu1 %v10641_v45  ;;  %12137 = vmatpush3.bf16.msra.mxu1 %v12520_v43 }
 0x402   : > { %12138 = vmatprep.subr.bf16.mxu1 %v12521_v3 }
 0x403   : > { %4085 = vmatmul.mubr.bf16.gmra.mrb[184].mxu0 %v10621_v13 }
 0x404   : > { %4092 = vmatprep.mubr.bf16.mxu0 %v10649_v35 }
 0x405   : > { %12139 = vmatpush3.bf16.msra.mxu1 %v12521_v3 }
 0x406   : > { %12140 = vmatprep.subr.bf16.mxu1 %v12522_v44 }
 0x408   : > { %4028 = vmatmul.mubr.bf16.gmra.mrb[164].mxu1 %v10637_v20  ;;  %v12550_v20 = vld [vmem:[#allocation9 + $0xf0] sm:$0xff]  }
 0x409   : > { %12141 = vmatpush3.bf16.msra.mxu1 %v12522_v44  ;;  %12144 = vmatprep.mubr.bf16.mxu1 %v14162_v38  ;;  %v12529_v38 = vld [vmem:[#allocation9 + $0x8] sm:$0xff]  }
 0x40a   : > { %12142 = vmatprep.subr.bf16.mxu1 %v12523_v42  ;;  %11425 = vmatpush3.bf16.msra.mxu0 %v12529_v38 }
 0x40b   : > { %4093 = vmatmul.mubr.bf16.gmra.mrb[188].mxu0 %v10645_v33  ;;  %11426 = vmatprep.subr.bf16.mxu0 %v12532_v46 }
 0x40d   : > { %12143 = vmatpush3.bf16.msra.mxu1 %v12523_v42 }
 0x40e   : > { %11462 = vmatprep.subr.bf16.mxu1 %v12526_v26  ;;  %11427 = vmatpush3.bf16.msra.mxu0 %v12533_v53 }
 0x40f   : > { %11428 = vmatprep.subr.bf16.mxu0 %v12536_v23 }
 0x410   : > { %12145 = vmatmul.mubr.bf16.vlgmr.msra.gmra.mrb[168].mxu1 %v10628_v2 }
 0x411   : > { %12148 = vmatprep.mubr.bf16.mxu1 %v10629_v58  ;;  %11463 = vmatpush3.bf16.msra.mxu1 %v12527_v40 }
 0x412   : > { %11464 = vmatprep.subr.bf16.mxu1 %v12530_v62  ;;  %11429 = vmatpush3.bf16.msra.mxu0 %v12537_v48 }
 0x413   : > { %11430 = vmatprep.subr.bf16.mxu0 %v12540_v4 }
 0x415   : > { %11465 = vmatpush3.bf16.msra.mxu1 %v12531_v57 }
 0x416   : > { %11466 = vmatprep.subr.bf16.mxu1 %v12534_v17  ;;  %11431 = vmatpush3.bf16.msra.mxu0 %v12541_v37 }
 0x417   : > { %11432 = vmatprep.subr.bf16.mxu0 %v12544_v51 }
 0x418   : > { %12149 = vmatmul.mubr.bf16.gmra.mrb[172].mxu1 %v10653_v34 }
 0x419   : > { %11467 = vmatpush3.bf16.msra.mxu1 %v12535_v36 }
 0x41a   : > { %11468 = vmatprep.subr.bf16.mxu1 %v12538_v8  ;;  %11433 = vmatpush3.bf16.msra.mxu0 %v12545_v6 }
 0x41b   : > { %11434 = vmatprep.subr.bf16.mxu0 %v12548_v10 }
 0x41d   : > { %11469 = vmatpush3.bf16.msra.mxu1 %v12539_v50 }
 0x41e   : > { %11470 = vmatprep.subr.bf16.mxu1 %v12542_v21  ;;  %11435 = vmatpush3.bf16.msra.mxu0 %v12549_v55 }
 0x41f   : > { %11436 = vmatprep.subr.bf16.mxu0 %v12552_v54 }
 0x421   : > { %11471 = vmatpush3.bf16.msra.mxu1 %v12543_v9 }
 0x422   : > { %11472 = vmatprep.subr.bf16.mxu1 %v12546_v7  ;;  %11437 = vmatpush3.bf16.msra.mxu0 %v12553_v32 }
 0x423   : > { %11502 = vmatprep.subr.bf16.mxu0 %v12556_v49 }
 0x425   : > { %11473 = vmatpush3.bf16.msra.mxu1 %v12547_v59 }
 0x426   : > { %11474 = vmatprep.subr.bf16.mxu1 %v12550_v20 }
 0x429   : > { %11475 = vmatpush3.bf16.msra.mxu1 %v12551_v22 }
 0x42a   : > { %11476 = vmatprep.subr.bf16.mxu1 %v12554_v41 }
 0x42d   : > { %11477 = vmatpush3.bf16.msra.mxu1 %v12555_v39 }
 0x42e   : > { %11542 = vmatprep.subr.bf16.mxu1 %v12558_v52 }
 0x493   : > { %v11266_v15 = vpop.f32.mrb[136].mxu1 }
 0x494   : > { %v11267_v11 = vpop.f32.mrb[137].mxu1 }
 0x495   : > { %v11268_v27 = vadd.f32 %v11267_v11, %v11266_v15  ;;  %v11269_v61 = vpop.f32.mrb[138].mxu1 }
 0x496   : > { %v11306_v56 = vpop.f32.mrb[160].mxu0  ;;  %v11270_v1 = vpop.f32.mrb[139].mxu1 }
 0x497   : > { %v11271_v14 = vadd.f32 %v11270_v1, %v11269_v61  ;;  %v11307_v2 = vpop.f32.mrb[161].mxu0 }
 0x498   : > { %v11308_v12 = vadd.f32 %v11307_v2, %v11306_v56  ;;  %v11309_v13 = vpop.f32.mrb[162].mxu0 }
 0x499   : > { %v11310_v28 = vpop.f32.mrb[163].mxu0 }
 0x49a   : > { %v3941_v58 = vadd.f32 %v11308_v12, %v11268_v27  ;;  %v11311_v19 = vadd.f32 %v11310_v28, %v11309_v13 }
 0x49b   : > { %v11272_v0 = vpop.f32.mrb[140].mxu1 }
 0x49c   : > { %v3944_v25 = vadd.f32 %v11311_v19, %v11271_v14  ;;  %v11273_v18 = vpop.f32.mrb[141].mxu1 }
 0x49d   : > { %v11274_v31 = vadd.f32 %v11273_v18, %v11272_v0  ;;  %v11275_v43 = vpop.f32.mrb[142].mxu1 }
 0x49e   : > { %v11312_v3 = vpop.f32.mrb[164].mxu0  ;;  %v11276_v45 = vpop.f32.mrb[143].mxu1 }
 0x49f   : > { %v11277_v35 = vadd.f32 %v11276_v45, %v11275_v43  ;;  %v11313_v44 = vpop.f32.mrb[165].mxu0 }
 0x4a0   : > { %v11314_v42 = vadd.f32 %v11313_v44, %v11312_v3  ;;  %v11315_v33 = vpop.f32.mrb[166].mxu0 }
 0x4a1   : > { %v11316_v34 = vpop.f32.mrb[167].mxu0 }
 0x4a2   : > { %v3949_v47 = vadd.f32 %v11314_v42, %v11274_v31  ;;  %v11317_v60 = vadd.f32 %v11316_v34, %v11315_v33 }
 0x4a4   : > { %v3952_v26 = vadd.f32 %v11317_v60, %v11277_v35 }
 0x4b3   : > { %v11278_v40 = vpop.f32.mrb[144].mxu1 }
 0x4b4   : > { %v11279_v16 = vpop.f32.mrb[145].mxu1 }
 0x4b5   : > { %v11280_v38 = vadd.f32 %v11279_v16, %v11278_v40  ;;  %v11281_v62 = vpop.f32.mrb[146].mxu1 }
 0x4b6   : > { %v11318_v57 = vpop.f32.mrb[168].mxu0  ;;  %v11282_v46 = vpop.f32.mrb[147].mxu1 }
 0x4b7   : > { %v11283_v53 = vadd.f32 %v11282_v46, %v11281_v62  ;;  %v11319_v17 = vpop.f32.mrb[169].mxu0 }
 0x4b8   : > { %v11320_v36 = vadd.f32 %v11319_v17, %v11318_v57  ;;  %v11321_v23 = vpop.f32.mrb[170].mxu0 }
 0x4b9   : > { %v11322_v48 = vpop.f32.mrb[171].mxu0 }
 0x4ba   : > { %v3957_v8 = vadd.f32 %v11320_v36, %v11280_v38  ;;  %v11323_v50 = vadd.f32 %v11322_v48, %v11321_v23 }
 0x4bb   : > { %v11284_v4 = vpop.f32.mrb[148].mxu1 }
 0x4bc   : > { %v3960_v37 = vadd.f32 %v11323_v50, %v11283_v53  ;;  %v11285_v21 = vpop.f32.mrb[149].mxu1 }
 0x4bd   : > { %v11286_v9 = vadd.f32 %v11285_v21, %v11284_v4  ;;  %v11287_v51 = vpop.f32.mrb[150].mxu1 }
 0x4be   : > { %v11324_v6 = vpop.f32.mrb[172].mxu0  ;;  %v11288_v7 = vpop.f32.mrb[151].mxu1 }
 0x4bf   : > { %v11289_v59 = vadd.f32 %v11288_v7, %v11287_v51  ;;  %v11325_v10 = vpop.f32.mrb[173].mxu0 }
 0x4c0   : > { %v11326_v55 = vadd.f32 %v11325_v10, %v11324_v6  ;;  %v11327_v20 = vpop.f32.mrb[174].mxu0 }
 0x4c1   : > { %v11328_v22 = vpop.f32.mrb[175].mxu0 }
 0x4c2   : > { %v3965_v54 = vadd.f32 %v11326_v55, %v11286_v9  ;;  %v11329_v32 = vadd.f32 %v11328_v22, %v11327_v20 }
 0x4c3   : > { %v11346_v41 = vpop.f32.mrb[152].mxu1 }
 0x4c4   : > { %v3968_v49 = vadd.f32 %v11329_v32, %v11289_v59  ;;  %v11347_v39 = vpop.f32.mrb[153].mxu1 }
 0x4c5   : > { %v11348_v52 = vadd.f32 %v11347_v39, %v11346_v41  ;;  %v11349_v15 = vpop.f32.mrb[154].mxu1 }
 0x4c6   : > { %v11386_v11 = vpop.f32.mrb[176].mxu0  ;;  %v11350_v27 = vpop.f32.mrb[155].mxu1 }
 0x4c7   : > { %v4006_v61 = vadd.f32 %v11348_v52, %v3941_v58  ;;  %v11351_v56 = vadd.f32 %v11350_v27, %v11349_v15  ;;  %v11387_v1 = vpop.f32.mrb[177].mxu0 }
 0x4c8   : > { %v11388_v14 = vadd.f32 %v11387_v1, %v11386_v11  ;;  %v11389_v2 = vpop.f32.mrb[178].mxu0 }
 0x4c9   : > { %v4009_v12 = vadd.f32 %v11351_v56, %v3944_v25  ;;  %v11390_v13 = vpop.f32.mrb[179].mxu0 }
 0x4ca   : > { %v11391_v28 = vadd.f32 %v11390_v13, %v11389_v2  ;;  %v4071_v19 = vadd.f32 %v11388_v14, %v4006_v61 }
 0x4cb   : > { %v11352_v0 = vpop.f32.mrb[156].mxu1 }
 0x4cc   : > { %v11353_v18 = vpop.f32.mrb[157].mxu1  ;;  %v4074_v31 = vadd.f32 %v11391_v28, %v4009_v12 }
 0x4cd   : > { %v11354_v43 = vadd.f32 %v11353_v18, %v11352_v0  ;;  %v11355_v3 = vpop.f32.mrb[158].mxu1 }
 0x4ce   : > { %v11392_v45 = vpop.f32.mrb[180].mxu0  ;;  %v11356_v35 = vpop.f32.mrb[159].mxu1 }
 0x4cf   : > { %v4014_v44 = vadd.f32 %v11354_v43, %v3949_v47  ;;  %v11357_v42 = vadd.f32 %v11356_v35, %v11355_v3  ;;  %v11393_v33 = vpop.f32.mrb[181].mxu0 }
 0x4d0   : > { %v11394_v34 = vadd.f32 %v11393_v33, %v11392_v45  ;;  %v11395_v58 = vpop.f32.mrb[182].mxu0 }
 0x4d1   : > { %v4017_v60 = vadd.f32 %v11357_v42, %v3952_v26  ;;  %v11396_v40 = vpop.f32.mrb[183].mxu0 }
 0x4d2   : > { %v11397_v16 = vadd.f32 %v11396_v40, %v11395_v58  ;;  %v4079_v38 = vadd.f32 %v11394_v34, %v4014_v44 }
 0x4d3   : > { %v11358_v25 = vpop.f32.mrb[160].mxu1 }
 0x4d4   : > { %v11359_v62 = vpop.f32.mrb[161].mxu1  ;;  %v4082_v57 = vadd.f32 %v11397_v16, %v4017_v60 }
 0x4d5   : > { %v11360_v46 = vadd.f32 %v11359_v62, %v11358_v25  ;;  %v11361_v53 = vpop.f32.mrb[162].mxu1 }
 0x4d6   : > { %v11398_v17 = vpop.f32.mrb[184].mxu0  ;;  %v11362_v36 = vpop.f32.mrb[163].mxu1 }
 0x4d7   : > { %v4022_v23 = vadd.f32 %v11360_v46, %v3957_v8  ;;  %v11363_v48 = vadd.f32 %v11362_v36, %v11361_v53  ;;  %v11399_v50 = vpop.f32.mrb[185].mxu0  ;;  %v12557_v46 = vld [vmem:[#allocation9 + $0x100] sm:$0xff]  }
 0x4d8   : > { %v11400_v4 = vadd.f32 %v11399_v50, %v11398_v17  ;;  %v11401_v47 = vpop.f32.mrb[186].mxu0 }
 0x4d9   : > { %v4025_v21 = vadd.f32 %v11363_v48, %v3960_v37  ;;  %v11402_v9 = vpop.f32.mrb[187].mxu0  ;;  %v12560_v48 = vld [vmem:[#allocation9 + $0x148] sm:$0xff]  }
 0x4da   : > { %v11403_v51 = vadd.f32 %v11402_v9, %v11401_v47  ;;  %v4087_v6 = vadd.f32 %v11400_v4, %v4022_v23 }
 0x4db   : > { %v11364_v26 = vpop.f32.mrb[164].mxu1 }
 0x4dc   : > { %v11365_v7 = vpop.f32.mrb[165].mxu1  ;;  %v4090_v59 = vadd.f32 %v11403_v51, %v4025_v21 }
 0x4dd   : > { %v11366_v10 = vadd.f32 %v11365_v7, %v11364_v26  ;;  %v11367_v55 = vpop.f32.mrb[166].mxu1 }
 0x4de   : > { %v11404_v20 = vpop.f32.mrb[188].mxu0  ;;  %v11368_v22 = vpop.f32.mrb[167].mxu1 }
 0x4df   : > { %v4030_v32 = vadd.f32 %v11366_v10, %v3965_v54  ;;  %v11369_v41 = vadd.f32 %v11368_v22, %v11367_v55  ;;  %v11405_v39 = vpop.f32.mrb[189].mxu0  ;;  %v12562_v10 = vld [vmem:[#allocation9 + $0x1c8] sm:$0xff]   ;;  %v12564_v22 = vld [vmem:[#allocation9 + $0x150] sm:$0xff]  }
 0x4e0   : > { %v11406_v52 = vadd.f32 %v11405_v39, %v11404_v20  ;;  %v11407_v8 = vpop.f32.mrb[190].mxu0 }
 0x4e1   : > { %v4033_v15 = vadd.f32 %v11369_v41, %v3968_v49  ;;  %v11408_v11 = vpop.f32.mrb[191].mxu0  ;;  %v12565_v41 = vld [vmem:[#allocation9 + $0x110] sm:$0xff]  }
 0x4e2   : > { %v11409_v27 = vadd.f32 %v11408_v11, %v11407_v8  ;;  %v4095_v61 = vadd.f32 %v11406_v52, %v4030_v32  ;;  %v12563_v32 = vld [vmem:[#allocation9 + $0x188] sm:$0xff]  }
 0x4e3   : > { %v12146_v37 = vpop.f32.mrb[168].mxu1 }
 0x4e4   : > { %v4144_v56 = vadd.f32 %v12146_v37, %v4079_v38  ;;  %v4135_v1 = vpop.f32.mrb[169].mxu1  ;;  %v4098_v14 = vadd.f32 %v11409_v27, %v4033_v15  ;;  %v12568_v27 = vld [vmem:[#allocation9 + $0x158] sm:$0xff]  }
 0x4e5   : > { %v4136_v2 = vadd.f32 %v4135_v1, %v4071_v19  ;;  %v12147_v12 = vpop.f32.mrb[170].mxu1 }
 0x4e6   : > { %v14242_v13 = vmax.f32 %v4144_v56, 0.0  ;;  %v4147_v28 = vadd.f32 %v12147_v12, %v4082_v57  ;;  %v4138_v0 = vpop.f32.mrb[171].mxu1  ;;  %v12569_v12 = vld [vmem:[#allocation9 + $0x118] sm:$0xff]  }
 0x4e7   : > { %v14244_v18 = vmax.f32 %v4136_v2, 0.0  ;;  %v4139_v54 = vadd.f32 %v4138_v0, %v4074_v31 }
 0x4e8   : > { %4230 = vst [vmem:[#allocation3 + $0x49] sm:$0xff] %v14242_v13  ;;  %v14247_v43 = vmax.f32 %v4147_v28, 0.0  ;;  %v12570_v28 = vld [vmem:[#allocation9 + $0x1d8] sm:$0xff]  }
 0x4e9   : > { %4228 = vst [vmem:[#allocation3 + $0x19] sm:$0xff] %v14244_v18  ;;  %v14250_v49 = vmax.f32 %v4139_v54, 0.0  ;;  %v10658_v3 = vpack.c.bf16 %v14244_v18, %v14230_v30  ;;  %v12572_v54 = vld [vmem:[#allocation9 + $0x160] sm:$0xff]  }
 0x4ea   : > { %4231 = vst [vmem:[#allocation3 + $0x61] sm:$0xff] %v14247_v43  ;;  %v10671_v19 = vpack.c.bf16 %v14247_v43, %v14242_v13 }
 0x4eb   : > { %4229 = vst [vmem:[#allocation3 + $0x31] sm:$0xff] %v14250_v49  ;;  %v12150_v45 = vpop.f32.mrb[172].mxu1  ;;  %5205 = vmatprep.mubr.bf16.mxu0 %v10658_v3  ;;  %v14260_v31 = vpack.c.bf16 %v14242_v13, %v14250_v49  ;;  %v10670_v35 = vpack.c.bf16 %v14250_v49, %v14244_v18  ;;  %v12571_v3 = vld [vmem:[#allocation9 + $0x198] sm:$0xff]   ;;  %v12592_v18 = vld [vmem:[#allocation9 + $0x220] sm:$0xff]   ;;  %v12593_v49 = vld [vmem:[#allocation9 + $0x228] sm:$0xff]  }
 0x4ec   : > { %v4160_v44 = vadd.f32 %v12150_v45, %v4095_v61  ;;  %v4151_v42 = vpop.f32.mrb[173].mxu1 }
 0x4ed   : > { %v4152_v33 = vadd.f32 %v4151_v42, %v4087_v6  ;;  %v12151_v30 = vpop.f32.mrb[174].mxu1  ;;  %v12559_v6 = vld [vmem:[#allocation9 + $0x180] sm:$0xff]   ;;  %v12576_v42 = vld [vmem:[#allocation9 + $0x168] sm:$0xff]  }
 0x4ee   : > { %v14264_v34 = vmax.f32 %v4160_v44, 0.0  ;;  %v4163_v58 = vadd.f32 %v12151_v30, %v4098_v14  ;;  %v4154_v60 = vpop.f32.mrb[175].mxu1  ;;  %v12567_v14 = vld [vmem:[#allocation9 + $0x190] sm:$0xff]   ;;  %v12574_v44 = vld [vmem:[#allocation9 + $0x1e0] sm:$0xff]  }
 0x4ef   : > { %v14266_v40 = vmax.f32 %v4152_v33, 0.0  ;;  %v4155_v16 = vadd.f32 %v4154_v60, %v4090_v59  ;;  %v4286_v38 = vld [vmem:[#allocation3 + $0x48] sm:$0xff]  ;;  %v12561_v59 = vld [vmem:[#allocation9 + $0x108] sm:$0xff]   ;;  %v12575_v33 = vld [vmem:[#allocation9 + $0x1a0] sm:$0xff]  }
 0x4f0   : > { %v14268_v25 = vld [vmem:[#allocation3 + $0x4a] sm:$0xff]  ;;  %4234 = vst [vmem:[#allocation3 + $0xa9] sm:$0xff] %v14264_v34  ;;  %v14271_v62 = vmax.f32 %v4163_v58, 0.0  ;;  %v4237_v57 = vld [vmem:[#allocation3 + $0x18] sm:$0xff] }
 0x4f1   : > { %v14273_v53 = vld [vmem:[#allocation3 + $0x1a] sm:$0xff]  ;;  %6854 = vst [vmem:[#allocation3 + $0x48] sm:$0xff] %v14149_v63  ;;  %6855 = vst [vmem:[#allocation3 + $0x50] sm:$0xff] %v14149_v63  ;;  %v14278_v17 = vmax.f32 %v4155_v16, 0.0  ;;  %v10654_v36 = vpack.c.bf16 %v4237_v57, %v14149_v63  ;;  %v14285_v50 = vpack.c.bf16 %v14266_v40, %v14247_v43  ;;  %v14287_v4 = vld [vmem:[#allocation3 + $0x62] sm:$0xff] }
 0x4f2   : > { %4232 = vst [vmem:[#allocation3 + $0x79] sm:$0xff] %v14266_v40  ;;  %v14281_v23 = vld [vmem:[#allocation3 + $0x60] sm:$0xff]  ;;  %6849 = vst [vmem:[#allocation3 + $0x20] sm:$0xff] %v14149_v63  ;;  %v4285_v47 = vld [vmem:[#allocation3 + $0x30] sm:$0xff]  ;;  %v10673_v9 = vpack.c.bf16 %v14271_v62, %v14264_v34  ;;  %v10662_v7 = vpack.c.bf16 %v14273_v53, %v14232_v24  ;;  %v10685_v13 = vpack.c.bf16 %v14236_v29, %v14271_v62 }
 0x4f3   : > { %6848 = vst [vmem:[#allocation3 + $0x18] sm:$0xff] %v14149_v63  ;;  %4235 = vst [vmem:[#allocation3 + $0xc1] sm:$0xff] %v14271_v62  ;;  %v14292_v21 = vld [vmem:[#allocation3 + $0x32] sm:$0xff]  ;;  %5206 = vmatmul.mubr.bf16.vlgmr.msra.gmra.mrb[192].mxu0 %v10654_v36  ;;  %v10666_v51 = vpack.c.bf16 %v4285_v47, %v4237_v57  ;;  %v14301_v26 = vpack.c.bf16 %v14264_v34, %v14278_v17  ;;  %v10672_v55 = vpack.c.bf16 %v14278_v17, %v14266_v40  ;;  %v12566_v24 = vld [vmem:[#allocation9 + $0x1d0] sm:$0xff]  }
 0x4f4   : > { %6857 = vst [vmem:[#allocation3 + $0x60] sm:$0xff] %v14149_v63  ;;  %6858 = vst [vmem:[#allocation3 + $0x68] sm:$0xff] %v14149_v63  ;;  %5213 = vmatprep.mubr.bf16.mxu0 %v14260_v31  ;;  %11503 = vmatpush3.bf16.msra.mxu0 %v12557_v46  ;;  %v10667_v20 = vpack.c.bf16 %v14281_v23, %v4286_v38  ;;  %v14319_v11 = vpack.c.bf16 %v4286_v38, %v4285_v47  ;;  %v12577_v58 = vld [vmem:[#allocation9 + $0x128] sm:$0xff]   ;;  %v12580_v38 = vld [vmem:[#allocation9 + $0x170] sm:$0xff]  }
 0x4f5   : > { %4233 = vst [vmem:[#allocation3 + $0x91] sm:$0xff] %v14278_v17  ;;  %6851 = vst [vmem:[#allocation3 + $0x30] sm:$0xff] %v14149_v63  ;;  %5270 = vmatprep.mubr.bf16.mxu1 %v10666_v51  ;;  %11504 = vmatprep.subr.bf16.mxu0 %v12560_v48  ;;  %v14337_v2 = vpack.c.bf16 %v14268_v25, %v14292_v21  ;;  %v12578_v60 = vld [vmem:[#allocation9 + $0x1e8] sm:$0xff]   ;;  %v12581_v46 = vld [vmem:[#allocation9 + $0x130] sm:$0xff]   ;;  %v10674_v47 = vpack.c.bf16 %v14292_v21, %v14273_v53 }
 0x4f6   : > { %6852 = vst [vmem:[#allocation3 + $0x38] sm:$0xff] %v14149_v63  ;;  %5271 = vmatmul.mubr.bf16.vlgmr.msra.gmra.mrb[176].mxu1 %v10662_v7  ;;  %v12579_v57 = vld [vmem:[#allocation9 + $0x1a8] sm:$0xff]   ;;  %v12584_v48 = vld [vmem:[#allocation9 + $0x178] sm:$0xff]   ;;  %v12583_v51 = vld [vmem:[#allocation9 + $0x1b0] sm:$0xff]   ;;  %v10675_v21 = vpack.c.bf16 %v14287_v4, %v14268_v25 }
 0x4f7   : > { %5278 = vmatprep.mubr.bf16.mxu1 %v10667_v20  ;;  %11543 = vmatpush3.bf16.msra.mxu1 %v12559_v6  ;;  %v14311_v39 = vld [vmem:[#allocation3 + $0xa8] sm:$0xff]  ;;  %v12589_v53 = vld [vmem:[#allocation9 + $0x208] sm:$0xff]   ;;  %v12594_v43 = vld [vmem:[#allocation9 + $0x230] sm:$0xff]  }
 0x4f8   : > { %v14313_v52 = vld [vmem:[#allocation3 + $0xaa] sm:$0xff]  ;;  %11505 = vmatpush3.bf16.msra.mxu0 %v12561_v59  ;;  %11544 = vmatprep.subr.bf16.mxu1 %v12562_v10 }
 0x4f9   : > { %v4288_v8 = vld [vmem:[#allocation3 + $0x78] sm:$0xff]  ;;  %6866 = vst [vmem:[#allocation3 + $0xa8] sm:$0xff] %v14149_v63  ;;  %6867 = vst [vmem:[#allocation3 + $0xb0] sm:$0xff] %v14149_v63  ;;  %11506 = vmatprep.subr.bf16.mxu0 %v12564_v22  ;;  %v12585_v7 = vld [vmem:[#allocation9 + $0x138] sm:$0xff]  }
 0x4fa   : > { %v14315_v15 = vld [vmem:[#allocation3 + $0x7a] sm:$0xff]  ;;  %v14323_v37 = vld [vmem:[#allocation3 + $0xc2] sm:$0xff]  ;;  %v14341_v45 = vpack.c.bf16 %v4288_v8, %v14281_v23  ;;  %v12588_v10 = vld [vmem:[#allocation9 + $0x200] sm:$0xff]  }
 0x4fb   : > { %v14321_v61 = vld [vmem:[#allocation3 + $0xc0] sm:$0xff]  ;;  %6860 = vst [vmem:[#allocation3 + $0x78] sm:$0xff] %v14149_v63  ;;  %6861 = vst [vmem:[#allocation3 + $0x80] sm:$0xff] %v14149_v63  ;;  %11545 = vmatpush3.bf16.msra.mxu1 %v12563_v32  ;;  %5214 = vmatmul.mubr.bf16.gmra.mrb[196].mxu0 %v14319_v11  ;;  %v14347_v30 = vpack.c.bf16 %v14315_v15, %v14287_v4  ;;  %v12586_v59 = vld [vmem:[#allocation9 + $0x1f8] sm:$0xff]   ;;  %v10689_v29 = vpack.c.bf16 %v14238_v5, %v14323_v37 }
 0x4fc   : > { %v4289_v56 = vld [vmem:[#allocation3 + $0x90] sm:$0xff]  ;;  %6869 = vst [vmem:[#allocation3 + $0xc0] sm:$0xff] %v14149_v63  ;;  %6870 = vst [vmem:[#allocation3 + $0xc8] sm:$0xff] %v14149_v63  ;;  %5221 = vmatprep.mubr.bf16.mxu0 %v14285_v50  ;;  %11507 = vmatpush3.bf16.msra.mxu0 %v12565_v41  ;;  %v10669_v16 = vpack.c.bf16 %v14321_v61, %v14311_v39  ;;  %v12582_v23 = vld [vmem:[#allocation9 + $0x1f0] sm:$0xff]  }
 0x4fd   : > { %v14327_v1 = vld [vmem:[#allocation3 + $0x92] sm:$0xff]  ;;  %11546 = vmatprep.subr.bf16.mxu1 %v12566_v24  ;;  %v10668_v0 = vpack.c.bf16 %v4289_v56, %v4288_v8  ;;  %11508 = vmatprep.subr.bf16.mxu0 %v12568_v27  ;;  %v10657_v36 = vpack.c.bf16 %v14311_v39, %v4289_v56  ;;  %v12587_v20 = vld [vmem:[#allocation9 + $0x1b8] sm:$0xff]   ;;  %v12590_v22 = vld [vmem:[#allocation9 + $0x210] sm:$0xff]  }
 0x4fe   : > { %6864 = vst [vmem:[#allocation3 + $0x98] sm:$0xff] %v14149_v63  ;;  %6863 = vst [vmem:[#allocation3 + $0x90] sm:$0xff] %v14149_v63  ;;  %5279 = vmatmul.mubr.bf16.gmra.mrb[180].mxu1 %v14337_v2  ;;  %v12573_v63 = vld [vmem:[#allocation9 + $0x120] sm:$0xff]   ;;  %v10665_v6 = vpack.c.bf16 %v14313_v52, %v14327_v1  ;;  %v10676_v32 = vpack.c.bf16 %v14327_v1, %v14315_v15  ;;  %v12600_v4 = vld [vmem:[#allocation11 + $0x48] sm:$0xff]  }
 0x4ff   : > { %5286 = vmatprep.mubr.bf16.mxu1 %v10668_v0  ;;  %11547 = vmatpush3.bf16.msra.mxu1 %v12567_v14  ;;  %v14383_v40 = vld [vmem:[#allocation3 + $0xf0] sm:$0xff]  ;;  %v12604_v41 = vld [vmem:[#allocation11 + $0x50] sm:$0xff]   ;;  %v12608_v24 = vld [vmem:[#allocation11 + $0x58] sm:$0xff]  }
 0x500   : > { %11509 = vmatpush3.bf16.msra.mxu0 %v12569_v12  ;;  %11548 = vmatprep.subr.bf16.mxu1 %v12570_v28  ;;  %v10681_v25 = vpack.c.bf16 %v14383_v40, %v14321_v61  ;;  %v12596_v34 = vld [vmem:[#allocation11 + $0x40] sm:$0xff]   ;;  %v12605_v39 = vld [vmem:[#allocation11 + $0x10] sm:$0xff]   ;;  %v12609_v8 = vld [vmem:[#allocation11 + $0x18] sm:$0xff]  }
 0x501   : > { %11510 = vmatprep.subr.bf16.mxu0 %v12572_v54  ;;  %v12597_v62 = vld [vmem:[#allocation11] sm:$0xff]   ;;  %v12606_v5 = vld [vmem:[#allocation11 + $0xd0] sm:$0xff]   ;;  %v12610_v15 = vld [vmem:[#allocation11 + $0xd8] sm:$0xff]  }
 0x502   : > { %v12598_v17 = vld [vmem:[#allocation11 + $0xc0] sm:$0xff]   ;;  %v12616_v1 = vld [vmem:[#allocation11 + $0x68] sm:$0xff]   ;;  %v12620_v28 = vld [vmem:[#allocation11 + $0x70] sm:$0xff]  }
 0x503   : > { %11549 = vmatpush3.bf16.msra.mxu1 %v12571_v3  ;;  %5222 = vmatmul.mubr.bf16.gmra.mrb[200].mxu0 %v14341_v45  ;;  %v12612_v27 = vld [vmem:[#allocation11 + $0x60] sm:$0xff]   ;;  %v12617_v14 = vld [vmem:[#allocation11 + $0x28] sm:$0xff]   ;;  %v12621_v0 = vld [vmem:[#allocation11 + $0x30] sm:$0xff]  }
 0x504   : > { %5229 = vmatprep.mubr.bf16.mxu0 %v14301_v26  ;;  %11511 = vmatpush3.bf16.msra.mxu0 %v12573_v63  ;;  %v12613_v61 = vld [vmem:[#allocation11 + $0x20] sm:$0xff]   ;;  %v12619_v12 = vld [vmem:[#allocation11 + $0xa8] sm:$0xff]   ;;  %v12622_v54 = vld [vmem:[#allocation11 + $0xf0] sm:$0xff]  }
 0x505   : > { %11550 = vmatprep.subr.bf16.mxu1 %v12574_v44  ;;  %11512 = vmatprep.subr.bf16.mxu0 %v12576_v42  ;;  %v12615_v56 = vld [vmem:[#allocation11 + $0xa0] sm:$0xff]   ;;  %v12623_v3 = vld [vmem:[#allocation11 + $0xb0] sm:$0xff]   ;;  %v12624_v63 = vld [vmem:[#allocation11 + $0x78] sm:$0xff]  }
 0x506   : > { %5287 = vmatmul.mubr.bf16.gmra.mrb[184].mxu1 %v14347_v30  ;;  %v12626_v44 = vld [vmem:[#allocation11 + $0xf8] sm:$0xff]   ;;  %v14390_v42 = vld [vmem:[#allocation2 + $0x1] sm:$0xff] }
 0x507   : > { %5294 = vmatprep.mubr.bf16.mxu1 %v10669_v16  ;;  %11551 = vmatpush3.bf16.msra.mxu1 %v12575_v33  ;;  %v12628_v33 = vld [vmem:[#allocation11 + $0x140] sm:$0xff]  }
 0x508   : > { %11513 = vmatpush3.bf16.msra.mxu0 %v12577_v58  ;;  %11552 = vmatprep.subr.bf16.mxu1 %v12578_v60  ;;  %v12627_v58 = vld [vmem:[#allocation11 + $0xb8] sm:$0xff]   ;;  %v12630_v60 = vld [vmem:[#allocation11 + $0x1c0] sm:$0xff]  }
 0x509   : > { %11514 = vmatprep.subr.bf16.mxu0 %v12580_v38  ;;  %v14396_v16 = vld [vmem:[#allocation2 + $0xd9] sm:$0xff] }
 0x50a   : > { %v14398_v38 = vld [vmem:[#allocation2 + $0xda] sm:$0xff] }
 0x50b   : > { %11553 = vmatpush3.bf16.msra.mxu1 %v12579_v57  ;;  %5230 = vmatmul.mubr.bf16.gmra.mrb[204].mxu0 %v10657_v36  ;;  %7111 = vst [vmem:[#allocation2 + $0xd8] sm:$0xff] %v14383_v40  ;;  %7112 = vst [vmem:[#allocation2 + $0xe0] sm:$0xff] %v14383_v40 }
 0x50c   : > { %11515 = vmatpush3.bf16.msra.mxu0 %v12581_v46  ;;  %5335 = vmatprep.mubr.bf16.mxu0 %v10674_v47 }
 0x50d   : > { %11554 = vmatprep.subr.bf16.mxu1 %v12582_v23  ;;  %11516 = vmatprep.subr.bf16.mxu0 %v12584_v48 }
 0x50e   : > { %5295 = vmatmul.mubr.bf16.gmra.mrb[188].mxu1 %v10665_v6 }
 0x50f   : > { %11555 = vmatpush3.bf16.msra.mxu1 %v12583_v51  ;;  %5400 = vmatprep.mubr.bf16.mxu1 %v14260_v31  ;;  %v12591_v31 = vld [vmem:[#allocation9 + $0x218] sm:$0xff]  }
 0x510   : > { %11517 = vmatpush3.bf16.msra.mxu0 %v12585_v7  ;;  %11556 = vmatprep.subr.bf16.mxu1 %v12586_v59 }
 0x511   : > { %12152 = vmatprep.subr.bf16.mxu0 %v12588_v10 }
 0x513   : > { %11557 = vmatpush3.bf16.msra.mxu1 %v12587_v20  ;;  %5336 = vmatmul.mubr.bf16.vlgmr.msra.gmra.mrb[208].mxu0 %v10670_v35  ;;  %v10677_v35 = vpack.c.bf16 %v14323_v37, %v14313_v52  ;;  %v12607_v52 = vld [vmem:[#allocation11 + $0x90] sm:$0xff]   ;;  %v12614_v37 = vld [vmem:[#allocation11 + $0xe0] sm:$0xff]  }
 0x514   : > { %5343 = vmatprep.mubr.bf16.mxu0 %v10675_v21  ;;  %12153 = vmatpush3.bf16.msra.mxu0 %v12588_v10 }
 0x515   : > { %12154 = vmatprep.subr.bf16.mxu0 %v12589_v53  ;;  %11594 = vmatprep.subr.bf16.mxu1 %v12596_v34 }
 0x516   : > { %5401 = vmatmul.mubr.bf16.vlgmr.msra.gmra.mrb[192].mxu1 %v14319_v11  ;;  %v12611_v11 = vld [vmem:[#allocation11 + $0x98] sm:$0xff]  }
 0x517   : > { %5408 = vmatprep.mubr.bf16.mxu1 %v14285_v50  ;;  %v12599_v50 = vld [vmem:[#allocation11 + $0x80] sm:$0xff]   ;;  %11595 = vmatpush3.bf16.msra.mxu1 %v12597_v62 }
 0x518   : > { %12155 = vmatpush3.bf16.msra.mxu0 %v12589_v53  ;;  %11596 = vmatprep.subr.bf16.mxu1 %v12600_v4 }
 0x519   : > { %12156 = vmatprep.subr.bf16.mxu0 %v12590_v22 }
 0x51b   : > { %5344 = vmatmul.mubr.bf16.gmra.mrb[212].mxu0 %v10671_v19  ;;  %v12595_v19 = vld [vmem:[#allocation9 + $0x238] sm:$0xff]  }
 0x51c   : > { %5351 = vmatprep.mubr.bf16.mxu0 %v10676_v32  ;;  %12157 = vmatpush3.bf16.msra.mxu0 %v12590_v22 }
 0x51d   : > { %12158 = vmatprep.subr.bf16.mxu0 %v12591_v31 }
 0x51e   : > { %5409 = vmatmul.mubr.bf16.gmra.mrb[196].mxu1 %v14341_v45  ;;  %v12625_v45 = vld [vmem:[#allocation11 + $0x38] sm:$0xff]  }
 0x51f   : > { %5416 = vmatprep.mubr.bf16.mxu1 %v14301_v26  ;;  %v12602_v26 = vld [vmem:[#allocation11 + $0xc8] sm:$0xff]  }
 0x520   : > { %12159 = vmatpush3.bf16.msra.mxu0 %v12591_v31 }
 0x521   : > { %12160 = vmatprep.subr.bf16.mxu0 %v12592_v18 }
 0x523   : > { %5352 = vmatmul.mubr.bf16.gmra.mrb[216].mxu0 %v10672_v55  ;;  %v12603_v55 = vld [vmem:[#allocation11 + $0x88] sm:$0xff]  }
 0x524   : > { %5359 = vmatprep.mubr.bf16.mxu0 %v10677_v35  ;;  %12161 = vmatpush3.bf16.msra.mxu0 %v12592_v18 }
 0x525   : > { %12162 = vmatprep.subr.bf16.mxu0 %v12593_v49 }
 0x526   : > { %5417 = vmatmul.mubr.bf16.gmra.mrb[200].mxu1 %v10657_v36 }
 0x527   : > { %5424 = vmatprep.mubr.bf16.mxu1 %v10685_v13 }
 0x528   : > { %12163 = vmatpush3.bf16.msra.mxu0 %v12593_v49 }
 0x529   : > { %12164 = vmatprep.subr.bf16.mxu0 %v12594_v43 }
 0x52b   : > { %5360 = vmatmul.mubr.bf16.gmra.mrb[220].mxu0 %v10673_v9  ;;  %v12601_v9 = vld [vmem:[#allocation11 + $0x8] sm:$0xff]  }
 0x52c   : > { %12165 = vmatpush3.bf16.msra.mxu0 %v12594_v43  ;;  %12168 = vmatprep.mubr.bf16.mxu0 %v14337_v2  ;;  %v12618_v2 = vld [vmem:[#allocation11 + $0xe8] sm:$0xff]  }
 0x52d   : > { %12166 = vmatprep.subr.bf16.mxu0 %v12595_v19  ;;  %11597 = vmatpush3.bf16.msra.mxu1 %v12601_v9 }
 0x52e   : > { %5425 = vmatmul.mubr.bf16.gmra.mrb[204].mxu1 %v10681_v25  ;;  %11598 = vmatprep.subr.bf16.mxu1 %v12604_v41 }
 0x530   : > { %12167 = vmatpush3.bf16.msra.mxu0 %v12595_v19 }
 0x531   : > { %11634 = vmatprep.subr.bf16.mxu0 %v12598_v17  ;;  %11599 = vmatpush3.bf16.msra.mxu1 %v12605_v39 }
 0x532   : > { %11600 = vmatprep.subr.bf16.mxu1 %v12608_v24 }
 0x533   : > { %12169 = vmatmul.mubr.bf16.vlgmr.msra.gmra.mrb[224].mxu0 %v14347_v30  ;;  %v14392_v30 = vld [vmem:[#allocation2 + $0x2] sm:$0xff] }
 0x534   : > { %12172 = vmatprep.mubr.bf16.mxu0 %v10665_v6  ;;  %11635 = vmatpush3.bf16.msra.mxu0 %v12599_v50  ;;  %7084 = vst [vmem:[#allocation2] sm:$0xff] %v14383_v40  ;;  %7085 = vst [vmem:[#allocation2 + $0x8] sm:$0xff] %v14383_v40 }
 0x535   : > { %11636 = vmatprep.subr.bf16.mxu0 %v12602_v26  ;;  %11601 = vmatpush3.bf16.msra.mxu1 %v12609_v8 }
 0x536   : > { %11602 = vmatprep.subr.bf16.mxu1 %v12612_v27 }
 0x538   : > { %11637 = vmatpush3.bf16.msra.mxu0 %v12603_v55 }
 0x539   : > { %11638 = vmatprep.subr.bf16.mxu0 %v12606_v5  ;;  %11603 = vmatpush3.bf16.msra.mxu1 %v12613_v61 }
 0x53a   : > { %11604 = vmatprep.subr.bf16.mxu1 %v12616_v1 }
 0x53b   : > { %12173 = vmatmul.mubr.bf16.gmra.mrb[228].mxu0 %v10689_v29 }
 0x53c   : > { %11639 = vmatpush3.bf16.msra.mxu0 %v12607_v52 }
 0x53d   : > { %11640 = vmatprep.subr.bf16.mxu0 %v12610_v15  ;;  %11605 = vmatpush3.bf16.msra.mxu1 %v12617_v14 }
 0x53e   : > { %11606 = vmatprep.subr.bf16.mxu1 %v12620_v28 }
 0x540   : > { %11641 = vmatpush3.bf16.msra.mxu0 %v12611_v11 }
 0x541   : > { %11642 = vmatprep.subr.bf16.mxu0 %v12614_v37  ;;  %11607 = vmatpush3.bf16.msra.mxu1 %v12621_v0 }
 0x542   : > { %11608 = vmatprep.subr.bf16.mxu1 %v12624_v63 }
 0x544   : > { %11643 = vmatpush3.bf16.msra.mxu0 %v12615_v56 }
 0x545   : > { %11644 = vmatprep.subr.bf16.mxu0 %v12618_v2  ;;  %11609 = vmatpush3.bf16.msra.mxu1 %v12625_v45 }
 0x546   : > { %11674 = vmatprep.subr.bf16.mxu1 %v12628_v33 }
 0x548   : > { %11645 = vmatpush3.bf16.msra.mxu0 %v12619_v12 }
 0x549   : > { %11646 = vmatprep.subr.bf16.mxu0 %v12622_v54 }
 0x54c   : > { %11647 = vmatpush3.bf16.msra.mxu0 %v12623_v3 }
 0x54d   : > { %11648 = vmatprep.subr.bf16.mxu0 %v12626_v44 }
 0x550   : > { %11649 = vmatpush3.bf16.msra.mxu0 %v12627_v58 }
 0x551   : > { %11714 = vmatprep.subr.bf16.mxu0 %v12630_v60 }
 0x5c6   : > { %v11438_v57 = vpop.f32.mrb[192].mxu0 }
 0x5c7   : > { %v11439_v46 = vpop.f32.mrb[193].mxu0 }
 0x5c8   : > { %v11440_v36 = vadd.f32 %v11439_v46, %v11438_v57  ;;  %v11441_v23 = vpop.f32.mrb[194].mxu0 }
 0x5c9   : > { %v11478_v48 = vpop.f32.mrb[176].mxu1  ;;  %v11442_v47 = vpop.f32.mrb[195].mxu0 }
 0x5ca   : > { %v11443_v51 = vadd.f32 %v11442_v47, %v11441_v23  ;;  %v11479_v6 = vpop.f32.mrb[177].mxu1 }
 0x5cb   : > { %v11480_v7 = vadd.f32 %v11479_v6, %v11478_v48  ;;  %v11481_v59 = vpop.f32.mrb[178].mxu1 }
 0x5cc   : > { %v11482_v10 = vpop.f32.mrb[179].mxu1 }
 0x5cd   : > { %v5273_v20 = vadd.f32 %v11480_v7, %v11440_v36  ;;  %v11483_v53 = vadd.f32 %v11482_v10, %v11481_v59 }
 0x5ce   : > { %v11444_v21 = vpop.f32.mrb[196].mxu0 }
 0x5cf   : > { %v5276_v22 = vadd.f32 %v11483_v53, %v11443_v51  ;;  %v11445_v31 = vpop.f32.mrb[197].mxu0 }
 0x5d0   : > { %v11446_v32 = vadd.f32 %v11445_v31, %v11444_v21  ;;  %v11447_v18 = vpop.f32.mrb[198].mxu0 }
 0x5d1   : > { %v11484_v49 = vpop.f32.mrb[180].mxu1  ;;  %v11448_v35 = vpop.f32.mrb[199].mxu0 }
 0x5d2   : > { %v11449_v13 = vadd.f32 %v11448_v35, %v11447_v18  ;;  %v11485_v43 = vpop.f32.mrb[181].mxu1 }
 0x5d3   : > { %v11486_v19 = vadd.f32 %v11485_v43, %v11484_v49  ;;  %v11487_v25 = vpop.f32.mrb[182].mxu1 }
 0x5d4   : > { %v11488_v29 = vpop.f32.mrb[183].mxu1 }
 0x5d5   : > { %v5281_v34 = vadd.f32 %v11486_v19, %v11446_v32  ;;  %v11489_v62 = vadd.f32 %v11488_v29, %v11487_v25 }
 0x5d6   : > { %v11450_v17 = vpop.f32.mrb[200].mxu0 }
 0x5d7   : > { %v5284_v50 = vadd.f32 %v11489_v62, %v11449_v13  ;;  %v11451_v4 = vpop.f32.mrb[201].mxu0 }
 0x5d8   : > { %v11452_v9 = vadd.f32 %v11451_v4, %v11450_v17  ;;  %v11453_v26 = vpop.f32.mrb[202].mxu0 }
 0x5d9   : > { %v11490_v55 = vpop.f32.mrb[184].mxu1  ;;  %v11454_v41 = vpop.f32.mrb[203].mxu0 }
 0x5da   : > { %v11455_v39 = vadd.f32 %v11454_v41, %v11453_v26  ;;  %v11491_v5 = vpop.f32.mrb[185].mxu1 }
 0x5db   : > { %v11492_v52 = vadd.f32 %v11491_v5, %v11490_v55  ;;  %v11493_v24 = vpop.f32.mrb[186].mxu1 }
 0x5dc   : > { %v11494_v8 = vpop.f32.mrb[187].mxu1 }
 0x5dd   : > { %v5289_v15 = vadd.f32 %v11492_v52, %v11452_v9  ;;  %v11495_v11 = vadd.f32 %v11494_v8, %v11493_v24 }
 0x5de   : > { %v11456_v27 = vpop.f32.mrb[204].mxu0 }
 0x5df   : > { %v5292_v61 = vadd.f32 %v11495_v11, %v11455_v39  ;;  %v11457_v37 = vpop.f32.mrb[205].mxu0 }
 0x5e0   : > { %v11458_v56 = vadd.f32 %v11457_v37, %v11456_v27  ;;  %v11459_v1 = vpop.f32.mrb[206].mxu0 }
 0x5e1   : > { %v11496_v14 = vpop.f32.mrb[188].mxu1  ;;  %v11460_v2 = vpop.f32.mrb[207].mxu0 }
 0x5e2   : > { %v11461_v12 = vadd.f32 %v11460_v2, %v11459_v1  ;;  %v11497_v28 = vpop.f32.mrb[189].mxu1 }
 0x5e3   : > { %v11498_v0 = vadd.f32 %v11497_v28, %v11496_v14  ;;  %v11499_v54 = vpop.f32.mrb[190].mxu1 }
 0x5e4   : > { %v11500_v3 = vpop.f32.mrb[191].mxu1 }
 0x5e5   : > { %v5297_v63 = vadd.f32 %v11498_v0, %v11458_v56  ;;  %v11501_v45 = vadd.f32 %v11500_v3, %v11499_v54 }
 0x5e6   : > { %v11518_v44 = vpop.f32.mrb[208].mxu0 }
 0x5e7   : > { %v5300_v33 = vadd.f32 %v11501_v45, %v11461_v12  ;;  %v11519_v58 = vpop.f32.mrb[209].mxu0 }
 0x5e8   : > { %v11520_v60 = vadd.f32 %v11519_v58, %v11518_v44  ;;  %v11521_v57 = vpop.f32.mrb[210].mxu0 }
 0x5e9   : > { %v11558_v46 = vpop.f32.mrb[192].mxu1  ;;  %v11522_v36 = vpop.f32.mrb[211].mxu0 }
 0x5ea   : > { %v5338_v23 = vadd.f32 %v11520_v60, %v5273_v20  ;;  %v11523_v48 = vadd.f32 %v11522_v36, %v11521_v57  ;;  %v11559_v47 = vpop.f32.mrb[193].mxu1 }
 0x5eb   : > { %v11560_v51 = vadd.f32 %v11559_v47, %v11558_v46  ;;  %v11561_v6 = vpop.f32.mrb[194].mxu1 }
 0x5ec   : > { %v5341_v7 = vadd.f32 %v11523_v48, %v5276_v22  ;;  %v11562_v59 = vpop.f32.mrb[195].mxu1 }
 0x5ed   : > { %v11563_v10 = vadd.f32 %v11562_v59, %v11561_v6  ;;  %v5403_v53 = vadd.f32 %v11560_v51, %v5338_v23 }
 0x5ee   : > { %v11524_v21 = vpop.f32.mrb[212].mxu0 }
 0x5ef   : > { %v11525_v31 = vpop.f32.mrb[213].mxu0  ;;  %v5406_v32 = vadd.f32 %v11563_v10, %v5341_v7 }
 0x5f0   : > { %v11526_v18 = vadd.f32 %v11525_v31, %v11524_v21  ;;  %v11527_v49 = vpop.f32.mrb[214].mxu0 }
 0x5f1   : > { %v11564_v35 = vpop.f32.mrb[196].mxu1  ;;  %v11528_v13 = vpop.f32.mrb[215].mxu0 }
 0x5f2   : > { %v5346_v43 = vadd.f32 %v11526_v18, %v5281_v34  ;;  %v11529_v19 = vadd.f32 %v11528_v13, %v11527_v49  ;;  %v11565_v25 = vpop.f32.mrb[197].mxu1 }
 0x5f3   : > { %v11566_v29 = vadd.f32 %v11565_v25, %v11564_v35  ;;  %v11567_v20 = vpop.f32.mrb[198].mxu1 }
 0x5f4   : > { %v5349_v62 = vadd.f32 %v11529_v19, %v5284_v50  ;;  %v11568_v17 = vpop.f32.mrb[199].mxu1 }
 0x5f5   : > { %v11569_v4 = vadd.f32 %v11568_v17, %v11567_v20  ;;  %v5411_v9 = vadd.f32 %v11566_v29, %v5346_v43 }
 0x5f6   : > { %v11530_v22 = vpop.f32.mrb[216].mxu0 }
 0x5f7   : > { %v11531_v26 = vpop.f32.mrb[217].mxu0  ;;  %v5414_v55 = vadd.f32 %v11569_v4, %v5349_v62 }
 0x5f8   : > { %v11532_v41 = vadd.f32 %v11531_v26, %v11530_v22  ;;  %v11533_v39 = vpop.f32.mrb[218].mxu0 }
 0x5f9   : > { %v11570_v5 = vpop.f32.mrb[200].mxu1  ;;  %v11534_v52 = vpop.f32.mrb[219].mxu0 }
 0x5fa   : > { %v5354_v24 = vadd.f32 %v11532_v41, %v5289_v15  ;;  %v11535_v8 = vadd.f32 %v11534_v52, %v11533_v39  ;;  %v11571_v11 = vpop.f32.mrb[201].mxu1  ;;  %v12629_v41 = vld [vmem:[#allocation11 + $0x100] sm:$0xff]  }
 0x5fb   : > { %v11572_v27 = vadd.f32 %v11571_v11, %v11570_v5  ;;  %v11573_v34 = vpop.f32.mrb[202].mxu1 }
 0x5fc   : > { %v5357_v37 = vadd.f32 %v11535_v8, %v5292_v61  ;;  %v11574_v56 = vpop.f32.mrb[203].mxu1  ;;  %v12632_v8 = vld [vmem:[#allocation11 + $0x148] sm:$0xff]  }
 0x5fd   : > { %v11575_v1 = vadd.f32 %v11574_v56, %v11573_v34  ;;  %v5419_v14 = vadd.f32 %v11572_v27, %v5354_v24 }
 0x5fe   : > { %v11536_v50 = vpop.f32.mrb[220].mxu0 }
 0x5ff   : > { %v11537_v2 = vpop.f32.mrb[221].mxu0  ;;  %v5422_v12 = vadd.f32 %v11575_v1, %v5357_v37 }
 0x600   : > { %v11538_v28 = vadd.f32 %v11537_v2, %v11536_v50  ;;  %v11539_v0 = vpop.f32.mrb[222].mxu0 }
 0x601   : > { %v11576_v54 = vpop.f32.mrb[204].mxu1  ;;  %v11540_v3 = vpop.f32.mrb[223].mxu0 }
 0x602   : > { %v5362_v45 = vadd.f32 %v11538_v28, %v5297_v63  ;;  %v11541_v44 = vadd.f32 %v11540_v3, %v11539_v0  ;;  %v11577_v58 = vpop.f32.mrb[205].mxu1  ;;  %v12634_v28 = vld [vmem:[#allocation11 + $0x1c8] sm:$0xff]   ;;  %v12636_v3 = vld [vmem:[#allocation11 + $0x150] sm:$0xff]  }
 0x603   : > { %v11578_v60 = vadd.f32 %v11577_v58, %v11576_v54  ;;  %v11579_v15 = vpop.f32.mrb[206].mxu1 }
 0x604   : > { %v5365_v57 = vadd.f32 %v11541_v44, %v5300_v33  ;;  %v11580_v46 = vpop.f32.mrb[207].mxu1  ;;  %v12637_v44 = vld [vmem:[#allocation11 + $0x110] sm:$0xff]  }
 0x605   : > { %v11581_v36 = vadd.f32 %v11580_v46, %v11579_v15  ;;  %v5427_v23 = vadd.f32 %v11578_v60, %v5362_v45  ;;  %v12635_v45 = vld [vmem:[#allocation11 + $0x188] sm:$0xff]  }
 0x606   : > { %v12170_v61 = vpop.f32.mrb[224].mxu0 }
 0x607   : > { %v5476_v48 = vadd.f32 %v12170_v61, %v5411_v9  ;;  %v5467_v47 = vpop.f32.mrb[225].mxu0  ;;  %v5430_v51 = vadd.f32 %v11581_v36, %v5365_v57  ;;  %v12640_v36 = vld [vmem:[#allocation11 + $0x158] sm:$0xff]  }
 0x608   : > { %v5468_v6 = vadd.f32 %v5467_v47, %v5403_v53  ;;  %v12171_v7 = vpop.f32.mrb[226].mxu0 }
 0x609   : > { %v14402_v59 = vmax.f32 %v5476_v48, 0.0  ;;  %v5479_v10 = vadd.f32 %v12171_v7, %v5414_v55  ;;  %v5470_v21 = vpop.f32.mrb[227].mxu0  ;;  %v12641_v7 = vld [vmem:[#allocation11 + $0x118] sm:$0xff]  }
 0x60a   : > { %v14404_v31 = vmax.f32 %v5468_v6, 0.0  ;;  %v5471_v63 = vadd.f32 %v5470_v21, %v5406_v32 }
 0x60b   : > { %5562 = vst [vmem:[#allocation2 + $0x49] sm:$0xff] %v14402_v59  ;;  %v14407_v18 = vmax.f32 %v5479_v10, 0.0  ;;  %v12642_v10 = vld [vmem:[#allocation11 + $0x1d8] sm:$0xff]  }
 0x60c   : > { %5560 = vst [vmem:[#allocation2 + $0x19] sm:$0xff] %v14404_v31  ;;  %v14410_v33 = vmax.f32 %v5471_v63, 0.0  ;;  %v10694_v49 = vpack.c.bf16 %v14404_v31, %v14390_v42  ;;  %v12644_v63 = vld [vmem:[#allocation11 + $0x160] sm:$0xff]  }
 0x60d   : > { %5563 = vst [vmem:[#allocation2 + $0x61] sm:$0xff] %v14407_v18  ;;  %v10707_v53 = vpack.c.bf16 %v14407_v18, %v14402_v59 }
 0x60e   : > { %5561 = vst [vmem:[#allocation2 + $0x31] sm:$0xff] %v14410_v33  ;;  %v12174_v35 = vpop.f32.mrb[228].mxu0  ;;  %6536 = vmatprep.mubr.bf16.mxu1 %v10694_v49  ;;  %v14420_v32 = vpack.c.bf16 %v14402_v59, %v14410_v33  ;;  %v10706_v13 = vpack.c.bf16 %v14410_v33, %v14404_v31  ;;  %v12643_v49 = vld [vmem:[#allocation11 + $0x198] sm:$0xff]   ;;  %v12664_v31 = vld [vmem:[#allocation11 + $0x220] sm:$0xff]   ;;  %v12665_v33 = vld [vmem:[#allocation11 + $0x228] sm:$0xff]  }
 0x60f   : > { %v5492_v43 = vadd.f32 %v12174_v35, %v5427_v23  ;;  %v5483_v19 = vpop.f32.mrb[229].mxu0  ;;  %v12645_v35 = vld [vmem:[#allocation11 + $0x120] sm:$0xff]  }
 0x610   : > { %v5484_v25 = vadd.f32 %v5483_v19, %v5419_v14  ;;  %v12175_v42 = vpop.f32.mrb[230].mxu0  ;;  %v12631_v14 = vld [vmem:[#allocation11 + $0x180] sm:$0xff]  }
 0x611   : > { %v14424_v29 = vmax.f32 %v5492_v43, 0.0  ;;  %v5495_v20 = vadd.f32 %v12175_v42, %v5430_v51  ;;  %v5486_v62 = vpop.f32.mrb[231].mxu0  ;;  %v12639_v51 = vld [vmem:[#allocation11 + $0x190] sm:$0xff]   ;;  %v12646_v19 = vld [vmem:[#allocation11 + $0x1e0] sm:$0xff]  }
 0x612   : > { %v14426_v17 = vmax.f32 %v5484_v25, 0.0  ;;  %v5487_v4 = vadd.f32 %v5486_v62, %v5422_v12  ;;  %v5618_v9 = vld [vmem:[#allocation2 + $0x48] sm:$0xff]  ;;  %v12647_v42 = vld [vmem:[#allocation11 + $0x1a0] sm:$0xff]  }
 0x613   : > { %v14428_v22 = vld [vmem:[#allocation2 + $0x4a] sm:$0xff]  ;;  %5566 = vst [vmem:[#allocation2 + $0xa9] sm:$0xff] %v14424_v29  ;;  %v14431_v26 = vmax.f32 %v5495_v20, 0.0  ;;  %v5569_v55 = vld [vmem:[#allocation2 + $0x18] sm:$0xff] }
 0x614   : > { %v14433_v39 = vld [vmem:[#allocation2 + $0x1a] sm:$0xff]  ;;  %7093 = vst [vmem:[#allocation2 + $0x48] sm:$0xff] %v14383_v40  ;;  %7094 = vst [vmem:[#allocation2 + $0x50] sm:$0xff] %v14383_v40  ;;  %v14438_v5 = vmax.f32 %v5487_v4, 0.0  ;;  %v10690_v52 = vpack.c.bf16 %v5569_v55, %v14383_v40  ;;  %v14445_v11 = vpack.c.bf16 %v14426_v17, %v14407_v18  ;;  %v14447_v27 = vld [vmem:[#allocation2 + $0x62] sm:$0xff] }
 0x615   : > { %5564 = vst [vmem:[#allocation2 + $0x79] sm:$0xff] %v14426_v17  ;;  %v14441_v24 = vld [vmem:[#allocation2 + $0x60] sm:$0xff]  ;;  %7087 = vst [vmem:[#allocation2 + $0x18] sm:$0xff] %v14383_v40  ;;  %v5617_v34 = vld [vmem:[#allocation2 + $0x30] sm:$0xff]  ;;  %v10709_v56 = vpack.c.bf16 %v14431_v26, %v14424_v29  ;;  %v10698_v2 = vpack.c.bf16 %v14433_v39, %v14392_v30  ;;  %v10721_v59 = vpack.c.bf16 %v14396_v16, %v14431_v26 }
 0x616   : > { %7088 = vst [vmem:[#allocation2 + $0x20] sm:$0xff] %v14383_v40  ;;  %5567 = vst [vmem:[#allocation2 + $0xc1] sm:$0xff] %v14431_v26  ;;  %v14452_v37 = vld [vmem:[#allocation2 + $0x32] sm:$0xff]  ;;  %6537 = vmatmul.mubr.bf16.vlgmr.msra.gmra.mrb[208].mxu1 %v10690_v52  ;;  %v10702_v1 = vpack.c.bf16 %v5617_v34, %v5569_v55  ;;  %v14461_v50 = vpack.c.bf16 %v14424_v29, %v14438_v5  ;;  %v12633_v12 = vld [vmem:[#allocation11 + $0x108] sm:$0xff]   ;;  %v10708_v0 = vpack.c.bf16 %v14438_v5, %v14426_v17 }
 0x617   : > { %7096 = vst [vmem:[#allocation2 + $0x60] sm:$0xff] %v14383_v40  ;;  %7097 = vst [vmem:[#allocation2 + $0x68] sm:$0xff] %v14383_v40  ;;  %6544 = vmatprep.mubr.bf16.mxu1 %v14420_v32  ;;  %11675 = vmatpush3.bf16.msra.mxu1 %v12629_v41  ;;  %v10703_v54 = vpack.c.bf16 %v14441_v24, %v5618_v9  ;;  %v12638_v30 = vld [vmem:[#allocation11 + $0x1d0] sm:$0xff]   ;;  %v14479_v46 = vpack.c.bf16 %v5618_v9, %v5617_v34  ;;  %v12648_v25 = vld [vmem:[#allocation11 + $0x168] sm:$0xff]  }
 0x618   : > { %5565 = vst [vmem:[#allocation2 + $0x91] sm:$0xff] %v14438_v5  ;;  %7090 = vst [vmem:[#allocation2 + $0x30] sm:$0xff] %v14383_v40  ;;  %6601 = vmatprep.mubr.bf16.mxu0 %v10702_v1  ;;  %11676 = vmatprep.subr.bf16.mxu1 %v12632_v8  ;;  %v14497_v6 = vpack.c.bf16 %v14428_v22, %v14452_v37  ;;  %v12649_v62 = vld [vmem:[#allocation11 + $0x128] sm:$0xff]   ;;  %v12652_v55 = vld [vmem:[#allocation11 + $0x170] sm:$0xff]   ;;  %v10710_v1 = vpack.c.bf16 %v14452_v37, %v14433_v39 }
 0x619   : > { %7091 = vst [vmem:[#allocation2 + $0x38] sm:$0xff] %v14383_v40  ;;  %6602 = vmatmul.mubr.bf16.vlgmr.msra.gmra.mrb[232].mxu0 %v10698_v2  ;;  %v12650_v4 = vld [vmem:[#allocation11 + $0x1e8] sm:$0xff]   ;;  %v12653_v52 = vld [vmem:[#allocation11 + $0x130] sm:$0xff]   ;;  %v12656_v34 = vld [vmem:[#allocation11 + $0x178] sm:$0xff]   ;;  %v10711_v37 = vpack.c.bf16 %v14447_v27, %v14428_v22 }
 0x61a   : > { %6609 = vmatprep.mubr.bf16.mxu0 %v10703_v54  ;;  %11715 = vmatpush3.bf16.msra.mxu0 %v12631_v14  ;;  %v14471_v58 = vld [vmem:[#allocation2 + $0xa8] sm:$0xff]  ;;  %v12654_v8 = vld [vmem:[#allocation11 + $0x1f0] sm:$0xff]   ;;  %v12660_v54 = vld [vmem:[#allocation11 + $0x200] sm:$0xff]  }
 0x61b   : > { %v14473_v60 = vld [vmem:[#allocation2 + $0xaa] sm:$0xff]  ;;  %11677 = vmatpush3.bf16.msra.mxu1 %v12633_v12  ;;  %11716 = vmatprep.subr.bf16.mxu0 %v12634_v28  ;;  %v12657_v12 = vld [vmem:[#allocation11 + $0x138] sm:$0xff]   ;;  %v12668_v22 = vld [vmem:[#allocation12] sm:$0xff]  }
 0x61c   : > { %v5620_v15 = vld [vmem:[#allocation2 + $0x78] sm:$0xff]  ;;  %7105 = vst [vmem:[#allocation2 + $0xa8] sm:$0xff] %v14383_v40  ;;  %7106 = vst [vmem:[#allocation2 + $0xb0] sm:$0xff] %v14383_v40  ;;  %11678 = vmatprep.subr.bf16.mxu1 %v12636_v3  ;;  %v12651_v41 = vld [vmem:[#allocation11 + $0x1a8] sm:$0xff]  }
 0x61d   : > { %v14475_v57 = vld [vmem:[#allocation2 + $0x7a] sm:$0xff]  ;;  %v14483_v61 = vld [vmem:[#allocation2 + $0xc2] sm:$0xff]  ;;  %v14501_v43 = vpack.c.bf16 %v5620_v15, %v14441_v24  ;;  %v12655_v14 = vld [vmem:[#allocation11 + $0x1b0] sm:$0xff]  }
 0x61e   : > { %v14481_v23 = vld [vmem:[#allocation2 + $0xc0] sm:$0xff]  ;;  %7099 = vst [vmem:[#allocation2 + $0x78] sm:$0xff] %v14383_v40  ;;  %7100 = vst [vmem:[#allocation2 + $0x80] sm:$0xff] %v14383_v40  ;;  %11717 = vmatpush3.bf16.msra.mxu0 %v12635_v45  ;;  %6545 = vmatmul.mubr.bf16.gmra.mrb[212].mxu1 %v14479_v46  ;;  %v14507_v20 = vpack.c.bf16 %v14475_v57, %v14447_v27  ;;  %v12658_v28 = vld [vmem:[#allocation11 + $0x1f8] sm:$0xff]   ;;  %v10725_v16 = vpack.c.bf16 %v14398_v38, %v14483_v61 }
 0x61f   : > { %v5621_v48 = vld [vmem:[#allocation2 + $0x90] sm:$0xff]  ;;  %7108 = vst [vmem:[#allocation2 + $0xc0] sm:$0xff] %v14383_v40  ;;  %7109 = vst [vmem:[#allocation2 + $0xc8] sm:$0xff] %v14383_v40  ;;  %6552 = vmatprep.mubr.bf16.mxu1 %v14445_v11  ;;  %11679 = vmatpush3.bf16.msra.mxu1 %v12637_v44  ;;  %v10705_v9 = vpack.c.bf16 %v14481_v23, %v14471_v58  ;;  %v12659_v3 = vld [vmem:[#allocation11 + $0x1b8] sm:$0xff]   ;;  %v10717_v17 = vpack.c.bf16 %v14383_v40, %v14481_v23 }
 0x620   : > { %v14487_v47 = vld [vmem:[#allocation2 + $0x92] sm:$0xff]  ;;  %11718 = vmatprep.subr.bf16.mxu0 %v12638_v30  ;;  %v10704_v21 = vpack.c.bf16 %v5621_v48, %v5620_v15  ;;  %11680 = vmatprep.subr.bf16.mxu1 %v12640_v36  ;;  %v10693_v24 = vpack.c.bf16 %v14471_v58, %v5621_v48  ;;  %v12661_v39 = vld [vmem:[#allocation11 + $0x208] sm:$0xff]   ;;  %v12672_v5 = vld [vmem:[#allocation12 + $0x20] sm:$0xff]  }
 0x621   : > { %7102 = vst [vmem:[#allocation2 + $0x90] sm:$0xff] %v14383_v40  ;;  %7103 = vst [vmem:[#allocation2 + $0x98] sm:$0xff] %v14383_v40  ;;  %6610 = vmatmul.mubr.bf16.gmra.mrb[236].mxu0 %v14497_v6  ;;  %v10701_v2 = vpack.c.bf16 %v14473_v60, %v14487_v47  ;;  %v12662_v45 = vld [vmem:[#allocation11 + $0x210] sm:$0xff]   ;;  %v10712_v44 = vpack.c.bf16 %v14487_v47, %v14475_v57  ;;  %v12669_v29 = vld [vmem:[#allocation12 + $0x8] sm:$0xff]  }
 0x622   : > { %6617 = vmatprep.mubr.bf16.mxu0 %v10704_v21  ;;  %11719 = vmatpush3.bf16.msra.mxu0 %v12639_v51  ;;  %v12666_v18 = vld [vmem:[#allocation11 + $0x230] sm:$0xff]   ;;  %v12671_v40 = vld [vmem:[#allocation12 + $0x18] sm:$0xff]   ;;  %v12680_v58 = vld [vmem:[#allocation14 + $0x48] sm:$0xff]  }
 0x623   : > { %11681 = vmatpush3.bf16.msra.mxu1 %v12641_v7  ;;  %11720 = vmatprep.subr.bf16.mxu0 %v12642_v10  ;;  %v12670_v26 = vld [vmem:[#allocation12 + $0x10] sm:$0xff]   ;;  %v12675_v27 = vld [vmem:[#allocation12 + $0x38] sm:$0xff]   ;;  %v12692_v36 = vld [vmem:[#allocation14 + $0x60] sm:$0xff]  }
 0x624   : > { %11682 = vmatprep.subr.bf16.mxu1 %v12644_v63  ;;  %v12674_v38 = vld [vmem:[#allocation12 + $0x30] sm:$0xff]   ;;  %v12688_v57 = vld [vmem:[#allocation14 + $0x58] sm:$0xff]  }
 0x625   : > { %v12684_v30 = vld [vmem:[#allocation14 + $0x50] sm:$0xff]  }
 0x626   : > { %11721 = vmatpush3.bf16.msra.mxu0 %v12643_v49  ;;  %6553 = vmatmul.mubr.bf16.gmra.mrb[216].mxu1 %v14501_v43  ;;  %v12685_v15 = vld [vmem:[#allocation14 + $0x10] sm:$0xff]  }
 0x627   : > { %6560 = vmatprep.mubr.bf16.mxu1 %v14461_v50  ;;  %11683 = vmatpush3.bf16.msra.mxu1 %v12645_v35 }
 0x628   : > { %11722 = vmatprep.subr.bf16.mxu0 %v12646_v19  ;;  %11684 = vmatprep.subr.bf16.mxu1 %v12648_v25 }
 0x629   : > { %6618 = vmatmul.mubr.bf16.gmra.mrb[240].mxu0 %v14507_v20 }
 0x62a   : > { %6625 = vmatprep.mubr.bf16.mxu0 %v10705_v9  ;;  %11723 = vmatpush3.bf16.msra.mxu0 %v12647_v42 }
 0x62b   : > { %11685 = vmatpush3.bf16.msra.mxu1 %v12649_v62  ;;  %11724 = vmatprep.subr.bf16.mxu0 %v12650_v4 }
 0x62c   : > { %11686 = vmatprep.subr.bf16.mxu1 %v12652_v55 }
 0x62e   : > { %11725 = vmatpush3.bf16.msra.mxu0 %v12651_v41  ;;  %6561 = vmatmul.mubr.bf16.gmra.mrb[220].mxu1 %v10693_v24 }
 0x62f   : > { %11687 = vmatpush3.bf16.msra.mxu1 %v12653_v52  ;;  %6666 = vmatprep.mubr.bf16.mxu1 %v10710_v1 }
 0x630   : > { %11726 = vmatprep.subr.bf16.mxu0 %v12654_v8  ;;  %11688 = vmatprep.subr.bf16.mxu1 %v12656_v34 }
 0x631   : > { %6626 = vmatmul.mubr.bf16.gmra.mrb[244].mxu0 %v10701_v2 }
 0x632   : > { %11727 = vmatpush3.bf16.msra.mxu0 %v12655_v14  ;;  %6731 = vmatprep.mubr.bf16.mxu0 %v14420_v32  ;;  %v12663_v32 = vld [vmem:[#allocation11 + $0x218] sm:$0xff]  }
 0x633   : > { %11689 = vmatpush3.bf16.msra.mxu1 %v12657_v12  ;;  %11728 = vmatprep.subr.bf16.mxu0 %v12658_v28 }
 0x634   : > { %12176 = vmatprep.subr.bf16.mxu1 %v12660_v54 }
 0x636   : > { %11729 = vmatpush3.bf16.msra.mxu0 %v12659_v3  ;;  %6667 = vmatmul.mubr.bf16.vlgmr.msra.gmra.mrb[224].mxu1 %v10706_v13  ;;  %v10713_v13 = vpack.c.bf16 %v14483_v61, %v14473_v60  ;;  %v12681_v60 = vld [vmem:[#allocation14 + $0x8] sm:$0xff]  }
 0x637   : > { %6674 = vmatprep.mubr.bf16.mxu1 %v10711_v37  ;;  %12177 = vmatpush3.bf16.msra.mxu1 %v12660_v54 }
 0x638   : > { %12178 = vmatprep.subr.bf16.mxu1 %v12661_v39  ;;  %12200 = vmatprep.subr.bf16.mxu0 %v12668_v22 }
 0x639   : > { %6732 = vmatmul.mubr.bf16.vlgmr.msra.gmra.mrb[248].mxu0 %v14479_v46  ;;  %v12689_v46 = vld [vmem:[#allocation14 + $0x18] sm:$0xff]  }
 0x63a   : > { %6739 = vmatprep.mubr.bf16.mxu0 %v14445_v11  ;;  %12201 = vmatpush3.bf16.msra.mxu0 %v12668_v22  ;;  %v12673_v11 = vld [vmem:[#allocation12 + $0x28] sm:$0xff]  }
 0x63b   : > { %12179 = vmatpush3.bf16.msra.mxu1 %v12661_v39  ;;  %12202 = vmatprep.subr.bf16.mxu0 %v12669_v29 }
 0x63c   : > { %12180 = vmatprep.subr.bf16.mxu1 %v12662_v45 }
 0x63e   : > { %6675 = vmatmul.mubr.bf16.gmra.mrb[228].mxu1 %v10707_v53  ;;  %v12667_v53 = vld [vmem:[#allocation11 + $0x238] sm:$0xff]   ;;  %12203 = vmatpush3.bf16.msra.mxu0 %v12669_v29 }
 0x63f   : > { %6682 = vmatprep.mubr.bf16.mxu1 %v10712_v44  ;;  %12181 = vmatpush3.bf16.msra.mxu1 %v12662_v45 }
 0x640   : > { %12182 = vmatprep.subr.bf16.mxu1 %v12663_v32  ;;  %12204 = vmatprep.subr.bf16.mxu0 %v12670_v26 }
 0x641   : > { %6740 = vmatmul.mubr.bf16.gmra.mrb[252].mxu0 %v14501_v43 }
 0x642   : > { %6747 = vmatprep.mubr.bf16.mxu0 %v14461_v50  ;;  %12205 = vmatpush3.bf16.msra.mxu0 %v12670_v26  ;;  %v12677_v50 = vld [vmem:[#allocation14] sm:$0xff]  }
 0x643   : > { %12183 = vmatpush3.bf16.msra.mxu1 %v12663_v32  ;;  %12206 = vmatprep.subr.bf16.mxu0 %v12671_v40 }
 0x644   : > { %12184 = vmatprep.subr.bf16.mxu1 %v12664_v31 }
 0x646   : > { %6683 = vmatmul.mubr.bf16.gmra.mrb[232].mxu1 %v10708_v0  ;;  %12207 = vmatpush3.bf16.msra.mxu0 %v12671_v40  ;;  %v12678_v0 = vld [vmem:[#allocation14 + $0xc0] sm:$0xff]  }
 0x647   : > { %6690 = vmatprep.mubr.bf16.mxu1 %v10713_v13  ;;  %12185 = vmatpush3.bf16.msra.mxu1 %v12664_v31 }
 0x648   : > { %12186 = vmatprep.subr.bf16.mxu1 %v12665_v33  ;;  %12208 = vmatprep.subr.bf16.mxu0 %v12672_v5 }
 0x649   : > { %6748 = vmatmul.mubr.bf16.gmra.mrb[0].mxu0 %v10693_v24 }
 0x64a   : > { %6755 = vmatprep.mubr.bf16.mxu0 %v10721_v59  ;;  %12209 = vmatpush3.bf16.msra.mxu0 %v12672_v5 }
 0x64b   : > { %12187 = vmatpush3.bf16.msra.mxu1 %v12665_v33  ;;  %12210 = vmatprep.subr.bf16.mxu0 %v12673_v11 }
 0x64c   : > { %12188 = vmatprep.subr.bf16.mxu1 %v12666_v18 }
 0x64e   : > { %6691 = vmatmul.mubr.bf16.gmra.mrb[236].mxu1 %v10709_v56  ;;  %12211 = vmatpush3.bf16.msra.mxu0 %v12673_v11  ;;  %v12676_v56 = vld [vmem:[#allocation14 + $0x40] sm:$0xff]  }
 0x64f   : > { %12189 = vmatpush3.bf16.msra.mxu1 %v12666_v18  ;;  %12192 = vmatprep.mubr.bf16.mxu1 %v14497_v6 }
 0x650   : > { %12190 = vmatprep.subr.bf16.mxu1 %v12667_v53  ;;  %12212 = vmatprep.subr.bf16.mxu0 %v12674_v38 }
 0x651   : > { %6756 = vmatmul.mubr.bf16.gmra.mrb[4].mxu0 %v10717_v17 }
 0x652   : > { %12213 = vmatpush3.bf16.msra.mxu0 %v12674_v38 }
 0x653   : > { %12191 = vmatpush3.bf16.msra.mxu1 %v12667_v53  ;;  %12214 = vmatprep.subr.bf16.mxu0 %v12675_v27 }
 0x654   : > { %11778 = vmatprep.subr.bf16.mxu1 %v12676_v56 }
 0x656   : > { %12193 = vmatmul.mubr.bf16.vlgmr.msra.gmra.mrb[240].mxu1 %v14507_v20  ;;  %12215 = vmatpush3.bf16.msra.mxu0 %v12675_v27 }
 0x657   : > { %12196 = vmatprep.mubr.bf16.mxu1 %v10701_v2  ;;  %11818 = vmatprep.subr.bf16.mxu0 %v12678_v0 }
 0x658   : > { %11779 = vmatpush3.bf16.msra.mxu1 %v12677_v50 }
 0x659   : > { %11780 = vmatprep.subr.bf16.mxu1 %v12680_v58 }
 0x65c   : > { %11781 = vmatpush3.bf16.msra.mxu1 %v12681_v60 }
 0x65d   : > { %11782 = vmatprep.subr.bf16.mxu1 %v12684_v30 }
 0x65e   : > { %12197 = vmatmul.mubr.bf16.gmra.mrb[244].mxu1 %v10725_v16 }
 0x660   : > { %11783 = vmatpush3.bf16.msra.mxu1 %v12685_v15 }
 0x661   : > { %11784 = vmatprep.subr.bf16.mxu1 %v12688_v57 }
 0x664   : > { %11785 = vmatpush3.bf16.msra.mxu1 %v12689_v46 }
 0x665   : > { %11786 = vmatprep.subr.bf16.mxu1 %v12692_v36 }
 0x6e9   : > { %v11610_v23 = vpop.f32.mrb[208].mxu1 }
 0x6ea   : > { %v11611_v61 = vpop.f32.mrb[209].mxu1 }
 0x6eb   : > { %v11612_v48 = vadd.f32 %v11611_v61, %v11610_v23  ;;  %v11613_v47 = vpop.f32.mrb[210].mxu1 }
 0x6ec   : > { %v11650_v51 = vpop.f32.mrb[232].mxu0  ;;  %v11614_v6 = vpop.f32.mrb[211].mxu1 }
 0x6ed   : > { %v11615_v7 = vadd.f32 %v11614_v6, %v11613_v47  ;;  %v11651_v10 = vpop.f32.mrb[233].mxu0 }
 0x6ee   : > { %v11652_v21 = vadd.f32 %v11651_v10, %v11650_v51  ;;  %v11653_v63 = vpop.f32.mrb[234].mxu0 }
 0x6ef   : > { %v11654_v49 = vpop.f32.mrb[235].mxu0 }
 0x6f0   : > { %v6604_v35 = vadd.f32 %v11652_v21, %v11612_v48  ;;  %v11655_v43 = vadd.f32 %v11654_v49, %v11653_v63 }
 0x6f1   : > { %v11616_v19 = vpop.f32.mrb[212].mxu1 }
 0x6f2   : > { %v6607_v25 = vadd.f32 %v11655_v43, %v11615_v7  ;;  %v11617_v42 = vpop.f32.mrb[213].mxu1 }
 0x6f3   : > { %v11618_v20 = vadd.f32 %v11617_v42, %v11616_v19  ;;  %v11619_v62 = vpop.f32.mrb[214].mxu1 }
 0x6f4   : > { %v11656_v4 = vpop.f32.mrb[236].mxu0  ;;  %v11620_v9 = vpop.f32.mrb[215].mxu1 }
 0x6f5   : > { %v11621_v55 = vadd.f32 %v11620_v9, %v11619_v62  ;;  %v11657_v41 = vpop.f32.mrb[237].mxu0 }
 0x6f6   : > { %v11658_v52 = vadd.f32 %v11657_v41, %v11656_v4  ;;  %v11659_v24 = vpop.f32.mrb[238].mxu0 }
 0x6f7   : > { %v11660_v8 = vpop.f32.mrb[239].mxu0 }
 0x6f8   : > { %v6612_v34 = vadd.f32 %v11658_v52, %v11618_v20  ;;  %v11661_v1 = vadd.f32 %v11660_v8, %v11659_v24 }
 0x6f9   : > { %v11622_v14 = vpop.f32.mrb[216].mxu1 }
 0x6fa   : > { %v6615_v2 = vadd.f32 %v11661_v1, %v11621_v55  ;;  %v11623_v12 = vpop.f32.mrb[217].mxu1 }
 0x6fb   : > { %v11624_v28 = vadd.f32 %v11623_v12, %v11622_v14  ;;  %v11625_v54 = vpop.f32.mrb[218].mxu1 }
 0x6fc   : > { %v11662_v3 = vpop.f32.mrb[240].mxu0  ;;  %v11626_v39 = vpop.f32.mrb[219].mxu1 }
 0x6fd   : > { %v11627_v37 = vadd.f32 %v11626_v39, %v11625_v54  ;;  %v11663_v45 = vpop.f32.mrb[241].mxu0 }
 0x6fe   : > { %v11664_v32 = vadd.f32 %v11663_v45, %v11662_v3  ;;  %v11665_v44 = vpop.f32.mrb[242].mxu0 }
 0x6ff   : > { %v11666_v31 = vpop.f32.mrb[243].mxu0 }
 0x700   : > { %v6620_v33 = vadd.f32 %v11664_v32, %v11624_v28  ;;  %v11667_v13 = vadd.f32 %v11666_v31, %v11665_v44 }
 0x701   : > { %v11628_v59 = vpop.f32.mrb[220].mxu1 }
 0x702   : > { %v6623_v18 = vadd.f32 %v11667_v13, %v11627_v37  ;;  %v11629_v53 = vpop.f32.mrb[221].mxu1 }
 0x703   : > { %v11630_v17 = vadd.f32 %v11629_v53, %v11628_v59  ;;  %v11631_v16 = vpop.f32.mrb[222].mxu1 }
 0x704   : > { %v11668_v22 = vpop.f32.mrb[244].mxu0  ;;  %v11632_v29 = vpop.f32.mrb[223].mxu1 }
 0x705   : > { %v11633_v26 = vadd.f32 %v11632_v29, %v11631_v16  ;;  %v11669_v40 = vpop.f32.mrb[245].mxu0 }
 0x706   : > { %v11670_v5 = vadd.f32 %v11669_v40, %v11668_v22  ;;  %v11671_v11 = vpop.f32.mrb[246].mxu0 }
 0x707   : > { %v11672_v38 = vpop.f32.mrb[247].mxu0 }
 0x708   : > { %v6628_v27 = vadd.f32 %v11670_v5, %v11630_v17  ;;  %v11673_v56 = vadd.f32 %v11672_v38, %v11671_v11 }
 0x709   : > { %v11690_v50 = vpop.f32.mrb[224].mxu1 }
 0x70a   : > { %v6631_v0 = vadd.f32 %v11673_v56, %v11633_v26  ;;  %v11691_v58 = vpop.f32.mrb[225].mxu1 }
 0x70b   : > { %v11692_v60 = vadd.f32 %v11691_v58, %v11690_v50  ;;  %v11693_v30 = vpop.f32.mrb[226].mxu1 }
 0x70c   : > { %v11730_v15 = vpop.f32.mrb[248].mxu0  ;;  %v11694_v57 = vpop.f32.mrb[227].mxu1 }
 0x70d   : > { %v6669_v46 = vadd.f32 %v11692_v60, %v6604_v35  ;;  %v11695_v36 = vadd.f32 %v11694_v57, %v11693_v30  ;;  %v11731_v23 = vpop.f32.mrb[249].mxu0 }
 0x70e   : > { %v11732_v61 = vadd.f32 %v11731_v23, %v11730_v15  ;;  %v11733_v48 = vpop.f32.mrb[250].mxu0 }
 0x70f   : > { %v6672_v47 = vadd.f32 %v11695_v36, %v6607_v25  ;;  %v11734_v51 = vpop.f32.mrb[251].mxu0 }
 0x710   : > { %v11735_v6 = vadd.f32 %v11734_v51, %v11733_v48  ;;  %v6734_v7 = vadd.f32 %v11732_v61, %v6669_v46  ;;  %v14556_v51 = vld [vmem:[#allocation3 + $0xf0] sm:$0xff] }
 0x711   : > { %v11696_v10 = vpop.f32.mrb[228].mxu1 }
 0x712   : > { %v11697_v21 = vpop.f32.mrb[229].mxu1  ;;  %v6737_v63 = vadd.f32 %v11735_v6, %v6672_v47 }
 0x713   : > { %v11698_v49 = vadd.f32 %v11697_v21, %v11696_v10  ;;  %v11699_v43 = vpop.f32.mrb[230].mxu1  ;;  %v12679_v21 = vld [vmem:[#allocation14 + $0x80] sm:$0xff]  }
 0x714   : > { %v11736_v19 = vpop.f32.mrb[252].mxu0  ;;  %v11700_v42 = vpop.f32.mrb[231].mxu1 }
 0x715   : > { %v6677_v20 = vadd.f32 %v11698_v49, %v6612_v34  ;;  %v11701_v62 = vadd.f32 %v11700_v42, %v11699_v43  ;;  %v11737_v4 = vpop.f32.mrb[253].mxu0  ;;  %v12682_v43 = vld [vmem:[#allocation14 + $0xc8] sm:$0xff]  }
 0x716   : > { %v11738_v9 = vadd.f32 %v11737_v4, %v11736_v19  ;;  %v11739_v35 = vpop.f32.mrb[254].mxu0 }
 0x717   : > { %v6680_v55 = vadd.f32 %v11701_v62, %v6615_v2  ;;  %v11740_v41 = vpop.f32.mrb[255].mxu0 }
 0x718   : > { %v11741_v52 = vadd.f32 %v11740_v41, %v11739_v35  ;;  %v6742_v24 = vadd.f32 %v11738_v9, %v6677_v20 }
 0x719   : > { %v11702_v25 = vpop.f32.mrb[232].mxu1 }
 0x71a   : > { %v11703_v8 = vpop.f32.mrb[233].mxu1  ;;  %v6745_v1 = vadd.f32 %v11741_v52, %v6680_v55  ;;  %v12683_v55 = vld [vmem:[#allocation14 + $0x88] sm:$0xff]   ;;  %v12686_v52 = vld [vmem:[#allocation14 + $0xd0] sm:$0xff]  }
 0x71b   : > { %v11704_v14 = vadd.f32 %v11703_v8, %v11702_v25  ;;  %v11705_v12 = vpop.f32.mrb[234].mxu1 }
 0x71c   : > { %v11742_v28 = vpop.f32.mrb[0].mxu0  ;;  %v11706_v54 = vpop.f32.mrb[235].mxu1 }
 0x71d   : > { %v6685_v3 = vadd.f32 %v11704_v14, %v6620_v33  ;;  %v11707_v39 = vadd.f32 %v11706_v54, %v11705_v12  ;;  %v11743_v37 = vpop.f32.mrb[1].mxu0  ;;  %v12690_v14 = vld [vmem:[#allocation14 + $0xd8] sm:$0xff]   ;;  %v12694_v54 = vld [vmem:[#allocation14 + $0xe0] sm:$0xff]  }
 0x71e   : > { %v11744_v45 = vadd.f32 %v11743_v37, %v11742_v28  ;;  %v11745_v34 = vpop.f32.mrb[2].mxu0  ;;  %v12691_v12 = vld [vmem:[#allocation14 + $0x98] sm:$0xff]   ;;  %v12693_v28 = vld [vmem:[#allocation14 + $0x20] sm:$0xff]   ;;  %v12697_v37 = vld [vmem:[#allocation14 + $0x28] sm:$0xff]  }
 0x71f   : > { %v6688_v32 = vadd.f32 %v11707_v39, %v6623_v18  ;;  %v11746_v44 = vpop.f32.mrb[3].mxu0  ;;  %11787 = vmatpush3.bf16.msra.mxu1 %v12693_v28  ;;  %v12696_v39 = vld [vmem:[#allocation14 + $0x68] sm:$0xff]  }
 0x720   : > { %v11747_v31 = vadd.f32 %v11746_v44, %v11745_v34  ;;  %v6750_v13 = vadd.f32 %v11744_v45, %v6685_v3  ;;  %v12695_v3 = vld [vmem:[#allocation14 + $0xa0] sm:$0xff]   ;;  %v12698_v45 = vld [vmem:[#allocation14 + $0xe8] sm:$0xff]   ;;  %11788 = vmatprep.subr.bf16.mxu1 %v12696_v39  ;;  %v12701_v44 = vld [vmem:[#allocation14 + $0x30] sm:$0xff]  }
 0x721   : > { %v11708_v2 = vpop.f32.mrb[236].mxu1  ;;  %v12699_v34 = vld [vmem:[#allocation14 + $0xa8] sm:$0xff]  }
 0x722   : > { %v11709_v59 = vpop.f32.mrb[237].mxu1  ;;  %v6753_v53 = vadd.f32 %v11747_v31, %v6688_v32  ;;  %v12700_v32 = vld [vmem:[#allocation14 + $0x70] sm:$0xff]   ;;  %v12715_v28 = vld [vmem:[#allocation14 + $0x188] sm:$0xff]  }
 0x723   : > { %v11710_v17 = vadd.f32 %v11709_v59, %v11708_v2  ;;  %v11711_v16 = vpop.f32.mrb[238].mxu1  ;;  %11789 = vmatpush3.bf16.msra.mxu1 %v12697_v37  ;;  %v12702_v31 = vld [vmem:[#allocation14 + $0xf0] sm:$0xff]   ;;  %v12704_v2 = vld [vmem:[#allocation14 + $0x78] sm:$0xff]  }
 0x724   : > { %v11748_v22 = vpop.f32.mrb[4].mxu0  ;;  %v11712_v29 = vpop.f32.mrb[239].mxu1  ;;  %11790 = vmatprep.subr.bf16.mxu1 %v12700_v32  ;;  %v12705_v59 = vld [vmem:[#allocation14 + $0x38] sm:$0xff]   ;;  %v12718_v37 = vld [vmem:[#allocation14 + $0x1d0] sm:$0xff]  }
 0x725   : > { %v6693_v26 = vadd.f32 %v11710_v17, %v6628_v27  ;;  %v11713_v40 = vadd.f32 %v11712_v29, %v11711_v16  ;;  %v11749_v5 = vpop.f32.mrb[5].mxu0  ;;  %v12707_v17 = vld [vmem:[#allocation14 + $0xb8] sm:$0xff]   ;;  %v12708_v16 = vld [vmem:[#allocation14 + $0x140] sm:$0xff]  }
 0x726   : > { %v11750_v33 = vadd.f32 %v11749_v5, %v11748_v22  ;;  %v11751_v11 = vpop.f32.mrb[6].mxu0  ;;  %v7162_v22 = vld [vmem:[#allocation2 + $0x1] sm:$0xff] }
 0x727   : > { %v6696_v38 = vadd.f32 %v11713_v40, %v6631_v0  ;;  %v11752_v56 = vpop.f32.mrb[7].mxu0  ;;  %11791 = vmatpush3.bf16.msra.mxu1 %v12701_v44  ;;  %v14580_v29 = vld [vmem:[#allocation2 + $0x2] sm:$0xff]  ;;  %v14584_v40 = vld [vmem:[#allocation2 + $0xd9] sm:$0xff] }
 0x728   : > { %v11753_v50 = vadd.f32 %v11752_v56, %v11751_v11  ;;  %v6758_v18 = vadd.f32 %v11750_v33, %v6693_v26  ;;  %11792 = vmatprep.subr.bf16.mxu1 %v12704_v2  ;;  %8637 = vst [vmem:[#allocation2 + $0x8] sm:$0xff] %v14556_v51  ;;  %8636 = vst [vmem:[#allocation2] sm:$0xff] %v14556_v51  ;;  %v12710_v26 = vld [vmem:[#allocation14 + $0x1c0] sm:$0xff]   ;;  %v12720_v44 = vld [vmem:[#allocation14 + $0x158] sm:$0xff]  }
 0x729   : > { %v12194_v58 = vpop.f32.mrb[240].mxu1  ;;  %v14586_v5 = vld [vmem:[#allocation2 + $0xda] sm:$0xff] }
 0x72a   : > { %v6807_v60 = vadd.f32 %v12194_v58, %v6742_v24  ;;  %v6798_v30 = vpop.f32.mrb[241].mxu1  ;;  %v6761_v15 = vadd.f32 %v11753_v50, %v6696_v38  ;;  %8663 = vst [vmem:[#allocation2 + $0xd8] sm:$0xff] %v14556_v51  ;;  %8664 = vst [vmem:[#allocation2 + $0xe0] sm:$0xff] %v14556_v51 }
 0x72b   : > { %v6799_v27 = vadd.f32 %v6798_v30, %v6734_v7  ;;  %v12195_v57 = vpop.f32.mrb[242].mxu1  ;;  %11793 = vmatpush3.bf16.msra.mxu1 %v12705_v59 }
 0x72c   : > { %v6831_v46 = vmax.f32 %v6807_v60, 0.0  ;;  %v6810_v0 = vadd.f32 %v12195_v57, %v6745_v1  ;;  %v6801_v36 = vpop.f32.mrb[243].mxu1  ;;  %v12687_v1 = vld [vmem:[#allocation14 + $0x90] sm:$0xff]   ;;  %11858 = vmatprep.subr.bf16.mxu1 %v12708_v16  ;;  %v12721_v16 = vld [vmem:[#allocation14 + $0x118] sm:$0xff]  }
 0x72d   : > { %v6829_v23 = vmax.f32 %v6799_v27, 0.0  ;;  %v6802_v61 = vadd.f32 %v6801_v36, %v6737_v63 }
 0x72e   : > { %6839 = vst [vmem:[%s14552_s25 + $0x10] sm:$0xff] %v6831_v46  ;;  %6901 = vst [vmem:[#allocation3 + $0x49] sm:$0xff] %v6831_v46  ;;  %v6832_v48 = vmax.f32 %v6810_v0, 0.0 }
 0x72f   : > { %6837 = vst [vmem:[%s14552_s25] sm:$0xff] %v6829_v23  ;;  %6899 = vst [vmem:[#allocation3 + $0x19] sm:$0xff] %v6829_v23  ;;  %v6830_v47 = vmax.f32 %v6802_v61, 0.0 }
 0x730   : > { %8445 = vst [vmem:[#allocation3 + $0x50] sm:$0xff] %v14556_v51  ;;  %8444 = vst [vmem:[#allocation3 + $0x48] sm:$0xff] %v14556_v51  ;;  %v10727_v6 = vpack.c.bf16 %v6832_v48, %v6831_v46 }
 0x731   : > { %6840 = vst [vmem:[%s14552_s25 + $0x18] sm:$0xff] %v6832_v48  ;;  %6902 = vst [vmem:[#allocation3 + $0x61] sm:$0xff] %v6832_v48  ;;  %v12198_v7 = vpop.f32.mrb[244].mxu1  ;;  %v10726_v10 = vpack.c.bf16 %v6830_v47, %v6829_v23 }
 0x732   : > { %8438 = vst [vmem:[#allocation3 + $0x18] sm:$0xff] %v14556_v51  ;;  %8439 = vst [vmem:[#allocation3 + $0x20] sm:$0xff] %v14556_v51  ;;  %v6823_v63 = vadd.f32 %v12198_v7, %v6758_v18  ;;  %v6814_v49 = vpop.f32.mrb[245].mxu1 }
 0x733   : > { %6838 = vst [vmem:[%s14552_s25 + $0x8] sm:$0xff] %v6830_v47  ;;  %6900 = vst [vmem:[#allocation3 + $0x31] sm:$0xff] %v6830_v47  ;;  %v6815_v19 = vadd.f32 %v6814_v49, %v6750_v13  ;;  %v12199_v42 = vpop.f32.mrb[246].mxu1  ;;  %12216 = vmatprep.mubr.bf16.mxu0 %v10726_v10  ;;  %v12703_v13 = vld [vmem:[#allocation14 + $0xb0] sm:$0xff]  }
 0x734   : > { %8448 = vst [vmem:[#allocation3 + $0x68] sm:$0xff] %v14556_v51  ;;  %8447 = vst [vmem:[#allocation3 + $0x60] sm:$0xff] %v14556_v51  ;;  %v6835_v20 = vmax.f32 %v6823_v63, 0.0  ;;  %v6826_v62 = vadd.f32 %v12199_v42, %v6761_v15  ;;  %v6817_v4 = vpop.f32.mrb[247].mxu1  ;;  %12217 = vmatmul.mubr.bf16.vlgmr.msra.gmra.mrb[8].mxu0 %v10727_v6  ;;  %v12712_v42 = vld [vmem:[#allocation14 + $0x148] sm:$0xff]  }
 0x735   : > { %8441 = vst [vmem:[#allocation3 + $0x30] sm:$0xff] %v14556_v51  ;;  %8442 = vst [vmem:[#allocation3 + $0x38] sm:$0xff] %v14556_v51  ;;  %v6833_v9 = vmax.f32 %v6815_v19, 0.0  ;;  %v6818_v35 = vadd.f32 %v6817_v4, %v6753_v53  ;;  %11819 = vmatpush3.bf16.msra.mxu0 %v12679_v21  ;;  %v12706_v53 = vld [vmem:[#allocation14 + $0xf8] sm:$0xff]   ;;  %v12709_v21 = vld [vmem:[#allocation14 + $0x100] sm:$0xff]  }
 0x736   : > { %6843 = vst [vmem:[%s14552_s25 + $0x30] sm:$0xff] %v6835_v20  ;;  %6905 = vst [vmem:[#allocation3 + $0xa9] sm:$0xff] %v6835_v20  ;;  %v6836_v41 = vmax.f32 %v6826_v62, 0.0  ;;  %11820 = vmatprep.subr.bf16.mxu0 %v12682_v43 }
 0x737   : > { %6841 = vst [vmem:[%s14552_s25 + $0x20] sm:$0xff] %v6833_v9  ;;  %6903 = vst [vmem:[#allocation3 + $0x79] sm:$0xff] %v6833_v9  ;;  %v6834_v24 = vmax.f32 %v6818_v35, 0.0 }
 0x738   : > { %8456 = vst [vmem:[#allocation3 + $0xa8] sm:$0xff] %v14556_v51  ;;  %8457 = vst [vmem:[#allocation3 + $0xb0] sm:$0xff] %v14556_v51  ;;  %v10729_v25 = vpack.c.bf16 %v6836_v41, %v6835_v20 }
 0x739   : > { %6844 = vst [vmem:[%s14552_s25 + $0x38] sm:$0xff] %v6836_v41  ;;  %6906 = vst [vmem:[#allocation3 + $0xc1] sm:$0xff] %v6836_v41  ;;  %v10728_v8 = vpack.c.bf16 %v6834_v24, %v6833_v9  ;;  %11821 = vmatpush3.bf16.msra.mxu0 %v12683_v55  ;;  %v12711_v41 = vld [vmem:[#allocation14 + $0x180] sm:$0xff]  }
 0x73a   : > { %8450 = vst [vmem:[#allocation3 + $0x78] sm:$0xff] %v14556_v51  ;;  %8451 = vst [vmem:[#allocation3 + $0x80] sm:$0xff] %v14556_v51  ;;  %11822 = vmatprep.subr.bf16.mxu0 %v12686_v52 }
 0x73b   : > { %6842 = vst [vmem:[%s14552_s25 + $0x28] sm:$0xff] %v6834_v24  ;;  %6904 = vst [vmem:[#allocation3 + $0x91] sm:$0xff] %v6834_v24  ;;  %12220 = vmatprep.mubr.bf16.mxu0 %v10728_v8  ;;  %v12714_v8 = vld [vmem:[#allocation14 + $0x1c8] sm:$0xff]   ;;  %s14797_s25 = scalar_lea.vmem %s15054_s11, %s10612_s15 }
 0x73c   : > { %8459 = vst [vmem:[#allocation3 + $0xc0] sm:$0xff] %v14556_v51  ;;  %8460 = vst [vmem:[#allocation3 + $0xc8] sm:$0xff] %v14556_v51  ;;  %12221 = vmatmul.mubr.bf16.gmra.mrb[12].mxu0 %v10729_v25  ;;  %v12713_v25 = vld [vmem:[#allocation14 + $0x108] sm:$0xff]  }
 0x73d   : > { %8453 = vst [vmem:[#allocation3 + $0x90] sm:$0xff] %v14556_v51  ;;  %8454 = vst [vmem:[#allocation3 + $0x98] sm:$0xff] %v14556_v51  ;;  %11823 = vmatpush3.bf16.msra.mxu0 %v12687_v1 }
 0x73e   : > { %11824 = vmatprep.subr.bf16.mxu0 %v12690_v14 }
 0x741   : > { %11825 = vmatpush3.bf16.msra.mxu0 %v12691_v12  ;;  %v12716_v12 = vld [vmem:[#allocation14 + $0x150] sm:$0xff]  }
 0x742   : > { %11826 = vmatprep.subr.bf16.mxu0 %v12694_v54  ;;  %v12717_v54 = vld [vmem:[#allocation14 + $0x110] sm:$0xff]  }
 0x745   : > { %11827 = vmatpush3.bf16.msra.mxu0 %v12695_v3 }
 0x746   : > { %11828 = vmatprep.subr.bf16.mxu0 %v12698_v45 }
 0x749   : > { %11829 = vmatpush3.bf16.msra.mxu0 %v12699_v34 }
 0x74a   : > { %11830 = vmatprep.subr.bf16.mxu0 %v12702_v31 }
 0x74d   : > { %11831 = vmatpush3.bf16.msra.mxu0 %v12703_v13 }
 0x74e   : > { %11832 = vmatprep.subr.bf16.mxu0 %v12706_v53  ;;  %v12719_v53 = vld [vmem:[#allocation14 + $0x190] sm:$0xff]  }
 0x751   : > { %11833 = vmatpush3.bf16.msra.mxu0 %v12707_v17 }
 0x752   : > { %11898 = vmatprep.subr.bf16.mxu0 %v12710_v26  ;;  %v12724_v26 = vld [vmem:[#allocation14 + $0x160] sm:$0xff]  }
 0x807   : > { %v12218_v33 = vpop.f32.mrb[8].mxu0 }
 0x808   : > { %v14590_v11 = vmax.f32 %v12218_v33, 0.0  ;;  %v7045_v38 = vpop.f32.mrb[9].mxu0  ;;  %v12723_v33 = vld [vmem:[#allocation14 + $0x198] sm:$0xff]  }
 0x809   : > { %v14592_v56 = vmax.f32 %v7045_v38, 0.0  ;;  %v12219_v50 = vpop.f32.mrb[10].mxu0  ;;  %v12725_v38 = vld [vmem:[#allocation14 + $0x120] sm:$0xff]  }
 0x80a   : > { %7140 = vst [vmem:[#allocation2 + $0x49] sm:$0xff] %v14590_v11  ;;  %v14595_v18 = vmax.f32 %v12219_v50, 0.0  ;;  %v7048_v58 = vpop.f32.mrb[11].mxu0 }
 0x80b   : > { %7138 = vst [vmem:[#allocation2 + $0x19] sm:$0xff] %v14592_v56  ;;  %v14598_v60 = vmax.f32 %v7048_v58, 0.0  ;;  %v10734_v30 = vpack.c.bf16 %v14592_v56, %v7162_v22  ;;  %v12722_v22 = vld [vmem:[#allocation14 + $0x1d8] sm:$0xff]   ;;  %v12726_v58 = vld [vmem:[#allocation14 + $0x1e0] sm:$0xff]  }
 0x80c   : > { %7141 = vst [vmem:[#allocation2 + $0x61] sm:$0xff] %v14595_v18  ;;  %v10747_v15 = vpack.c.bf16 %v14595_v18, %v14590_v11 }
 0x80d   : > { %7139 = vst [vmem:[#allocation2 + $0x31] sm:$0xff] %v14598_v60  ;;  %8114 = vmatprep.mubr.bf16.mxu1 %v10734_v30  ;;  %v14607_v27 = vpack.c.bf16 %v14590_v11, %v14598_v60  ;;  %v10746_v57 = vpack.c.bf16 %v14598_v60, %v14592_v56  ;;  %v12728_v30 = vld [vmem:[#allocation14 + $0x168] sm:$0xff]   ;;  %v12744_v56 = vld [vmem:[#allocation14 + $0x220] sm:$0xff]  }
 0x80e   : > { %v12745_v60 = vld [vmem:[#allocation14 + $0x228] sm:$0xff]  }
 0x80f   : > { %v12222_v46 = vpop.f32.mrb[12].mxu0 }
 0x810   : > { %v14611_v0 = vmax.f32 %v12222_v46, 0.0  ;;  %v7061_v36 = vpop.f32.mrb[13].mxu0  ;;  %v12727_v46 = vld [vmem:[#allocation14 + $0x1a0] sm:$0xff]  }
 0x811   : > { %v14613_v23 = vmax.f32 %v7061_v36, 0.0  ;;  %v12223_v61 = vpop.f32.mrb[14].mxu0  ;;  %v7196_v48 = vld [vmem:[#allocation2 + $0x48] sm:$0xff] }
 0x812   : > { %v14615_v47 = vld [vmem:[#allocation2 + $0x4a] sm:$0xff]  ;;  %7144 = vst [vmem:[#allocation2 + $0xa9] sm:$0xff] %v14611_v0  ;;  %v14618_v6 = vmax.f32 %v12223_v61, 0.0  ;;  %v7064_v7 = vpop.f32.mrb[15].mxu0  ;;  %v7147_v10 = vld [vmem:[#allocation2 + $0x18] sm:$0xff] }
 0x813   : > { %v14620_v63 = vld [vmem:[#allocation2 + $0x1a] sm:$0xff]  ;;  %8646 = vst [vmem:[#allocation2 + $0x50] sm:$0xff] %v14556_v51  ;;  %8645 = vst [vmem:[#allocation2 + $0x48] sm:$0xff] %v14556_v51  ;;  %v14625_v49 = vmax.f32 %v7064_v7, 0.0  ;;  %v10730_v43 = vpack.c.bf16 %v7147_v10, %v14556_v51  ;;  %v14632_v20 = vpack.c.bf16 %v14613_v23, %v14595_v18  ;;  %v14634_v62 = vld [vmem:[#allocation2 + $0x62] sm:$0xff] }
 0x814   : > { %7142 = vst [vmem:[#allocation2 + $0x79] sm:$0xff] %v14613_v23  ;;  %v14628_v19 = vld [vmem:[#allocation2 + $0x60] sm:$0xff]  ;;  %8640 = vst [vmem:[#allocation2 + $0x20] sm:$0xff] %v14556_v51  ;;  %v7195_v4 = vld [vmem:[#allocation2 + $0x30] sm:$0xff]  ;;  %v10749_v35 = vpack.c.bf16 %v14618_v6, %v14611_v0  ;;  %v10738_v24 = vpack.c.bf16 %v14620_v63, %v14580_v29  ;;  %v10761_v11 = vpack.c.bf16 %v14584_v40, %v14618_v6 }
 0x815   : > { %8639 = vst [vmem:[#allocation2 + $0x18] sm:$0xff] %v14556_v51  ;;  %7145 = vst [vmem:[#allocation2 + $0xc1] sm:$0xff] %v14618_v6  ;;  %v14639_v9 = vld [vmem:[#allocation2 + $0x32] sm:$0xff]  ;;  %8115 = vmatmul.mubr.bf16.vlgmr.msra.gmra.mrb[248].mxu1 %v10730_v43  ;;  %v10742_v55 = vpack.c.bf16 %v7195_v4, %v7147_v10  ;;  %v14648_v52 = vpack.c.bf16 %v14611_v0, %v14625_v49  ;;  %v10748_v1 = vpack.c.bf16 %v14625_v49, %v14613_v23  ;;  %v12729_v61 = vld [vmem:[#allocation14 + $0x128] sm:$0xff]  }
 0x816   : > { %8649 = vst [vmem:[#allocation2 + $0x68] sm:$0xff] %v14556_v51  ;;  %8648 = vst [vmem:[#allocation2 + $0x60] sm:$0xff] %v14556_v51  ;;  %8121 = vmatprep.mubr.bf16.mxu1 %v14607_v27  ;;  %11859 = vmatpush3.bf16.msra.mxu1 %v12709_v21  ;;  %v10743_v14 = vpack.c.bf16 %v14628_v19, %v7196_v48  ;;  %v14666_v32 = vpack.c.bf16 %v7196_v48, %v7195_v4  ;;  %v12730_v48 = vld [vmem:[#allocation14 + $0x1e8] sm:$0xff]   ;;  %v12732_v10 = vld [vmem:[#allocation14 + $0x170] sm:$0xff]  }
 0x817   : > { %7143 = vst [vmem:[#allocation2 + $0x91] sm:$0xff] %v14625_v49  ;;  %8643 = vst [vmem:[#allocation2 + $0x38] sm:$0xff] %v14556_v51  ;;  %8175 = vmatprep.mubr.bf16.mxu0 %v10742_v55  ;;  %11860 = vmatprep.subr.bf16.mxu1 %v12712_v42  ;;  %v14684_v17 = vpack.c.bf16 %v14615_v47, %v14639_v9  ;;  %v12731_v21 = vld [vmem:[#allocation14 + $0x1a8] sm:$0xff]   ;;  %v12733_v43 = vld [vmem:[#allocation14 + $0x130] sm:$0xff]   ;;  %v10750_v55 = vpack.c.bf16 %v14639_v9, %v14620_v63 }
 0x818   : > { %8642 = vst [vmem:[#allocation2 + $0x30] sm:$0xff] %v14556_v51  ;;  %8176 = vmatmul.mubr.bf16.vlgmr.msra.gmra.mrb[16].mxu0 %v10738_v24  ;;  %v12734_v42 = vld [vmem:[#allocation14 + $0x1f0] sm:$0xff]   ;;  %v12736_v4 = vld [vmem:[#allocation14 + $0x178] sm:$0xff]   ;;  %v12741_v63 = vld [vmem:[#allocation14 + $0x208] sm:$0xff]   ;;  %v10751_v9 = vpack.c.bf16 %v14634_v62, %v14615_v47 }
 0x819   : > { %8182 = vmatprep.mubr.bf16.mxu0 %v10743_v14  ;;  %11899 = vmatpush3.bf16.msra.mxu0 %v12711_v41  ;;  %v14658_v3 = vld [vmem:[#allocation2 + $0xa8] sm:$0xff]  ;;  %v12735_v41 = vld [vmem:[#allocation14 + $0x1b0] sm:$0xff]   ;;  %v12740_v14 = vld [vmem:[#allocation14 + $0x200] sm:$0xff]  }
 0x81a   : > { %v14660_v39 = vld [vmem:[#allocation2 + $0xaa] sm:$0xff]  ;;  %11861 = vmatpush3.bf16.msra.mxu1 %v12713_v25  ;;  %11900 = vmatprep.subr.bf16.mxu0 %v12714_v8  ;;  %v12737_v25 = vld [vmem:[#allocation14 + $0x138] sm:$0xff]   ;;  %v12748_v0 = vld [vmem:[%s15051_s8] sm:$0xff]  }
 0x81b   : > { %v7198_v45 = vld [vmem:[#allocation2 + $0x78] sm:$0xff]  ;;  %8657 = vst [vmem:[#allocation2 + $0xa8] sm:$0xff] %v14556_v51  ;;  %8658 = vst [vmem:[#allocation2 + $0xb0] sm:$0xff] %v14556_v51  ;;  %11862 = vmatprep.subr.bf16.mxu1 %v12716_v12  ;;  %v12746_v18 = vld [vmem:[#allocation14 + $0x230] sm:$0xff]  }
 0x81c   : > { %v14662_v34 = vld [vmem:[#allocation2 + $0x7a] sm:$0xff]  ;;  %v14670_v13 = vld [vmem:[#allocation2 + $0xc2] sm:$0xff]  ;;  %v14688_v50 = vpack.c.bf16 %v7198_v45, %v14628_v19  ;;  %v12750_v49 = vld [vmem:[%s15051_s8 + $0x10] sm:$0xff]  }
 0x81d   : > { %v14668_v31 = vld [vmem:[#allocation2 + $0xc0] sm:$0xff]  ;;  %8652 = vst [vmem:[#allocation2 + $0x80] sm:$0xff] %v14556_v51  ;;  %8651 = vst [vmem:[#allocation2 + $0x78] sm:$0xff] %v14556_v51  ;;  %11901 = vmatpush3.bf16.msra.mxu0 %v12715_v28  ;;  %8122 = vmatmul.mubr.bf16.gmra.mrb[252].mxu1 %v14666_v32  ;;  %v14694_v36 = vpack.c.bf16 %v14662_v34, %v14634_v62  ;;  %v12738_v8 = vld [vmem:[#allocation14 + $0x1f8] sm:$0xff]   ;;  %v10765_v40 = vpack.c.bf16 %v14586_v5, %v14670_v13 }
 0x81e   : > { %v7199_v2 = vld [vmem:[#allocation2 + $0x90] sm:$0xff]  ;;  %8660 = vst [vmem:[#allocation2 + $0xc0] sm:$0xff] %v14556_v51  ;;  %8661 = vst [vmem:[#allocation2 + $0xc8] sm:$0xff] %v14556_v51  ;;  %8128 = vmatprep.mubr.bf16.mxu1 %v14632_v20  ;;  %11863 = vmatpush3.bf16.msra.mxu1 %v12717_v54  ;;  %v10745_v7 = vpack.c.bf16 %v14668_v31, %v14658_v3  ;;  %v12739_v12 = vld [vmem:[#allocation14 + $0x1b8] sm:$0xff]   ;;  %v10757_v23 = vpack.c.bf16 %v14556_v51, %v14668_v31 }
 0x81f   : > { %v14674_v59 = vld [vmem:[#allocation2 + $0x92] sm:$0xff]  ;;  %11902 = vmatprep.subr.bf16.mxu0 %v12718_v37  ;;  %v10744_v29 = vpack.c.bf16 %v7199_v2, %v7198_v45  ;;  %11864 = vmatprep.subr.bf16.mxu1 %v12720_v44  ;;  %v10733_v19 = vpack.c.bf16 %v14658_v3, %v7199_v2  ;;  %v12749_v6 = vld [vmem:[%s15051_s8 + $0x8] sm:$0xff]  }
 0x820   : > { %8654 = vst [vmem:[#allocation2 + $0x90] sm:$0xff] %v14556_v51  ;;  %8655 = vst [vmem:[#allocation2 + $0x98] sm:$0xff] %v14556_v51  ;;  %8183 = vmatmul.mubr.bf16.gmra.mrb[20].mxu0 %v14684_v17  ;;  %v10741_v24 = vpack.c.bf16 %v14660_v39, %v14674_v59  ;;  %v12742_v28 = vld [vmem:[#allocation14 + $0x210] sm:$0xff]   ;;  %v10752_v47 = vpack.c.bf16 %v14674_v59, %v14662_v34  ;;  %v12751_v5 = vld [vmem:[%s15051_s8 + $0x18] sm:$0xff]  }
 0x821   : > { %8189 = vmatprep.mubr.bf16.mxu0 %v10744_v29  ;;  %11903 = vmatpush3.bf16.msra.mxu0 %v12719_v53  ;;  %v12753_v62 = vld [vmem:[%s15051_s8 + $0x28] sm:$0xff]   ;;  %v12755_v54 = vld [vmem:[%s15051_s8 + $0x38] sm:$0xff]   ;;  %v12764_v45 = vld [vmem:[%s15052_s9 + $0x50] sm:$0xff]  }
 0x822   : > { %11865 = vmatpush3.bf16.msra.mxu1 %v12721_v16  ;;  %11904 = vmatprep.subr.bf16.mxu0 %v12722_v22  ;;  %v12760_v3 = vld [vmem:[%s15052_s9 + $0x48] sm:$0xff]   ;;  %v12768_v34 = vld [vmem:[%s15052_s9 + $0x58] sm:$0xff]  }
 0x823   : > { %11866 = vmatprep.subr.bf16.mxu1 %v12724_v26  ;;  %v12761_v37 = vld [vmem:[%s15052_s9 + $0x8] sm:$0xff]  }
 0x825   : > { %11905 = vmatpush3.bf16.msra.mxu0 %v12723_v33  ;;  %8129 = vmatmul.mubr.bf16.gmra.mrb[0].mxu1 %v14688_v50 }
 0x826   : > { %8135 = vmatprep.mubr.bf16.mxu1 %v14648_v52  ;;  %11867 = vmatpush3.bf16.msra.mxu1 %v12725_v38 }
 0x827   : > { %11906 = vmatprep.subr.bf16.mxu0 %v12726_v58  ;;  %11868 = vmatprep.subr.bf16.mxu1 %v12728_v30 }
 0x828   : > { %8190 = vmatmul.mubr.bf16.gmra.mrb[24].mxu0 %v14694_v36 }
 0x829   : > { %8196 = vmatprep.mubr.bf16.mxu0 %v10745_v7  ;;  %11907 = vmatpush3.bf16.msra.mxu0 %v12727_v46 }
 0x82a   : > { %11869 = vmatpush3.bf16.msra.mxu1 %v12729_v61  ;;  %11908 = vmatprep.subr.bf16.mxu0 %v12730_v48 }
 0x82b   : > { %11870 = vmatprep.subr.bf16.mxu1 %v12732_v10 }
 0x82d   : > { %11909 = vmatpush3.bf16.msra.mxu0 %v12731_v21  ;;  %8136 = vmatmul.mubr.bf16.gmra.mrb[4].mxu1 %v10733_v19 }
 0x82e   : > { %11871 = vmatpush3.bf16.msra.mxu1 %v12733_v43  ;;  %8236 = vmatprep.mubr.bf16.mxu1 %v10750_v55 }
 0x82f   : > { %11910 = vmatprep.subr.bf16.mxu0 %v12734_v42  ;;  %11872 = vmatprep.subr.bf16.mxu1 %v12736_v4 }
 0x830   : > { %8197 = vmatmul.mubr.bf16.gmra.mrb[28].mxu0 %v10741_v24 }
 0x831   : > { %11911 = vmatpush3.bf16.msra.mxu0 %v12735_v41  ;;  %8297 = vmatprep.mubr.bf16.mxu0 %v14607_v27  ;;  %v12743_v27 = vld [vmem:[#allocation14 + $0x218] sm:$0xff]  }
 0x832   : > { %11873 = vmatpush3.bf16.msra.mxu1 %v12737_v25  ;;  %11912 = vmatprep.subr.bf16.mxu0 %v12738_v8 }
 0x833   : > { %12224 = vmatprep.subr.bf16.mxu1 %v12740_v14 }
 0x835   : > { %11913 = vmatpush3.bf16.msra.mxu0 %v12739_v12  ;;  %8237 = vmatmul.mubr.bf16.vlgmr.msra.gmra.mrb[8].mxu1 %v10746_v57  ;;  %v10753_v57 = vpack.c.bf16 %v14670_v13, %v14660_v39  ;;  %v12758_v39 = vld [vmem:[%s15052_s9 + $0xc0] sm:$0xff]  }
 0x836   : > { %8243 = vmatprep.mubr.bf16.mxu1 %v10751_v9  ;;  %12225 = vmatpush3.bf16.msra.mxu1 %v12740_v14 }
 0x837   : > { %12226 = vmatprep.subr.bf16.mxu1 %v12741_v63  ;;  %12248 = vmatprep.subr.bf16.mxu0 %v14556_v51 }
 0x838   : > { %8298 = vmatmul.mubr.bf16.vlgmr.msra.gmra.mrb[32].mxu0 %v14666_v32 }
 0x839   : > { %8304 = vmatprep.mubr.bf16.mxu0 %v14632_v20  ;;  %12249 = vmatpush3.bf16.msra.mxu0 %v12748_v0  ;;  %v12752_v20 = vld [vmem:[%s15051_s8 + $0x20] sm:$0xff]  }
 0x83a   : > { %12227 = vmatpush3.bf16.msra.mxu1 %v12741_v63  ;;  %12250 = vmatprep.subr.bf16.mxu0 %v14556_v51 }
 0x83b   : > { %12228 = vmatprep.subr.bf16.mxu1 %v12742_v28 }
 0x83d   : > { %8244 = vmatmul.mubr.bf16.gmra.mrb[12].mxu1 %v10747_v15  ;;  %v12747_v15 = vld [vmem:[#allocation14 + $0x238] sm:$0xff]   ;;  %12251 = vmatpush3.bf16.msra.mxu0 %v12749_v6 }
 0x83e   : > { %8250 = vmatprep.mubr.bf16.mxu1 %v10752_v47  ;;  %12229 = vmatpush3.bf16.msra.mxu1 %v12742_v28 }
 0x83f   : > { %12230 = vmatprep.subr.bf16.mxu1 %v12743_v27  ;;  %12252 = vmatprep.subr.bf16.mxu0 %v14556_v51 }
 0x840   : > { %8305 = vmatmul.mubr.bf16.gmra.mrb[36].mxu0 %v14688_v50 }
 0x841   : > { %8311 = vmatprep.mubr.bf16.mxu0 %v14648_v52  ;;  %12253 = vmatpush3.bf16.msra.mxu0 %v12750_v49  ;;  %v12756_v52 = vld [vmem:[%s15052_s9 + $0x40] sm:$0xff]  }
 0x842   : > { %12231 = vmatpush3.bf16.msra.mxu1 %v12743_v27  ;;  %12254 = vmatprep.subr.bf16.mxu0 %v14556_v51 }
 0x843   : > { %12232 = vmatprep.subr.bf16.mxu1 %v12744_v56 }
 0x845   : > { %8251 = vmatmul.mubr.bf16.gmra.mrb[16].mxu1 %v10748_v1  ;;  %12255 = vmatpush3.bf16.msra.mxu0 %v12751_v5  ;;  %v12757_v1 = vld [vmem:[%s15052_s9] sm:$0xff]  }
 0x846   : > { %8257 = vmatprep.mubr.bf16.mxu1 %v10753_v57  ;;  %12233 = vmatpush3.bf16.msra.mxu1 %v12744_v56 }
 0x847   : > { %12234 = vmatprep.subr.bf16.mxu1 %v12745_v60  ;;  %12256 = vmatprep.subr.bf16.mxu0 %v14556_v51 }
 0x848   : > { %8312 = vmatmul.mubr.bf16.gmra.mrb[40].mxu0 %v10733_v19 }
 0x849   : > { %8318 = vmatprep.mubr.bf16.mxu0 %v10761_v11  ;;  %12257 = vmatpush3.bf16.msra.mxu0 %v12752_v20 }
 0x84a   : > { %12235 = vmatpush3.bf16.msra.mxu1 %v12745_v60  ;;  %12258 = vmatprep.subr.bf16.mxu0 %v14556_v51 }
 0x84b   : > { %12236 = vmatprep.subr.bf16.mxu1 %v12746_v18 }
 0x84d   : > { %8258 = vmatmul.mubr.bf16.gmra.mrb[20].mxu1 %v10749_v35  ;;  %12259 = vmatpush3.bf16.msra.mxu0 %v12753_v62  ;;  %v12754_v35 = vld [vmem:[%s15051_s8 + $0x30] sm:$0xff]  }
 0x84e   : > { %12237 = vmatpush3.bf16.msra.mxu1 %v12746_v18  ;;  %12240 = vmatprep.mubr.bf16.mxu1 %v14684_v17 }
 0x84f   : > { %12238 = vmatprep.subr.bf16.mxu1 %v12747_v15  ;;  %12260 = vmatprep.subr.bf16.mxu0 %v14556_v51 }
 0x850   : > { %8319 = vmatmul.mubr.bf16.gmra.mrb[44].mxu0 %v10757_v23 }
 0x851   : > { %12264 = vmatprep.mubr.msk.bf16.mxu0 %vm13065_vm8, %v14556_v51  ;;  %12261 = vmatpush3.bf16.msra.mxu0 %v12754_v35 }
 0x852   : > { %12239 = vmatpush3.bf16.msra.mxu1 %v12747_v15  ;;  %12262 = vmatprep.subr.bf16.mxu0 %v14556_v51  ;;  %v12765_v51 = vld [vmem:[%s15052_s9 + $0x10] sm:$0xff]  }
 0x853   : > { %11959 = vmatprep.subr.bf16.mxu1 %v12756_v52 }
 0x855   : > { %12241 = vmatmul.mubr.bf16.vlgmr.msra.gmra.mrb[24].mxu1 %v14694_v36  ;;  %12263 = vmatpush3.bf16.msra.mxu0 %v12755_v54 }
 0x856   : > { %12244 = vmatprep.mubr.bf16.mxu1 %v10741_v24  ;;  %11960 = vmatpush3.bf16.msra.mxu1 %v12757_v1 }
 0x857   : > { %11961 = vmatprep.subr.bf16.mxu1 %v12760_v3  ;;  %11981 = vmatprep.subr.bf16.mxu0 %v12758_v39 }
 0x85a   : > { %11962 = vmatpush3.bf16.msra.mxu1 %v12761_v37 }
 0x85b   : > { %11963 = vmatprep.subr.bf16.mxu1 %v12764_v45 }
 0x85d   : > { %12245 = vmatmul.mubr.bf16.gmra.mrb[28].mxu1 %v10765_v40 }
 0x85e   : > { %11964 = vmatpush3.bf16.msra.mxu1 %v12765_v51 }
 0x85f   : > { %11965 = vmatprep.subr.bf16.mxu1 %v12768_v34 }
 0x8e8   : > { %v11794_v32 = vpop.f32.mrb[248].mxu1 }
 0x8e9   : > { %v11795_v44 = vpop.f32.mrb[249].mxu1 }
 0x8ea   : > { %v11796_v31 = vadd.f32 %v11795_v44, %v11794_v32  ;;  %v11797_v13 = vpop.f32.mrb[250].mxu1 }
 0x8eb   : > { %v11834_v2 = vpop.f32.mrb[16].mxu0  ;;  %v11798_v59 = vpop.f32.mrb[251].mxu1 }
 0x8ec   : > { %v11835_v53 = vpop.f32.mrb[17].mxu0 }
 0x8ed   : > { %v11836_v17 = vadd.f32 %v11835_v53, %v11834_v2  ;;  %v11837_v16 = vpop.f32.mrb[18].mxu0 }
 0x8ee   : > { %v11838_v22 = vpop.f32.mrb[19].mxu0 }
 0x8ef   : > { %v8178_v29 = vadd.f32 %v11836_v17, %v11796_v31 }
 0x8f0   : > { %v11800_v26 = vpop.f32.mrb[252].mxu1 }
 0x8f1   : > { %v11801_v33 = vpop.f32.mrb[253].mxu1 }
 0x8f2   : > { %v11802_v38 = vadd.f32 %v11801_v33, %v11800_v26  ;;  %v11803_v50 = vpop.f32.mrb[254].mxu1 }
 0x8f3   : > { %v11840_v58 = vpop.f32.mrb[20].mxu0  ;;  %v11804_v30 = vpop.f32.mrb[255].mxu1 }
 0x8f4   : > { %v11841_v46 = vpop.f32.mrb[21].mxu0 }
 0x8f5   : > { %v11842_v36 = vadd.f32 %v11841_v46, %v11840_v58  ;;  %v11843_v61 = vpop.f32.mrb[22].mxu0 }
 0x8f6   : > { %v11844_v48 = vpop.f32.mrb[23].mxu0 }
 0x8f7   : > { %v8185_v7 = vadd.f32 %v11842_v36, %v11802_v38 }
 0x8f8   : > { %v11806_v10 = vpop.f32.mrb[0].mxu1 }
 0x8f9   : > { %v11807_v21 = vpop.f32.mrb[1].mxu1 }
 0x8fa   : > { %v11808_v43 = vadd.f32 %v11807_v21, %v11806_v10  ;;  %v11809_v19 = vpop.f32.mrb[2].mxu1 }
 0x8fb   : > { %v11846_v42 = vpop.f32.mrb[24].mxu0  ;;  %v11810_v4 = vpop.f32.mrb[3].mxu1 }
 0x8fc   : > { %v11847_v55 = vpop.f32.mrb[25].mxu0 }
 0x8fd   : > { %v11848_v41 = vadd.f32 %v11847_v55, %v11846_v42  ;;  %v11849_v24 = vpop.f32.mrb[26].mxu0 }
 0x8fe   : > { %v11850_v25 = vpop.f32.mrb[27].mxu0 }
 0x8ff   : > { %v8192_v8 = vadd.f32 %v11848_v41, %v11808_v43 }
 0x900   : > { %v11812_v14 = vpop.f32.mrb[4].mxu1 }
 0x901   : > { %v11813_v12 = vpop.f32.mrb[5].mxu1 }
 0x902   : > { %v11814_v63 = vadd.f32 %v11813_v12, %v11812_v14  ;;  %v11815_v9 = vpop.f32.mrb[6].mxu1 }
 0x903   : > { %v11852_v28 = vpop.f32.mrb[28].mxu0  ;;  %v11816_v27 = vpop.f32.mrb[7].mxu1 }
 0x904   : > { %v11853_v47 = vpop.f32.mrb[29].mxu0 }
 0x905   : > { %v11854_v56 = vadd.f32 %v11853_v47, %v11852_v28  ;;  %v11855_v60 = vpop.f32.mrb[30].mxu0 }
 0x906   : > { %v11856_v57 = vpop.f32.mrb[31].mxu0 }
 0x907   : > { %v8199_v11 = vadd.f32 %v11854_v56, %v11814_v63 }
 0x908   : > { %v11874_v18 = vpop.f32.mrb[8].mxu1 }
 0x909   : > { %v11875_v15 = vpop.f32.mrb[9].mxu1 }
 0x90a   : > { %v11876_v23 = vadd.f32 %v11875_v15, %v11874_v18  ;;  %v11877_v40 = vpop.f32.mrb[10].mxu1 }
 0x90b   : > { %v11914_v0 = vpop.f32.mrb[32].mxu0  ;;  %v11878_v6 = vpop.f32.mrb[11].mxu1 }
 0x90c   : > { %v8239_v49 = vadd.f32 %v11876_v23, %v8178_v29  ;;  %v11915_v5 = vpop.f32.mrb[33].mxu0 }
 0x90d   : > { %v11916_v20 = vadd.f32 %v11915_v5, %v11914_v0  ;;  %v11917_v62 = vpop.f32.mrb[34].mxu0 }
 0x90e   : > { %v11918_v35 = vpop.f32.mrb[35].mxu0 }
 0x90f   : > { %v8300_v52 = vadd.f32 %v11916_v20, %v8239_v49 }
 0x910   : > { %v11880_v1 = vpop.f32.mrb[12].mxu1 }
 0x911   : > { %v11881_v54 = vpop.f32.mrb[13].mxu1 }
 0x912   : > { %v11882_v3 = vadd.f32 %v11881_v54, %v11880_v1  ;;  %v11883_v39 = vpop.f32.mrb[14].mxu1 }
 0x913   : > { %v11920_v37 = vpop.f32.mrb[36].mxu0  ;;  %v11884_v45 = vpop.f32.mrb[15].mxu1 }
 0x914   : > { %v8246_v51 = vadd.f32 %v11882_v3, %v8185_v7  ;;  %v11921_v34 = vpop.f32.mrb[37].mxu0 }
 0x915   : > { %v11922_v32 = vadd.f32 %v11921_v34, %v11920_v37  ;;  %v11923_v44 = vpop.f32.mrb[38].mxu0 }
 0x916   : > { %v11924_v31 = vpop.f32.mrb[39].mxu0 }
 0x917   : > { %v8307_v13 = vadd.f32 %v11922_v32, %v8246_v51 }
 0x918   : > { %v11886_v2 = vpop.f32.mrb[16].mxu1 }
 0x919   : > { %v11887_v59 = vpop.f32.mrb[17].mxu1 }
 0x91a   : > { %v11888_v53 = vadd.f32 %v11887_v59, %v11886_v2  ;;  %v11889_v17 = vpop.f32.mrb[18].mxu1  ;;  %v8526_v59 = vlaneseq }
 0x91b   : > { %v11926_v16 = vpop.f32.mrb[40].mxu0  ;;  %v11890_v22 = vpop.f32.mrb[19].mxu1 }
 0x91c   : > { %v8253_v29 = vadd.f32 %v11888_v53, %v8192_v8  ;;  %v11927_v26 = vpop.f32.mrb[41].mxu0 }
 0x91d   : > { %v11928_v33 = vadd.f32 %v11927_v26, %v11926_v16  ;;  %v11929_v38 = vpop.f32.mrb[42].mxu0  ;;  %v14815_v16 = vshrl.u32 %v8526_v59, 7 }
 0x91e   : > { %v11930_v50 = vpop.f32.mrb[43].mxu0 }
 0x91f   : > { %v8314_v58 = vadd.f32 %v11928_v33, %v8253_v29 }
 0x920   : > { %v11892_v30 = vpop.f32.mrb[20].mxu1 }
 0x921   : > { %v11893_v46 = vpop.f32.mrb[21].mxu1 }
 0x922   : > { %v11894_v36 = vadd.f32 %v11893_v46, %v11892_v30  ;;  %v11895_v61 = vpop.f32.mrb[22].mxu1 }
 0x923   : > { %v11932_v48 = vpop.f32.mrb[44].mxu0  ;;  %v11896_v7 = vpop.f32.mrb[23].mxu1 }
 0x924   : > { %v8260_v10 = vadd.f32 %v11894_v36, %v8199_v11  ;;  %v11933_v21 = vpop.f32.mrb[45].mxu0  ;;  %v12759_v36 = vld [vmem:[%s15052_s9 + $0x80] sm:$0xff]   ;;  %v12763_v7 = vld [vmem:[%s15052_s9 + $0x88] sm:$0xff]  }
 0x925   : > { %v11934_v43 = vadd.f32 %v11933_v21, %v11932_v48  ;;  %v11935_v19 = vpop.f32.mrb[46].mxu0  ;;  %v12762_v48 = vld [vmem:[%s15052_s9 + $0xc8] sm:$0xff]   ;;  %v12767_v21 = vld [vmem:[%s15052_s9 + $0x90] sm:$0xff]  }
 0x926   : > { %v11936_v42 = vpop.f32.mrb[47].mxu0  ;;  %v12770_v19 = vld [vmem:[%s15052_s9 + $0xd8] sm:$0xff]  }
 0x927   : > { %v8321_v4 = vadd.f32 %v11934_v43, %v8260_v10  ;;  %v12766_v10 = vld [vmem:[%s15052_s9 + $0xd0] sm:$0xff]   ;;  %v12769_v43 = vld [vmem:[%s15052_s9 + $0x18] sm:$0xff]  }
 0x928   : > { %v12242_v55 = vpop.f32.mrb[24].mxu1  ;;  %11966 = vmatpush3.bf16.msra.mxu1 %v12769_v43  ;;  %v12771_v42 = vld [vmem:[%s15052_s9 + $0x98] sm:$0xff]  }
 0x929   : > { %v8368_v41 = vadd.f32 %v12242_v55, %v8307_v13  ;;  %v8360_v24 = vpop.f32.mrb[25].mxu1  ;;  %v13066_v13 = vmov 1983009808   ;;  %v12773_v55 = vld [vmem:[%s15052_s9 + $0x20] sm:$0xff]  }
 0x92a   : > { %v8361_v25 = vadd.f32 %v8360_v24, %v8300_v52  ;;  %v12243_v8 = vpop.f32.mrb[26].mxu1  ;;  %v8524_v2 = vunpack.c.l.s4 %v13066_v13  ;;  %v12776_v24 = vld [vmem:[%s15052_s9 + $0x68] sm:$0xff]  }
 0x92b   : > { %v8388_v14 = vmax.f32 %v8368_v41, 0.0  ;;  %v8363_v12 = vpop.f32.mrb[27].mxu1  ;;  %v12774_v41 = vld [vmem:[%s15052_s9 + $0xe0] sm:$0xff]   ;;  %v12778_v8 = vld [vmem:[%s15052_s9 + $0xe8] sm:$0xff]  }
 0x92c   : > { %v8387_v63 = vmax.f32 %v8361_v25, 0.0  ;;  %v8525_v17 = vunpack.c.0.s8 %v8524_v2  ;;  %v12775_v25 = vld [vmem:[%s15052_s9 + $0xa0] sm:$0xff]   ;;  %v12780_v12 = vld [vmem:[%s15052_s9 + $0x70] sm:$0xff]  }
 0x92d   : > { %v8396_v9 = vrot.slane %v8388_v14, 1  ;;  %v8404_v28 = vrot.slane %v8388_v14, 2  ;;  %v8412_v56 = vrot.slane %v8388_v14, 3 }
 0x92e   : > { %v8395_v27 = vrot.slane %v8387_v63, 1  ;;  %v8403_v47 = vrot.slane %v8387_v63, 2  ;;  %v8411_v11 = vrot.slane %v8387_v63, 3  ;;  %v14818_v38 = vsub.s32 %v8525_v17, %v14815_v16  ;;  %v8753_v17 = vld [vmem:[#allocation2 + $0x79] sm:$0xf] }
 0x92f   : > { %v8420_v60 = vsel %vm2540_vm1, %v8388_v14, %v8396_v9  ;;  %v12777_v14 = vld [vmem:[%s15052_s9 + $0x28] sm:$0xff]   ;;  %v12782_v9 = vld [vmem:[%s15052_s9 + $0xf0] sm:$0xff]  }
 0x930   : > { %v8424_v57 = vsel %vm2549_vm2, %v8420_v60, %v8404_v28  ;;  %v8419_v18 = vsel %vm2540_vm1, %v8387_v63, %v8395_v27  ;;  %v12246_v15 = vpop.f32.mrb[28].mxu1  ;;  %v12779_v63 = vld [vmem:[%s15052_s9 + $0xa8] sm:$0xff]   ;;  %v12781_v28 = vld [vmem:[%s15052_s9 + $0x30] sm:$0xff]   ;;  %v12784_v27 = vld [vmem:[%s15052_s9 + $0x78] sm:$0xff]  }
 0x931   : > { %v8428_v23 = vsel %vm2558_vm3, %v8424_v57, %v8412_v56  ;;  %v8423_v40 = vsel %vm2549_vm2, %v8419_v18, %v8403_v47  ;;  %v8382_v0 = vadd.f32 %v12246_v15, %v8321_v4  ;;  %v8374_v6 = vpop.f32.mrb[29].mxu1  ;;  %v12772_v4 = vld [vmem:[%s15052_s9 + $0x60] sm:$0xff]   ;;  %v12783_v47 = vld [vmem:[%s15052_s9 + $0xb0] sm:$0xff]   ;;  %v12786_v56 = vld [vmem:[%s15052_s9 + $0xf8] sm:$0xff]  }
 0x932   : > { %8432 = vst [vmem:[%s14797_s25 + $0x4] sm:$0xf] %v8428_v23  ;;  %8490 = vst [vmem:[#allocation3 + $0x31] sm:$0xf] %v8428_v23  ;;  %v8427_v49 = vsel %vm2558_vm3, %v8423_v40, %v8411_v11  ;;  %v8375_v5 = vadd.f32 %v8374_v6, %v8314_v58  ;;  %v12247_v20 = vpop.f32.mrb[30].mxu1  ;;  %11967 = vmatprep.subr.bf16.mxu1 %v12772_v4  ;;  %v12785_v60 = vld [vmem:[%s15052_s9 + $0x38] sm:$0xff]  }
 0x933   : > { %8431 = vst [vmem:[%s14797_s25] sm:$0xf] %v8427_v49  ;;  %8489 = vst [vmem:[#allocation3 + $0x19] sm:$0xf] %v8427_v49  ;;  %v8390_v62 = vmax.f32 %v8382_v0, 0.0  ;;  %v8377_v35 = vpop.f32.mrb[31].mxu1  ;;  %11968 = vmatpush3.bf16.msra.mxu1 %v12773_v55  ;;  %v12788_v57 = vld [vmem:[%s15052_s9 + $0x140] sm:$0xff]  }
 0x934   : > { %v8389_v52 = vmax.f32 %v8375_v5, 0.0  ;;  %11969 = vmatprep.subr.bf16.mxu1 %v12776_v24  ;;  %v12787_v11 = vld [vmem:[%s15052_s9 + $0xb8] sm:$0xff]   ;;  %v12790_v18 = vld [vmem:[%s15052_s9 + $0x1c0] sm:$0xff]  }
 0x935   : > { %v8398_v1 = vrot.slane %v8390_v62, 1  ;;  %v8406_v54 = vrot.slane %v8390_v62, 2  ;;  %v8414_v37 = vrot.slane %v8390_v62, 3  ;;  %v8694_v35 = vld [vmem:[#allocation2] sm:$0xf] }
 0x936   : > { %v8397_v3 = vrot.slane %v8389_v52, 1  ;;  %v8405_v39 = vrot.slane %v8389_v52, 2  ;;  %v8413_v34 = vrot.slane %v8389_v52, 3 }
 0x937   : > { %v8422_v45 = vsel %vm2540_vm1, %v8390_v62, %v8398_v1  ;;  %11970 = vmatpush3.bf16.msra.mxu1 %v12777_v14  ;;  %v8702_v62 = vld [vmem:[#allocation2 + $0x1] sm:$0xf] }
 0x938   : > { %v8426_v51 = vsel %vm2549_vm2, %v8422_v45, %v8406_v54  ;;  %v8421_v32 = vsel %vm2540_vm1, %v8389_v52, %v8397_v3  ;;  %11971 = vmatprep.subr.bf16.mxu1 %v12780_v12  ;;  %v8710_v52 = vld [vmem:[#allocation2 + $0x2] sm:$0xf] }
 0x939   : > { %v8430_v44 = vsel %vm2558_vm3, %v8426_v51, %v8414_v37  ;;  %v8425_v31 = vsel %vm2549_vm2, %v8421_v32, %v8405_v39  ;;  %v8494_v29 = vld [vmem:[#allocation3 + $0x31] sm:$0xf] }
 0x93a   : > { %8434 = vst [vmem:[%s14797_s25 + $0xc] sm:$0xf] %v8430_v44  ;;  %8492 = vst [vmem:[#allocation3 + $0x61] sm:$0xf] %v8430_v44  ;;  %v8429_v53 = vsel %vm2558_vm3, %v8425_v31, %v8413_v34  ;;  %v8493_v22 = vld [vmem:[#allocation3 + $0x19] sm:$0xf] }
 0x93b   : > { %8433 = vst [vmem:[%s14797_s25 + $0x8] sm:$0xf] %v8429_v53  ;;  %8491 = vst [vmem:[#allocation3 + $0x49] sm:$0xf] %v8429_v53  ;;  %v10508_v33 = vpack.c.bf16 %v8494_v29, %v8493_v22  ;;  %11972 = vmatpush3.bf16.msra.mxu1 %v12781_v28 }
 0x93c   : > { %11973 = vmatprep.subr.bf16.mxu1 %v12784_v27 }
 0x93d   : > { %v8529_v30 = vrot.slane %v10508_v33, %v14818_v38 }
 0x93f   : > { %11974 = vmatpush3.bf16.msra.mxu1 %v12785_v60  ;;  %v12791_v60 = vld [vmem:[%s15052_s9 + $0x180] sm:$0xff]  }
 0x940   : > { %12003 = vmatprep.subr.bf16.mxu1 %v12788_v57  ;;  %v12792_v57 = vld [vmem:[%s15052_s9 + $0x148] sm:$0xff]  }
 0x941   : > { %v8496_v26 = vld [vmem:[#allocation3 + $0x61] sm:$0xf] }
 0x942   : > { %v8495_v50 = vld [vmem:[#allocation3 + $0x49] sm:$0xf] }
 0x943   : > { %v10509_v58 = vpack.c.bf16 %v8496_v26, %v8495_v50 }
 0x945   : > { %v8536_v46 = vrot.slane %v10509_v58, %v14818_v38 }
 0x947   : > { %v8537_v61 = vcombine.low %v8529_v30, %v8536_v46 }
 0x949   : > { %12265 = vmatmul.mubr.bf16.vlgmr.msra.gmra.mrb[48].mxu0 %v8537_v61 }
 0x94a   : > { %11982 = vmatpush3.bf16.msra.mxu0 %v12759_v36 }
 0x94b   : > { %11983 = vmatprep.subr.bf16.mxu0 %v12762_v48 }
 0x94e   : > { %11984 = vmatpush3.bf16.msra.mxu0 %v12763_v7 }
 0x94f   : > { %11985 = vmatprep.subr.bf16.mxu0 %v12766_v10 }
 0x952   : > { %11986 = vmatpush3.bf16.msra.mxu0 %v12767_v21 }
 0x953   : > { %11987 = vmatprep.subr.bf16.mxu0 %v12770_v19 }
 0x956   : > { %11988 = vmatpush3.bf16.msra.mxu0 %v12771_v42 }
 0x957   : > { %11989 = vmatprep.subr.bf16.mxu0 %v12774_v41 }
 0x95a   : > { %11990 = vmatpush3.bf16.msra.mxu0 %v12775_v25 }
 0x95b   : > { %11991 = vmatprep.subr.bf16.mxu0 %v12778_v8  ;;  %v12789_v8 = vld [vmem:[%s15052_s9 + $0x100] sm:$0xff]  }
 0x95e   : > { %11992 = vmatpush3.bf16.msra.mxu0 %v12779_v63 }
 0x95f   : > { %11993 = vmatprep.subr.bf16.mxu0 %v12782_v9 }
 0x962   : > { %11994 = vmatpush3.bf16.msra.mxu0 %v12783_v47 }
 0x963   : > { %11995 = vmatprep.subr.bf16.mxu0 %v12786_v56 }
 0x966   : > { %11996 = vmatpush3.bf16.msra.mxu0 %v12787_v11 }
 0x967   : > { %12025 = vmatprep.subr.bf16.mxu0 %v12790_v18 }
 0xa1c   : > { %v8621_v15 = vpop.f32.mrb[48].mxu0 }
 0xa1d   : > { %v8628_v23 = vmax.f32 %v8621_v15, 0.0  ;;  %v12266_v40 = vpop.f32.mrb[49].mxu0 }
 0xa1e   : > { %v8624_v0 = vpop.f32.mrb[50].mxu0  ;;  %v12794_v40 = vld [vmem:[%s15052_s9 + $0x1c8] sm:$0xff]  }
 0xa1f   : > { %v8632_v6 = vcombine.high %v8628_v23, %v8628_v23  ;;  %8690 = vst [vmem:[#allocation2 + $0x19] sm:$0xf] %v8628_v23  ;;  %v8629_v49 = vmax.f32 %v8624_v0, 0.0  ;;  %v12267_v5 = vpop.f32.mrb[51].mxu0  ;;  %v12793_v0 = vld [vmem:[%s15052_s9 + $0x108] sm:$0xff]  }
 0xa20   : > { %v12795_v5 = vld [vmem:[%s15052_s9 + $0x188] sm:$0xff]  }
 0xa21   : > { %8691 = vst [vmem:[#allocation2 + $0x31] sm:$0xf] %v8632_v6  ;;  %v8633_v20 = vcombine.high %v8629_v49, %v8629_v49  ;;  %8692 = vst [vmem:[#allocation2 + $0x49] sm:$0xf] %v8629_v49  ;;  %v12796_v49 = vld [vmem:[%s15052_s9 + $0x150] sm:$0xff]  }
 0xa23   : > { %8693 = vst [vmem:[#allocation2 + $0x61] sm:$0xf] %v8633_v20  ;;  %v12798_v20 = vld [vmem:[%s15052_s9 + $0x1d0] sm:$0xff]  }
 0xa26   : > { %v8703_v1 = vld [vmem:[#allocation2 + $0x19] sm:$0xf] }
 0xa27   : > { %v8695_v54 = vld [vmem:[#allocation2 + $0x18] sm:$0xf]  ;;  %v10520_v3 = vpack.c.bf16 %v8703_v1, %v8702_v62  ;;  %v12797_v62 = vld [vmem:[%s15052_s9 + $0x110] sm:$0xff]  }
 0xa28   : > { %v10518_v39 = vpack.c.bf16 %v8695_v54, %v8694_v35  ;;  %v8718_v37 = vld [vmem:[#allocation2 + $0x18] sm:$0xf]  ;;  %v8704_v51 = vld [vmem:[#allocation2 + $0x31] sm:$0xf]  ;;  %v8705_v34 = vld [vmem:[#allocation2 + $0x49] sm:$0xf] }
 0xa29   : > { %v8711_v45 = vld [vmem:[#allocation2 + $0x1a] sm:$0xf]  ;;  %v8696_v32 = vld [vmem:[#allocation2 + $0x30] sm:$0xf]  ;;  %v10521_v13 = vpack.c.bf16 %v8705_v34, %v8704_v51  ;;  %v8697_v2 = vld [vmem:[#allocation2 + $0x48] sm:$0xf]  ;;  %v8800_v22 = vrot.slane %v10520_v3, %v14818_v38 }
 0xa2a   : > { %v8734_v44 = vld [vmem:[#allocation2 + $0x1a] sm:$0xf]  ;;  %v10522_v31 = vpack.c.bf16 %v8711_v45, %v8710_v52  ;;  %v8719_v59 = vld [vmem:[#allocation2 + $0x30] sm:$0xf]  ;;  %v8720_v53 = vld [vmem:[#allocation2 + $0x48] sm:$0xf]  ;;  %v10519_v29 = vpack.c.bf16 %v8697_v2, %v8696_v32  ;;  %v8778_v26 = vrot.slane %v10518_v39, %v14818_v38 }
 0xa2b   : > { %v8721_v33 = vld [vmem:[#allocation2 + $0x60] sm:$0xf]  ;;  %v10524_v50 = vpack.c.bf16 %v8719_v59, %v8718_v37  ;;  %v8735_v58 = vld [vmem:[#allocation2 + $0x32] sm:$0xf]  ;;  %v8736_v30 = vld [vmem:[#allocation2 + $0x4a] sm:$0xf]  ;;  %v8807_v46 = vrot.slane %v10521_v13, %v14818_v38 }
 0xa2c   : > { %v10525_v36 = vpack.c.bf16 %v8721_v33, %v8720_v53  ;;  %v8737_v61 = vld [vmem:[#allocation2 + $0x62] sm:$0xf]  ;;  %v10528_v48 = vpack.c.bf16 %v8735_v58, %v8734_v44  ;;  %v8712_v7 = vld [vmem:[#allocation2 + $0x32] sm:$0xf]  ;;  %v8713_v10 = vld [vmem:[#allocation2 + $0x4a] sm:$0xf]  ;;  %v8822_v21 = vrot.slane %v10522_v31, %v14818_v38  ;;  %v8785_v43 = vrot.slane %v10519_v29, %v14818_v38 }
 0xa2d   : > { %v8844_v19 = vrot.slane %v10524_v50, %v14818_v38  ;;  %v10529_v42 = vpack.c.bf16 %v8737_v61, %v8736_v30  ;;  %v10523_v4 = vpack.c.bf16 %v8713_v10, %v8712_v7  ;;  %v8750_v55 = vld [vmem:[#allocation2 + $0x31] sm:$0xf]  ;;  %v8751_v41 = vld [vmem:[#allocation2 + $0x49] sm:$0xf]  ;;  %v8752_v24 = vld [vmem:[#allocation2 + $0x61] sm:$0xf]  ;;  %v8808_v25 = vcombine.low %v8800_v22, %v8807_v46 }
 0xa2e   : > { %v8851_v14 = vrot.slane %v10525_v36, %v14818_v38  ;;  %v8888_v12 = vrot.slane %v10528_v48, %v14818_v38  ;;  %v10532_v63 = vpack.c.bf16 %v8751_v41, %v8750_v55  ;;  %v8786_v9 = vcombine.low %v8778_v26, %v8785_v43  ;;  %v12800_v35 = vld [vmem:[%s15052_s9 + $0x158] sm:$0xff]   ;;  %v12799_v52 = vld [vmem:[%s15052_s9 + $0x190] sm:$0xff]   ;;  %v12804_v3 = vld [vmem:[%s15052_s9 + $0x160] sm:$0xff]  }
 0xa2f   : > { %v8895_v28 = vrot.slane %v10529_v42, %v14818_v38  ;;  %v8829_v27 = vrot.slane %v10523_v4, %v14818_v38  ;;  %v10533_v47 = vpack.c.bf16 %v8753_v17, %v8752_v24  ;;  %9572 = vmatprep.mubr.bf16.mxu1 %v8808_v25  ;;  %v12802_v1 = vld [vmem:[%s15052_s9 + $0x1d8] sm:$0xff]   ;;  %v12806_v37 = vld [vmem:[%s15052_s9 + $0x1e0] sm:$0xff]   ;;  %v12808_v51 = vld [vmem:[%s15052_s9 + $0x168] sm:$0xff]  }
 0xa30   : > { %v8852_v56 = vcombine.low %v8844_v19, %v8851_v14  ;;  %9573 = vmatmul.mubr.bf16.vlgmr.msra.gmra.mrb[32].mxu1 %v8786_v9  ;;  %v8932_v15 = vrot.slane %v10532_v63, %v14818_v38  ;;  %v12801_v54 = vld [vmem:[%s15052_s9 + $0x118] sm:$0xff]   ;;  %v12805_v45 = vld [vmem:[%s15052_s9 + $0x120] sm:$0xff]   ;;  %v12810_v32 = vld [vmem:[%s15052_s9 + $0x1e8] sm:$0xff]  }
 0xa31   : > { %v8896_v11 = vcombine.low %v8888_v12, %v8895_v28  ;;  %v8830_v18 = vcombine.low %v8822_v21, %v8829_v27  ;;  %v8939_v23 = vrot.slane %v10533_v47, %v14818_v38  ;;  %12004 = vmatpush3.bf16.msra.mxu1 %v12789_v8  ;;  %v12803_v39 = vld [vmem:[%s15052_s9 + $0x198] sm:$0xff]   ;;  %v12807_v34 = vld [vmem:[%s15052_s9 + $0x1a0] sm:$0xff]   ;;  %v12809_v44 = vld [vmem:[%s15052_s9 + $0x128] sm:$0xff]  }
 0xa32   : > { %9613 = vmatprep.mubr.bf16.mxu0 %v8852_v56  ;;  %12005 = vmatprep.subr.bf16.mxu1 %v12792_v57  ;;  %v12812_v31 = vld [vmem:[%s15052_s9 + $0x170] sm:$0xff]   ;;  %v12811_v13 = vld [vmem:[%s15052_s9 + $0x1a8] sm:$0xff]   ;;  %v8729_v2 = vld [vmem:[#allocation2 + $0x61] sm:$0xf] }
 0xa33   : > { %9654 = vmatprep.mubr.bf16.mxu1 %v8896_v11  ;;  %9614 = vmatmul.mubr.bf16.vlgmr.msra.gmra.mrb[52].mxu0 %v8830_v18  ;;  %v8940_v6 = vcombine.low %v8932_v15, %v8939_v23  ;;  %v12813_v59 = vld [vmem:[%s15052_s9 + $0x130] sm:$0xff]   ;;  %v8745_v17 = vld [vmem:[#allocation2 + $0x78] sm:$0xf]  ;;  %v8728_v29 = vld [vmem:[#allocation2 + $0x49] sm:$0xf] }
 0xa34   : > { %12026 = vmatpush3.bf16.msra.mxu0 %v12791_v60  ;;  %v12814_v53 = vld [vmem:[%s15052_s9 + $0x1f0] sm:$0xff]   ;;  %v8744_v26 = vld [vmem:[#allocation2 + $0x60] sm:$0xf]  ;;  %v12816_v50 = vld [vmem:[%s15052_s9 + $0x178] sm:$0xff]   ;;  %v10527_v58 = vpack.c.bf16 %v8729_v2, %v8728_v29 }
 0xa35   : > { %9695 = vmatprep.mubr.bf16.mxu0 %v8940_v6  ;;  %12027 = vmatprep.subr.bf16.mxu0 %v12794_v40  ;;  %v8727_v22 = vld [vmem:[#allocation2 + $0x31] sm:$0xf]  ;;  %v8726_v30 = vld [vmem:[#allocation2 + $0x19] sm:$0xf]  ;;  %v8743_v36 = vld [vmem:[#allocation2 + $0x48] sm:$0xf]  ;;  %v10531_v7 = vpack.c.bf16 %v8745_v17, %v8744_v26 }
 0xa36   : > { %12006 = vmatpush3.bf16.msra.mxu1 %v12793_v0  ;;  %v12815_v33 = vld [vmem:[%s15052_s9 + $0x1b0] sm:$0xff]   ;;  %v12818_v61 = vld [vmem:[%s15052_s9 + $0x1f8] sm:$0xff]   ;;  %v10526_v48 = vpack.c.bf16 %v8727_v22, %v8726_v30  ;;  %v8873_v21 = vrot.slane %v10527_v58, %v14818_v38  ;;  %v12820_v55 = vld [vmem:[%s15052_s9 + $0x200] sm:$0xff]  }
 0xa37   : > { %12007 = vmatprep.subr.bf16.mxu1 %v12796_v49  ;;  %v8742_v46 = vld [vmem:[#allocation2 + $0x30] sm:$0xf]  ;;  %v12817_v10 = vld [vmem:[%s15052_s9 + $0x138] sm:$0xff]   ;;  %v8917_v4 = vrot.slane %v10531_v7, %v14818_v38  ;;  %v12833_v24 = vld [vmem:[#allocation3 + $0xf0] sm:$0xff] }
 0xa38   : > { %12028 = vmatpush3.bf16.msra.mxu0 %v12795_v5  ;;  %v10530_v43 = vpack.c.bf16 %v8743_v36, %v8742_v46  ;;  %v12819_v19 = vld [vmem:[%s15052_s9 + $0x1b8] sm:$0xff]   ;;  %v8866_v42 = vrot.slane %v10526_v48, %v14818_v38  ;;  %v12821_v14 = vld [vmem:[%s15052_s9 + $0x208] sm:$0xff]   ;;  %v12822_v12 = vld [vmem:[%s15052_s9 + $0x210] sm:$0xff]   ;;  %v9751_v36 = vsub.s32 2, %v14815_v16 }
 0xa39   : > { %12029 = vmatprep.subr.bf16.mxu0 %v12798_v20  ;;  %v12823_v63 = vld [vmem:[%s15052_s9 + $0x218] sm:$0xff]   ;;  %v12824_v9 = vld [vmem:[%s15052_s9 + $0x220] sm:$0xff]   ;;  %v12825_v28 = vld [vmem:[%s15052_s9 + $0x228] sm:$0xff]  }
 0xa3a   : > { %12008 = vmatpush3.bf16.msra.mxu1 %v12797_v62  ;;  %v8874_v41 = vcombine.low %v8866_v42, %v8873_v21  ;;  %v8910_v25 = vrot.slane %v10530_v43, %v14818_v38  ;;  %v8760_v27 = vld [vmem:[#allocation2 + $0x62] sm:$0xf]  ;;  %v8761_v47 = vld [vmem:[#allocation2 + $0x7a] sm:$0xf]  ;;  %v12826_v56 = vld [vmem:[%s15052_s9 + $0x230] sm:$0xff]  }
 0xa3b   : > { %12009 = vmatprep.subr.bf16.mxu1 %v12800_v35  ;;  %v8758_v60 = vld [vmem:[#allocation2 + $0x32] sm:$0xf]  ;;  %v8759_v57 = vld [vmem:[#allocation2 + $0x4a] sm:$0xf]  ;;  %v10535_v11 = vpack.c.bf16 %v8761_v47, %v8760_v27  ;;  %v12827_v15 = vld [vmem:[%s15052_s9 + $0x238] sm:$0xff]  }
 0xa3c   : > { %12030 = vmatpush3.bf16.msra.mxu0 %v12799_v52  ;;  %v8918_v8 = vcombine.low %v8910_v25, %v8917_v4  ;;  %v10534_v18 = vpack.c.bf16 %v8759_v57, %v8758_v60 }
 0xa3d   : > { %12031 = vmatprep.subr.bf16.mxu0 %v12802_v1  ;;  %v8961_v23 = vrot.slane %v10535_v11, %v14818_v38 }
 0xa3e   : > { %12010 = vmatpush3.bf16.msra.mxu1 %v12801_v54  ;;  %v8954_v40 = vrot.slane %v10534_v18, %v14818_v38 }
 0xa3f   : > { %12011 = vmatprep.subr.bf16.mxu1 %v12804_v3 }
 0xa40   : > { %12032 = vmatpush3.bf16.msra.mxu0 %v12803_v39  ;;  %v8962_v0 = vcombine.low %v8954_v40, %v8961_v23 }
 0xa41   : > { %12033 = vmatprep.subr.bf16.mxu0 %v12806_v37 }
 0xa42   : > { %12012 = vmatpush3.bf16.msra.mxu1 %v12805_v45 }
 0xa43   : > { %12013 = vmatprep.subr.bf16.mxu1 %v12808_v51 }
 0xa44   : > { %12034 = vmatpush3.bf16.msra.mxu0 %v12807_v34 }
 0xa45   : > { %12035 = vmatprep.subr.bf16.mxu0 %v12810_v32 }
 0xa46   : > { %12014 = vmatpush3.bf16.msra.mxu1 %v12809_v44 }
 0xa47   : > { %12015 = vmatprep.subr.bf16.mxu1 %v12812_v31 }
 0xa48   : > { %12036 = vmatpush3.bf16.msra.mxu0 %v12811_v13 }
 0xa49   : > { %12037 = vmatprep.subr.bf16.mxu0 %v12814_v53 }
 0xa4a   : > { %12016 = vmatpush3.bf16.msra.mxu1 %v12813_v59 }
 0xa4b   : > { %12017 = vmatprep.subr.bf16.mxu1 %v12816_v50 }
 0xa4c   : > { %12038 = vmatpush3.bf16.msra.mxu0 %v12815_v33 }
 0xa4d   : > { %12039 = vmatprep.subr.bf16.mxu0 %v12818_v61 }
 0xa4e   : > { %12018 = vmatpush3.bf16.msra.mxu1 %v12817_v10 }
 0xa4f   : > { %12268 = vmatprep.subr.bf16.mxu1 %v12833_v24 }
 0xa50   : > { %12040 = vmatpush3.bf16.msra.mxu0 %v12819_v19 }
 0xa51   : > { %9655 = vmatmul.mubr.bf16.vlgmr.msra.gmra.mrb[36].mxu1 %v8874_v41 }
 0xa52   : > { %12269 = vmatpush3.bf16.msra.mxu1 %v12820_v55  ;;  %12284 = vmatprep.mubr.msk.bf16.mxu1 %vm13065_vm8, %v12833_v24 }
 0xa53   : > { %9696 = vmatmul.mubr.bf16.vlgmr.msra.gmra.mrb[56].mxu0 %v8918_v8  ;;  %12270 = vmatprep.subr.bf16.mxu1 %v12833_v24 }
 0xa56   : > { %12271 = vmatpush3.bf16.msra.mxu1 %v12821_v14 }
 0xa57   : > { %12272 = vmatprep.subr.bf16.mxu1 %v12833_v24 }
 0xa5a   : > { %12273 = vmatpush3.bf16.msra.mxu1 %v12822_v12 }
 0xa5b   : > { %12274 = vmatprep.subr.bf16.mxu1 %v12833_v24 }
 0xa5e   : > { %12275 = vmatpush3.bf16.msra.mxu1 %v12823_v63 }
 0xa5f   : > { %12276 = vmatprep.subr.bf16.mxu1 %v12833_v24 }
 0xa62   : > { %12277 = vmatpush3.bf16.msra.mxu1 %v12824_v9 }
 0xa63   : > { %12278 = vmatprep.subr.bf16.mxu1 %v12833_v24 }
 0xa66   : > { %12279 = vmatpush3.bf16.msra.mxu1 %v12825_v28 }
 0xa67   : > { %12280 = vmatprep.subr.bf16.mxu1 %v12833_v24 }
 0xa6a   : > { %12281 = vmatpush3.bf16.msra.mxu1 %v12826_v56 }
 0xa6b   : > { %12282 = vmatprep.subr.bf16.mxu1 %v12833_v24 }
 0xa6e   : > { %12283 = vmatpush3.bf16.msra.mxu1 %v12827_v15 }
 0xa71   : > { %12285 = vmatmul.mubr.bf16.vlgmr.msra.gmra.mrb[40].mxu1 %v8962_v0 }
 0xb03   : > { %v11975_v6 = vpop.f32.mrb[32].mxu1 }
 0xb04   : > { %v11976_v49 = vpop.f32.mrb[33].mxu1 }
 0xb05   : > { %v11977_v5 = vadd.f32 %v11976_v49, %v11975_v6  ;;  %v11978_v20 = vpop.f32.mrb[34].mxu1 }
 0xb06   : > { %v11997_v62 = vpop.f32.mrb[52].mxu0  ;;  %v11979_v35 = vpop.f32.mrb[35].mxu1 }
 0xb07   : > { %v11998_v52 = vpop.f32.mrb[53].mxu0  ;;  %v11980_v1 = vadd.f32 %v11979_v35, %v11978_v20 }
 0xb08   : > { %v11999_v54 = vadd.f32 %v11998_v52, %v11997_v62  ;;  %v12000_v3 = vpop.f32.mrb[54].mxu0 }
 0xb09   : > { %v12001_v39 = vpop.f32.mrb[55].mxu0 }
 0xb0a   : > { %v9616_v37 = vadd.f32 %v11999_v54, %v11977_v5  ;;  %v12002_v45 = vadd.f32 %v12001_v39, %v12000_v3 }
 0xb0c   : > { %v9619_v51 = vadd.f32 %v12002_v45, %v11980_v1 }
 0xb24   : > { %v12019_v34 = vpop.f32.mrb[36].mxu1 }
 0xb25   : > { %v12020_v32 = vpop.f32.mrb[37].mxu1 }
 0xb26   : > { %v12021_v38 = vadd.f32 %v12020_v32, %v12019_v34  ;;  %v12022_v44 = vpop.f32.mrb[38].mxu1  ;;  %v12041_v31 = vpop.f32.mrb[56].mxu0 }
 0xb27   : > { %v12023_v13 = vpop.f32.mrb[39].mxu1  ;;  %v12042_v2 = vpop.f32.mrb[57].mxu0 }
 0xb28   : > { %v9657_v59 = vadd.f32 %v12021_v38, %v9616_v37  ;;  %v12024_v53 = vadd.f32 %v12023_v13, %v12022_v44  ;;  %v12043_v17 = vadd.f32 %v12042_v2, %v12041_v31  ;;  %v12044_v22 = vpop.f32.mrb[58].mxu0 }
 0xb29   : > { %v12045_v29 = vpop.f32.mrb[59].mxu0 }
 0xb2a   : > { %v9660_v26 = vadd.f32 %v12024_v53, %v9619_v51  ;;  %v12046_v33 = vadd.f32 %v12045_v29, %v12044_v22  ;;  %v9698_v50 = vadd.f32 %v12043_v17, %v9657_v59 }
 0xb2c   : > { %v9701_v58 = vadd.f32 %v12046_v33, %v9660_v26 }
 0xb44   : > { %v9738_v30 = vpop.f32.mrb[40].mxu1 }
 0xb45   : > { %v9739_v46 = vadd.f32 %v9738_v30, %v9698_v50  ;;  %v12286_v61 = vpop.f32.mrb[41].mxu1 }
 0xb46   : > { %v9741_v48 = vpop.f32.mrb[42].mxu1 }
 0xb47   : > { %v9745_v7 = vmax.f32 %v9739_v46, 0.0  ;;  %v9742_v10 = vadd.f32 %v9741_v48, %v9701_v58  ;;  %v12287_v21 = vpop.f32.mrb[43].mxu1 }
 0xb49   : > { %v9752_v43 = vrot.slane %v9745_v7, %v9751_v36  ;;  %v9746_v19 = vmax.f32 %v9742_v10, 0.0 }
 0xb4b   : > { %v9759_v42 = vsel %vm2540_vm1, %v9745_v7, %v9752_v43  ;;  %v9756_v4 = vrot.slane %v9746_v19, %v9751_v36 }
 0xb4c   : > { %9761 = vst [vmem:[%s540_s29] sm:$0x3] %v9759_v42 }
 0xb4d   : > { %v9760_v55 = vsel %vm2540_vm1, %v9746_v19, %v9756_v4 }
 0xb4e   : > { %9762 = vst [vmem:[%s540_s29 + $0x2] sm:$0x3] %v9760_v55 }
 0xb4f PF: > { %s15074_s16 = sld [smem:[#allocation19_spill]] }
 0xb55   : > { %s27_s21 = sadd.s32 1, %s15074_s16  }
 0xb56   : > { %p24_p9 = scmp.ge.s32.totalorder %s27_s21, 4  }
 0xb58   :  { %26 = sbr.rel (!%p24_p9) target bundleno = 6 (0x6), region = 147 }
 0xb5f   :  { %9816 = vsyncpa [#allocation5], 1 }
 0xb60   :  { %9818 = vsyncpa [#allocation5 + $0x1], 1 }
 0xb61   :  { %9819 = vsyncpa [#allocation7], 1 }
 0xb62   :  { %9820 = vsyncpa [#allocation10], 1 }
 0xb63   :  { %9821 = vsyncpa [#allocation13], 1 }

</bundles_post_ra>
